<compile_context>
chip_gen: v7x
topology: tpu7x:2x2x1
jax: 0.10.0
libtpu: 0.0.40
codegen_flags: <defaults>
</compile_context>

<pallas_src>
import functools

import jax
import jax.numpy as jnp
from jax.experimental import pallas as pl
from jax.experimental.pallas import tpu as pltpu


VMEM_LIMIT = 32 * 1024 * 1024  # scoped-VMEM safe on v5e/v6e (128 MiB) and v7x (64 MiB)


# ----------------------------------------------------------------------------- fused forward kernel
def _transrgat_kernel(num_relations, heads, neg_slope, eps,
                      x_ref, src_ref, dst_ref, dstt_ref, typ_ref, er_ref,
                      w_ref, le_ref, qke_ref, bias_ref,
                      w1_ref, b1_ref, w2_ref, b2_ref, g_ref, be_ref,
                      out_ref, x_state):
    N, C = x_ref.shape
    E = src_ref.shape[0]
    H = heads
    R = num_relations
    outc = C // H
    l = pl.program_id(0)
    last = pl.num_programs(0) - 1

    # ---- layer 0: seed the resident node-feature state ----------------------
    @pl.when(l == 0)
    def _():
        x_state[...] = x_ref[...]

    x = x_state[...]                                  # [N, C] f32 (layer input)
    x_bf = x.astype(jnp.bfloat16)

    src = src_ref[...]                                # [E, 1] i32
    dst = dst_ref[...]                                # [E, 1] i32
    typ = typ_ref[...]                                # [E, 1] i32
    dst_row = dstt_ref[...]                           # [1, E] i32

    # ---- per-relation projection, stacked into one [R*N, C] table -----------
    xw_stack = jnp.concatenate(
        [jnp.dot(x_bf, w_ref[0, r], preferred_element_type=jnp.float32)
         for r in range(R)], axis=0)                  # [R*N, C] f32

    # ---- combined (relation, node) one-hot gathers -> 2 MXU matmuls ----------
    rel_node = jax.lax.broadcasted_iota(jnp.int32, (E, R * N), 1)   # [E, R*N]
    gi = (rel_node == typ * N + dst).astype(jnp.float32)            # W_r x_dst pick
    gj = (rel_node == typ * N + src).astype(jnp.float32)            # W_r x_src pick
    out_i = jnp.dot(gi, xw_stack, preferred_element_type=jnp.float32)   # [E, C]
    out_j = jnp.dot(gj, xw_stack, preferred_element_type=jnp.float32)   # [E, C]

    # ---- edge-feature projection (lin_edge, no bias in PyG) ------------------
    ef = jnp.dot(er_ref[...], le_ref[0], preferred_element_type=jnp.float32)  # [E, C]

    # ---- attention logits: out_i@q + out_j@k + ef@e (no [E,3C] concat) -------
    qke = qke_ref[0]                                  # [3C, H] bf16
    logits = (jnp.dot(out_i.astype(jnp.bfloat16), qke[0:C],
                      preferred_element_type=jnp.float32)
              + jnp.dot(out_j.astype(jnp.bfloat16), qke[C:2 * C],
                        preferred_element_type=jnp.float32)
              + jnp.dot(ef.astype(jnp.bfloat16), qke[2 * C:3 * C],
                        preferred_element_type=jnp.float32))        # [E, H]
    logits = jnp.where(logits >= 0.0, logits, neg_slope * logits)   # leaky_relu

    # ---- destination one-hots, both orientations built directly (no transpose)
    dst_oh = jax.lax.broadcasted_iota(jnp.int32, (E, N), 1) == dst  # [E, N] bool
    dst_oh_f = dst_oh.astype(jnp.float32)
    dst_oh_t = (jax.lax.broadcasted_iota(jnp.int32, (N, E), 0) == dst_row
                ).astype(jnp.float32)                               # [N, E]

    # ---- per-destination segment max (tiny static H loop) --------------------
    # NOTE: -1e30 (not -inf) so masked 0*(-1e30) products stay finite.
    big_neg = jnp.float32(-1e30)
    max_cols = []
    for h in range(H):
        mh = jnp.where(dst_oh, logits[:, h:h + 1], big_neg)         # [E, N]
        seg_max = jnp.max(mh, axis=0, keepdims=True)                # [1, N]
        max_cols.append(jnp.sum(dst_oh_f * seg_max, axis=1, keepdims=True))
    max_e = jnp.concatenate(max_cols, axis=1)                       # [E, H]

    # ---- segment softmax, all heads at once (2 tiny MXU matmuls) -------------
    p = jnp.exp(logits - max_e)                                     # [E, H]
    denom_n = jnp.dot(dst_oh_t, p, preferred_element_type=jnp.float32)      # [N, H]
    denom_e = jnp.dot(dst_oh_f, denom_n, preferred_element_type=jnp.float32)  # [E, H]
    alpha = p * pl.reciprocal(denom_e, approx=True)                 # [E, H] (EUP)

    # ---- messages (per-head VPU broadcast), scatter-add, bias, residual ------
    weighted = jnp.concatenate(
        [out_j[:, h * outc:(h + 1) * outc] * alpha[:, h:h + 1] for h in range(H)],
        axis=1)                                                     # [E, C]
    agg = jnp.dot(dst_oh_t, weighted, preferred_element_type=jnp.float32)   # [N, C]
    new_x = agg + bias_ref[0] + x
    x_state[...] = new_x

    # ---- fused FFN / LayerNorm tail, after the last layer --------------------
    @pl.when(l == last)
    def _():
        gamma = g_ref[...]
        beta = be_ref[...]

        def ln(v):
            mu = jnp.mean(v, axis=-1, keepdims=True)
            var = jnp.mean((v - mu) * (v - mu), axis=-1, keepdims=True)
            return (v - mu) * jax.lax.rsqrt(var + eps) * gamma + beta

        enc = x_ref[...]                       # original x (enc_emb), resident
        xv = ln(new_x + enc)
        hid = jnp.dot(xv.astype(jnp.bfloat16), w1_ref[...],
                      preferred_element_type=jnp.float32) + b1_ref[...]
        hid = jnp.maximum(hid, 0.0)
        y = jnp.dot(hid.astype(jnp.bfloat16), w2_ref[...],
                    preferred_element_type=jnp.float32) + b2_ref[...]
        xv = ln(y + xv)
        out_ref[...] = xv + enc


# ----------------------------------------------------------------------------- wrapper
def transrgat_forward(params, x, edge_index, edge_type, edge_repre,
                      neg_slope=0.2, eps=1e-5):
    N, C = x.shape
    heads = params["heads"]
    R = params["num_relations"]
    E = edge_type.shape[0]
    L = len(params["convs"])
    edge_dim = edge_repre.shape[1]
    Ch = params["ff1_w"].shape[1]

    src = edge_index[0].astype(jnp.int32).reshape(E, 1)
    dst = edge_index[1].astype(jnp.int32).reshape(E, 1)
    dst_row = edge_index[1].astype(jnp.int32).reshape(1, E)
    typ = edge_type.astype(jnp.int32).reshape(E, 1)

    # Wrapper-side packing: per-layer weights stacked along a leading layer
    # axis and pre-cast to bf16 so the kernel DMAs half the bytes.
    w_st = jnp.stack([lp["weight"] for lp in params["convs"]]).astype(jnp.bfloat16)
    le_st = jnp.stack([lp["lin_edge"] for lp in params["convs"]]).astype(jnp.bfloat16)
    qke_st = jnp.stack([jnp.concatenate([lp["q"], lp["k"], lp["e"]], axis=0)
                        for lp in params["convs"]]).astype(jnp.bfloat16)      # [L,3C,H]
    b_st = jnp.stack([lp["bias"].reshape(1, C) for lp in params["convs"]])    # [L,1,C] f32
    er_bf = edge_repre.astype(jnp.bfloat16)
    w1_bf = params["ff1_w"].astype(jnp.bfloat16)
    w2_bf = params["ff2_w"].astype(jnp.bfloat16)

    def _res(shape):            # resident: same block on every layer step
        return pl.BlockSpec(shape, lambda l: (0,) * len(shape))

    def _per_layer(shape):      # leading dim indexed by the layer grid axis
        return pl.BlockSpec((1,) + tuple(shape[1:]),
                            lambda l: (l,) + (0,) * (len(shape) - 1))

    kernel = functools.partial(_transrgat_kernel, R, heads, neg_slope, eps)

    return pl.pallas_call(
        kernel,
        out_shape=jax.ShapeDtypeStruct((N, C), jnp.float32),
        grid=(L,),
        in_specs=[
            _res((N, C)),                      # x (also enc_emb for the tail)
            _res((E, 1)),                      # src indices
            _res((E, 1)),                      # dst indices
            _res((1, E)),                      # dst indices (row form)
            _res((E, 1)),                      # edge types
            _res((E, edge_dim)),               # edge_repre (bf16)
            _per_layer((L, R, C, C)),          # relation weights (bf16)
            _per_layer((L, edge_dim, C)),      # lin_edge (bf16)
            _per_layer((L, 3 * C, heads)),     # packed q|k|e (bf16)
            _per_layer((L, 1, C)),             # conv bias (f32)
            _res((C, Ch)), _res((1, Ch)),      # ff1 (bf16 / f32)
            _res((Ch, C)), _res((1, C)),       # ff2 (bf16 / f32)
            _res((1, C)), _res((1, C)),        # shared LayerNorm gamma / beta
        ],
        out_specs=_res((N, C)),
        scratch_shapes=[pltpu.VMEM((N, C), jnp.float32)],   # resident node state
        compiler_params=pltpu.CompilerParams(
            dimension_semantics=("arbitrary",),
            vmem_limit_bytes=VMEM_LIMIT),
    )(x, src, dst, dst_row, typ, er_bf,
      w_st, le_st, qke_st, b_st,
      w1_bf, params["ff1_b"].reshape(1, Ch),
      w2_bf, params["ff2_b"].reshape(1, C),
      params["ln_gamma"].reshape(1, C), params["ln_beta"].reshape(1, C))


# ----------------------------------------------------------------------------- params
def glorot(key, shape):
    fan_in, fan_out = shape[-2], shape[-1]
    limit = (6.0 / (fan_in + fan_out)) ** 0.5
    return jax.random.uniform(key, shape, jnp.float32, -limit, limit)


def init_params(key, in_channels, out_channels, num_relations, heads, num_layers,
                edge_dim=768):
    HC = heads * out_channels
    assert in_channels == HC
    params = {"heads": heads, "num_relations": num_relations, "convs": []}
    for _ in range(num_layers):
        key, *ks = jax.random.split(key, 6)
        params["convs"].append({
            "weight":   glorot(ks[0], (num_relations, in_channels, HC)),
            "q":        glorot(ks[1], (HC, heads)),
            "k":        glorot(ks[2], (HC, heads)),
            "e":        glorot(ks[3], (HC, heads)),
            "lin_edge": glorot(ks[4], (edge_dim, HC)),          # no bias in PyG
            "bias":     jnp.zeros((HC,), jnp.float32),
        })
    key, k1, k2 = jax.random.split(key, 3)
    params["ff1_w"] = glorot(k1, (in_channels, 2 * in_channels))
    params["ff1_b"] = jnp.zeros((2 * in_channels,), jnp.float32)
    params["ff2_w"] = glorot(k2, (2 * in_channels, in_channels))
    params["ff2_b"] = jnp.zeros((in_channels,), jnp.float32)
    # Single nn.LayerNorm(512) applied twice in the reference module -> shared.
    params["ln_gamma"] = jnp.ones((in_channels,), jnp.float32)
    params["ln_beta"] = jnp.zeros((in_channels,), jnp.float32)
    return params


# ----------------------------------------------------------------------------- main
if __name__ == "__main__":
    key = jax.random.PRNGKey(0)

    # LayerNorm(512) in the module forces in_channels = 512 = heads * out_channels.
    heads = 4
    out_channels = 128
    in_channels = heads * out_channels        # 512
    num_relations = 3
    num_layers = 2
    edge_dim = 768
    N = 16                                    # nodes
    E = 48                                    # edges

    key, kx, ksrc, kdst, ktyp, kattr, kp = jax.random.split(key, 7)
    x = jax.random.normal(kx, (N, in_channels), jnp.float32)
    edge_index = jnp.stack([
        jax.random.randint(ksrc, (E,), 0, N),
        jax.random.randint(kdst, (E,), 0, N),
    ], axis=0)                                # [2, E]
    edge_type = jax.random.randint(ktyp, (E,), 0, num_relations)       # [E]
    edge_repre = jax.random.normal(kattr, (E, edge_dim), jnp.float32)  # [E, 768]

    params = init_params(kp, in_channels, out_channels, num_relations, heads,
                         num_layers, edge_dim)

    @jax.jit
    def fwd(x_, edge_index_, edge_type_, edge_repre_):
        return transrgat_forward(params, x_, edge_index_, edge_type_, edge_repre_)

    out = jax.block_until_ready(fwd(x, edge_index, edge_type, edge_repre))
    assert out.shape == (N, in_channels)
    assert bool(jnp.all(jnp.isfinite(out)))
    # TODO(synk): RGATConv attention-dropout is a no-op here (eval mode).
    print("KERNEL_OK")
</pallas_src>

<mosaic_0001>
module attributes {stable_mosaic.version = 11 : i64} {
  func.func @_transrgat_kernel(%arg0: i32, %arg1: memref<16x512xf32, #tpu.memory_space<vmem>>, %arg2: memref<48x1xi32, #tpu.memory_space<vmem>>, %arg3: memref<48x1xi32, #tpu.memory_space<vmem>>, %arg4: memref<1x48xi32, #tpu.memory_space<vmem>>, %arg5: memref<48x1xi32, #tpu.memory_space<vmem>>, %arg6: memref<48x768xbf16, #tpu.memory_space<vmem>>, %arg7: memref<1x3x512x512xbf16, #tpu.memory_space<vmem>>, %arg8: memref<1x768x512xbf16, #tpu.memory_space<vmem>>, %arg9: memref<1x1536x4xbf16, #tpu.memory_space<vmem>>, %arg10: memref<1x1x512xf32, #tpu.memory_space<vmem>>, %arg11: memref<512x1024xbf16, #tpu.memory_space<vmem>>, %arg12: memref<1x1024xf32, #tpu.memory_space<vmem>>, %arg13: memref<1024x512xbf16, #tpu.memory_space<vmem>>, %arg14: memref<1x512xf32, #tpu.memory_space<vmem>>, %arg15: memref<1x512xf32, #tpu.memory_space<vmem>>, %arg16: memref<1x512xf32, #tpu.memory_space<vmem>>, %arg17: memref<16x512xf32, #tpu.memory_space<vmem>>, %arg18: memref<16x512xf32, #tpu.memory_space<vmem>>) attributes {dimension_semantics = [#tpu.dimension_semantics<arbitrary>], iteration_bounds = array<i64: 2>, scalar_prefetch = 0 : i64, scratch_operands = 1 : i64, tpu.core_type = #tpu.core_type<tc>, window_params = [{pipeline_mode = #tpu.pipeline_mode<synchronous>, transform_indices = @transform_0, window_bounds = array<i64: 16, 512>}, {pipeline_mode = #tpu.pipeline_mode<synchronous>, transform_indices = @transform_1, window_bounds = array<i64: 48, 1>}, {pipeline_mode = #tpu.pipeline_mode<synchronous>, transform_indices = @transform_2, window_bounds = array<i64: 48, 1>}, {pipeline_mode = #tpu.pipeline_mode<synchronous>, transform_indices = @transform_3, window_bounds = array<i64: 1, 48>}, {pipeline_mode = #tpu.pipeline_mode<synchronous>, transform_indices = @transform_4, window_bounds = array<i64: 48, 1>}, {pipeline_mode = #tpu.pipeline_mode<synchronous>, transform_indices = @transform_5, window_bounds = array<i64: 48, 768>}, {transform_indices = @transform_6, window_bounds = array<i64: 1, 3, 512, 512>}, {transform_indices = @transform_7, window_bounds = array<i64: 1, 768, 512>}, {transform_indices = @transform_8, window_bounds = array<i64: 1, 1536, 4>}, {transform_indices = @transform_9, window_bounds = array<i64: 1, 1, 512>}, {pipeline_mode = #tpu.pipeline_mode<synchronous>, transform_indices = @transform_10, window_bounds = array<i64: 512, 1024>}, {pipeline_mode = #tpu.pipeline_mode<synchronous>, transform_indices = @transform_11, window_bounds = array<i64: 1, 1024>}, {pipeline_mode = #tpu.pipeline_mode<synchronous>, transform_indices = @transform_12, window_bounds = array<i64: 1024, 512>}, {pipeline_mode = #tpu.pipeline_mode<synchronous>, transform_indices = @transform_13, window_bounds = array<i64: 1, 512>}, {pipeline_mode = #tpu.pipeline_mode<synchronous>, transform_indices = @transform_14, window_bounds = array<i64: 1, 512>}, {pipeline_mode = #tpu.pipeline_mode<synchronous>, transform_indices = @transform_15, window_bounds = array<i64: 1, 512>}, {pipeline_mode = #tpu.pipeline_mode<synchronous>, transform_indices = @transform_16, window_bounds = array<i64: 16, 512>}]} {
    %c0_i32 = arith.constant 0 : i32
    %0 = arith.cmpi eq, %arg0, %c0_i32 : i32
    %1 = arith.extui %0 : i1 to i32
    %c0_i32_0 = arith.constant 0 : i32
    %2 = arith.cmpi ne, %1, %c0_i32_0 : i32
    scf.if %2 {
      %c0_60 = arith.constant 0 : index
      %c0_61 = arith.constant 0 : index
      %146 = vector.load %arg1[%c0_60, %c0_61] : memref<16x512xf32, #tpu.memory_space<vmem>>, vector<16x512xf32>
      %c0_62 = arith.constant 0 : index
      %c0_63 = arith.constant 0 : index
      %147 = vector.load %arg18[%c0_62, %c0_63] : memref<16x512xf32, #tpu.memory_space<vmem>>, vector<16x512xf32>
      tpu.vector_store %arg18[%c0_62, %c0_63], %146 {strides = array<i32>} : memref<16x512xf32, #tpu.memory_space<vmem>>, vector<16x512xf32>,
    } else {
    }
    %c0 = arith.constant 0 : index
    %c0_1 = arith.constant 0 : index
    %3 = vector.load %arg18[%c0, %c0_1] : memref<16x512xf32, #tpu.memory_space<vmem>>, vector<16x512xf32>
    %4 = arith.truncf %3 : vector<16x512xf32> to vector<16x512xbf16>
    %c0_2 = arith.constant 0 : index
    %c0_3 = arith.constant 0 : index
    %5 = vector.load %arg2[%c0_2, %c0_3] : memref<48x1xi32, #tpu.memory_space<vmem>>, vector<48x1xi32>
    %c0_4 = arith.constant 0 : index
    %c0_5 = arith.constant 0 : index
    %6 = vector.load %arg3[%c0_4, %c0_5] : memref<48x1xi32, #tpu.memory_space<vmem>>, vector<48x1xi32>
    %c0_6 = arith.constant 0 : index
    %c0_7 = arith.constant 0 : index
    %7 = vector.load %arg5[%c0_6, %c0_7] : memref<48x1xi32, #tpu.memory_space<vmem>>, vector<48x1xi32>
    %c0_8 = arith.constant 0 : index
    %c0_9 = arith.constant 0 : index
    %8 = vector.load %arg4[%c0_8, %c0_9] : memref<1x48xi32, #tpu.memory_space<vmem>>, vector<1x48xi32>
    %c0_10 = arith.constant 0 : index
    %c0_11 = arith.constant 0 : index
    %c0_12 = arith.constant 0 : index
    %c0_13 = arith.constant 0 : index
    %9 = vector.load %arg7[%c0_10, %c0_11, %c0_12, %c0_13] : memref<1x3x512x512xbf16, #tpu.memory_space<vmem>>, vector<1x1x512x512xbf16>
    %10 = vector.shape_cast %9 : vector<1x1x512x512xbf16> to vector<512x512xbf16>
    %cst = arith.constant dense<0.000000e+00> : vector<16x512xf32>
    %11 = tpu.matmul %4, %10, %cst {dimension_numbers = #tpu.dot_dimension_numbers<[1], [0], [0], [1], [0, 0, 1, 1], [], []>} : vector<16x512xbf16>, vector<512x512xbf16>, vector<16x512xf32> -> vector<16x512xf32>
    %c0_14 = arith.constant 0 : index
    %c1 = arith.constant 1 : index
    %c0_15 = arith.constant 0 : index
    %c0_16 = arith.constant 0 : index
    %12 = vector.load %arg7[%c0_14, %c1, %c0_15, %c0_16] : memref<1x3x512x512xbf16, #tpu.memory_space<vmem>>, vector<1x1x512x512xbf16>
    %13 = vector.shape_cast %12 : vector<1x1x512x512xbf16> to vector<512x512xbf16>
    %cst_17 = arith.constant dense<0.000000e+00> : vector<16x512xf32>
    %14 = tpu.matmul %4, %13, %cst_17 {dimension_numbers = #tpu.dot_dimension_numbers<[1], [0], [0], [1], [0, 0, 1, 1], [], []>} : vector<16x512xbf16>, vector<512x512xbf16>, vector<16x512xf32> -> vector<16x512xf32>
    %c0_18 = arith.constant 0 : index
    %c2 = arith.constant 2 : index
    %c0_19 = arith.constant 0 : index
    %c0_20 = arith.constant 0 : index
    %15 = vector.load %arg7[%c0_18, %c2, %c0_19, %c0_20] : memref<1x3x512x512xbf16, #tpu.memory_space<vmem>>, vector<1x1x512x512xbf16>
    %16 = vector.shape_cast %15 : vector<1x1x512x512xbf16> to vector<512x512xbf16>
    %cst_21 = arith.constant dense<0.000000e+00> : vector<16x512xf32>
    %17 = tpu.matmul %4, %16, %cst_21 {dimension_numbers = #tpu.dot_dimension_numbers<[1], [0], [0], [1], [0, 0, 1, 1], [], []>} : vector<16x512xbf16>, vector<512x512xbf16>, vector<16x512xf32> -> vector<16x512xf32>
    %18 = tpu.concatenate %11, %14, %17 in 0 : vector<16x512xf32>, vector<16x512xf32>, vector<16x512xf32> -> vector<48x512xf32>
    %19 = tpu.iota {dimensions = array<i32: 1>} : vector<48x48xi32>
    %c16_i32 = arith.constant 16 : i32
    %20 = vector.broadcast %c16_i32 : i32 to vector<48x1xi32>
    %21 = arith.muli %7, %20 : vector<48x1xi32>
    %22 = arith.addi %21, %6 : vector<48x1xi32>
    %23 = vector.broadcast %22 : vector<48x1xi32> to vector<48x48xi32>
    %24 = arith.cmpi eq, %19, %23 : vector<48x48xi32>
    %25 = arith.extui %24 : vector<48x48xi1> to vector<48x48xi32>
    %26 = arith.sitofp %25 : vector<48x48xi32> to vector<48x48xf32>
    %c16_i32_22 = arith.constant 16 : i32
    %27 = vector.broadcast %c16_i32_22 : i32 to vector<48x1xi32>
    %28 = arith.muli %7, %27 : vector<48x1xi32>
    %29 = arith.addi %28, %5 : vector<48x1xi32>
    %30 = vector.broadcast %29 : vector<48x1xi32> to vector<48x48xi32>
    %31 = arith.cmpi eq, %19, %30 : vector<48x48xi32>
    %32 = arith.extui %31 : vector<48x48xi1> to vector<48x48xi32>
    %33 = arith.sitofp %32 : vector<48x48xi32> to vector<48x48xf32>
    %cst_23 = arith.constant dense<0.000000e+00> : vector<48x512xf32>
    %34 = tpu.matmul %26, %18, %cst_23 {dimension_numbers = #tpu.dot_dimension_numbers<[1], [0], [0], [1], [0, 0, 1, 1], [], []>} : vector<48x48xf32>, vector<48x512xf32>, vector<48x512xf32> -> vector<48x512xf32>
    %cst_24 = arith.constant dense<0.000000e+00> : vector<48x512xf32>
    %35 = tpu.matmul %33, %18, %cst_24 {dimension_numbers = #tpu.dot_dimension_numbers<[1], [0], [0], [1], [0, 0, 1, 1], [], []>} : vector<48x48xf32>, vector<48x512xf32>, vector<48x512xf32> -> vector<48x512xf32>
    %c0_25 = arith.constant 0 : index
    %c0_26 = arith.constant 0 : index
    %36 = vector.load %arg6[%c0_25, %c0_26] : memref<48x768xbf16, #tpu.memory_space<vmem>>, vector<48x768xbf16>
    %c0_27 = arith.constant 0 : index
    %c0_28 = arith.constant 0 : index
    %c0_29 = arith.constant 0 : index
    %37 = vector.load %arg8[%c0_27, %c0_28, %c0_29] : memref<1x768x512xbf16, #tpu.memory_space<vmem>>, vector<1x768x512xbf16>
    %38 = vector.shape_cast %37 : vector<1x768x512xbf16> to vector<768x512xbf16>
    %cst_30 = arith.constant dense<0.000000e+00> : vector<48x512xf32>
    %39 = tpu.matmul %36, %38, %cst_30 {dimension_numbers = #tpu.dot_dimension_numbers<[1], [0], [0], [1], [0, 0, 1, 1], [], []>} : vector<48x768xbf16>, vector<768x512xbf16>, vector<48x512xf32> -> vector<48x512xf32>
    %c0_31 = arith.constant 0 : index
    %c0_32 = arith.constant 0 : index
    %c0_33 = arith.constant 0 : index
    %40 = vector.load %arg9[%c0_31, %c0_32, %c0_33] : memref<1x1536x4xbf16, #tpu.memory_space<vmem>>, vector<1x1536x4xbf16>
    %41 = vector.shape_cast %40 : vector<1x1536x4xbf16> to vector<1536x4xbf16>
    %42 = arith.truncf %34 : vector<48x512xf32> to vector<48x512xbf16>
    %43 = vector.extract_strided_slice %41 {offsets = [0, 0], sizes = [512, 4], strides = [1, 1]} : vector<1536x4xbf16> to vector<512x4xbf16>
    %cst_34 = arith.constant dense<0.000000e+00> : vector<48x4xf32>
    %44 = tpu.matmul %42, %43, %cst_34 {dimension_numbers = #tpu.dot_dimension_numbers<[1], [0], [0], [1], [0, 0, 1, 1], [], []>} : vector<48x512xbf16>, vector<512x4xbf16>, vector<48x4xf32> -> vector<48x4xf32>
    %45 = arith.truncf %35 : vector<48x512xf32> to vector<48x512xbf16>
    %46 = vector.extract_strided_slice %41 {offsets = [512, 0], sizes = [512, 4], strides = [1, 1]} : vector<1536x4xbf16> to vector<512x4xbf16>
    %cst_35 = arith.constant dense<0.000000e+00> : vector<48x4xf32>
    %47 = tpu.matmul %45, %46, %cst_35 {dimension_numbers = #tpu.dot_dimension_numbers<[1], [0], [0], [1], [0, 0, 1, 1], [], []>} : vector<48x512xbf16>, vector<512x4xbf16>, vector<48x4xf32> -> vector<48x4xf32>
    %48 = arith.addf %44, %47 : vector<48x4xf32>
    %49 = arith.truncf %39 : vector<48x512xf32> to vector<48x512xbf16>
    %50 = vector.extract_strided_slice %41 {offsets = [1024, 0], sizes = [512, 4], strides = [1, 1]} : vector<1536x4xbf16> to vector<512x4xbf16>
    %cst_36 = arith.constant dense<0.000000e+00> : vector<48x4xf32>
    %51 = tpu.matmul %49, %50, %cst_36 {dimension_numbers = #tpu.dot_dimension_numbers<[1], [0], [0], [1], [0, 0, 1, 1], [], []>} : vector<48x512xbf16>, vector<512x4xbf16>, vector<48x4xf32> -> vector<48x4xf32>
    %52 = arith.addf %48, %51 : vector<48x4xf32>
    %cst_37 = arith.constant 0.000000e+00 : f32
    %53 = vector.broadcast %cst_37 : f32 to vector<48x4xf32>
    %54 = arith.cmpf oge, %52, %53 : vector<48x4xf32>
    %cst_38 = arith.constant 2.000000e-01 : f32
    %55 = vector.broadcast %cst_38 : f32 to vector<48x4xf32>
    %56 = arith.mulf %55, %52 : vector<48x4xf32>
    %57 = arith.select %54, %52, %56 : vector<48x4xi1>, vector<48x4xf32>
    %58 = tpu.iota {dimensions = array<i32: 1>} : vector<48x16xi32>
    %59 = vector.broadcast %6 : vector<48x1xi32> to vector<48x16xi32>
    %60 = arith.cmpi eq, %58, %59 : vector<48x16xi32>
    %61 = arith.extui %60 : vector<48x16xi1> to vector<48x16xi32>
    %62 = arith.sitofp %61 : vector<48x16xi32> to vector<48x16xf32>
    %63 = tpu.iota {dimensions = array<i32: 0>} : vector<16x48xi32>
    %64 = vector.broadcast %8 : vector<1x48xi32> to vector<16x48xi32>
    %65 = arith.cmpi eq, %63, %64 : vector<16x48xi32>
    %66 = arith.extui %65 : vector<16x48xi1> to vector<16x48xi32>
    %67 = arith.sitofp %66 : vector<16x48xi32> to vector<16x48xf32>
    %68 = vector.extract_strided_slice %57 {offsets = [0, 0], sizes = [48, 1], strides = [1, 1]} : vector<48x4xf32> to vector<48x1xf32>
    %cst_39 = arith.constant -1.000000e+30 : f32
    %69 = vector.shape_cast %68 : vector<48x1xf32> to vector<48x1xf32>
    %70 = vector.broadcast %69 : vector<48x1xf32> to vector<48x16xf32>
    %71 = vector.broadcast %cst_39 : f32 to vector<48x16xf32>
    %72 = arith.select %60, %70, %71 : vector<48x16xi1>, vector<48x16xf32>
    %cst_40 = arith.constant dense<0xFF800000> : vector<16xf32>
    %73 = vector.multi_reduction <maximumf>, %72, %cst_40 [0] : vector<48x16xf32> to vector<16xf32>
    %74 = vector.shape_cast %73 : vector<16xf32> to vector<1x16xf32>
    %75 = vector.broadcast %74 : vector<1x16xf32> to vector<48x16xf32>
    %76 = arith.mulf %62, %75 : vector<48x16xf32>
    %cst_41 = arith.constant dense<0.000000e+00> : vector<48xf32>
    %77 = vector.multi_reduction <add>, %76, %cst_41 [1] : vector<48x16xf32> to vector<48xf32>
    %78 = vector.shape_cast %77 : vector<48xf32> to vector<48x1xf32>
    %79 = vector.extract_strided_slice %57 {offsets = [0, 1], sizes = [48, 1], strides = [1, 1]} : vector<48x4xf32> to vector<48x1xf32>
    %cst_42 = arith.constant -1.000000e+30 : f32
    %80 = vector.shape_cast %79 : vector<48x1xf32> to vector<48x1xf32>
    %81 = vector.broadcast %80 : vector<48x1xf32> to vector<48x16xf32>
    %82 = vector.broadcast %cst_42 : f32 to vector<48x16xf32>
    %83 = arith.select %60, %81, %82 : vector<48x16xi1>, vector<48x16xf32>
    %cst_43 = arith.constant dense<0xFF800000> : vector<16xf32>
    %84 = vector.multi_reduction <maximumf>, %83, %cst_43 [0] : vector<48x16xf32> to vector<16xf32>
    %85 = vector.shape_cast %84 : vector<16xf32> to vector<1x16xf32>
    %86 = vector.broadcast %85 : vector<1x16xf32> to vector<48x16xf32>
    %87 = arith.mulf %62, %86 : vector<48x16xf32>
    %cst_44 = arith.constant dense<0.000000e+00> : vector<48xf32>
    %88 = vector.multi_reduction <add>, %87, %cst_44 [1] : vector<48x16xf32> to vector<48xf32>
    %89 = vector.shape_cast %88 : vector<48xf32> to vector<48x1xf32>
    %90 = vector.extract_strided_slice %57 {offsets = [0, 2], sizes = [48, 1], strides = [1, 1]} : vector<48x4xf32> to vector<48x1xf32>
    %cst_45 = arith.constant -1.000000e+30 : f32
    %91 = vector.shape_cast %90 : vector<48x1xf32> to vector<48x1xf32>
    %92 = vector.broadcast %91 : vector<48x1xf32> to vector<48x16xf32>
    %93 = vector.broadcast %cst_45 : f32 to vector<48x16xf32>
    %94 = arith.select %60, %92, %93 : vector<48x16xi1>, vector<48x16xf32>
    %cst_46 = arith.constant dense<0xFF800000> : vector<16xf32>
    %95 = vector.multi_reduction <maximumf>, %94, %cst_46 [0] : vector<48x16xf32> to vector<16xf32>
    %96 = vector.shape_cast %95 : vector<16xf32> to vector<1x16xf32>
    %97 = vector.broadcast %96 : vector<1x16xf32> to vector<48x16xf32>
    %98 = arith.mulf %62, %97 : vector<48x16xf32>
    %cst_47 = arith.constant dense<0.000000e+00> : vector<48xf32>
    %99 = vector.multi_reduction <add>, %98, %cst_47 [1] : vector<48x16xf32> to vector<48xf32>
    %100 = vector.shape_cast %99 : vector<48xf32> to vector<48x1xf32>
    %101 = vector.extract_strided_slice %57 {offsets = [0, 3], sizes = [48, 1], strides = [1, 1]} : vector<48x4xf32> to vector<48x1xf32>
    %cst_48 = arith.constant -1.000000e+30 : f32
    %102 = vector.shape_cast %101 : vector<48x1xf32> to vector<48x1xf32>
    %103 = vector.broadcast %102 : vector<48x1xf32> to vector<48x16xf32>
    %104 = vector.broadcast %cst_48 : f32 to vector<48x16xf32>
    %105 = arith.select %60, %103, %104 : vector<48x16xi1>, vector<48x16xf32>
    %cst_49 = arith.constant dense<0xFF800000> : vector<16xf32>
    %106 = vector.multi_reduction <maximumf>, %105, %cst_49 [0] : vector<48x16xf32> to vector<16xf32>
    %107 = vector.shape_cast %106 : vector<16xf32> to vector<1x16xf32>
    %108 = vector.broadcast %107 : vector<1x16xf32> to vector<48x16xf32>
    %109 = arith.mulf %62, %108 : vector<48x16xf32>
    %cst_50 = arith.constant dense<0.000000e+00> : vector<48xf32>
    %110 = vector.multi_reduction <add>, %109, %cst_50 [1] : vector<48x16xf32> to vector<48xf32>
    %111 = vector.shape_cast %110 : vector<48xf32> to vector<48x1xf32>
    %112 = tpu.concatenate %78, %89, %100, %111 in 1 : vector<48x1xf32>, vector<48x1xf32>, vector<48x1xf32>, vector<48x1xf32> -> vector<48x4xf32>
    %113 = arith.subf %57, %112 : vector<48x4xf32>
    %114 = math.exp %113 : vector<48x4xf32>
    %cst_51 = arith.constant dense<0.000000e+00> : vector<16x4xf32>
    %115 = tpu.matmul %67, %114, %cst_51 {dimension_numbers = #tpu.dot_dimension_numbers<[1], [0], [0], [1], [0, 0, 1, 1], [], []>} : vector<16x48xf32>, vector<48x4xf32>, vector<16x4xf32> -> vector<16x4xf32>
    %cst_52 = arith.constant dense<0.000000e+00> : vector<48x4xf32>
    %116 = tpu.matmul %62, %115, %cst_52 {dimension_numbers = #tpu.dot_dimension_numbers<[1], [0], [0], [1], [0, 0, 1, 1], [], []>} : vector<48x16xf32>, vector<16x4xf32>, vector<48x4xf32> -> vector<48x4xf32>
    %117 = tpu.reciprocal %116 {approx = true} : vector<48x4xf32> -> vector<48x4xf32>
    %118 = arith.mulf %114, %117 : vector<48x4xf32>
    %119 = vector.extract_strided_slice %35 {offsets = [0, 0], sizes = [48, 128], strides = [1, 1]} : vector<48x512xf32> to vector<48x128xf32>
    %120 = vector.extract_strided_slice %118 {offsets = [0, 0], sizes = [48, 1], strides = [1, 1]} : vector<48x4xf32> to vector<48x1xf32>
    %121 = vector.broadcast %120 : vector<48x1xf32> to vector<48x128xf32>
    %122 = arith.mulf %119, %121 : vector<48x128xf32>
    %123 = vector.extract_strided_slice %35 {offsets = [0, 128], sizes = [48, 128], strides = [1, 1]} : vector<48x512xf32> to vector<48x128xf32>
    %124 = vector.extract_strided_slice %118 {offsets = [0, 1], sizes = [48, 1], strides = [1, 1]} : vector<48x4xf32> to vector<48x1xf32>
    %125 = vector.broadcast %124 : vector<48x1xf32> to vector<48x128xf32>
    %126 = arith.mulf %123, %125 : vector<48x128xf32>
    %127 = vector.extract_strided_slice %35 {offsets = [0, 256], sizes = [48, 128], strides = [1, 1]} : vector<48x512xf32> to vector<48x128xf32>
    %128 = vector.extract_strided_slice %118 {offsets = [0, 2], sizes = [48, 1], strides = [1, 1]} : vector<48x4xf32> to vector<48x1xf32>
    %129 = vector.broadcast %128 : vector<48x1xf32> to vector<48x128xf32>
    %130 = arith.mulf %127, %129 : vector<48x128xf32>
    %131 = vector.extract_strided_slice %35 {offsets = [0, 384], sizes = [48, 128], strides = [1, 1]} : vector<48x512xf32> to vector<48x128xf32>
    %132 = vector.extract_strided_slice %118 {offsets = [0, 3], sizes = [48, 1], strides = [1, 1]} : vector<48x4xf32> to vector<48x1xf32>
    %133 = vector.broadcast %132 : vector<48x1xf32> to vector<48x128xf32>
    %134 = arith.mulf %131, %133 : vector<48x128xf32>
    %135 = tpu.concatenate %122, %126, %130, %134 in 1 : vector<48x128xf32>, vector<48x128xf32>, vector<48x128xf32>, vector<48x128xf32> -> vector<48x512xf32>
    %cst_53 = arith.constant dense<0.000000e+00> : vector<16x512xf32>
    %136 = tpu.matmul %67, %135, %cst_53 {dimension_numbers = #tpu.dot_dimension_numbers<[1], [0], [0], [1], [0, 0, 1, 1], [], []>} : vector<16x48xf32>, vector<48x512xf32>, vector<16x512xf32> -> vector<16x512xf32>
    %c0_54 = arith.constant 0 : index
    %c0_55 = arith.constant 0 : index
    %c0_56 = arith.constant 0 : index
    %137 = vector.load %arg10[%c0_54, %c0_55, %c0_56] : memref<1x1x512xf32, #tpu.memory_space<vmem>>, vector<1x1x512xf32>
    %138 = vector.shape_cast %137 : vector<1x1x512xf32> to vector<1x512xf32>
    %139 = vector.broadcast %138 : vector<1x512xf32> to vector<16x512xf32>
    %140 = arith.addf %136, %139 : vector<16x512xf32>
    %141 = arith.addf %140, %3 : vector<16x512xf32>
    %c0_57 = arith.constant 0 : index
    %c0_58 = arith.constant 0 : index
    %142 = vector.load %arg18[%c0_57, %c0_58] : memref<16x512xf32, #tpu.memory_space<vmem>>, vector<16x512xf32>
    tpu.vector_store %arg18[%c0_57, %c0_58], %141 {strides = array<i32>} : memref<16x512xf32, #tpu.memory_space<vmem>>, vector<16x512xf32>,
    %c1_i32 = arith.constant 1 : i32
    %143 = arith.cmpi eq, %arg0, %c1_i32 : i32
    %144 = arith.extui %143 : i1 to i32
    %c0_i32_59 = arith.constant 0 : i32
    %145 = arith.cmpi ne, %144, %c0_i32_59 : i32
    scf.if %145 {
      %c0_60 = arith.constant 0 : index
      %c0_61 = arith.constant 0 : index
      %146 = vector.load %arg15[%c0_60, %c0_61] : memref<1x512xf32, #tpu.memory_space<vmem>>, vector<1x512xf32>
      %c0_62 = arith.constant 0 : index
      %c0_63 = arith.constant 0 : index
      %147 = vector.load %arg16[%c0_62, %c0_63] : memref<1x512xf32, #tpu.memory_space<vmem>>, vector<1x512xf32>
      %c0_64 = arith.constant 0 : index
      %c0_65 = arith.constant 0 : index
      %148 = vector.load %arg1[%c0_64, %c0_65] : memref<16x512xf32, #tpu.memory_space<vmem>>, vector<16x512xf32>
      %149 = arith.addf %141, %148 : vector<16x512xf32>
      %cst_66 = arith.constant dense<0.000000e+00> : vector<16xf32>
      %150 = vector.multi_reduction <add>, %149, %cst_66 [1] : vector<16x512xf32> to vector<16xf32>
      %151 = vector.shape_cast %150 : vector<16xf32> to vector<16x1xf32>
      %cst_67 = arith.constant 5.120000e+02 : f32
      %152 = vector.broadcast %cst_67 : f32 to vector<16x1xf32>
      %153 = arith.divf %151, %152 : vector<16x1xf32>
      %154 = vector.broadcast %153 : vector<16x1xf32> to vector<16x512xf32>
      %155 = arith.subf %149, %154 : vector<16x512xf32>
      %156 = vector.broadcast %153 : vector<16x1xf32> to vector<16x512xf32>
      %157 = arith.subf %149, %156 : vector<16x512xf32>
      %158 = arith.mulf %155, %157 : vector<16x512xf32>
      %cst_68 = arith.constant dense<0.000000e+00> : vector<16xf32>
      %159 = vector.multi_reduction <add>, %158, %cst_68 [1] : vector<16x512xf32> to vector<16xf32>
      %160 = vector.shape_cast %159 : vector<16xf32> to vector<16x1xf32>
      %cst_69 = arith.constant 5.120000e+02 : f32
      %161 = vector.broadcast %cst_69 : f32 to vector<16x1xf32>
      %162 = arith.divf %160, %161 : vector<16x1xf32>
      %163 = vector.broadcast %153 : vector<16x1xf32> to vector<16x512xf32>
      %164 = arith.subf %149, %163 : vector<16x512xf32>
      %cst_70 = arith.constant 9.99999974E-6 : f32
      %165 = vector.broadcast %cst_70 : f32 to vector<16x1xf32>
      %166 = arith.addf %162, %165 : vector<16x1xf32>
      %167 = math.rsqrt %166 : vector<16x1xf32>
      %168 = vector.broadcast %167 : vector<16x1xf32> to vector<16x512xf32>
      %169 = arith.mulf %164, %168 : vector<16x512xf32>
      %170 = vector.broadcast %146 : vector<1x512xf32> to vector<16x512xf32>
      %171 = arith.mulf %169, %170 : vector<16x512xf32>
      %172 = vector.broadcast %147 : vector<1x512xf32> to vector<16x512xf32>
      %173 = arith.addf %171, %172 : vector<16x512xf32>
      %174 = arith.truncf %173 : vector<16x512xf32> to vector<16x512xbf16>
      %c0_71 = arith.constant 0 : index
      %c0_72 = arith.constant 0 : index
      %175 = vector.load %arg11[%c0_71, %c0_72] : memref<512x1024xbf16, #tpu.memory_space<vmem>>, vector<512x1024xbf16>
      %cst_73 = arith.constant dense<0.000000e+00> : vector<16x1024xf32>
      %176 = tpu.matmul %174, %175, %cst_73 {dimension_numbers = #tpu.dot_dimension_numbers<[1], [0], [0], [1], [0, 0, 1, 1], [], []>} : vector<16x512xbf16>, vector<512x1024xbf16>, vector<16x1024xf32> -> vector<16x1024xf32>
      %c0_74 = arith.constant 0 : index
      %c0_75 = arith.constant 0 : index
      %177 = vector.load %arg12[%c0_74, %c0_75] : memref<1x1024xf32, #tpu.memory_space<vmem>>, vector<1x1024xf32>
      %178 = vector.broadcast %177 : vector<1x1024xf32> to vector<16x1024xf32>
      %179 = arith.addf %176, %178 : vector<16x1024xf32>
      %cst_76 = arith.constant 0.000000e+00 : f32
      %180 = vector.broadcast %cst_76 : f32 to vector<16x1024xf32>
      %181 = arith.maximumf %179, %180 : vector<16x1024xf32>
      %182 = arith.truncf %181 : vector<16x1024xf32> to vector<16x1024xbf16>
      %c0_77 = arith.constant 0 : index
      %c0_78 = arith.constant 0 : index
      %183 = vector.load %arg13[%c0_77, %c0_78] : memref<1024x512xbf16, #tpu.memory_space<vmem>>, vector<1024x512xbf16>
      %cst_79 = arith.constant dense<0.000000e+00> : vector<16x512xf32>
      %184 = tpu.matmul %182, %183, %cst_79 {dimension_numbers = #tpu.dot_dimension_numbers<[1], [0], [0], [1], [0, 0, 1, 1], [], []>} : vector<16x1024xbf16>, vector<1024x512xbf16>, vector<16x512xf32> -> vector<16x512xf32>
      %c0_80 = arith.constant 0 : index
      %c0_81 = arith.constant 0 : index
      %185 = vector.load %arg14[%c0_80, %c0_81] : memref<1x512xf32, #tpu.memory_space<vmem>>, vector<1x512xf32>
      %186 = vector.broadcast %185 : vector<1x512xf32> to vector<16x512xf32>
      %187 = arith.addf %184, %186 : vector<16x512xf32>
      %188 = arith.addf %187, %173 : vector<16x512xf32>
      %cst_82 = arith.constant dense<0.000000e+00> : vector<16xf32>
      %189 = vector.multi_reduction <add>, %188, %cst_82 [1] : vector<16x512xf32> to vector<16xf32>
      %190 = vector.shape_cast %189 : vector<16xf32> to vector<16x1xf32>
      %cst_83 = arith.constant 5.120000e+02 : f32
      %191 = vector.broadcast %cst_83 : f32 to vector<16x1xf32>
      %192 = arith.divf %190, %191 : vector<16x1xf32>
      %193 = vector.broadcast %192 : vector<16x1xf32> to vector<16x512xf32>
      %194 = arith.subf %188, %193 : vector<16x512xf32>
      %195 = vector.broadcast %192 : vector<16x1xf32> to vector<16x512xf32>
      %196 = arith.subf %188, %195 : vector<16x512xf32>
      %197 = arith.mulf %194, %196 : vector<16x512xf32>
      %cst_84 = arith.constant dense<0.000000e+00> : vector<16xf32>
      %198 = vector.multi_reduction <add>, %197, %cst_84 [1] : vector<16x512xf32> to vector<16xf32>
      %199 = vector.shape_cast %198 : vector<16xf32> to vector<16x1xf32>
      %cst_85 = arith.constant 5.120000e+02 : f32
      %200 = vector.broadcast %cst_85 : f32 to vector<16x1xf32>
      %201 = arith.divf %199, %200 : vector<16x1xf32>
      %202 = vector.broadcast %192 : vector<16x1xf32> to vector<16x512xf32>
      %203 = arith.subf %188, %202 : vector<16x512xf32>
      %cst_86 = arith.constant 9.99999974E-6 : f32
      %204 = vector.broadcast %cst_86 : f32 to vector<16x1xf32>
      %205 = arith.addf %201, %204 : vector<16x1xf32>
      %206 = math.rsqrt %205 : vector<16x1xf32>
      %207 = vector.broadcast %206 : vector<16x1xf32> to vector<16x512xf32>
      %208 = arith.mulf %203, %207 : vector<16x512xf32>
      %209 = vector.broadcast %146 : vector<1x512xf32> to vector<16x512xf32>
      %210 = arith.mulf %208, %209 : vector<16x512xf32>
      %211 = vector.broadcast %147 : vector<1x512xf32> to vector<16x512xf32>
      %212 = arith.addf %210, %211 : vector<16x512xf32>
      %213 = arith.addf %212, %148 : vector<16x512xf32>
      %c0_87 = arith.constant 0 : index
      %c0_88 = arith.constant 0 : index
      %214 = vector.load %arg17[%c0_87, %c0_88] : memref<16x512xf32, #tpu.memory_space<vmem>>, vector<16x512xf32>
      tpu.vector_store %arg17[%c0_87, %c0_88], %213 {strides = array<i32>} : memref<16x512xf32, #tpu.memory_space<vmem>>, vector<16x512xf32>,
    } else {
    }
    return
  }
  func.func @transform_0(%arg0: i32) -> (i32, i32) {
    %c0_i32 = arith.constant 0 : i32
    %c0_i32_0 = arith.constant 0 : i32
    %c0_i32_1 = arith.constant 0 : i32
    return %c0_i32, %c0_i32_0 : i32, i32
  }
  func.func @transform_1(%arg0: i32) -> (i32, i32) {
    %c0_i32 = arith.constant 0 : i32
    %c0_i32_0 = arith.constant 0 : i32
    %c0_i32_1 = arith.constant 0 : i32
    return %c0_i32, %c0_i32_0 : i32, i32
  }
  func.func @transform_2(%arg0: i32) -> (i32, i32) {
    %c0_i32 = arith.constant 0 : i32
    %c0_i32_0 = arith.constant 0 : i32
    %c0_i32_1 = arith.constant 0 : i32
    return %c0_i32, %c0_i32_0 : i32, i32
  }
  func.func @transform_3(%arg0: i32) -> (i32, i32) {
    %c0_i32 = arith.constant 0 : i32
    %c0_i32_0 = arith.constant 0 : i32
    %c0_i32_1 = arith.constant 0 : i32
    return %c0_i32, %c0_i32_0 : i32, i32
  }
  func.func @transform_4(%arg0: i32) -> (i32, i32) {
    %c0_i32 = arith.constant 0 : i32
    %c0_i32_0 = arith.constant 0 : i32
    %c0_i32_1 = arith.constant 0 : i32
    return %c0_i32, %c0_i32_0 : i32, i32
  }
  func.func @transform_5(%arg0: i32) -> (i32, i32) {
    %c0_i32 = arith.constant 0 : i32
    %c0_i32_0 = arith.constant 0 : i32
    %c0_i32_1 = arith.constant 0 : i32
    return %c0_i32, %c0_i32_0 : i32, i32
  }
  func.func @transform_6(%arg0: i32) -> (i32, i32, i32, i32) {
    %c0_i32 = arith.constant 0 : i32
    %c0_i32_0 = arith.constant 0 : i32
    %c0_i32_1 = arith.constant 0 : i32
    %c0_i32_2 = arith.constant 0 : i32
    return %arg0, %c0_i32, %c0_i32_0, %c0_i32_1 : i32, i32, i32, i32
  }
  func.func @transform_7(%arg0: i32) -> (i32, i32, i32) {
    %c0_i32 = arith.constant 0 : i32
    %c0_i32_0 = arith.constant 0 : i32
    %c0_i32_1 = arith.constant 0 : i32
    return %arg0, %c0_i32, %c0_i32_0 : i32, i32, i32
  }
  func.func @transform_8(%arg0: i32) -> (i32, i32, i32) {
    %c0_i32 = arith.constant 0 : i32
    %c0_i32_0 = arith.constant 0 : i32
    %c0_i32_1 = arith.constant 0 : i32
    return %arg0, %c0_i32, %c0_i32_0 : i32, i32, i32
  }
  func.func @transform_9(%arg0: i32) -> (i32, i32, i32) {
    %c0_i32 = arith.constant 0 : i32
    %c0_i32_0 = arith.constant 0 : i32
    %c0_i32_1 = arith.constant 0 : i32
    return %arg0, %c0_i32, %c0_i32_0 : i32, i32, i32
  }
  func.func @transform_10(%arg0: i32) -> (i32, i32) {
    %c0_i32 = arith.constant 0 : i32
    %c0_i32_0 = arith.constant 0 : i32
    %c0_i32_1 = arith.constant 0 : i32
    return %c0_i32, %c0_i32_0 : i32, i32
  }
  func.func @transform_11(%arg0: i32) -> (i32, i32) {
    %c0_i32 = arith.constant 0 : i32
    %c0_i32_0 = arith.constant 0 : i32
    %c0_i32_1 = arith.constant 0 : i32
    return %c0_i32, %c0_i32_0 : i32, i32
  }
  func.func @transform_12(%arg0: i32) -> (i32, i32) {
    %c0_i32 = arith.constant 0 : i32
    %c0_i32_0 = arith.constant 0 : i32
    %c0_i32_1 = arith.constant 0 : i32
    return %c0_i32, %c0_i32_0 : i32, i32
  }
  func.func @transform_13(%arg0: i32) -> (i32, i32) {
    %c0_i32 = arith.constant 0 : i32
    %c0_i32_0 = arith.constant 0 : i32
    %c0_i32_1 = arith.constant 0 : i32
    return %c0_i32, %c0_i32_0 : i32, i32
  }
  func.func @transform_14(%arg0: i32) -> (i32, i32) {
    %c0_i32 = arith.constant 0 : i32
    %c0_i32_0 = arith.constant 0 : i32
    %c0_i32_1 = arith.constant 0 : i32
    return %c0_i32, %c0_i32_0 : i32, i32
  }
  func.func @transform_15(%arg0: i32) -> (i32, i32) {
    %c0_i32 = arith.constant 0 : i32
    %c0_i32_0 = arith.constant 0 : i32
    %c0_i32_1 = arith.constant 0 : i32
    return %c0_i32, %c0_i32_0 : i32, i32
  }
  func.func @transform_16(%arg0: i32) -> (i32, i32) {
    %c0_i32 = arith.constant 0 : i32
    %c0_i32_0 = arith.constant 0 : i32
    %c0_i32_1 = arith.constant 0 : i32
    return %c0_i32, %c0_i32_0 : i32, i32
  }
}

</mosaic_0001>

<bundles_post_ra>
// kernel: fwd.1
= control target key start
LH: loop header
LB: loop body
LE: loop exit
PB: predicated region body
PF: predicated region fallthrough
CT: control target
= control target key end

     0   :  { %s18950_s0 = inlined_call_operand.vmem [shape: f32[16,512], index: 0, kind: input, shape index: {}]   ;;  %s18951_s1 = inlined_call_operand.vmem [shape: s32[48,1], index: 1, kind: input, shape index: {}]   ;;  %s18952_s2 = inlined_call_operand.vmem [shape: s32[48,1], index: 2, kind: input, shape index: {}]   ;;  %s18953_s3 = inlined_call_operand.vmem [shape: s32[1,48], index: 3, kind: input, shape index: {}]   ;;  %s18954_s4 = inlined_call_operand.vmem [shape: s32[48,1], index: 4, kind: input, shape index: {}]   ;;  %s18955_s5 = inlined_call_operand.vmem [shape: bf16[48,768], index: 5, kind: input, shape index: {}]   ;;  %s18956_s6 = inlined_call_operand.vmem [shape: bf16[2,3,512,512], index: 6, kind: input, shape index: {}]   ;;  %s18957_s7 = inlined_call_operand.vmem [shape: bf16[2,768,512], index: 7, kind: input, shape index: {}]   ;;  %s18958_s8 = inlined_call_operand.vmem [shape: bf16[2,1536,4], index: 8, kind: input, shape index: {}]   ;;  %s18959_s9 = inlined_call_operand.vmem [shape: f32[2,1,512], index: 9, kind: input, shape index: {}]   ;;  %s18960_s10 = inlined_call_operand.vmem [shape: bf16[512,1024], index: 10, kind: input, shape index: {}]   ;;  %s18961_s11 = inlined_call_operand.vmem [shape: f32[1,1024], index: 11, kind: input, shape index: {}]   ;;  %s18962_s12 = inlined_call_operand.vmem [shape: bf16[1024,512], index: 12, kind: input, shape index: {}]   ;;  %s18963_s13 = inlined_call_operand.vmem [shape: f32[1,512], index: 13, kind: input, shape index: {}, may-alias: {13,15}]   ;;  %s18964_s14 = inlined_call_operand.vmem [shape: f32[1,512], index: 14, kind: input, shape index: {}]   ;;  %s18965_s15 = inlined_call_operand.vmem [shape: f32[1,512], index: 15, kind: input, shape index: {}, may-alias: {13,15}]   ;;  %s18966_s16 = inlined_call_operand.hbm [shape: f32[16,512], index: 16, kind: output, shape index: {}]  }
   0x1   :  { %18987 = sst [smem:[#allocation12_spill]] %s18950_s0 }
   0x2   :  { %18988 = sst [smem:[#allocation13_spill]] %s18961_s11 }
   0x3   :  { %18989 = sst [smem:[#allocation14_spill]] %s18963_s13 }
   0x4   :  { %18990 = sst [smem:[#allocation15_spill]] %s18966_s16 }
   0x5   :  { %21 = vsyncpa [#allocation4], 0  ;;  %s15466_s21 = smov 0  }
   0x6 LB: > { %18991 = sst [smem:[#allocation6_spill]] %s15371_s21  ;;  %s15472_s22 = sadd.s32 4294967295, %s15371_s21   ;;  %s15371_s21 = sphi %s15466_s21, %s27_s21  }
   0x7   : > { %p11847_p0 = scmp.ge.s32.totalorder %s15371_s21, 1  ;;  %p487_p1 = scmp.lt.s32.totalorder %s15371_s21, 3 }
   0x9   : > { %p488_p2 = pnand %p11847_p0, %p487_p1 }
   0xb   : > { %491 = sbr.rel (%p488_p2) target bundleno = 3977 (0xf89), region = 84 }
  0x12   : > { %p546_p3 = scmp.lt.s32.totalorder %s15472_s22, 1  ;;  %p11852_p4 = scmp.ne.s32.totalorder %s15472_s22, 0 }
  0x13   : > { %s18992_s28 = sld [smem:[#allocation12_spill]] (!%p11852_p4) }
  0x14   : > { %s547_s23 = scalar_select %p546_p3, %s15472_s22, 1 }
  0x15   : > { %569 = sbr.rel (%p11852_p4) target bundleno = 30 (0x1e), region = 88 }
  0x16   : > { %s13845_s24 = smul.u32 3072, %s547_s23  ;;  %s11851_s25 = sshll.u32 %s547_s23, 2 }
  0x17   : > { %s13846_s26 = smul.u32 1536, %s547_s23  ;;  %s15481_s29 = scalar_lea.vmem %s18959_s9, %s11851_s25 }
  0x18   : > { %s15486_s17 = scalar_lea.vmem %s18956_s6, %s13845_s24  ;;  %s13847_s18 = smul.u32 768, %s547_s23 }
  0x19   : > { %s15491_s21 = scalar_lea.vmem %s18957_s7, %s13846_s26  ;;  %v570_v0 = vld [vmem:[%s18992_s28] sm:$0xff] (!%p11852_p4)  ;;  %v571_v1 = vld [vmem:[%s18992_s28 + $0x8] sm:$0xff] (!%p11852_p4)  ;;  %v572_v2 = vld [vmem:[%s18992_s28 + $0x10] sm:$0xff] (!%p11852_p4) }
  0x1a   : > { %s15496_s11 = scalar_lea.vmem %s18958_s8, %s13847_s18  ;;  %578 = vst [vmem:[#allocation2] sm:$0xff] (!%p11852_p4), %v570_v0  ;;  %579 = vst [vmem:[#allocation2 + $0x8] sm:$0xff] (!%p11852_p4), %v571_v1  ;;  %v573_v3 = vld [vmem:[%s18992_s28 + $0x18] sm:$0xff] (!%p11852_p4)  ;;  %v574_v4 = vld [vmem:[%s18992_s28 + $0x20] sm:$0xff] (!%p11852_p4) }
  0x1b   : > { %580 = vst [vmem:[#allocation2 + $0x10] sm:$0xff] (!%p11852_p4), %v572_v2  ;;  %v575_v5 = vld [vmem:[%s18992_s28 + $0x28] sm:$0xff] (!%p11852_p4)  ;;  %581 = vst [vmem:[#allocation2 + $0x18] sm:$0xff] (!%p11852_p4), %v573_v3  ;;  %v576_v6 = vld [vmem:[%s18992_s28 + $0x30] sm:$0xff] (!%p11852_p4) }
  0x1c   : > { %582 = vst [vmem:[#allocation2 + $0x20] sm:$0xff] %v574_v4  ;;  %583 = vst [vmem:[#allocation2 + $0x28] sm:$0xff] %v575_v5  ;;  %v577_v7 = vld [vmem:[%s18992_s28 + $0x38] sm:$0xff] }
  0x1d   : > { %584 = vst [vmem:[#allocation2 + $0x30] sm:$0xff] %v576_v6  ;;  %585 = vst [vmem:[#allocation2 + $0x38] sm:$0xff] %v577_v7 }
  0x1e PF: > { %v13915_v8 = vld [vmem:[%s15486_s17 + $0x4] ss:$16 sps:$4 sm:$0xff]   ;;  %v13917_v9 = vld [vmem:[%s15486_s17 + $0xc] ss:$16 sps:$4 sm:$0xff]   ;;  %v13919_v10 = vld [vmem:[%s15486_s17] ss:$16 sps:$4 sm:$0xff]  }
  0x1f   : > { %1385 = vmatprep.subr.bf16.mxu0 %v13915_v8  ;;  %v13920_v11 = vld [vmem:[%s15486_s17 + $0x8] ss:$16 sps:$4 sm:$0xff]   ;;  %1471 = vmatprep.subr.bf16.mxu1 %v13917_v9  ;;  %v13921_v12 = vld [vmem:[%s15486_s17 + $0x24] ss:$16 sps:$4 sm:$0xff]   ;;  %v13923_v13 = vld [vmem:[%s15486_s17 + $0x2c] ss:$16 sps:$4 sm:$0xff]  }
  0x20   : > { %1386 = vmatpush1.bf16.msra.mxu0 %v13919_v10  ;;  %1472 = vmatpush1.bf16.msra.mxu1 %v13920_v11  ;;  %v13925_v14 = vld [vmem:[%s15486_s17 + $0x20] ss:$16 sps:$4 sm:$0xff]   ;;  %v13926_v15 = vld [vmem:[%s15486_s17 + $0x28] ss:$16 sps:$4 sm:$0xff]   ;;  %v13927_v16 = vld [vmem:[%s15486_s17 + $0x44] ss:$16 sps:$4 sm:$0xff]  }
  0x21   : > { %1387 = vmatprep.subr.bf16.mxu0 %v13921_v12  ;;  %1473 = vmatprep.subr.bf16.mxu1 %v13923_v13  ;;  %v13929_v17 = vld [vmem:[%s15486_s17 + $0x4c] ss:$16 sps:$4 sm:$0xff]   ;;  %v13931_v18 = vld [vmem:[%s15486_s17 + $0x40] ss:$16 sps:$4 sm:$0xff]   ;;  %v13932_v19 = vld [vmem:[%s15486_s17 + $0x48] ss:$16 sps:$4 sm:$0xff]  }
  0x22   : > { %v13933_v20 = vld [vmem:[%s15486_s17 + $0x64] ss:$16 sps:$4 sm:$0xff]   ;;  %v13935_v21 = vld [vmem:[%s15486_s17 + $0x6c] ss:$16 sps:$4 sm:$0xff]   ;;  %v13937_v22 = vld [vmem:[%s15486_s17 + $0x60] ss:$16 sps:$4 sm:$0xff]  }
  0x23   : > { %v13938_v23 = vld [vmem:[%s15486_s17 + $0x68] ss:$16 sps:$4 sm:$0xff]   ;;  %v13939_v24 = vld [vmem:[%s15486_s17 + $0x84] ss:$16 sps:$4 sm:$0xff]   ;;  %v13941_v25 = vld [vmem:[%s15486_s17 + $0x8c] ss:$16 sps:$4 sm:$0xff]  }
  0x24   : > { %1388 = vmatpush1.bf16.msra.mxu0 %v13925_v14  ;;  %1474 = vmatpush1.bf16.msra.mxu1 %v13926_v15  ;;  %v13943_v26 = vld [vmem:[%s15486_s17 + $0x80] ss:$16 sps:$4 sm:$0xff]   ;;  %v13944_v27 = vld [vmem:[%s15486_s17 + $0x88] ss:$16 sps:$4 sm:$0xff]   ;;  %v13945_v28 = vld [vmem:[%s15486_s17 + $0xa4] ss:$16 sps:$4 sm:$0xff]  }
  0x25   : > { %1389 = vmatprep.subr.bf16.mxu0 %v13927_v16  ;;  %1475 = vmatprep.subr.bf16.mxu1 %v13929_v17  ;;  %v13947_v29 = vld [vmem:[%s15486_s17 + $0xac] ss:$16 sps:$4 sm:$0xff]   ;;  %v13949_v30 = vld [vmem:[%s15486_s17 + $0xa0] ss:$16 sps:$4 sm:$0xff]   ;;  %v13950_v31 = vld [vmem:[%s15486_s17 + $0xa8] ss:$16 sps:$4 sm:$0xff]  }
  0x26   : > { %v13951_v32 = vld [vmem:[%s15486_s17 + $0xc4] ss:$16 sps:$4 sm:$0xff]   ;;  %v13953_v33 = vld [vmem:[%s15486_s17 + $0xcc] ss:$16 sps:$4 sm:$0xff]   ;;  %v13955_v34 = vld [vmem:[%s15486_s17 + $0xc0] ss:$16 sps:$4 sm:$0xff]  }
  0x27   : > { %v13956_v35 = vld [vmem:[%s15486_s17 + $0xc8] ss:$16 sps:$4 sm:$0xff]   ;;  %v13957_v36 = vld [vmem:[%s15486_s17 + $0xe4] ss:$16 sps:$4 sm:$0xff]   ;;  %v13959_v37 = vld [vmem:[%s15486_s17 + $0xec] ss:$16 sps:$4 sm:$0xff]  }
  0x28   : > { %1390 = vmatpush1.bf16.msra.mxu0 %v13931_v18  ;;  %1476 = vmatpush1.bf16.msra.mxu1 %v13932_v19  ;;  %v13961_v38 = vld [vmem:[%s15486_s17 + $0xe0] ss:$16 sps:$4 sm:$0xff]   ;;  %v13962_v39 = vld [vmem:[%s15486_s17 + $0xe8] ss:$16 sps:$4 sm:$0xff]   ;;  %v13963_v40 = vld [vmem:[%s15486_s17 + $0x104] ss:$16 sps:$4 sm:$0xff]  }
  0x29   : > { %1391 = vmatprep.subr.bf16.mxu0 %v13933_v20  ;;  %1477 = vmatprep.subr.bf16.mxu1 %v13935_v21  ;;  %v13965_v41 = vld [vmem:[%s15486_s17 + $0x10c] ss:$16 sps:$4 sm:$0xff]   ;;  %v13967_v42 = vld [vmem:[%s15486_s17 + $0x100] ss:$16 sps:$4 sm:$0xff]   ;;  %v13968_v43 = vld [vmem:[%s15486_s17 + $0x108] ss:$16 sps:$4 sm:$0xff]  }
  0x2a   : > { %v13969_v44 = vld [vmem:[%s15486_s17 + $0x124] ss:$16 sps:$4 sm:$0xff]   ;;  %v13971_v45 = vld [vmem:[%s15486_s17 + $0x12c] ss:$16 sps:$4 sm:$0xff]   ;;  %v13973_v46 = vld [vmem:[%s15486_s17 + $0x120] ss:$16 sps:$4 sm:$0xff]  }
  0x2b   : > { %v13974_v47 = vld [vmem:[%s15486_s17 + $0x128] ss:$16 sps:$4 sm:$0xff]   ;;  %v13975_v48 = vld [vmem:[%s15486_s17 + $0x144] ss:$16 sps:$4 sm:$0xff]   ;;  %v13977_v49 = vld [vmem:[%s15486_s17 + $0x14c] ss:$16 sps:$4 sm:$0xff]  }
  0x2c   : > { %1392 = vmatpush1.bf16.msra.mxu0 %v13937_v22  ;;  %1478 = vmatpush1.bf16.msra.mxu1 %v13938_v23  ;;  %v13979_v50 = vld [vmem:[%s15486_s17 + $0x140] ss:$16 sps:$4 sm:$0xff]   ;;  %v13980_v51 = vld [vmem:[%s15486_s17 + $0x148] ss:$16 sps:$4 sm:$0xff]   ;;  %v13981_v52 = vld [vmem:[%s15486_s17 + $0x164] ss:$16 sps:$4 sm:$0xff]  }
  0x2d   : > { %1393 = vmatprep.subr.bf16.mxu0 %v13939_v24  ;;  %1479 = vmatprep.subr.bf16.mxu1 %v13941_v25  ;;  %v13983_v53 = vld [vmem:[%s15486_s17 + $0x16c] ss:$16 sps:$4 sm:$0xff]   ;;  %v13985_v56 = vld [vmem:[%s15486_s17 + $0x160] ss:$16 sps:$4 sm:$0xff]   ;;  %v13986_v57 = vld [vmem:[%s15486_s17 + $0x168] ss:$16 sps:$4 sm:$0xff]  }
  0x2e   : > { %v587_v54 = vld [vmem:[#allocation2 + $0x8] sm:$0xff]  ;;  %v13987_v59 = vld [vmem:[%s15486_s17 + $0x184] ss:$16 sps:$4 sm:$0xff]   ;;  %v13991_v61 = vld [vmem:[%s15486_s17 + $0x180] ss:$16 sps:$4 sm:$0xff]   ;;  %vm3531_vm1 = vcmask 392192  }
  0x2f   : > { %v591_v55 = vld [vmem:[#allocation2 + $0x28] sm:$0xff]  ;;  %v13993_v63 = vld [vmem:[%s15486_s17 + $0x1a4] ss:$16 sps:$4 sm:$0xff]   ;;  %v13997_v1 = vld [vmem:[%s15486_s17 + $0x1a0] ss:$16 sps:$4 sm:$0xff]   ;;  %vm6865_vm14 = vcmask 130048  }
  0x30   : > { %1394 = vmatpush1.bf16.msra.mxu0 %v13943_v26  ;;  %1480 = vmatpush1.bf16.msra.mxu1 %v13944_v27  ;;  %v15571_v58 = vpack.c.bf16 %v591_v55, %v587_v54  ;;  %v13989_v60 = vld [vmem:[%s15486_s17 + $0x18c] ss:$16 sps:$4 sm:$0xff]   ;;  %v13992_v62 = vld [vmem:[%s15486_s17 + $0x188] ss:$16 sps:$4 sm:$0xff]   ;;  %v13999_v3 = vld [vmem:[%s15486_s17 + $0x1c4] ss:$16 sps:$4 sm:$0xff]  }
  0x31   : > { %1395 = vmatprep.subr.bf16.mxu0 %v13945_v28  ;;  %1481 = vmatprep.subr.bf16.mxu1 %v13947_v29  ;;  %v13995_v0 = vld [vmem:[%s15486_s17 + $0x1ac] ss:$16 sps:$4 sm:$0xff]   ;;  %v13998_v2 = vld [vmem:[%s15486_s17 + $0x1a8] ss:$16 sps:$4 sm:$0xff]   ;;  %v14003_v5 = vld [vmem:[%s15486_s17 + $0x1c0] ss:$16 sps:$4 sm:$0xff]  }
  0x32   : > { %1417 = vmatprep.mubr.bf16.mxu0 %v15571_v58  ;;  %1503 = vmatprep.mubr.bf16.mxu1 %v15571_v58  ;;  %v14001_v4 = vld [vmem:[%s15486_s17 + $0x1cc] ss:$16 sps:$4 sm:$0xff]   ;;  %v14004_v6 = vld [vmem:[%s15486_s17 + $0x1c8] ss:$16 sps:$4 sm:$0xff]   ;;  %v14005_v7 = vld [vmem:[%s15486_s17 + $0x1e4] ss:$16 sps:$4 sm:$0xff]  }
  0x33   : > { %v14007_v8 = vld [vmem:[%s15486_s17 + $0x1ec] ss:$16 sps:$4 sm:$0xff]   ;;  %v14009_v9 = vld [vmem:[%s15486_s17 + $0x1e0] ss:$16 sps:$4 sm:$0xff]   ;;  %v14010_v10 = vld [vmem:[%s15486_s17 + $0x1e8] ss:$16 sps:$4 sm:$0xff]  }
  0x34   : > { %1396 = vmatpush1.bf16.msra.mxu0 %v13949_v30  ;;  %1482 = vmatpush1.bf16.msra.mxu1 %v13950_v31  ;;  %v14013_v11 = vld [vmem:[%s15486_s17 + $0x204] ss:$16 sps:$4 sm:$0xff]   ;;  %v14016_v14 = vld [vmem:[%s15486_s17 + $0x20c] ss:$16 sps:$4 sm:$0xff]   ;;  %v14011_v15 = vld [vmem:[%s15486_s17 + $0x200] ss:$16 sps:$4 sm:$0xff]  }
  0x35   : > { %1397 = vmatprep.subr.bf16.mxu0 %v13951_v32  ;;  %1483 = vmatprep.subr.bf16.mxu1 %v13953_v33  ;;  %v586_v12 = vld [vmem:[#allocation2] sm:$0xff]  ;;  %v14014_v16 = vld [vmem:[%s15486_s17 + $0x208] ss:$16 sps:$4 sm:$0xff]   ;;  %v14022_v19 = vld [vmem:[%s15486_s17 + $0x22c] ss:$16 sps:$4 sm:$0xff]   ;;  %p12856_p5 = scmp.ne.s32.totalorder %s15472_s22, 1 }
  0x36   : > { %v590_v13 = vld [vmem:[#allocation2 + $0x20] sm:$0xff]  ;;  %v14020_v21 = vld [vmem:[%s15486_s17 + $0x228] ss:$16 sps:$4 sm:$0xff]   ;;  %v14028_v23 = vld [vmem:[%s15486_s17 + $0x24c] ss:$16 sps:$4 sm:$0xff]   ;;  %s19032_s19 = sld [smem:[#allocation12_spill]] (!%p12856_p5) }
  0x37   : > { %v15595_v17 = vpack.c.bf16 %v590_v13, %v586_v12  ;;  %v14019_v18 = vld [vmem:[%s15486_s17 + $0x224] ss:$16 sps:$4 sm:$0xff]   ;;  %v14017_v20 = vld [vmem:[%s15486_s17 + $0x220] ss:$16 sps:$4 sm:$0xff]   ;;  %v14026_v25 = vld [vmem:[%s15486_s17 + $0x248] ss:$16 sps:$4 sm:$0xff]  }
  0x38   : > { %1398 = vmatpush1.bf16.msra.mxu0 %v13955_v34  ;;  %1484 = vmatpush1.bf16.msra.mxu1 %v13956_v35  ;;  %v14025_v22 = vld [vmem:[%s15486_s17 + $0x244] ss:$16 sps:$4 sm:$0xff]   ;;  %v14023_v24 = vld [vmem:[%s15486_s17 + $0x240] ss:$16 sps:$4 sm:$0xff]   ;;  %v14034_v27 = vld [vmem:[%s15486_s17 + $0x26c] ss:$16 sps:$4 sm:$0xff]  }
  0x39   : > { %1399 = vmatprep.subr.bf16.mxu0 %v13957_v36  ;;  %1485 = vmatprep.subr.bf16.mxu1 %v13959_v37  ;;  %v14031_v26 = vld [vmem:[%s15486_s17 + $0x264] ss:$16 sps:$4 sm:$0xff]   ;;  %v14029_v28 = vld [vmem:[%s15486_s17 + $0x260] ss:$16 sps:$4 sm:$0xff]   ;;  %v14032_v29 = vld [vmem:[%s15486_s17 + $0x268] ss:$16 sps:$4 sm:$0xff]  }
  0x3a   : > { %v14037_v30 = vld [vmem:[%s15486_s17 + $0x284] ss:$16 sps:$4 sm:$0xff]   ;;  %v14040_v31 = vld [vmem:[%s15486_s17 + $0x28c] ss:$16 sps:$4 sm:$0xff]   ;;  %v14035_v32 = vld [vmem:[%s15486_s17 + $0x280] ss:$16 sps:$4 sm:$0xff]  }
  0x3b   : > { %v14038_v33 = vld [vmem:[%s15486_s17 + $0x288] ss:$16 sps:$4 sm:$0xff]   ;;  %v14043_v34 = vld [vmem:[%s15486_s17 + $0x2a4] ss:$16 sps:$4 sm:$0xff]   ;;  %v14046_v35 = vld [vmem:[%s15486_s17 + $0x2ac] ss:$16 sps:$4 sm:$0xff]  }
  0x3c   : > { %1400 = vmatpush1.bf16.msra.mxu0 %v13961_v38  ;;  %1486 = vmatpush1.bf16.msra.mxu1 %v13962_v39  ;;  %v14041_v36 = vld [vmem:[%s15486_s17 + $0x2a0] ss:$16 sps:$4 sm:$0xff]   ;;  %v14044_v37 = vld [vmem:[%s15486_s17 + $0x2a8] ss:$16 sps:$4 sm:$0xff]   ;;  %v14049_v38 = vld [vmem:[%s15486_s17 + $0x2c4] ss:$16 sps:$4 sm:$0xff]  }
  0x3d   : > { %1401 = vmatprep.subr.bf16.mxu0 %v13963_v40  ;;  %1487 = vmatprep.subr.bf16.mxu1 %v13965_v41  ;;  %v14052_v39 = vld [vmem:[%s15486_s17 + $0x2cc] ss:$16 sps:$4 sm:$0xff]   ;;  %v14047_v41 = vld [vmem:[%s15486_s17 + $0x2c0] ss:$16 sps:$4 sm:$0xff]   ;;  %v14098_v13 = vld [vmem:[%s15486_s17 + $0x3c8] ss:$16 sps:$4 sm:$0xff]  }
  0x3e   : > { %v589_v40 = vld [vmem:[#allocation2 + $0x18] sm:$0xff]  ;;  %v14065_v55 = vld [vmem:[%s15486_s17 + $0x320] ss:$16 sps:$4 sm:$0xff]   ;;  %s19033_s23 = sld [smem:[#allocation13_spill]] (!%p12856_p5)  ;;  %s19034_s28 = sld [smem:[#allocation14_spill]] (!%p12856_p5) }
  0x3f   : > { %v14070_v54 = vld [vmem:[%s15486_s17 + $0x32c] ss:$16 sps:$4 sm:$0xff]   ;;  %v14095_v12 = vld [vmem:[%s15486_s17 + $0x3c0] ss:$16 sps:$4 sm:$0xff]  }
  0x40   : > { %1402 = vmatpush1.bf16.msra.mxu0 %v13967_v42  ;;  %1488 = vmatpush1.bf16.msra.mxu1 %v13968_v43  ;;  %v14050_v42 = vld [vmem:[%s15486_s17 + $0x2c8] ss:$16 sps:$4 sm:$0xff]  }
  0x41   : > { %1403 = vmatprep.subr.bf16.mxu0 %v13969_v44  ;;  %1489 = vmatprep.subr.bf16.mxu1 %v13971_v45  ;;  %v593_v43 = vld [vmem:[#allocation2 + $0x38] sm:$0xff]  ;;  %v14055_v44 = vld [vmem:[%s15486_s17 + $0x2e4] ss:$16 sps:$4 sm:$0xff]  }
  0x42   : > { %v15624_v45 = vpack.c.bf16 %v593_v43, %v589_v40  ;;  %v14131_v40 = vld [vmem:[%s15486_s17 + $0x480] ss:$16 sps:$4 sm:$0xff]   ;;  %v14142_v43 = vld [vmem:[%s15486_s17 + $0x4ac] ss:$16 sps:$4 sm:$0xff]  }
  0x44   : > { %1404 = vmatpush1.bf16.msra.mxu0 %v13973_v46  ;;  %1490 = vmatpush1.bf16.msra.mxu1 %v13974_v47  ;;  %v14058_v46 = vld [vmem:[%s15486_s17 + $0x2ec] ss:$16 sps:$4 sm:$0xff]   ;;  %v14053_v47 = vld [vmem:[%s15486_s17 + $0x2e0] ss:$16 sps:$4 sm:$0xff]  }
  0x45   : > { %1405 = vmatprep.subr.bf16.mxu0 %v13975_v48  ;;  %1491 = vmatprep.subr.bf16.mxu1 %v13977_v49  ;;  %v14056_v48 = vld [vmem:[%s15486_s17 + $0x2e8] ss:$16 sps:$4 sm:$0xff]   ;;  %v14061_v49 = vld [vmem:[%s15486_s17 + $0x304] ss:$16 sps:$4 sm:$0xff]  }
  0x48   : > { %1406 = vmatpush1.bf16.msra.mxu0 %v13979_v50  ;;  %1492 = vmatpush1.bf16.msra.mxu1 %v13980_v51  ;;  %v14064_v50 = vld [vmem:[%s15486_s17 + $0x30c] ss:$16 sps:$4 sm:$0xff]   ;;  %v14059_v51 = vld [vmem:[%s15486_s17 + $0x300] ss:$16 sps:$4 sm:$0xff]  }
  0x49   : > { %1407 = vmatprep.subr.bf16.mxu0 %v13981_v52  ;;  %1493 = vmatprep.subr.bf16.mxu1 %v13983_v53  ;;  %v14062_v52 = vld [vmem:[%s15486_s17 + $0x308] ss:$16 sps:$4 sm:$0xff]   ;;  %v14067_v53 = vld [vmem:[%s15486_s17 + $0x324] ss:$16 sps:$4 sm:$0xff]  }
  0x4c   : > { %1408 = vmatpush1.bf16.msra.mxu0 %v13985_v56  ;;  %1494 = vmatpush1.bf16.msra.mxu1 %v13986_v57  ;;  %v14068_v56 = vld [vmem:[%s15486_s17 + $0x328] ss:$16 sps:$4 sm:$0xff]   ;;  %v14073_v57 = vld [vmem:[%s15486_s17 + $0x344] ss:$16 sps:$4 sm:$0xff]  }
  0x4d   : > { %1409 = vmatprep.subr.bf16.mxu0 %v13987_v59  ;;  %1495 = vmatprep.subr.bf16.mxu1 %v13989_v60  ;;  %v14076_v59 = vld [vmem:[%s15486_s17 + $0x34c] ss:$16 sps:$4 sm:$0xff]   ;;  %v14071_v60 = vld [vmem:[%s15486_s17 + $0x340] ss:$16 sps:$4 sm:$0xff]  }
  0x50   : > { %1410 = vmatpush1.bf16.msra.mxu0 %v13991_v61  ;;  %1496 = vmatpush1.bf16.msra.mxu1 %v13992_v62  ;;  %v14074_v61 = vld [vmem:[%s15486_s17 + $0x348] ss:$16 sps:$4 sm:$0xff]   ;;  %v14079_v62 = vld [vmem:[%s15486_s17 + $0x364] ss:$16 sps:$4 sm:$0xff]  }
  0x51   : > { %1411 = vmatprep.subr.bf16.mxu0 %v13993_v63  ;;  %1497 = vmatprep.subr.bf16.mxu1 %v13995_v0  ;;  %v14082_v63 = vld [vmem:[%s15486_s17 + $0x36c] ss:$16 sps:$4 sm:$0xff]   ;;  %v14077_v0 = vld [vmem:[%s15486_s17 + $0x360] ss:$16 sps:$4 sm:$0xff]  }
  0x54   : > { %1412 = vmatpush1.bf16.msra.mxu0 %v13997_v1  ;;  %1498 = vmatpush1.bf16.msra.mxu1 %v13998_v2  ;;  %v14080_v1 = vld [vmem:[%s15486_s17 + $0x368] ss:$16 sps:$4 sm:$0xff]   ;;  %v14085_v2 = vld [vmem:[%s15486_s17 + $0x384] ss:$16 sps:$4 sm:$0xff]  }
  0x55   : > { %1413 = vmatprep.subr.bf16.mxu0 %v13999_v3  ;;  %1499 = vmatprep.subr.bf16.mxu1 %v14001_v4  ;;  %v14088_v3 = vld [vmem:[%s15486_s17 + $0x38c] ss:$16 sps:$4 sm:$0xff]   ;;  %v14083_v4 = vld [vmem:[%s15486_s17 + $0x380] ss:$16 sps:$4 sm:$0xff]  }
  0x58   : > { %1414 = vmatpush1.bf16.msra.mxu0 %v14003_v5  ;;  %1500 = vmatpush1.bf16.msra.mxu1 %v14004_v6  ;;  %v14086_v5 = vld [vmem:[%s15486_s17 + $0x388] ss:$16 sps:$4 sm:$0xff]   ;;  %v14091_v6 = vld [vmem:[%s15486_s17 + $0x3a4] ss:$16 sps:$4 sm:$0xff]  }
  0x59   : > { %1415 = vmatprep.subr.bf16.mxu0 %v14005_v7  ;;  %1501 = vmatprep.subr.bf16.mxu1 %v14007_v8  ;;  %v14094_v7 = vld [vmem:[%s15486_s17 + $0x3ac] ss:$16 sps:$4 sm:$0xff]   ;;  %v14089_v8 = vld [vmem:[%s15486_s17 + $0x3a0] ss:$16 sps:$4 sm:$0xff]  }
  0x5c   : > { %1416 = vmatpush1.bf16.msra.mxu0 %v14009_v9  ;;  %1502 = vmatpush1.bf16.msra.mxu1 %v14010_v10  ;;  %v14092_v9 = vld [vmem:[%s15486_s17 + $0x3a8] ss:$16 sps:$4 sm:$0xff]   ;;  %v14097_v10 = vld [vmem:[%s15486_s17 + $0x3c4] ss:$16 sps:$4 sm:$0xff]  }
  0x5d   : > { %1428 = vmatprep.subr.bf16.mxu0 %v14013_v11  ;;  %1514 = vmatprep.subr.bf16.mxu1 %v14016_v14  ;;  %v14100_v11 = vld [vmem:[%s15486_s17 + $0x3cc] ss:$16 sps:$4 sm:$0xff]   ;;  %v14103_v14 = vld [vmem:[%s15486_s17 + $0x3e4] ss:$16 sps:$4 sm:$0xff]  }
  0x5f   : > { %1418 = vmatmul.mubr.bf16.vlgmr.msra.gmra.mrb[0].mxu0 %v15595_v17  ;;  %1504 = vmatmul.mubr.bf16.vlgmr.msra.gmra.mrb[0].mxu1 %v15595_v17 }
  0x60   : > { %1429 = vmatpush1.bf16.msra.mxu0 %v14011_v15  ;;  %1515 = vmatpush1.bf16.msra.mxu1 %v14014_v16  ;;  %v14106_v15 = vld [vmem:[%s15486_s17 + $0x3ec] ss:$16 sps:$4 sm:$0xff]   ;;  %v14101_v16 = vld [vmem:[%s15486_s17 + $0x3e0] ss:$16 sps:$4 sm:$0xff]  }
  0x61   : > { %1430 = vmatprep.subr.bf16.mxu0 %v14019_v18  ;;  %1516 = vmatprep.subr.bf16.mxu1 %v14022_v19  ;;  %v14104_v18 = vld [vmem:[%s15486_s17 + $0x3e8] ss:$16 sps:$4 sm:$0xff]   ;;  %v588_v19 = vld [vmem:[#allocation2 + $0x10] sm:$0xff] }
  0x62   : > { %1460 = vmatprep.mubr.bf16.mxu0 %v15624_v45  ;;  %1546 = vmatprep.mubr.bf16.mxu1 %v15624_v45 }
  0x64   : > { %1431 = vmatpush1.bf16.msra.mxu0 %v14017_v20  ;;  %1517 = vmatpush1.bf16.msra.mxu1 %v14020_v21  ;;  %v592_v20 = vld [vmem:[#allocation2 + $0x30] sm:$0xff] }
  0x65   : > { %1432 = vmatprep.subr.bf16.mxu0 %v14025_v22  ;;  %1518 = vmatprep.subr.bf16.mxu1 %v14028_v23  ;;  %v14109_v21 = vld [vmem:[%s15486_s17 + $0x404] ss:$16 sps:$4 sm:$0xff]   ;;  %v14112_v22 = vld [vmem:[%s15486_s17 + $0x40c] ss:$16 sps:$4 sm:$0xff]   ;;  %v15665_v23 = vpack.c.bf16 %v592_v20, %v588_v19  ;;  %v14191_v19 = vld [vmem:[%s15486_s17 + $0x5c0] ss:$16 sps:$4 sm:$0xff]  }
  0x66   : > { %v14194_v20 = vld [vmem:[%s15486_s17 + $0x5c8] ss:$16 sps:$4 sm:$0xff]  }
  0x68   : > { %1433 = vmatpush1.bf16.msra.mxu0 %v14023_v24  ;;  %1519 = vmatpush1.bf16.msra.mxu1 %v14026_v25  ;;  %v14107_v24 = vld [vmem:[%s15486_s17 + $0x400] ss:$16 sps:$4 sm:$0xff]   ;;  %v14110_v25 = vld [vmem:[%s15486_s17 + $0x408] ss:$16 sps:$4 sm:$0xff]  }
  0x69   : > { %1434 = vmatprep.subr.bf16.mxu0 %v14031_v26  ;;  %1520 = vmatprep.subr.bf16.mxu1 %v14034_v27  ;;  %v14115_v26 = vld [vmem:[%s15486_s17 + $0x424] ss:$16 sps:$4 sm:$0xff]   ;;  %v14118_v27 = vld [vmem:[%s15486_s17 + $0x42c] ss:$16 sps:$4 sm:$0xff]  }
  0x6c   : > { %1435 = vmatpush1.bf16.msra.mxu0 %v14029_v28  ;;  %1521 = vmatpush1.bf16.msra.mxu1 %v14032_v29  ;;  %v14113_v28 = vld [vmem:[%s15486_s17 + $0x420] ss:$16 sps:$4 sm:$0xff]   ;;  %v14116_v29 = vld [vmem:[%s15486_s17 + $0x428] ss:$16 sps:$4 sm:$0xff]  }
  0x6d   : > { %1436 = vmatprep.subr.bf16.mxu0 %v14037_v30  ;;  %1522 = vmatprep.subr.bf16.mxu1 %v14040_v31  ;;  %v14121_v30 = vld [vmem:[%s15486_s17 + $0x444] ss:$16 sps:$4 sm:$0xff]   ;;  %v14124_v31 = vld [vmem:[%s15486_s17 + $0x44c] ss:$16 sps:$4 sm:$0xff]  }
  0x70   : > { %1437 = vmatpush1.bf16.msra.mxu0 %v14035_v32  ;;  %1523 = vmatpush1.bf16.msra.mxu1 %v14038_v33  ;;  %v14119_v32 = vld [vmem:[%s15486_s17 + $0x440] ss:$16 sps:$4 sm:$0xff]   ;;  %v14122_v33 = vld [vmem:[%s15486_s17 + $0x448] ss:$16 sps:$4 sm:$0xff]  }
  0x71   : > { %1438 = vmatprep.subr.bf16.mxu0 %v14043_v34  ;;  %1524 = vmatprep.subr.bf16.mxu1 %v14046_v35  ;;  %v14127_v34 = vld [vmem:[%s15486_s17 + $0x464] ss:$16 sps:$4 sm:$0xff]   ;;  %v14130_v35 = vld [vmem:[%s15486_s17 + $0x46c] ss:$16 sps:$4 sm:$0xff]  }
  0x74   : > { %1439 = vmatpush1.bf16.msra.mxu0 %v14041_v36  ;;  %1525 = vmatpush1.bf16.msra.mxu1 %v14044_v37  ;;  %v14125_v36 = vld [vmem:[%s15486_s17 + $0x460] ss:$16 sps:$4 sm:$0xff]   ;;  %v14128_v37 = vld [vmem:[%s15486_s17 + $0x468] ss:$16 sps:$4 sm:$0xff]  }
  0x75   : > { %1440 = vmatprep.subr.bf16.mxu0 %v14049_v38  ;;  %1526 = vmatprep.subr.bf16.mxu1 %v14052_v39  ;;  %v14133_v38 = vld [vmem:[%s15486_s17 + $0x484] ss:$16 sps:$4 sm:$0xff]   ;;  %v14136_v39 = vld [vmem:[%s15486_s17 + $0x48c] ss:$16 sps:$4 sm:$0xff]  }
  0x78   : > { %1441 = vmatpush1.bf16.msra.mxu0 %v14047_v41  ;;  %1527 = vmatpush1.bf16.msra.mxu1 %v14050_v42  ;;  %v14134_v41 = vld [vmem:[%s15486_s17 + $0x488] ss:$16 sps:$4 sm:$0xff]   ;;  %v14139_v42 = vld [vmem:[%s15486_s17 + $0x4a4] ss:$16 sps:$4 sm:$0xff]  }
  0x79   : > { %1442 = vmatprep.subr.bf16.mxu0 %v14055_v44  ;;  %1528 = vmatprep.subr.bf16.mxu1 %v14058_v46  ;;  %v14137_v44 = vld [vmem:[%s15486_s17 + $0x4a0] ss:$16 sps:$4 sm:$0xff]   ;;  %v14140_v46 = vld [vmem:[%s15486_s17 + $0x4a8] ss:$16 sps:$4 sm:$0xff]  }
  0x7c   : > { %1443 = vmatpush1.bf16.msra.mxu0 %v14053_v47  ;;  %1529 = vmatpush1.bf16.msra.mxu1 %v14056_v48  ;;  %v14145_v47 = vld [vmem:[%s15486_s17 + $0x4c4] ss:$16 sps:$4 sm:$0xff]   ;;  %v14148_v48 = vld [vmem:[%s15486_s17 + $0x4cc] ss:$16 sps:$4 sm:$0xff]  }
  0x7d   : > { %1444 = vmatprep.subr.bf16.mxu0 %v14061_v49  ;;  %1530 = vmatprep.subr.bf16.mxu1 %v14064_v50  ;;  %v14143_v49 = vld [vmem:[%s15486_s17 + $0x4c0] ss:$16 sps:$4 sm:$0xff]   ;;  %v14146_v50 = vld [vmem:[%s15486_s17 + $0x4c8] ss:$16 sps:$4 sm:$0xff]  }
  0x80   : > { %1445 = vmatpush1.bf16.msra.mxu0 %v14059_v51  ;;  %1531 = vmatpush1.bf16.msra.mxu1 %v14062_v52  ;;  %v14151_v51 = vld [vmem:[%s15486_s17 + $0x4e4] ss:$16 sps:$4 sm:$0xff]   ;;  %v14154_v52 = vld [vmem:[%s15486_s17 + $0x4ec] ss:$16 sps:$4 sm:$0xff]  }
  0x81   : > { %1446 = vmatprep.subr.bf16.mxu0 %v14067_v53  ;;  %1532 = vmatprep.subr.bf16.mxu1 %v14070_v54  ;;  %v14149_v53 = vld [vmem:[%s15486_s17 + $0x4e0] ss:$16 sps:$4 sm:$0xff]   ;;  %v14152_v54 = vld [vmem:[%s15486_s17 + $0x4e8] ss:$16 sps:$4 sm:$0xff]  }
  0x84   : > { %1447 = vmatpush1.bf16.msra.mxu0 %v14065_v55  ;;  %1533 = vmatpush1.bf16.msra.mxu1 %v14068_v56  ;;  %v14157_v55 = vld [vmem:[%s15486_s17 + $0x504] ss:$16 sps:$4 sm:$0xff]   ;;  %v14160_v56 = vld [vmem:[%s15486_s17 + $0x50c] ss:$16 sps:$4 sm:$0xff]  }
  0x85   : > { %1448 = vmatprep.subr.bf16.mxu0 %v14073_v57  ;;  %1534 = vmatprep.subr.bf16.mxu1 %v14076_v59  ;;  %v14155_v57 = vld [vmem:[%s15486_s17 + $0x500] ss:$16 sps:$4 sm:$0xff]   ;;  %v14158_v59 = vld [vmem:[%s15486_s17 + $0x508] ss:$16 sps:$4 sm:$0xff]  }
  0x88   : > { %1449 = vmatpush1.bf16.msra.mxu0 %v14071_v60  ;;  %1535 = vmatpush1.bf16.msra.mxu1 %v14074_v61  ;;  %v14163_v60 = vld [vmem:[%s15486_s17 + $0x524] ss:$16 sps:$4 sm:$0xff]   ;;  %v14166_v61 = vld [vmem:[%s15486_s17 + $0x52c] ss:$16 sps:$4 sm:$0xff]  }
  0x89   : > { %1450 = vmatprep.subr.bf16.mxu0 %v14079_v62  ;;  %1536 = vmatprep.subr.bf16.mxu1 %v14082_v63  ;;  %v14161_v62 = vld [vmem:[%s15486_s17 + $0x520] ss:$16 sps:$4 sm:$0xff]   ;;  %v14164_v63 = vld [vmem:[%s15486_s17 + $0x528] ss:$16 sps:$4 sm:$0xff]  }
  0x8c   : > { %1451 = vmatpush1.bf16.msra.mxu0 %v14077_v0  ;;  %1537 = vmatpush1.bf16.msra.mxu1 %v14080_v1  ;;  %v14169_v0 = vld [vmem:[%s15486_s17 + $0x544] ss:$16 sps:$4 sm:$0xff]   ;;  %v14172_v1 = vld [vmem:[%s15486_s17 + $0x54c] ss:$16 sps:$4 sm:$0xff]  }
  0x8d   : > { %1452 = vmatprep.subr.bf16.mxu0 %v14085_v2  ;;  %1538 = vmatprep.subr.bf16.mxu1 %v14088_v3  ;;  %v14167_v2 = vld [vmem:[%s15486_s17 + $0x540] ss:$16 sps:$4 sm:$0xff]   ;;  %v14170_v3 = vld [vmem:[%s15486_s17 + $0x548] ss:$16 sps:$4 sm:$0xff]  }
  0x90   : > { %1453 = vmatpush1.bf16.msra.mxu0 %v14083_v4  ;;  %1539 = vmatpush1.bf16.msra.mxu1 %v14086_v5  ;;  %v14175_v4 = vld [vmem:[%s15486_s17 + $0x564] ss:$16 sps:$4 sm:$0xff]   ;;  %v14178_v5 = vld [vmem:[%s15486_s17 + $0x56c] ss:$16 sps:$4 sm:$0xff]  }
  0x91   : > { %1454 = vmatprep.subr.bf16.mxu0 %v14091_v6  ;;  %1540 = vmatprep.subr.bf16.mxu1 %v14094_v7  ;;  %v14173_v6 = vld [vmem:[%s15486_s17 + $0x560] ss:$16 sps:$4 sm:$0xff]   ;;  %v14176_v7 = vld [vmem:[%s15486_s17 + $0x568] ss:$16 sps:$4 sm:$0xff]  }
  0x94   : > { %1455 = vmatpush1.bf16.msra.mxu0 %v14089_v8  ;;  %1541 = vmatpush1.bf16.msra.mxu1 %v14092_v9  ;;  %v14181_v8 = vld [vmem:[%s15486_s17 + $0x584] ss:$16 sps:$4 sm:$0xff]   ;;  %v14184_v9 = vld [vmem:[%s15486_s17 + $0x58c] ss:$16 sps:$4 sm:$0xff]  }
  0x95   : > { %1456 = vmatprep.subr.bf16.mxu0 %v14097_v10  ;;  %1542 = vmatprep.subr.bf16.mxu1 %v14100_v11  ;;  %v14179_v10 = vld [vmem:[%s15486_s17 + $0x580] ss:$16 sps:$4 sm:$0xff]   ;;  %v14182_v11 = vld [vmem:[%s15486_s17 + $0x588] ss:$16 sps:$4 sm:$0xff]  }
  0x98   : > { %1457 = vmatpush1.bf16.msra.mxu0 %v14095_v12  ;;  %1543 = vmatpush1.bf16.msra.mxu1 %v14098_v13  ;;  %v14187_v12 = vld [vmem:[%s15486_s17 + $0x5a4] ss:$16 sps:$4 sm:$0xff]   ;;  %v14190_v13 = vld [vmem:[%s15486_s17 + $0x5ac] ss:$16 sps:$4 sm:$0xff]  }
  0x99   : > { %1458 = vmatprep.subr.bf16.mxu0 %v14103_v14  ;;  %1544 = vmatprep.subr.bf16.mxu1 %v14106_v15  ;;  %v14185_v14 = vld [vmem:[%s15486_s17 + $0x5a0] ss:$16 sps:$4 sm:$0xff]   ;;  %v14188_v15 = vld [vmem:[%s15486_s17 + $0x5a8] ss:$16 sps:$4 sm:$0xff]  }
  0x9c   : > { %1459 = vmatpush1.bf16.msra.mxu0 %v14101_v16  ;;  %1545 = vmatpush1.bf16.msra.mxu1 %v14104_v18  ;;  %v14193_v16 = vld [vmem:[%s15486_s17 + $0x5c4] ss:$16 sps:$4 sm:$0xff]   ;;  %v14196_v18 = vld [vmem:[%s15486_s17 + $0x5cc] ss:$16 sps:$4 sm:$0xff]  }
  0x9d   : > { %2326 = vmatprep.subr.bf16.mxu0 %v14109_v21  ;;  %2412 = vmatprep.subr.bf16.mxu1 %v14112_v22  ;;  %v14199_v21 = vld [vmem:[%s15486_s17 + $0x5e4] ss:$16 sps:$4 sm:$0xff]   ;;  %v14202_v22 = vld [vmem:[%s15486_s17 + $0x5ec] ss:$16 sps:$4 sm:$0xff]  }
  0x9f   : > { %1461 = vmatmul.mubr.bf16.vlgmr.msra.gmra.mrb[0].mxu0 %v15665_v23  ;;  %1547 = vmatmul.mubr.bf16.vlgmr.msra.gmra.mrb[0].mxu1 %v15665_v23 }
  0xa0   : > { %2327 = vmatpush1.bf16.msra.mxu0 %v14107_v24  ;;  %2413 = vmatpush1.bf16.msra.mxu1 %v14110_v25  ;;  %v14197_v24 = vld [vmem:[%s15486_s17 + $0x5e0] ss:$16 sps:$4 sm:$0xff]   ;;  %v14200_v25 = vld [vmem:[%s15486_s17 + $0x5e8] ss:$16 sps:$4 sm:$0xff]  }
  0xa1   : > { %2328 = vmatprep.subr.bf16.mxu0 %v14115_v26  ;;  %2414 = vmatprep.subr.bf16.mxu1 %v14118_v27  ;;  %v14205_v26 = vld [vmem:[%s15486_s17 + $0x604] ss:$16 sps:$4 sm:$0xff]   ;;  %v14208_v27 = vld [vmem:[%s15486_s17 + $0x60c] ss:$16 sps:$4 sm:$0xff]  }
  0xa2   : > { %2358 = vmatprep.mubr.bf16.mxu0 %v15571_v58  ;;  %2444 = vmatprep.mubr.bf16.mxu1 %v15571_v58 }
  0xa4   : > { %2329 = vmatpush1.bf16.msra.mxu0 %v14113_v28  ;;  %2415 = vmatpush1.bf16.msra.mxu1 %v14116_v29  ;;  %v14203_v28 = vld [vmem:[%s15486_s17 + $0x600] ss:$16 sps:$4 sm:$0xff]   ;;  %v14206_v29 = vld [vmem:[%s15486_s17 + $0x608] ss:$16 sps:$4 sm:$0xff]  }
  0xa5   : > { %2330 = vmatprep.subr.bf16.mxu0 %v14121_v30  ;;  %2416 = vmatprep.subr.bf16.mxu1 %v14124_v31  ;;  %v14211_v30 = vld [vmem:[%s15486_s17 + $0x624] ss:$16 sps:$4 sm:$0xff]   ;;  %v14214_v31 = vld [vmem:[%s15486_s17 + $0x62c] ss:$16 sps:$4 sm:$0xff]  }
  0xa8   : > { %2331 = vmatpush1.bf16.msra.mxu0 %v14119_v32  ;;  %2417 = vmatpush1.bf16.msra.mxu1 %v14122_v33  ;;  %v14209_v32 = vld [vmem:[%s15486_s17 + $0x620] ss:$16 sps:$4 sm:$0xff]   ;;  %v14212_v33 = vld [vmem:[%s15486_s17 + $0x628] ss:$16 sps:$4 sm:$0xff]  }
  0xa9   : > { %2332 = vmatprep.subr.bf16.mxu0 %v14127_v34  ;;  %2418 = vmatprep.subr.bf16.mxu1 %v14130_v35  ;;  %v14217_v34 = vld [vmem:[%s15486_s17 + $0x644] ss:$16 sps:$4 sm:$0xff]   ;;  %v14220_v35 = vld [vmem:[%s15486_s17 + $0x64c] ss:$16 sps:$4 sm:$0xff]  }
  0xac   : > { %2333 = vmatpush1.bf16.msra.mxu0 %v14125_v36  ;;  %2419 = vmatpush1.bf16.msra.mxu1 %v14128_v37  ;;  %v14215_v36 = vld [vmem:[%s15486_s17 + $0x640] ss:$16 sps:$4 sm:$0xff]   ;;  %v14218_v37 = vld [vmem:[%s15486_s17 + $0x648] ss:$16 sps:$4 sm:$0xff]  }
  0xad   : > { %2334 = vmatprep.subr.bf16.mxu0 %v14133_v38  ;;  %2420 = vmatprep.subr.bf16.mxu1 %v14136_v39  ;;  %v14223_v38 = vld [vmem:[%s15486_s17 + $0x664] ss:$16 sps:$4 sm:$0xff]   ;;  %v14226_v39 = vld [vmem:[%s15486_s17 + $0x66c] ss:$16 sps:$4 sm:$0xff]  }
  0xb0   : > { %2335 = vmatpush1.bf16.msra.mxu0 %v14131_v40  ;;  %2421 = vmatpush1.bf16.msra.mxu1 %v14134_v41  ;;  %v14221_v40 = vld [vmem:[%s15486_s17 + $0x660] ss:$16 sps:$4 sm:$0xff]   ;;  %v14224_v41 = vld [vmem:[%s15486_s17 + $0x668] ss:$16 sps:$4 sm:$0xff]  }
  0xb1   : > { %2336 = vmatprep.subr.bf16.mxu0 %v14139_v42  ;;  %2422 = vmatprep.subr.bf16.mxu1 %v14142_v43  ;;  %v14229_v42 = vld [vmem:[%s15486_s17 + $0x684] ss:$16 sps:$4 sm:$0xff]   ;;  %v14232_v43 = vld [vmem:[%s15486_s17 + $0x68c] ss:$16 sps:$4 sm:$0xff]  }
  0xb4   : > { %2337 = vmatpush1.bf16.msra.mxu0 %v14137_v44  ;;  %2423 = vmatpush1.bf16.msra.mxu1 %v14140_v46  ;;  %v14227_v44 = vld [vmem:[%s15486_s17 + $0x680] ss:$16 sps:$4 sm:$0xff]   ;;  %v14230_v46 = vld [vmem:[%s15486_s17 + $0x688] ss:$16 sps:$4 sm:$0xff]  }
  0xb5   : > { %2338 = vmatprep.subr.bf16.mxu0 %v14145_v47  ;;  %2424 = vmatprep.subr.bf16.mxu1 %v14148_v48  ;;  %v14235_v47 = vld [vmem:[%s15486_s17 + $0x6a4] ss:$16 sps:$4 sm:$0xff]   ;;  %v14238_v48 = vld [vmem:[%s15486_s17 + $0x6ac] ss:$16 sps:$4 sm:$0xff]  }
  0xb8   : > { %2339 = vmatpush1.bf16.msra.mxu0 %v14143_v49  ;;  %2425 = vmatpush1.bf16.msra.mxu1 %v14146_v50  ;;  %v14233_v49 = vld [vmem:[%s15486_s17 + $0x6a0] ss:$16 sps:$4 sm:$0xff]   ;;  %v14236_v50 = vld [vmem:[%s15486_s17 + $0x6a8] ss:$16 sps:$4 sm:$0xff]  }
  0xb9   : > { %2340 = vmatprep.subr.bf16.mxu0 %v14151_v51  ;;  %2426 = vmatprep.subr.bf16.mxu1 %v14154_v52  ;;  %v14241_v51 = vld [vmem:[%s15486_s17 + $0x6c4] ss:$16 sps:$4 sm:$0xff]   ;;  %v14244_v52 = vld [vmem:[%s15486_s17 + $0x6cc] ss:$16 sps:$4 sm:$0xff]  }
  0xbc   : > { %2341 = vmatpush1.bf16.msra.mxu0 %v14149_v53  ;;  %2427 = vmatpush1.bf16.msra.mxu1 %v14152_v54  ;;  %v14239_v53 = vld [vmem:[%s15486_s17 + $0x6c0] ss:$16 sps:$4 sm:$0xff]   ;;  %v14242_v54 = vld [vmem:[%s15486_s17 + $0x6c8] ss:$16 sps:$4 sm:$0xff]  }
  0xbd   : > { %2342 = vmatprep.subr.bf16.mxu0 %v14157_v55  ;;  %2428 = vmatprep.subr.bf16.mxu1 %v14160_v56  ;;  %v14247_v55 = vld [vmem:[%s15486_s17 + $0x6e4] ss:$16 sps:$4 sm:$0xff]   ;;  %v14250_v56 = vld [vmem:[%s15486_s17 + $0x6ec] ss:$16 sps:$4 sm:$0xff]  }
  0xc0   : > { %2343 = vmatpush1.bf16.msra.mxu0 %v14155_v57  ;;  %2429 = vmatpush1.bf16.msra.mxu1 %v14158_v59  ;;  %v14245_v57 = vld [vmem:[%s15486_s17 + $0x6e0] ss:$16 sps:$4 sm:$0xff]   ;;  %v14248_v59 = vld [vmem:[%s15486_s17 + $0x6e8] ss:$16 sps:$4 sm:$0xff]  }
  0xc1   : > { %2344 = vmatprep.subr.bf16.mxu0 %v14163_v60  ;;  %2430 = vmatprep.subr.bf16.mxu1 %v14166_v61  ;;  %v14253_v60 = vld [vmem:[%s15486_s17 + $0x704] ss:$16 sps:$4 sm:$0xff]   ;;  %v14256_v61 = vld [vmem:[%s15486_s17 + $0x70c] ss:$16 sps:$4 sm:$0xff]  }
  0xc4   : > { %2345 = vmatpush1.bf16.msra.mxu0 %v14161_v62  ;;  %2431 = vmatpush1.bf16.msra.mxu1 %v14164_v63  ;;  %v14251_v62 = vld [vmem:[%s15486_s17 + $0x700] ss:$16 sps:$4 sm:$0xff]   ;;  %v14254_v63 = vld [vmem:[%s15486_s17 + $0x708] ss:$16 sps:$4 sm:$0xff]  }
  0xc5   : > { %2346 = vmatprep.subr.bf16.mxu0 %v14169_v0  ;;  %2432 = vmatprep.subr.bf16.mxu1 %v14172_v1  ;;  %v14259_v0 = vld [vmem:[%s15486_s17 + $0x724] ss:$16 sps:$4 sm:$0xff]   ;;  %v14262_v1 = vld [vmem:[%s15486_s17 + $0x72c] ss:$16 sps:$4 sm:$0xff]  }
  0xc8   : > { %2347 = vmatpush1.bf16.msra.mxu0 %v14167_v2  ;;  %2433 = vmatpush1.bf16.msra.mxu1 %v14170_v3  ;;  %v14257_v2 = vld [vmem:[%s15486_s17 + $0x720] ss:$16 sps:$4 sm:$0xff]   ;;  %v14260_v3 = vld [vmem:[%s15486_s17 + $0x728] ss:$16 sps:$4 sm:$0xff]  }
  0xc9   : > { %2348 = vmatprep.subr.bf16.mxu0 %v14175_v4  ;;  %2434 = vmatprep.subr.bf16.mxu1 %v14178_v5  ;;  %v14265_v4 = vld [vmem:[%s15486_s17 + $0x744] ss:$16 sps:$4 sm:$0xff]   ;;  %v14268_v5 = vld [vmem:[%s15486_s17 + $0x74c] ss:$16 sps:$4 sm:$0xff]  }
  0xcc   : > { %2349 = vmatpush1.bf16.msra.mxu0 %v14173_v6  ;;  %2435 = vmatpush1.bf16.msra.mxu1 %v14176_v7  ;;  %v14263_v6 = vld [vmem:[%s15486_s17 + $0x740] ss:$16 sps:$4 sm:$0xff]   ;;  %v14266_v7 = vld [vmem:[%s15486_s17 + $0x748] ss:$16 sps:$4 sm:$0xff]  }
  0xcd   : > { %2350 = vmatprep.subr.bf16.mxu0 %v14181_v8  ;;  %2436 = vmatprep.subr.bf16.mxu1 %v14184_v9  ;;  %v14271_v8 = vld [vmem:[%s15486_s17 + $0x764] ss:$16 sps:$4 sm:$0xff]   ;;  %v14274_v9 = vld [vmem:[%s15486_s17 + $0x76c] ss:$16 sps:$4 sm:$0xff]  }
  0xd0   : > { %2351 = vmatpush1.bf16.msra.mxu0 %v14179_v10  ;;  %2437 = vmatpush1.bf16.msra.mxu1 %v14182_v11  ;;  %v14269_v10 = vld [vmem:[%s15486_s17 + $0x760] ss:$16 sps:$4 sm:$0xff]   ;;  %v14272_v11 = vld [vmem:[%s15486_s17 + $0x768] ss:$16 sps:$4 sm:$0xff]  }
  0xd1   : > { %2352 = vmatprep.subr.bf16.mxu0 %v14187_v12  ;;  %2438 = vmatprep.subr.bf16.mxu1 %v14190_v13  ;;  %v14277_v12 = vld [vmem:[%s15486_s17 + $0x784] ss:$16 sps:$4 sm:$0xff]   ;;  %v14280_v13 = vld [vmem:[%s15486_s17 + $0x78c] ss:$16 sps:$4 sm:$0xff]  }
  0xd4   : > { %2353 = vmatpush1.bf16.msra.mxu0 %v14185_v14  ;;  %2439 = vmatpush1.bf16.msra.mxu1 %v14188_v15  ;;  %v14275_v14 = vld [vmem:[%s15486_s17 + $0x780] ss:$16 sps:$4 sm:$0xff]   ;;  %v14278_v15 = vld [vmem:[%s15486_s17 + $0x788] ss:$16 sps:$4 sm:$0xff]  }
  0xd5   : > { %2354 = vmatprep.subr.bf16.mxu0 %v14193_v16  ;;  %2440 = vmatprep.subr.bf16.mxu1 %v14196_v18  ;;  %v14283_v16 = vld [vmem:[%s15486_s17 + $0x7a4] ss:$16 sps:$4 sm:$0xff]   ;;  %v14286_v18 = vld [vmem:[%s15486_s17 + $0x7ac] ss:$16 sps:$4 sm:$0xff]  }
  0xd8   : > { %2355 = vmatpush1.bf16.msra.mxu0 %v14191_v19  ;;  %2441 = vmatpush1.bf16.msra.mxu1 %v14194_v20  ;;  %v14281_v19 = vld [vmem:[%s15486_s17 + $0x7a0] ss:$16 sps:$4 sm:$0xff]   ;;  %v14284_v20 = vld [vmem:[%s15486_s17 + $0x7a8] ss:$16 sps:$4 sm:$0xff]  }
  0xd9   : > { %2356 = vmatprep.subr.bf16.mxu0 %v14199_v21  ;;  %2442 = vmatprep.subr.bf16.mxu1 %v14202_v22  ;;  %v14289_v21 = vld [vmem:[%s15486_s17 + $0x7c4] ss:$16 sps:$4 sm:$0xff]   ;;  %v14292_v22 = vld [vmem:[%s15486_s17 + $0x7cc] ss:$16 sps:$4 sm:$0xff]  }
  0xdc   : > { %2357 = vmatpush1.bf16.msra.mxu0 %v14197_v24  ;;  %2443 = vmatpush1.bf16.msra.mxu1 %v14200_v25  ;;  %v14287_v24 = vld [vmem:[%s15486_s17 + $0x7c0] ss:$16 sps:$4 sm:$0xff]   ;;  %v14290_v25 = vld [vmem:[%s15486_s17 + $0x7c8] ss:$16 sps:$4 sm:$0xff]  }
  0xdd   : > { %2369 = vmatprep.subr.bf16.mxu0 %v14205_v26  ;;  %2455 = vmatprep.subr.bf16.mxu1 %v14208_v27  ;;  %v14295_v26 = vld [vmem:[%s15486_s17 + $0x7e4] ss:$16 sps:$4 sm:$0xff]   ;;  %v14298_v27 = vld [vmem:[%s15486_s17 + $0x7ec] ss:$16 sps:$4 sm:$0xff]  }
  0xdf   : > { %2359 = vmatmul.mubr.bf16.vlgmr.msra.gmra.mrb[4].mxu0 %v15595_v17  ;;  %2445 = vmatmul.mubr.bf16.vlgmr.msra.gmra.mrb[4].mxu1 %v15595_v17 }
  0xe0   : > { %2370 = vmatpush1.bf16.msra.mxu0 %v14203_v28  ;;  %2456 = vmatpush1.bf16.msra.mxu1 %v14206_v29  ;;  %v14293_v28 = vld [vmem:[%s15486_s17 + $0x7e0] ss:$16 sps:$4 sm:$0xff]   ;;  %v14296_v29 = vld [vmem:[%s15486_s17 + $0x7e8] ss:$16 sps:$4 sm:$0xff]  }
  0xe1   : > { %2371 = vmatprep.subr.bf16.mxu0 %v14211_v30  ;;  %2457 = vmatprep.subr.bf16.mxu1 %v14214_v31  ;;  %v14301_v30 = vld [vmem:[%s15486_s17 + $0x804] ss:$16 sps:$4 sm:$0xff]   ;;  %v14304_v31 = vld [vmem:[%s15486_s17 + $0x80c] ss:$16 sps:$4 sm:$0xff]  }
  0xe2   : > { %2401 = vmatprep.mubr.bf16.mxu0 %v15624_v45  ;;  %2487 = vmatprep.mubr.bf16.mxu1 %v15624_v45 }
  0xe4   : > { %2372 = vmatpush1.bf16.msra.mxu0 %v14209_v32  ;;  %2458 = vmatpush1.bf16.msra.mxu1 %v14212_v33  ;;  %v14299_v32 = vld [vmem:[%s15486_s17 + $0x800] ss:$16 sps:$4 sm:$0xff]   ;;  %v14302_v33 = vld [vmem:[%s15486_s17 + $0x808] ss:$16 sps:$4 sm:$0xff]  }
  0xe5   : > { %2373 = vmatprep.subr.bf16.mxu0 %v14217_v34  ;;  %2459 = vmatprep.subr.bf16.mxu1 %v14220_v35  ;;  %v14307_v34 = vld [vmem:[%s15486_s17 + $0x824] ss:$16 sps:$4 sm:$0xff]   ;;  %v14310_v35 = vld [vmem:[%s15486_s17 + $0x82c] ss:$16 sps:$4 sm:$0xff]  }
  0xe8   : > { %2374 = vmatpush1.bf16.msra.mxu0 %v14215_v36  ;;  %2460 = vmatpush1.bf16.msra.mxu1 %v14218_v37  ;;  %v14305_v36 = vld [vmem:[%s15486_s17 + $0x820] ss:$16 sps:$4 sm:$0xff]   ;;  %v14308_v37 = vld [vmem:[%s15486_s17 + $0x828] ss:$16 sps:$4 sm:$0xff]  }
  0xe9   : > { %2375 = vmatprep.subr.bf16.mxu0 %v14223_v38  ;;  %2461 = vmatprep.subr.bf16.mxu1 %v14226_v39  ;;  %v14313_v38 = vld [vmem:[%s15486_s17 + $0x844] ss:$16 sps:$4 sm:$0xff]   ;;  %v14316_v39 = vld [vmem:[%s15486_s17 + $0x84c] ss:$16 sps:$4 sm:$0xff]  }
  0xec   : > { %2376 = vmatpush1.bf16.msra.mxu0 %v14221_v40  ;;  %2462 = vmatpush1.bf16.msra.mxu1 %v14224_v41  ;;  %v15816_v40 = vld [vmem:[%s18952_s2] sm:$0xff] }
  0xed   : > { %2377 = vmatprep.subr.bf16.mxu0 %v14229_v42  ;;  %2463 = vmatprep.subr.bf16.mxu1 %v14232_v43  ;;  %v15821_v41 = vld [vmem:[%s18954_s4] sm:$0xff]  ;;  %v15827_v43 = vld [vmem:[%s18954_s4 + $0x8] sm:$0xff] }
  0xee   : > { %v3441_v42 = vmul.u32 16, %v15821_v41  ;;  %v14355_v41 = vld [vmem:[%s15486_s17 + $0x924] ss:$16 sps:$4 sm:$0xff]  }
  0xf0   : > { %2378 = vmatpush1.bf16.msra.mxu0 %v14227_v44  ;;  %2464 = vmatpush1.bf16.msra.mxu1 %v14230_v46  ;;  %v606_v44 = vld [vmem:[%s18952_s2 + $0x10] sm:$0xff] }
  0xf1   : > { %2379 = vmatprep.subr.bf16.mxu0 %v14235_v47  ;;  %2465 = vmatprep.subr.bf16.mxu1 %v14238_v48  ;;  %v15835_v46 = vld [vmem:[%s18954_s4 + $0x10] sm:$0xff]  ;;  %v14314_v48 = vld [vmem:[%s15486_s17 + $0x848] ss:$16 sps:$4 sm:$0xff]  }
  0xf2   : > { %v14311_v47 = vld [vmem:[%s15486_s17 + $0x840] ss:$16 sps:$4 sm:$0xff]  }
  0xf4   : > { %2380 = vmatpush1.bf16.msra.mxu0 %v14233_v49  ;;  %2466 = vmatpush1.bf16.msra.mxu1 %v14236_v50  ;;  %v15844_v49 = vld [vmem:[%s18952_s2 + $0x8] sm:$0xff]  ;;  %v3442_v50 = vmul.u32 16, %v15827_v43  ;;  %v14353_v43 = vld [vmem:[%s15486_s17 + $0x920] ss:$16 sps:$4 sm:$0xff]  }
  0xf5   : > { %2381 = vmatprep.subr.bf16.mxu0 %v14241_v51  ;;  %2467 = vmatprep.subr.bf16.mxu1 %v14244_v52  ;;  %v3443_v51 = vmul.u32 16, %v15835_v46  ;;  %v18972_v52 = vmov 0   ;;  %v14361_v46 = vld [vmem:[%s15486_s17 + $0x944] ss:$16 sps:$4 sm:$0xff]  }
  0xf6   : > { %13870 = vset.pattern.permute.xlu0 %v18972_v52  ;;  %13871 = vset.pattern.permute.xlu1 %v18972_v52 }
  0xf8   : > { %2382 = vmatpush1.bf16.msra.mxu0 %v14239_v53  ;;  %2468 = vmatpush1.bf16.msra.mxu1 %v14242_v54  ;;  %v3447_v53 = vadd.s32 %v3441_v42, %v15816_v40  ;;  %v15859_v54 = vld [vmem:[%s18952_s2 + $0x18] sm:$0xff] }
  0xf9   : > { %2383 = vmatprep.subr.bf16.mxu0 %v14247_v55  ;;  %2469 = vmatprep.subr.bf16.mxu1 %v14250_v56  ;;  %v613_v55 = vld [vmem:[%s18954_s4 + $0x18] sm:$0xff]  ;;  %v14319_v56 = vld [vmem:[%s15486_s17 + $0x864] ss:$16 sps:$4 sm:$0xff]  }
  0xfa   : > { %3454 = vperm.xlu0 %13870, %v3447_v53   ;;  %v14370_v53 = vld [vmem:[%s15486_s17 + $0x96c] ss:$16 sps:$4 sm:$0xff]  }
  0xfc   : > { %2384 = vmatpush1.bf16.msra.mxu0 %v14245_v57  ;;  %2470 = vmatpush1.bf16.msra.mxu1 %v14248_v59  ;;  %v14322_v57 = vld [vmem:[%s15486_s17 + $0x86c] ss:$16 sps:$4 sm:$0xff]   ;;  %v3449_v59 = vadd.s32 %v3443_v51, %v606_v44  ;;  %v14356_v44 = vld [vmem:[%s15486_s17 + $0x928] ss:$16 sps:$4 sm:$0xff]  }
  0xfd   : > { %2385 = vmatprep.subr.bf16.mxu0 %v14253_v60  ;;  %2471 = vmatprep.subr.bf16.mxu1 %v14256_v61  ;;  %v3444_v60 = vmul.u32 16, %v613_v55  ;;  %v15871_v61 = vld [vmem:[%s18954_s4 + $0x28] sm:$0xff]  ;;  %v14373_v55 = vld [vmem:[%s15486_s17 + $0x984] ss:$16 sps:$4 sm:$0xff]  }
  0xfe   : > { %3460 = vperm.xlu1 %13871, %v3449_v59   ;;  %v14374_v59 = vld [vmem:[%s15486_s17 + $0x988] ss:$16 sps:$4 sm:$0xff]  }
 0x100   : > { %2386 = vmatpush1.bf16.msra.mxu0 %v14251_v62  ;;  %2472 = vmatpush1.bf16.msra.mxu1 %v14254_v63  ;;  %v15876_v62 = vld [vmem:[%s18952_s2 + $0x20] sm:$0xff]  ;;  %v15881_v63 = vld [vmem:[%s18952_s2 + $0x28] sm:$0xff] }
 0x101   : > { %2387 = vmatprep.subr.bf16.mxu0 %v14259_v0  ;;  %2473 = vmatprep.subr.bf16.mxu1 %v14262_v1  ;;  %v14317_v0 = vld [vmem:[%s15486_s17 + $0x860] ss:$16 sps:$4 sm:$0xff]   ;;  %v14320_v1 = vld [vmem:[%s15486_s17 + $0x868] ss:$16 sps:$4 sm:$0xff]  }
 0x104   : > { %2388 = vmatpush1.bf16.msra.mxu0 %v14257_v2  ;;  %2474 = vmatpush1.bf16.msra.mxu1 %v14260_v3  ;;  %v3448_v2 = vadd.s32 %v3442_v50, %v15844_v49 }
 0x105   : > { %2389 = vmatprep.subr.bf16.mxu0 %v14265_v4  ;;  %2475 = vmatprep.subr.bf16.mxu1 %v14268_v5  ;;  %v3450_v4 = vadd.s32 %v3444_v60, %v15859_v54  ;;  %v3446_v5 = vmul.u32 16, %v15871_v61  ;;  %v14440_v61 = vld [vmem:[%s15486_s17 + $0xae8] ss:$16 sps:$4 sm:$0xff]  }
 0x106   : > { %3457 = vperm.xlu0 %13870, %v3448_v2   ;;  %v14388_v2 = vld [vmem:[%s15486_s17 + $0x9cc] ss:$16 sps:$4 sm:$0xff]  }
 0x107   : > { %3463 = vperm.xlu1 %13871, %v3450_v4   ;;  %v14386_v4 = vld [vmem:[%s15486_s17 + $0x9c8] ss:$16 sps:$4 sm:$0xff]  }
 0x108   : > { %2390 = vmatpush1.bf16.msra.mxu0 %v14263_v6  ;;  %2476 = vmatpush1.bf16.msra.mxu1 %v14266_v7  ;;  %v14325_v6 = vld [vmem:[%s15486_s17 + $0x884] ss:$16 sps:$4 sm:$0xff]   ;;  %v14328_v7 = vld [vmem:[%s15486_s17 + $0x88c] ss:$16 sps:$4 sm:$0xff]  }
 0x109   : > { %2391 = vmatprep.subr.bf16.mxu0 %v14271_v8  ;;  %2477 = vmatprep.subr.bf16.mxu1 %v14274_v9  ;;  %v598_v8 = vld [vmem:[%s18951_s1] sm:$0xff]  ;;  %v599_v9 = vld [vmem:[%s18951_s1 + $0x8] sm:$0xff] }
 0x10c   : > { %2392 = vmatpush1.bf16.msra.mxu0 %v14269_v10  ;;  %2478 = vmatpush1.bf16.msra.mxu1 %v14272_v11  ;;  %v14323_v10 = vld [vmem:[%s15486_s17 + $0x880] ss:$16 sps:$4 sm:$0xff]   ;;  %v14326_v11 = vld [vmem:[%s15486_s17 + $0x888] ss:$16 sps:$4 sm:$0xff]  }
 0x10d   : > { %2393 = vmatprep.subr.bf16.mxu0 %v14277_v12  ;;  %2479 = vmatprep.subr.bf16.mxu1 %v14280_v13  ;;  %v3452_v13 = vadd.s32 %v3446_v5, %v15881_v63 }
 0x10f   : > { %3469 = vperm.xlu1 %13871, %v3452_v13   ;;  %v14398_v13 = vld [vmem:[%s15486_s17 + $0xa08] ss:$16 sps:$4 sm:$0xff]  }
 0x110   : > { %2394 = vmatpush1.bf16.msra.mxu0 %v14275_v14  ;;  %2480 = vmatpush1.bf16.msra.mxu1 %v14278_v15  ;;  %v14331_v14 = vld [vmem:[%s15486_s17 + $0x8a4] ss:$16 sps:$4 sm:$0xff]   ;;  %v14334_v15 = vld [vmem:[%s15486_s17 + $0x8ac] ss:$16 sps:$4 sm:$0xff]  }
 0x111   : > { %2395 = vmatprep.subr.bf16.mxu0 %v14283_v16  ;;  %2481 = vmatprep.subr.bf16.mxu1 %v14286_v18  ;;  %v600_v16 = vld [vmem:[%s18951_s1 + $0x10] sm:$0xff]  ;;  %v601_v18 = vld [vmem:[%s18951_s1 + $0x18] sm:$0xff] }
 0x114   : > { %2396 = vmatpush1.bf16.msra.mxu0 %v14281_v19  ;;  %2482 = vmatpush1.bf16.msra.mxu1 %v14284_v20  ;;  %v14329_v19 = vld [vmem:[%s15486_s17 + $0x8a0] ss:$16 sps:$4 sm:$0xff]   ;;  %v14332_v20 = vld [vmem:[%s15486_s17 + $0x8a8] ss:$16 sps:$4 sm:$0xff]  }
 0x115   : > { %2397 = vmatprep.subr.bf16.mxu0 %v14289_v21  ;;  %2483 = vmatprep.subr.bf16.mxu1 %v14292_v22  ;;  %v3489_v21 = vadd.s32 %v3441_v42, %v598_v8  ;;  %v3490_v22 = vadd.s32 %v3442_v50, %v599_v9  ;;  %v14358_v42 = vld [vmem:[%s15486_s17 + $0x92c] ss:$16 sps:$4 sm:$0xff]   ;;  %v14362_v50 = vld [vmem:[%s15486_s17 + $0x948] ss:$16 sps:$4 sm:$0xff]   ;;  %v14389_v8 = vld [vmem:[%s15486_s17 + $0x9e0] ss:$16 sps:$4 sm:$0xff]  }
 0x116   : > { %v14392_v9 = vld [vmem:[%s15486_s17 + $0x9e8] ss:$16 sps:$4 sm:$0xff]  }
 0x117   : > { %3499 = vperm.xlu1 %13871, %v3490_v22   ;;  %v14410_v22 = vld [vmem:[%s15486_s17 + $0xa48] ss:$16 sps:$4 sm:$0xff]  }
 0x118   : > { %2398 = vmatpush1.bf16.msra.mxu0 %v14287_v24  ;;  %2484 = vmatpush1.bf16.msra.mxu1 %v14290_v25  ;;  %v14337_v24 = vld [vmem:[%s15486_s17 + $0x8c4] ss:$16 sps:$4 sm:$0xff]   ;;  %v14340_v25 = vld [vmem:[%s15486_s17 + $0x8cc] ss:$16 sps:$4 sm:$0xff]  }
 0x119   : > { %2399 = vmatprep.subr.bf16.mxu0 %v14295_v26  ;;  %2485 = vmatprep.subr.bf16.mxu1 %v14298_v27  ;;  %v602_v26 = vld [vmem:[%s18951_s1 + $0x20] sm:$0xff] }
 0x11a   : > { %v14335_v27 = vld [vmem:[%s15486_s17 + $0x8c0] ss:$16 sps:$4 sm:$0xff]  }
 0x11c   : > { %2400 = vmatpush1.bf16.msra.mxu0 %v14293_v28  ;;  %2486 = vmatpush1.bf16.msra.mxu1 %v14296_v29  ;;  %v14338_v28 = vld [vmem:[%s15486_s17 + $0x8c8] ss:$16 sps:$4 sm:$0xff]   ;;  %v3491_v29 = vadd.s32 %v3443_v51, %v600_v16  ;;  %v14367_v51 = vld [vmem:[%s15486_s17 + $0x964] ss:$16 sps:$4 sm:$0xff]   ;;  %v14401_v16 = vld [vmem:[%s15486_s17 + $0xa20] ss:$16 sps:$4 sm:$0xff]  }
 0x11d   : > { %3267 = vmatprep.subr.bf16.mxu0 %v14301_v30  ;;  %3353 = vmatprep.subr.bf16.mxu1 %v14304_v31  ;;  %v3492_v30 = vadd.s32 %v3444_v60, %v601_v18  ;;  %v14343_v31 = vld [vmem:[%s15486_s17 + $0x8e4] ss:$16 sps:$4 sm:$0xff]   ;;  %v14404_v18 = vld [vmem:[%s15486_s17 + $0xa28] ss:$16 sps:$4 sm:$0xff]  }
 0x11e   : > { %v14379_v60 = vld [vmem:[%s15486_s17 + $0x9a4] ss:$16 sps:$4 sm:$0xff]  }
 0x11f   : > { %2402 = vmatmul.mubr.bf16.vlgmr.msra.gmra.mrb[4].mxu0 %v15665_v23  ;;  %2488 = vmatmul.mubr.bf16.vlgmr.msra.gmra.mrb[4].mxu1 %v15665_v23 }
 0x120   : > { %3268 = vmatpush1.bf16.msra.mxu0 %v14299_v32  ;;  %3354 = vmatpush1.bf16.msra.mxu1 %v14302_v33  ;;  %v14346_v32 = vld [vmem:[%s15486_s17 + $0x8ec] ss:$16 sps:$4 sm:$0xff]   ;;  %v14341_v33 = vld [vmem:[%s15486_s17 + $0x8e0] ss:$16 sps:$4 sm:$0xff]  }
 0x121   : > { %3269 = vmatprep.subr.bf16.mxu0 %v14307_v34  ;;  %3355 = vmatprep.subr.bf16.mxu1 %v14310_v35  ;;  %v14344_v34 = vld [vmem:[%s15486_s17 + $0x8e8] ss:$16 sps:$4 sm:$0xff]  }
 0x122   : > { %3299 = vmatprep.mubr.bf16.mxu0 %v15571_v58  ;;  %3385 = vmatprep.mubr.bf16.mxu1 %v15571_v58  ;;  %v15854_v58 = vld [vmem:[%s18954_s4 + $0x20] sm:$0xff] }
 0x123   : > { %v3445_v3 = vmul.u32 16, %v15854_v58  ;;  %3505 = vperm.xlu1 %13871, %v3492_v30   ;;  %v14368_v58 = vld [vmem:[%s15486_s17 + $0x968] ss:$16 sps:$4 sm:$0xff]   ;;  %v14427_v30 = vld [vmem:[%s15486_s17 + $0xaa4] ss:$16 sps:$4 sm:$0xff]  }
 0x124   : > { %3270 = vmatpush1.bf16.msra.mxu0 %v14305_v36  ;;  %3356 = vmatpush1.bf16.msra.mxu1 %v14308_v37  ;;  %v14349_v36 = vld [vmem:[%s15486_s17 + $0x904] ss:$16 sps:$4 sm:$0xff]   ;;  %v14352_v37 = vld [vmem:[%s15486_s17 + $0x90c] ss:$16 sps:$4 sm:$0xff]  }
 0x125   : > { %3271 = vmatprep.subr.bf16.mxu0 %v14313_v38  ;;  %3357 = vmatprep.subr.bf16.mxu1 %v14316_v39  ;;  %v3451_v12 = vadd.s32 %v3445_v3, %v15876_v62  ;;  %v3493_v35 = vadd.s32 %v3445_v3, %v602_v26  ;;  %v14347_v38 = vld [vmem:[%s15486_s17 + $0x900] ss:$16 sps:$4 sm:$0xff]   ;;  %v14350_v39 = vld [vmem:[%s15486_s17 + $0x908] ss:$16 sps:$4 sm:$0xff]  }
 0x126   : > { %v14383_v3 = vld [vmem:[%s15486_s17 + $0x9c0] ss:$16 sps:$4 sm:$0xff]   ;;  %v14416_v26 = vld [vmem:[%s15486_s17 + $0xa68] ss:$16 sps:$4 sm:$0xff]  }
 0x127   : > { %3466 = vperm.xlu0 %13870, %v3451_v12   ;;  %v14395_v12 = vld [vmem:[%s15486_s17 + $0xa00] ss:$16 sps:$4 sm:$0xff]  }
 0x128   : > { %3272 = vmatpush1.bf16.msra.mxu0 %v14311_v47  ;;  %3358 = vmatpush1.bf16.msra.mxu1 %v14314_v48  ;;  %v14364_v47 = vld [vmem:[%s15486_s17 + $0x94c] ss:$16 sps:$4 sm:$0xff]   ;;  %v14359_v48 = vld [vmem:[%s15486_s17 + $0x940] ss:$16 sps:$4 sm:$0xff]  }
 0x129   : > { %3273 = vmatprep.subr.bf16.mxu0 %v14319_v56  ;;  %3359 = vmatprep.subr.bf16.mxu1 %v14322_v57  ;;  %v14376_v56 = vld [vmem:[%s15486_s17 + $0x98c] ss:$16 sps:$4 sm:$0xff]   ;;  %v14371_v57 = vld [vmem:[%s15486_s17 + $0x980] ss:$16 sps:$4 sm:$0xff]  }
 0x12b   : > { %3496 = vperm.xlu0 %13870, %v3489_v21   ;;  %v14407_v21 = vld [vmem:[%s15486_s17 + $0xa40] ss:$16 sps:$4 sm:$0xff]  }
 0x12c   : > { %3274 = vmatpush1.bf16.msra.mxu0 %v14317_v0  ;;  %3360 = vmatpush1.bf16.msra.mxu1 %v14320_v1  ;;  %v14380_v0 = vld [vmem:[%s15486_s17 + $0x9a8] ss:$16 sps:$4 sm:$0xff]   ;;  %v14385_v1 = vld [vmem:[%s15486_s17 + $0x9c4] ss:$16 sps:$4 sm:$0xff]  }
 0x12d   : > { %3275 = vmatprep.subr.bf16.mxu0 %v14325_v6  ;;  %3361 = vmatprep.subr.bf16.mxu1 %v14328_v7  ;;  %v14391_v6 = vld [vmem:[%s15486_s17 + $0x9e4] ss:$16 sps:$4 sm:$0xff]   ;;  %v14394_v7 = vld [vmem:[%s15486_s17 + $0x9ec] ss:$16 sps:$4 sm:$0xff]  }
 0x12f   : > { %3502 = vperm.xlu0 %13870, %v3491_v29   ;;  %v14422_v29 = vld [vmem:[%s15486_s17 + $0xa88] ss:$16 sps:$4 sm:$0xff]  }
 0x130   : > { %3276 = vmatpush1.bf16.msra.mxu0 %v14323_v10  ;;  %3362 = vmatpush1.bf16.msra.mxu1 %v14326_v11  ;;  %v14397_v10 = vld [vmem:[%s15486_s17 + $0xa04] ss:$16 sps:$4 sm:$0xff]   ;;  %v14400_v11 = vld [vmem:[%s15486_s17 + $0xa0c] ss:$16 sps:$4 sm:$0xff]  }
 0x131   : > { %3277 = vmatprep.subr.bf16.mxu0 %v14331_v14  ;;  %3363 = vmatprep.subr.bf16.mxu1 %v14334_v15  ;;  %v14403_v14 = vld [vmem:[%s15486_s17 + $0xa24] ss:$16 sps:$4 sm:$0xff]   ;;  %v14406_v15 = vld [vmem:[%s15486_s17 + $0xa2c] ss:$16 sps:$4 sm:$0xff]  }
 0x133   : > { %3508 = vperm.xlu0 %13870, %v3493_v35   ;;  %v14436_v35 = vld [vmem:[%s15486_s17 + $0xacc] ss:$16 sps:$4 sm:$0xff]  }
 0x134   : > { %3278 = vmatpush1.bf16.msra.mxu0 %v14329_v19  ;;  %3364 = vmatpush1.bf16.msra.mxu1 %v14332_v20  ;;  %v14409_v19 = vld [vmem:[%s15486_s17 + $0xa44] ss:$16 sps:$4 sm:$0xff]   ;;  %v14412_v20 = vld [vmem:[%s15486_s17 + $0xa4c] ss:$16 sps:$4 sm:$0xff]  }
 0x135   : > { %3279 = vmatprep.subr.bf16.mxu0 %v14337_v24  ;;  %3365 = vmatprep.subr.bf16.mxu1 %v14340_v25  ;;  %v14415_v24 = vld [vmem:[%s15486_s17 + $0xa64] ss:$16 sps:$4 sm:$0xff]   ;;  %v14413_v25 = vld [vmem:[%s15486_s17 + $0xa60] ss:$16 sps:$4 sm:$0xff]  }
 0x137   : > { %6781 = vperm.xlu0 %13870, %v15816_v40   ;;  %v14365_v40 = vld [vmem:[%s15486_s17 + $0x960] ss:$16 sps:$4 sm:$0xff]  }
 0x138   : > { %3280 = vmatpush1.bf16.msra.mxu0 %v14335_v27  ;;  %3366 = vmatpush1.bf16.msra.mxu1 %v14338_v28  ;;  %v14421_v27 = vld [vmem:[%s15486_s17 + $0xa84] ss:$16 sps:$4 sm:$0xff]   ;;  %v14424_v28 = vld [vmem:[%s15486_s17 + $0xa8c] ss:$16 sps:$4 sm:$0xff]  }
 0x139   : > { %3281 = vmatprep.subr.bf16.mxu0 %v14343_v31  ;;  %3367 = vmatprep.subr.bf16.mxu1 %v14346_v32  ;;  %v14430_v31 = vld [vmem:[%s15486_s17 + $0xaac] ss:$16 sps:$4 sm:$0xff]   ;;  %v14425_v32 = vld [vmem:[%s15486_s17 + $0xaa0] ss:$16 sps:$4 sm:$0xff]  }
 0x13b   : > { %6793 = vperm.xlu0 %13870, %v15876_v62   ;;  %v14382_v62 = vld [vmem:[%s15486_s17 + $0x9ac] ss:$16 sps:$4 sm:$0xff]  }
 0x13c   : > { %3282 = vmatpush1.bf16.msra.mxu0 %v14341_v33  ;;  %3368 = vmatpush1.bf16.msra.mxu1 %v14344_v34  ;;  %v14428_v33 = vld [vmem:[%s15486_s17 + $0xaa8] ss:$16 sps:$4 sm:$0xff]   ;;  %v14433_v34 = vld [vmem:[%s15486_s17 + $0xac4] ss:$16 sps:$4 sm:$0xff]  }
 0x13d   : > { %3283 = vmatprep.subr.bf16.mxu0 %v14349_v36  ;;  %3369 = vmatprep.subr.bf16.mxu1 %v14352_v37 }
 0x13f   : > { %6790 = vperm.xlu0 %13870, %v15859_v54   ;;  %v14377_v54 = vld [vmem:[%s15486_s17 + $0x9a0] ss:$16 sps:$4 sm:$0xff]  }
 0x140   : > { %3284 = vmatpush1.bf16.msra.mxu0 %v14347_v38  ;;  %3370 = vmatpush1.bf16.msra.mxu1 %v14350_v39  ;;  %v14431_v38 = vld [vmem:[%s15486_s17 + $0xac0] ss:$16 sps:$4 sm:$0xff]   ;;  %v14434_v39 = vld [vmem:[%s15486_s17 + $0xac8] ss:$16 sps:$4 sm:$0xff]  }
 0x141   : > { %3285 = vmatprep.subr.bf16.mxu0 %v14355_v41  ;;  %3371 = vmatprep.subr.bf16.mxu1 %v14358_v42 }
 0x144   : > { %3286 = vmatpush1.bf16.msra.mxu0 %v14353_v43  ;;  %3372 = vmatpush1.bf16.msra.mxu1 %v14356_v44  ;;  %v14439_v43 = vld [vmem:[%s15486_s17 + $0xae4] ss:$16 sps:$4 sm:$0xff]   ;;  %v14442_v44 = vld [vmem:[%s15486_s17 + $0xaec] ss:$16 sps:$4 sm:$0xff]  }
 0x145   : > { %3287 = vmatprep.subr.bf16.mxu0 %v14361_v46  ;;  %3373 = vmatprep.subr.bf16.mxu1 %v14364_v47  ;;  %v603_v46 = vld [vmem:[%s18951_s1 + $0x28] sm:$0xff] }
 0x148   : > { %3288 = vmatpush1.bf16.msra.mxu0 %v14359_v48  ;;  %3374 = vmatpush1.bf16.msra.mxu1 %v14362_v50  ;;  %v3494_v50 = vadd.s32 %v3446_v5, %v603_v46  ;;  %v14445_v5 = vld [vmem:[%s15486_s17 + $0xb04] ss:$16 sps:$4 sm:$0xff]  }
 0x149   : > { %3289 = vmatprep.subr.bf16.mxu0 %v14367_v51  ;;  %3375 = vmatprep.subr.bf16.mxu1 %v14370_v53 }
 0x14a   : > { %3511 = vperm.xlu1 %13871, %v3494_v50  }
 0x14c   : > { %3290 = vmatpush1.bf16.msra.mxu0 %v14365_v40  ;;  %3376 = vmatpush1.bf16.msra.mxu1 %v14368_v58 }
 0x14d   : > { %3291 = vmatprep.subr.bf16.mxu0 %v14373_v55  ;;  %3377 = vmatprep.subr.bf16.mxu1 %v14376_v56 }
 0x14e   : > { %6784 = vperm.xlu1 %13871, %v15844_v49   ;;  %v14455_v49 = vld [vmem:[%s15486_s17 + $0xb40] ss:$16 sps:$4 sm:$0xff]  }
 0x150   : > { %3292 = vmatpush1.bf16.msra.mxu0 %v14371_v57  ;;  %3378 = vmatpush1.bf16.msra.mxu1 %v14374_v59  ;;  %v14437_v57 = vld [vmem:[%s15486_s17 + $0xae0] ss:$16 sps:$4 sm:$0xff]   ;;  %v14448_v59 = vld [vmem:[%s15486_s17 + $0xb0c] ss:$16 sps:$4 sm:$0xff]  }
 0x151   : > { %3293 = vmatprep.subr.bf16.mxu0 %v14379_v60  ;;  %3379 = vmatprep.subr.bf16.mxu1 %v14382_v62  ;;  %v14443_v60 = vld [vmem:[%s15486_s17 + $0xb00] ss:$16 sps:$4 sm:$0xff]   ;;  %v14446_v62 = vld [vmem:[%s15486_s17 + $0xb08] ss:$16 sps:$4 sm:$0xff]  }
 0x152   : > { %6796 = vperm.xlu1 %13871, %v15881_v63   ;;  %v14463_v63 = vld [vmem:[%s15486_s17 + $0xb64] ss:$16 sps:$4 sm:$0xff]  }
 0x154   : > { %3294 = vmatpush1.bf16.msra.mxu0 %v14377_v54  ;;  %3380 = vmatpush1.bf16.msra.mxu1 %v14380_v0  ;;  %v14451_v54 = vld [vmem:[%s15486_s17 + $0xb24] ss:$16 sps:$4 sm:$0xff]   ;;  %v14454_v0 = vld [vmem:[%s15486_s17 + $0xb2c] ss:$16 sps:$4 sm:$0xff]  }
 0x155   : > { %3295 = vmatprep.subr.bf16.mxu0 %v14385_v1  ;;  %3381 = vmatprep.subr.bf16.mxu1 %v14388_v2  ;;  %v14449_v1 = vld [vmem:[%s15486_s17 + $0xb20] ss:$16 sps:$4 sm:$0xff]   ;;  %v14452_v2 = vld [vmem:[%s15486_s17 + $0xb28] ss:$16 sps:$4 sm:$0xff]  }
 0x158   : > { %3296 = vmatpush1.bf16.msra.mxu0 %v14383_v3  ;;  %3382 = vmatpush1.bf16.msra.mxu1 %v14386_v4  ;;  %v14457_v3 = vld [vmem:[%s15486_s17 + $0xb44] ss:$16 sps:$4 sm:$0xff]   ;;  %v14460_v4 = vld [vmem:[%s15486_s17 + $0xb4c] ss:$16 sps:$4 sm:$0xff]  }
 0x159   : > { %3297 = vmatprep.subr.bf16.mxu0 %v14391_v6  ;;  %3383 = vmatprep.subr.bf16.mxu1 %v14394_v7  ;;  %v14458_v6 = vld [vmem:[%s15486_s17 + $0xb48] ss:$16 sps:$4 sm:$0xff]   ;;  %v14926_v7 = vld [vmem:[%s18952_s2 + $0x10] sm:$0xff] }
 0x15a   : > { %6787 = vperm.xlu1 %13871, %v14926_v7   ;;  %v14491_v7 = vld [vmem:[%s15491_s21] ss:$16 sps:$4 sm:$0xff]  }
 0x15c   : > { %3298 = vmatpush1.bf16.msra.mxu0 %v14389_v8  ;;  %3384 = vmatpush1.bf16.msra.mxu1 %v14392_v9  ;;  %v14466_v8 = vld [vmem:[%s15486_s17 + $0xb6c] ss:$16 sps:$4 sm:$0xff]   ;;  %v14461_v9 = vld [vmem:[%s15486_s17 + $0xb60] ss:$16 sps:$4 sm:$0xff]  }
 0x15d   : > { %3310 = vmatprep.subr.bf16.mxu0 %v14397_v10  ;;  %3396 = vmatprep.subr.bf16.mxu1 %v14400_v11  ;;  %v14464_v10 = vld [vmem:[%s15486_s17 + $0xb68] ss:$16 sps:$4 sm:$0xff]   ;;  %v14469_v11 = vld [vmem:[%s15486_s17 + $0xb84] ss:$16 sps:$4 sm:$0xff]  }
 0x15f   : > { %3300 = vmatmul.mubr.bf16.vlgmr.msra.gmra.mrb[8].mxu0 %v15595_v17  ;;  %3386 = vmatmul.mubr.bf16.vlgmr.msra.gmra.mrb[8].mxu1 %v15595_v17  ;;  %v14418_v17 = vld [vmem:[%s15486_s17 + $0xa6c] ss:$16 sps:$4 sm:$0xff]  }
 0x160   : > { %3311 = vmatpush1.bf16.msra.mxu0 %v14395_v12  ;;  %3397 = vmatpush1.bf16.msra.mxu1 %v14398_v13  ;;  %v14472_v12 = vld [vmem:[%s15486_s17 + $0xb8c] ss:$16 sps:$4 sm:$0xff]   ;;  %v14467_v13 = vld [vmem:[%s15486_s17 + $0xb80] ss:$16 sps:$4 sm:$0xff]  }
 0x161   : > { %3312 = vmatprep.subr.bf16.mxu0 %v14403_v14  ;;  %3398 = vmatprep.subr.bf16.mxu1 %v14406_v15  ;;  %v14470_v14 = vld [vmem:[%s15486_s17 + $0xb88] ss:$16 sps:$4 sm:$0xff]   ;;  %v14475_v15 = vld [vmem:[%s15486_s17 + $0xba4] ss:$16 sps:$4 sm:$0xff]  }
 0x162   : > { %3342 = vmatprep.mubr.bf16.mxu0 %v15624_v45  ;;  %3428 = vmatprep.mubr.bf16.mxu1 %v15624_v45  ;;  %v14419_v45 = vld [vmem:[%s15486_s17 + $0xa80] ss:$16 sps:$4 sm:$0xff]  }
 0x164   : > { %3313 = vmatpush1.bf16.msra.mxu0 %v14401_v16  ;;  %3399 = vmatpush1.bf16.msra.mxu1 %v14404_v18  ;;  %v14478_v16 = vld [vmem:[%s15486_s17 + $0xbac] ss:$16 sps:$4 sm:$0xff]   ;;  %v14473_v18 = vld [vmem:[%s15486_s17 + $0xba0] ss:$16 sps:$4 sm:$0xff]  }
 0x165   : > { %3314 = vmatprep.subr.bf16.mxu0 %v14409_v19  ;;  %3400 = vmatprep.subr.bf16.mxu1 %v14412_v20  ;;  %v14476_v19 = vld [vmem:[%s15486_s17 + $0xba8] ss:$16 sps:$4 sm:$0xff]   ;;  %v14481_v20 = vld [vmem:[%s15486_s17 + $0xbc4] ss:$16 sps:$4 sm:$0xff]  }
 0x168   : > { %3315 = vmatpush1.bf16.msra.mxu0 %v14407_v21  ;;  %3401 = vmatpush1.bf16.msra.mxu1 %v14410_v22  ;;  %v14484_v21 = vld [vmem:[%s15486_s17 + $0xbcc] ss:$16 sps:$4 sm:$0xff]   ;;  %v14479_v22 = vld [vmem:[%s15486_s17 + $0xbc0] ss:$16 sps:$4 sm:$0xff]  }
 0x169   : > { %3316 = vmatprep.subr.bf16.mxu0 %v14415_v24  ;;  %3402 = vmatprep.subr.bf16.mxu1 %v14418_v17  ;;  %v14482_v24 = vld [vmem:[%s15486_s17 + $0xbc8] ss:$16 sps:$4 sm:$0xff]   ;;  %v14487_v17 = vld [vmem:[%s15486_s17 + $0xbe4] ss:$16 sps:$4 sm:$0xff]  }
 0x16c   : > { %3317 = vmatpush1.bf16.msra.mxu0 %v14413_v25  ;;  %3403 = vmatpush1.bf16.msra.mxu1 %v14416_v26  ;;  %v14490_v25 = vld [vmem:[%s15486_s17 + $0xbec] ss:$16 sps:$4 sm:$0xff]   ;;  %v14485_v26 = vld [vmem:[%s15486_s17 + $0xbe0] ss:$16 sps:$4 sm:$0xff]  }
 0x16d   : > { %3318 = vmatprep.subr.bf16.mxu0 %v14421_v27  ;;  %3404 = vmatprep.subr.bf16.mxu1 %v14424_v28  ;;  %v14488_v27 = vld [vmem:[%s15486_s17 + $0xbe8] ss:$16 sps:$4 sm:$0xff]   ;;  %v18974_v28 = vmov 0.0  }
 0x170   : > { %3319 = vmatpush1.bf16.msra.mxu0 %v14419_v45  ;;  %3405 = vmatpush1.bf16.msra.mxu1 %v14422_v29 }
 0x171   : > { %3320 = vmatprep.subr.bf16.mxu0 %v14427_v30  ;;  %3406 = vmatprep.subr.bf16.mxu1 %v14430_v31 }
 0x172   : > { %v1462_v36 = vpop.f32.mrb[0].mxu0  ;;  %v1548_v37 = vpop.f32.mrb[0].mxu1 }
 0x173   : > { %v1464_v41 = vpop.f32.mrb[1].mxu0  ;;  %v1550_v42 = vpop.f32.mrb[1].mxu1 }
 0x174   : > { %v1466_v47 = vpop.f32.mrb[2].mxu0  ;;  %v1552_v48 = vpop.f32.mrb[2].mxu1  ;;  %3321 = vmatpush1.bf16.msra.mxu0 %v14425_v32  ;;  %3407 = vmatpush1.bf16.msra.mxu1 %v14428_v33 }
 0x175   : > { %v16000_v51 = vpack.c.bf16 %v1466_v47, %v1462_v36  ;;  %v16002_v53 = vpack.c.bf16 %v1552_v48, %v1548_v37  ;;  %v1468_v40 = vpop.f32.mrb[3].mxu0  ;;  %v1554_v58 = vpop.f32.mrb[3].mxu1  ;;  %3322 = vmatprep.subr.bf16.mxu0 %v14433_v34  ;;  %3408 = vmatprep.subr.bf16.mxu1 %v14436_v35 }
 0x176   : > { %v16004_v55 = vpack.c.bf16 %v1468_v40, %v1464_v41  ;;  %v16006_v56 = vpack.c.bf16 %v1554_v58, %v1550_v42 }
 0x178   : > { %3323 = vmatpush1.bf16.msra.mxu0 %v14431_v38  ;;  %3409 = vmatpush1.bf16.msra.mxu1 %v14434_v39  ;;  %v18971_v39 = vlaneseq }
 0x179   : > { %3324 = vmatprep.subr.bf16.mxu0 %v14439_v43  ;;  %3410 = vmatprep.subr.bf16.mxu1 %v14442_v44  ;;  %v3455_v41 = vpop.permute.xlu0 %3454 }
 0x17a   : > { %v16056_v42 = vand.u32 127, %v18971_v39 }
 0x17c   : > { %3325 = vmatpush1.bf16.msra.mxu0 %v14437_v57  ;;  %3411 = vmatpush1.bf16.msra.mxu1 %v14440_v61  ;;  %vm3471_vm0 = vcmp.eq.s32.totalorder %v16056_v42, %v3455_v41  ;;  %v14532_v41 = vld [vmem:[%s15491_s21 + $0xcc] ss:$16 sps:$4 sm:$0xff]  }
 0x17d   : > { %3326 = vmatprep.subr.bf16.mxu0 %v14445_v5  ;;  %3412 = vmatprep.subr.bf16.mxu1 %v14448_v59 }
 0x180   : > { %3327 = vmatpush1.bf16.msra.mxu0 %v14443_v60  ;;  %3413 = vmatpush1.bf16.msra.mxu1 %v14446_v62  ;;  %v12493_v60 = vsel %vm3471_vm0, 1.0, %v18974_v28 }
 0x181   : > { %3328 = vmatprep.subr.bf16.mxu0 %v14451_v54  ;;  %3414 = vmatprep.subr.bf16.mxu1 %v14454_v0  ;;  %v3461_v54 = vpop.permute.xlu1 %3460  ;;  %v14496_v0 = vld [vmem:[%s15491_s21 + $0xc] ss:$16 sps:$4 sm:$0xff]  }
 0x182   : > { %vm3473_vm3 = vcmp.eq.s32.totalorder %v16056_v42, %v3461_v54  ;;  %v14545_v54 = vld [vmem:[%s15491_s21 + $0x120] ss:$16 sps:$4 sm:$0xff]  }
 0x184   : > { %3329 = vmatpush1.bf16.msra.mxu0 %v14449_v1  ;;  %3415 = vmatpush1.bf16.msra.mxu1 %v14452_v2 }
 0x185   : > { %3330 = vmatprep.subr.bf16.mxu0 %v14457_v3  ;;  %3416 = vmatprep.subr.bf16.mxu1 %v14460_v4  ;;  %v3458_v62 = vpop.permute.xlu0 %3457 }
 0x186   : > { %vm3472_vm2 = vcmp.eq.s32.totalorder %v16056_v42, %v3458_v62  ;;  %v14550_v62 = vld [vmem:[%s15491_s21 + $0x12c] ss:$16 sps:$4 sm:$0xff]  }
 0x188   : > { %3331 = vmatpush1.bf16.msra.mxu0 %v14455_v49  ;;  %3417 = vmatpush1.bf16.msra.mxu1 %v14458_v6 }
 0x189   : > { %3332 = vmatprep.subr.bf16.mxu0 %v14463_v63  ;;  %3418 = vmatprep.subr.bf16.mxu1 %v14466_v8  ;;  %v14494_v63 = vld [vmem:[%s15491_s21 + $0x8] ss:$16 sps:$4 sm:$0xff]  }
 0x18c   : > { %3333 = vmatpush1.bf16.msra.mxu0 %v14461_v9  ;;  %3419 = vmatpush1.bf16.msra.mxu1 %v14464_v10  ;;  %v14499_v10 = vld [vmem:[%s15491_s21 + $0x24] ss:$16 sps:$4 sm:$0xff]  }
 0x18d   : > { %3334 = vmatprep.subr.bf16.mxu0 %v14469_v11  ;;  %3420 = vmatprep.subr.bf16.mxu1 %v14472_v12  ;;  %v14502_v11 = vld [vmem:[%s15491_s21 + $0x2c] ss:$16 sps:$4 sm:$0xff]   ;;  %v14497_v12 = vld [vmem:[%s15491_s21 + $0x20] ss:$16 sps:$4 sm:$0xff]  }
 0x190   : > { %3335 = vmatpush1.bf16.msra.mxu0 %v14467_v13  ;;  %3421 = vmatpush1.bf16.msra.mxu1 %v14470_v14  ;;  %v14500_v13 = vld [vmem:[%s15491_s21 + $0x28] ss:$16 sps:$4 sm:$0xff]  }
 0x191   : > { %3336 = vmatprep.subr.bf16.mxu0 %v14475_v15  ;;  %3422 = vmatprep.subr.bf16.mxu1 %v14478_v16  ;;  %v14505_v16 = vld [vmem:[%s15491_s21 + $0x44] ss:$16 sps:$4 sm:$0xff]  }
 0x194   : > { %3337 = vmatpush1.bf16.msra.mxu0 %v14473_v18  ;;  %3423 = vmatpush1.bf16.msra.mxu1 %v14476_v19  ;;  %v14508_v18 = vld [vmem:[%s15491_s21 + $0x4c] ss:$16 sps:$4 sm:$0xff]   ;;  %v14503_v19 = vld [vmem:[%s15491_s21 + $0x40] ss:$16 sps:$4 sm:$0xff]  }
 0x195   : > { %3338 = vmatprep.subr.bf16.mxu0 %v14481_v20  ;;  %3424 = vmatprep.subr.bf16.mxu1 %v14484_v21  ;;  %v14506_v20 = vld [vmem:[%s15491_s21 + $0x48] ss:$16 sps:$4 sm:$0xff]  }
 0x198   : > { %3339 = vmatpush1.bf16.msra.mxu0 %v14479_v22  ;;  %3425 = vmatpush1.bf16.msra.mxu1 %v14482_v24  ;;  %v14511_v24 = vld [vmem:[%s15491_s21 + $0x64] ss:$16 sps:$4 sm:$0xff]  }
 0x199   : > { %3340 = vmatprep.subr.bf16.mxu0 %v14487_v17  ;;  %3426 = vmatprep.subr.bf16.mxu1 %v14490_v25  ;;  %v14514_v17 = vld [vmem:[%s15491_s21 + $0x6c] ss:$16 sps:$4 sm:$0xff]   ;;  %v14509_v25 = vld [vmem:[%s15491_s21 + $0x60] ss:$16 sps:$4 sm:$0xff]  }
 0x19c   : > { %3341 = vmatpush1.bf16.msra.mxu0 %v14485_v26  ;;  %3427 = vmatpush1.bf16.msra.mxu1 %v14488_v27  ;;  %v14512_v26 = vld [vmem:[%s15491_s21 + $0x68] ss:$16 sps:$4 sm:$0xff]  }
 0x19d   : > { %13622 = vmatprep.subr.bf16.mxu0 %v16004_v55  ;;  %13634 = vmatprep.subr.bf16.mxu1 %v16006_v56 }
 0x19f   : > { %3343 = vmatmul.mubr.bf16.vlgmr.msra.gmra.mrb[8].mxu0 %v15665_v23  ;;  %3429 = vmatmul.mubr.bf16.vlgmr.msra.gmra.mrb[8].mxu1 %v15665_v23 }
 0x1a0   : > { %13624 = vmatpush1.bf16.msra.mxu0 %v16000_v51  ;;  %13636 = vmatpush1.bf16.msra.mxu1 %v16002_v53 }
 0x1a1   : > { %3614 = vmatprep.mubr.f32.mxu0 %v18974_v28  ;;  %3715 = vmatprep.mubr.f32.mxu1 %v18974_v28 }
 0x1a6   : > { %v3467_v1 = vpop.permute.xlu0 %3466 }
 0x1a7   : > { %vm3475_vm5 = vcmp.eq.s32.totalorder %v16056_v42, %v3467_v1  ;;  %v14559_v1 = vld [vmem:[%s15491_s21 + $0x164] ss:$16 sps:$4 sm:$0xff]  }
 0x1a8   : > { %v12497_v3 = vsel %vm3475_vm5, 1.0, %v18974_v28 }
 0x1aa   : > { %v3497_v49 = vpop.permute.xlu0 %3496 }
 0x1ab   : > { %vm3513_vm7 = vcmp.eq.s32.totalorder %v16056_v42, %v3497_v49  ;;  %v14565_v49 = vld [vmem:[%s15491_s21 + $0x184] ss:$16 sps:$4 sm:$0xff]  }
 0x1ac   : > { %v12499_v8 = vsel %vm3513_vm7, 1.0, %v18974_v28 }
 0x1ae   : > { %v3503_v14 = vpop.permute.xlu0 %3502 }
 0x1af   : > { %vm3515_vm9 = vcmp.eq.s32.totalorder %v16056_v42, %v3503_v14  ;;  %v14575_v14 = vld [vmem:[%s15491_s21 + $0x1c0] ss:$16 sps:$4 sm:$0xff]  }
 0x1b0   : > { %v12501_v21 = vsel %vm3515_vm9, 1.0, %v18974_v28 }
 0x1b2   : > { %v3509_v27 = vpop.permute.xlu0 %3508 }
 0x1b3   : > { %vm3517_vm11 = vcmp.eq.s32.totalorder %v16056_v42, %v3509_v27  ;;  %v14601_v27 = vld [vmem:[%s15491_s21 + $0x22c] ss:$16 sps:$4 sm:$0xff]  }
 0x1f2   : > { %v2403_v45 = vpop.f32.mrb[4].mxu0  ;;  %v2489_v29 = vpop.f32.mrb[4].mxu1 }
 0x1f3   : > { %v2405_v30 = vpop.f32.mrb[5].mxu0  ;;  %v2491_v31 = vpop.f32.mrb[5].mxu1 }
 0x1f4   : > { %v2407_v32 = vpop.f32.mrb[6].mxu0  ;;  %v2493_v33 = vpop.f32.mrb[6].mxu1 }
 0x1f5   : > { %v13627_v34 = vpack.c.bf16 %v2407_v32, %v2403_v45  ;;  %v13639_v35 = vpack.c.bf16 %v2493_v33, %v2489_v29  ;;  %v2409_v36 = vpop.f32.mrb[7].mxu0  ;;  %v2495_v37 = vpop.f32.mrb[7].mxu1  ;;  %v14517_v29 = vld [vmem:[%s15491_s21 + $0x84] ss:$16 sps:$4 sm:$0xff]   ;;  %v14518_v32 = vld [vmem:[%s15491_s21 + $0x88] ss:$16 sps:$4 sm:$0xff]  }
 0x1f6   : > { %v13625_v23 = vpack.c.bf16 %v2409_v36, %v2405_v30  ;;  %v13637_v38 = vpack.c.bf16 %v2495_v37, %v2491_v31  ;;  %v14520_v30 = vld [vmem:[%s15491_s21 + $0x8c] ss:$16 sps:$4 sm:$0xff]   ;;  %v14515_v31 = vld [vmem:[%s15491_s21 + $0x80] ss:$16 sps:$4 sm:$0xff]   ;;  %v12503_v33 = vsel %vm3517_vm11, 1.0, %v18974_v28 }
 0x1f7   : > { %v14526_v36 = vld [vmem:[%s15491_s21 + $0xac] ss:$16 sps:$4 sm:$0xff]   ;;  %v14521_v37 = vld [vmem:[%s15491_s21 + $0xa0] ss:$16 sps:$4 sm:$0xff]  }
 0x1f8   : > { %13626 = vmatprep.subr.bf16.mxu0 %v13625_v23  ;;  %13638 = vmatprep.subr.bf16.mxu1 %v13637_v38 }
 0x1f9   : > { %13628 = vmatpush1.bf16.msra.mxu0 %v13627_v34  ;;  %13640 = vmatpush1.bf16.msra.mxu1 %v13639_v35 }
 0x272   : > { %v3344_v43 = vpop.f32.mrb[8].mxu0  ;;  %v3430_v44 = vpop.f32.mrb[8].mxu1 }
 0x273   : > { %v3346_v46 = vpop.f32.mrb[9].mxu0  ;;  %v3432_v47 = vpop.f32.mrb[9].mxu1 }
 0x274   : > { %v3348_v48 = vpop.f32.mrb[10].mxu0  ;;  %v3434_v50 = vpop.f32.mrb[10].mxu1 }
 0x275   : > { %v13631_v40 = vpack.c.bf16 %v3348_v48, %v3344_v43  ;;  %v13643_v58 = vpack.c.bf16 %v3434_v50, %v3430_v44  ;;  %v3350_v57 = vpop.f32.mrb[11].mxu0  ;;  %v3436_v61 = vpop.f32.mrb[11].mxu1  ;;  %v14589_v44 = vld [vmem:[%s18955_s5 + $0x4] ss:$24 sps:$4 sm:$0xff]  }
 0x276   : > { %v13629_v5 = vpack.c.bf16 %v3350_v57, %v3346_v46  ;;  %v13641_v59 = vpack.c.bf16 %v3436_v61, %v3432_v47  ;;  %v14527_v46 = vld [vmem:[%s15491_s21 + $0xc0] ss:$16 sps:$4 sm:$0xff]   ;;  %v14530_v47 = vld [vmem:[%s15491_s21 + $0xc8] ss:$16 sps:$4 sm:$0xff]   ;;  %v14535_v48 = vld [vmem:[%s15491_s21 + $0xe4] ss:$16 sps:$4 sm:$0xff]  }
 0x277   : > { %v14538_v50 = vld [vmem:[%s15491_s21 + $0xec] ss:$16 sps:$4 sm:$0xff]   ;;  %v14541_v57 = vld [vmem:[%s15491_s21 + $0x104] ss:$16 sps:$4 sm:$0xff]  }
 0x278   : > { %13630 = vmatprep.subr.bf16.mxu0 %v13629_v5  ;;  %13642 = vmatprep.subr.bf16.mxu1 %v13641_v59  ;;  %v14544_v61 = vld [vmem:[%s15491_s21 + $0x10c] ss:$16 sps:$4 sm:$0xff]  }
 0x279   : > { %13632 = vmatpush1.bf16.msra.mxu0 %v13631_v40  ;;  %13644 = vmatpush1.bf16.msra.mxu1 %v13643_v58 }
 0x27a   : > { %13646 = vmatprep.subr.bf16.mxu0 %v16004_v55  ;;  %13658 = vmatprep.subr.bf16.mxu1 %v16006_v56  ;;  %v12494_v55 = vsel %vm3472_vm2, 1.0, %v18974_v28  ;;  %v14493_v56 = vld [vmem:[%s15491_s21 + $0x4] ss:$16 sps:$4 sm:$0xff]  }
 0x27c   : > { %12505 = vmatmul.mubr.msk.f32.vlgmr.msra.gmra.mrb[12].mxu0 %vm3531_vm1, %v12493_v60  ;;  %12511 = vmatmul.mubr.msk.f32.vlgmr.msra.gmra.mrb[12].mxu1 %vm3531_vm1, %v12493_v60  ;;  %v14547_v60 = vld [vmem:[%s15491_s21 + $0x124] ss:$16 sps:$4 sm:$0xff]  }
 0x27d   : > { %13648 = vmatpush1.bf16.msra.mxu0 %v16000_v51  ;;  %13660 = vmatpush1.bf16.msra.mxu1 %v16002_v53  ;;  %v12495_v51 = vsel %vm3473_vm3, 1.0, %v18974_v28  ;;  %v3464_v53 = vpop.permute.xlu1 %3463 }
 0x27e   : > { %13650 = vmatprep.subr.bf16.mxu0 %v13625_v23  ;;  %13662 = vmatprep.subr.bf16.mxu1 %v13637_v38  ;;  %vm3474_vm4 = vcmp.eq.s32.totalorder %v16056_v42, %v3464_v53  ;;  %v14524_v23 = vld [vmem:[%s15491_s21 + $0xa8] ss:$16 sps:$4 sm:$0xff]   ;;  %v14529_v38 = vld [vmem:[%s15491_s21 + $0xc4] ss:$16 sps:$4 sm:$0xff]   ;;  %v14556_v53 = vld [vmem:[%s15491_s21 + $0x14c] ss:$16 sps:$4 sm:$0xff]  }
 0x27f   : > { %3620 = vmatprep.mubr.f32.mxu0 %v18974_v28  ;;  %3721 = vmatprep.mubr.f32.mxu1 %v18974_v28  ;;  %v12496_v2 = vsel %vm3474_vm4, 1.0, %v18974_v28 }
 0x280   : > { %12506 = vmatmul.mubr.msk.f32.gmra.mrb[14].mxu0 %vm3531_vm1, %v12494_v55  ;;  %12512 = vmatmul.mubr.msk.f32.gmra.mrb[14].mxu1 %vm3531_vm1, %v12494_v55  ;;  %v14548_v55 = vld [vmem:[%s15491_s21 + $0x128] ss:$16 sps:$4 sm:$0xff]  }
 0x281   : > { %13652 = vmatpush1.bf16.msra.mxu0 %v13627_v34  ;;  %13664 = vmatpush1.bf16.msra.mxu1 %v13639_v35  ;;  %v3470_v4 = vpop.permute.xlu1 %3469  ;;  %v14523_v35 = vld [vmem:[%s15491_s21 + $0xa4] ss:$16 sps:$4 sm:$0xff]  }
 0x282   : > { %13654 = vmatprep.subr.bf16.mxu0 %v13629_v5  ;;  %13666 = vmatprep.subr.bf16.mxu1 %v13641_v59  ;;  %vm3476_vm6 = vcmp.eq.s32.totalorder %v16056_v42, %v3470_v4  ;;  %v14539_v5 = vld [vmem:[%s15491_s21 + $0x100] ss:$16 sps:$4 sm:$0xff]   ;;  %v14542_v59 = vld [vmem:[%s15491_s21 + $0x108] ss:$16 sps:$4 sm:$0xff]  }
 0x283   : > { %3626 = vmatprep.mubr.f32.mxu0 %v18974_v28  ;;  %3727 = vmatprep.mubr.f32.mxu1 %v18974_v28  ;;  %v12498_v6 = vsel %vm3476_vm6, 1.0, %v18974_v28  ;;  %v14560_v4 = vld [vmem:[%s15491_s21 + $0x168] ss:$16 sps:$4 sm:$0xff]  }
 0x284   : > { %12507 = vmatmul.mubr.msk.f32.gmra.mrb[16].mxu0 %vm3531_vm1, %v12495_v51  ;;  %12513 = vmatmul.mubr.msk.f32.gmra.mrb[16].mxu1 %vm3531_vm1, %v12495_v51  ;;  %v14553_v51 = vld [vmem:[%s15491_s21 + $0x144] ss:$16 sps:$4 sm:$0xff]  }
 0x285   : > { %13656 = vmatpush1.bf16.msra.mxu0 %v13631_v40  ;;  %13668 = vmatpush1.bf16.msra.mxu1 %v13643_v58  ;;  %v3500_v9 = vpop.permute.xlu1 %3499  ;;  %v14533_v40 = vld [vmem:[%s15491_s21 + $0xe0] ss:$16 sps:$4 sm:$0xff]   ;;  %v14536_v58 = vld [vmem:[%s15491_s21 + $0xe8] ss:$16 sps:$4 sm:$0xff]  }
 0x286   : > { %3632 = vmatprep.mubr.f32.mxu0 %v18974_v28  ;;  %3733 = vmatprep.mubr.f32.mxu1 %v18974_v28  ;;  %vm3514_vm8 = vcmp.eq.s32.totalorder %v16056_v42, %v3500_v9  ;;  %v14574_v9 = vld [vmem:[%s15491_s21 + $0x1ac] ss:$16 sps:$4 sm:$0xff]  }
 0x287   : > { %5232 = vmatprep.subr.bf16.mxu0 %v14493_v56  ;;  %5421 = vmatprep.subr.bf16.mxu1 %v14496_v0  ;;  %v12500_v15 = vsel %vm3514_vm8, 1.0, %v18974_v28  ;;  %v14551_v56 = vld [vmem:[%s15491_s21 + $0x140] ss:$16 sps:$4 sm:$0xff]   ;;  %v14554_v0 = vld [vmem:[%s15491_s21 + $0x148] ss:$16 sps:$4 sm:$0xff]  }
 0x288   : > { %12508 = vmatmul.mubr.msk.f32.gmra.mrb[18].mxu0 %vm3531_vm1, %v12496_v2  ;;  %12514 = vmatmul.mubr.msk.f32.gmra.mrb[18].mxu1 %vm3531_vm1, %v12496_v2  ;;  %v14562_v2 = vld [vmem:[%s15491_s21 + $0x16c] ss:$16 sps:$4 sm:$0xff]  }
 0x289   : > { %3638 = vmatprep.mubr.f32.mxu0 %v18974_v28  ;;  %3739 = vmatprep.mubr.f32.mxu1 %v18974_v28  ;;  %v3506_v22 = vpop.permute.xlu1 %3505 }
 0x28a   : > { %vm3516_vm10 = vcmp.eq.s32.totalorder %v16056_v42, %v3506_v22  ;;  %v14595_v22 = vld [vmem:[%s15491_s21 + $0x20c] ss:$16 sps:$4 sm:$0xff]  }
 0x28b   : > { %v12502_v45 = vsel %vm3516_vm10, 1.0, %v18974_v28 }
 0x28c   : > { %12509 = vmatmul.mubr.msk.f32.gmra.mrb[20].mxu0 %vm3531_vm1, %v12497_v3  ;;  %12515 = vmatmul.mubr.msk.f32.gmra.mrb[20].mxu1 %vm3531_vm1, %v12497_v3  ;;  %v14557_v3 = vld [vmem:[%s15491_s21 + $0x160] ss:$16 sps:$4 sm:$0xff]  }
 0x28d   : > { %3644 = vmatprep.mubr.f32.mxu0 %v18974_v28  ;;  %3745 = vmatprep.mubr.f32.mxu1 %v18974_v28  ;;  %v3512_v34 = vpop.permute.xlu1 %3511 }
 0x28e   : > { %vm3518_vm12 = vcmp.eq.s32.totalorder %v16056_v42, %v3512_v34  ;;  %v14602_v34 = vld [vmem:[%s15491_s21 + $0x240] ss:$16 sps:$4 sm:$0xff]  }
 0x28f   : > { %v12504_v43 = vsel %vm3518_vm12, 1.0, %v18974_v28  ;;  %vm7120_vm12 = vcmask 7168  }
 0x290   : > { %12510 = vmatmul.mubr.msk.f32.gmra.mrb[22].mxu0 %vm3531_vm1, %v12498_v6  ;;  %12516 = vmatmul.mubr.msk.f32.gmra.mrb[22].mxu1 %vm3531_vm1, %v12498_v6  ;;  %v14568_v6 = vld [vmem:[%s15491_s21 + $0x18c] ss:$16 sps:$4 sm:$0xff]  }
 0x291   : > { %3834 = vmatprep.mubr.f32.mxu0 %v18974_v28  ;;  %3935 = vmatprep.mubr.f32.mxu1 %v18974_v28 }
 0x294   : > { %12517 = vmatmul.mubr.msk.f32.vlgmr.msra.gmra.mrb[24].mxu0 %vm3531_vm1, %v12499_v8  ;;  %12523 = vmatmul.mubr.msk.f32.vlgmr.msra.gmra.mrb[24].mxu1 %vm3531_vm1, %v12499_v8  ;;  %v14571_v8 = vld [vmem:[%s15491_s21 + $0x1a4] ss:$16 sps:$4 sm:$0xff]  }
 0x295   : > { %5233 = vmatpush1.bf16.msra.mxu0 %v14491_v7  ;;  %5422 = vmatpush1.bf16.msra.mxu1 %v14494_v63  ;;  %v14563_v7 = vld [vmem:[%s15491_s21 + $0x180] ss:$16 sps:$4 sm:$0xff]   ;;  %v14566_v63 = vld [vmem:[%s15491_s21 + $0x188] ss:$16 sps:$4 sm:$0xff]  }
 0x296   : > { %3840 = vmatprep.mubr.f32.mxu0 %v18974_v28  ;;  %3941 = vmatprep.mubr.f32.mxu1 %v18974_v28 }
 0x297   : > { %5234 = vmatprep.subr.bf16.mxu0 %v14499_v10  ;;  %5423 = vmatprep.subr.bf16.mxu1 %v14502_v11  ;;  %v14569_v10 = vld [vmem:[%s15491_s21 + $0x1a0] ss:$16 sps:$4 sm:$0xff]   ;;  %v14572_v11 = vld [vmem:[%s15491_s21 + $0x1a8] ss:$16 sps:$4 sm:$0xff]  }
 0x298   : > { %12518 = vmatmul.mubr.msk.f32.gmra.mrb[26].mxu0 %vm3531_vm1, %v12500_v15  ;;  %12524 = vmatmul.mubr.msk.f32.gmra.mrb[26].mxu1 %vm3531_vm1, %v12500_v15  ;;  %v14578_v15 = vld [vmem:[%s15491_s21 + $0x1c8] ss:$16 sps:$4 sm:$0xff]  }
 0x299   : > { %5235 = vmatpush1.bf16.msra.mxu0 %v14497_v12  ;;  %5424 = vmatpush1.bf16.msra.mxu1 %v14500_v13  ;;  %v14577_v12 = vld [vmem:[%s15491_s21 + $0x1c4] ss:$16 sps:$4 sm:$0xff]   ;;  %v14580_v13 = vld [vmem:[%s15491_s21 + $0x1cc] ss:$16 sps:$4 sm:$0xff]  }
 0x29a   : > { %3846 = vmatprep.mubr.f32.mxu0 %v18974_v28  ;;  %3947 = vmatprep.mubr.f32.mxu1 %v18974_v28 }
 0x29b   : > { %5236 = vmatprep.subr.bf16.mxu0 %v14505_v16  ;;  %5425 = vmatprep.subr.bf16.mxu1 %v14508_v18  ;;  %v14583_v16 = vld [vmem:[%s15491_s21 + $0x1e4] ss:$16 sps:$4 sm:$0xff]   ;;  %v14586_v18 = vld [vmem:[%s15491_s21 + $0x1ec] ss:$16 sps:$4 sm:$0xff]  }
 0x29c   : > { %12519 = vmatmul.mubr.msk.f32.gmra.mrb[28].mxu0 %vm3531_vm1, %v12501_v21  ;;  %12525 = vmatmul.mubr.msk.f32.gmra.mrb[28].mxu1 %vm3531_vm1, %v12501_v21  ;;  %v14592_v21 = vld [vmem:[%s15491_s21 + $0x204] ss:$16 sps:$4 sm:$0xff]  }
 0x29d   : > { %5237 = vmatpush1.bf16.msra.mxu0 %v14503_v19  ;;  %5426 = vmatpush1.bf16.msra.mxu1 %v14506_v20  ;;  %v14581_v19 = vld [vmem:[%s15491_s21 + $0x1e0] ss:$16 sps:$4 sm:$0xff]   ;;  %v14584_v20 = vld [vmem:[%s15491_s21 + $0x1e8] ss:$16 sps:$4 sm:$0xff]  }
 0x29e   : > { %3852 = vmatprep.mubr.f32.mxu0 %v18974_v28  ;;  %3953 = vmatprep.mubr.f32.mxu1 %v18974_v28 }
 0x29f   : > { %5238 = vmatprep.subr.bf16.mxu0 %v14511_v24  ;;  %5427 = vmatprep.subr.bf16.mxu1 %v14514_v17  ;;  %v14587_v24 = vld [vmem:[%s18955_s5] ss:$24 sps:$4 sm:$0xff]  }
 0x2a0   : > { %12520 = vmatmul.mubr.msk.f32.gmra.mrb[30].mxu0 %vm3531_vm1, %v12502_v45  ;;  %12526 = vmatmul.mubr.msk.f32.gmra.mrb[30].mxu1 %vm3531_vm1, %v12502_v45  ;;  %v14590_v17 = vld [vmem:[%s15491_s21 + $0x200] ss:$16 sps:$4 sm:$0xff]   ;;  %v14662_v45 = vld [vmem:[%s18955_s5 + $0x34] ss:$24 sps:$4 sm:$0xff]  }
 0x2a1   : > { %5239 = vmatpush1.bf16.msra.mxu0 %v14509_v25  ;;  %5428 = vmatpush1.bf16.msra.mxu1 %v14512_v26  ;;  %v14593_v25 = vld [vmem:[%s15491_s21 + $0x208] ss:$16 sps:$4 sm:$0xff]   ;;  %v14598_v26 = vld [vmem:[%s15491_s21 + $0x224] ss:$16 sps:$4 sm:$0xff]  }
 0x2a2   : > { %3858 = vmatprep.mubr.f32.mxu0 %v18974_v28  ;;  %3959 = vmatprep.mubr.f32.mxu1 %v18974_v28 }
 0x2a3   : > { %5240 = vmatprep.subr.bf16.mxu0 %v14517_v29  ;;  %5429 = vmatprep.subr.bf16.mxu1 %v14520_v30  ;;  %v14596_v29 = vld [vmem:[%s15491_s21 + $0x220] ss:$16 sps:$4 sm:$0xff]   ;;  %v14599_v30 = vld [vmem:[%s15491_s21 + $0x228] ss:$16 sps:$4 sm:$0xff]  }
 0x2a4   : > { %12521 = vmatmul.mubr.msk.f32.gmra.mrb[32].mxu0 %vm3531_vm1, %v12503_v33  ;;  %12527 = vmatmul.mubr.msk.f32.gmra.mrb[32].mxu1 %vm3531_vm1, %v12503_v33  ;;  %v14670_v33 = vld [vmem:[%s18955_s5 + $0x30] ss:$24 sps:$4 sm:$0xff]  }
 0x2a5   : > { %5241 = vmatpush1.bf16.msra.mxu0 %v14515_v31  ;;  %5430 = vmatpush1.bf16.msra.mxu1 %v14518_v32  ;;  %v14604_v31 = vld [vmem:[%s15491_s21 + $0x244] ss:$16 sps:$4 sm:$0xff]   ;;  %v14607_v32 = vld [vmem:[%s15491_s21 + $0x24c] ss:$16 sps:$4 sm:$0xff]  }
 0x2a6   : > { %3864 = vmatprep.mubr.f32.mxu0 %v18974_v28  ;;  %3965 = vmatprep.mubr.f32.mxu1 %v18974_v28  ;;  %v14844_v28 = vld [vmem:[%s15496_s11 + $0x8] sm:$0xff]  }
 0x2a7   : > { %5242 = vmatprep.subr.bf16.mxu0 %v14523_v35  ;;  %5431 = vmatprep.subr.bf16.mxu1 %v14526_v36  ;;  %v14605_v35 = vld [vmem:[%s15491_s21 + $0x248] ss:$16 sps:$4 sm:$0xff]   ;;  %v14610_v36 = vld [vmem:[%s15491_s21 + $0x264] ss:$16 sps:$4 sm:$0xff]  }
 0x2a8   : > { %12522 = vmatmul.mubr.msk.f32.gmra.mrb[34].mxu0 %vm3531_vm1, %v12504_v43  ;;  %12528 = vmatmul.mubr.msk.f32.gmra.mrb[34].mxu1 %vm3531_vm1, %v12504_v43  ;;  %v14616_v43 = vld [vmem:[%s15491_s21 + $0x284] ss:$16 sps:$4 sm:$0xff]  }
 0x2a9   : > { %5243 = vmatpush1.bf16.msra.mxu0 %v14521_v37  ;;  %5432 = vmatpush1.bf16.msra.mxu1 %v14524_v23  ;;  %v14613_v37 = vld [vmem:[%s15491_s21 + $0x26c] ss:$16 sps:$4 sm:$0xff]  }
 0x2aa   : > { %5244 = vmatprep.subr.bf16.mxu0 %v14529_v38  ;;  %5433 = vmatprep.subr.bf16.mxu1 %v14532_v41  ;;  %v14677_v23 = vld [vmem:[%s18955_s5 + $0x64] ss:$24 sps:$4 sm:$0xff]   ;;  %v14608_v38 = vld [vmem:[%s15491_s21 + $0x260] ss:$16 sps:$4 sm:$0xff]   ;;  %v14611_v41 = vld [vmem:[%s15491_s21 + $0x268] ss:$16 sps:$4 sm:$0xff]  }
 0x2ab   : > { %5264 = vmatprep.mubr.bf16.mxu0 %v14589_v44  ;;  %5453 = vmatprep.mubr.bf16.mxu1 %v14589_v44  ;;  %v14619_v44 = vld [vmem:[%s15491_s21 + $0x28c] ss:$16 sps:$4 sm:$0xff]  }
 0x2ad   : > { %5245 = vmatpush1.bf16.msra.mxu0 %v14527_v46  ;;  %5434 = vmatpush1.bf16.msra.mxu1 %v14530_v47  ;;  %v14685_v46 = vld [vmem:[%s18955_s5 + $0x60] ss:$24 sps:$4 sm:$0xff]  }
 0x2ae   : > { %5246 = vmatprep.subr.bf16.mxu0 %v14535_v48  ;;  %5435 = vmatprep.subr.bf16.mxu1 %v14538_v50  ;;  %v14614_v47 = vld [vmem:[%s15491_s21 + $0x280] ss:$16 sps:$4 sm:$0xff]   ;;  %v14617_v48 = vld [vmem:[%s15491_s21 + $0x288] ss:$16 sps:$4 sm:$0xff]   ;;  %v14622_v50 = vld [vmem:[%s15491_s21 + $0x2a4] ss:$16 sps:$4 sm:$0xff]  }
 0x2b1   : > { %5247 = vmatpush1.bf16.msra.mxu0 %v14533_v40  ;;  %5436 = vmatpush1.bf16.msra.mxu1 %v14536_v58  ;;  %v14625_v40 = vld [vmem:[%s15491_s21 + $0x2ac] ss:$16 sps:$4 sm:$0xff]  }
 0x2b2   : > { %5248 = vmatprep.subr.bf16.mxu0 %v14541_v57  ;;  %5437 = vmatprep.subr.bf16.mxu1 %v14544_v61  ;;  %v14694_v58 = vld [vmem:[%s18955_s5 + $0xc] ss:$24 sps:$4 sm:$0xff]   ;;  %v14620_v57 = vld [vmem:[%s15491_s21 + $0x2a0] ss:$16 sps:$4 sm:$0xff]   ;;  %v14623_v61 = vld [vmem:[%s15491_s21 + $0x2a8] ss:$16 sps:$4 sm:$0xff]  }
 0x2b5   : > { %5249 = vmatpush1.bf16.msra.mxu0 %v14539_v5  ;;  %5438 = vmatpush1.bf16.msra.mxu1 %v14542_v59  ;;  %v14628_v5 = vld [vmem:[%s15491_s21 + $0x2c4] ss:$16 sps:$4 sm:$0xff]   ;;  %v14631_v59 = vld [vmem:[%s15491_s21 + $0x2cc] ss:$16 sps:$4 sm:$0xff]  }
 0x2b6   : > { %5250 = vmatprep.subr.bf16.mxu0 %v14547_v60  ;;  %5439 = vmatprep.subr.bf16.mxu1 %v14550_v62  ;;  %v14626_v60 = vld [vmem:[%s15491_s21 + $0x2c0] ss:$16 sps:$4 sm:$0xff]   ;;  %v14629_v62 = vld [vmem:[%s15491_s21 + $0x2c8] ss:$16 sps:$4 sm:$0xff]  }
 0x2b9   : > { %5251 = vmatpush1.bf16.msra.mxu0 %v14545_v54  ;;  %5440 = vmatpush1.bf16.msra.mxu1 %v14548_v55  ;;  %v14634_v54 = vld [vmem:[%s15491_s21 + $0x2e4] ss:$16 sps:$4 sm:$0xff]   ;;  %v14637_v55 = vld [vmem:[%s15491_s21 + $0x2ec] ss:$16 sps:$4 sm:$0xff]  }
 0x2ba   : > { %5252 = vmatprep.subr.bf16.mxu0 %v14553_v51  ;;  %5441 = vmatprep.subr.bf16.mxu1 %v14556_v53  ;;  %v14632_v51 = vld [vmem:[%s15491_s21 + $0x2e0] ss:$16 sps:$4 sm:$0xff]   ;;  %v14635_v53 = vld [vmem:[%s15491_s21 + $0x2e8] ss:$16 sps:$4 sm:$0xff]  }
 0x2bd   : > { %5253 = vmatpush1.bf16.msra.mxu0 %v14551_v56  ;;  %5442 = vmatpush1.bf16.msra.mxu1 %v14554_v0  ;;  %v14640_v56 = vld [vmem:[%s15491_s21 + $0x304] ss:$16 sps:$4 sm:$0xff]   ;;  %v14643_v0 = vld [vmem:[%s15491_s21 + $0x30c] ss:$16 sps:$4 sm:$0xff]  }
 0x2be   : > { %5254 = vmatprep.subr.bf16.mxu0 %v14559_v1  ;;  %5443 = vmatprep.subr.bf16.mxu1 %v14562_v2  ;;  %v14638_v1 = vld [vmem:[%s15491_s21 + $0x300] ss:$16 sps:$4 sm:$0xff]   ;;  %v14641_v2 = vld [vmem:[%s15491_s21 + $0x308] ss:$16 sps:$4 sm:$0xff]  }
 0x2c1   : > { %5255 = vmatpush1.bf16.msra.mxu0 %v14557_v3  ;;  %5444 = vmatpush1.bf16.msra.mxu1 %v14560_v4  ;;  %v14646_v3 = vld [vmem:[%s15491_s21 + $0x324] ss:$16 sps:$4 sm:$0xff]   ;;  %v14649_v4 = vld [vmem:[%s15491_s21 + $0x32c] ss:$16 sps:$4 sm:$0xff]  }
 0x2c2   : > { %5256 = vmatprep.subr.bf16.mxu0 %v14565_v49  ;;  %5445 = vmatprep.subr.bf16.mxu1 %v14568_v6  ;;  %v14644_v49 = vld [vmem:[%s15491_s21 + $0x320] ss:$16 sps:$4 sm:$0xff]   ;;  %v14647_v6 = vld [vmem:[%s15491_s21 + $0x328] ss:$16 sps:$4 sm:$0xff]  }
 0x2c5   : > { %5257 = vmatpush1.bf16.msra.mxu0 %v14563_v7  ;;  %5446 = vmatpush1.bf16.msra.mxu1 %v14566_v63  ;;  %v14652_v7 = vld [vmem:[%s15491_s21 + $0x344] ss:$16 sps:$4 sm:$0xff]   ;;  %v14655_v63 = vld [vmem:[%s15491_s21 + $0x34c] ss:$16 sps:$4 sm:$0xff]  }
 0x2c6   : > { %5258 = vmatprep.subr.bf16.mxu0 %v14571_v8  ;;  %5447 = vmatprep.subr.bf16.mxu1 %v14574_v9  ;;  %v14650_v8 = vld [vmem:[%s15491_s21 + $0x340] ss:$16 sps:$4 sm:$0xff]   ;;  %v14653_v9 = vld [vmem:[%s15491_s21 + $0x348] ss:$16 sps:$4 sm:$0xff]  }
 0x2c9   : > { %5259 = vmatpush1.bf16.msra.mxu0 %v14569_v10  ;;  %5448 = vmatpush1.bf16.msra.mxu1 %v14572_v11  ;;  %v14658_v10 = vld [vmem:[%s15491_s21 + $0x364] ss:$16 sps:$4 sm:$0xff]   ;;  %v14661_v11 = vld [vmem:[%s15491_s21 + $0x36c] ss:$16 sps:$4 sm:$0xff]  }
 0x2ca   : > { %5260 = vmatprep.subr.bf16.mxu0 %v14577_v12  ;;  %5449 = vmatprep.subr.bf16.mxu1 %v14580_v13  ;;  %v14656_v12 = vld [vmem:[%s15491_s21 + $0x360] ss:$16 sps:$4 sm:$0xff]   ;;  %v14659_v13 = vld [vmem:[%s15491_s21 + $0x368] ss:$16 sps:$4 sm:$0xff]  }
 0x2cd   : > { %5261 = vmatpush1.bf16.msra.mxu0 %v14575_v14  ;;  %5450 = vmatpush1.bf16.msra.mxu1 %v14578_v15  ;;  %v14666_v14 = vld [vmem:[%s15491_s21 + $0x384] ss:$16 sps:$4 sm:$0xff]   ;;  %v14669_v15 = vld [vmem:[%s15491_s21 + $0x38c] ss:$16 sps:$4 sm:$0xff]  }
 0x2ce   : > { %5262 = vmatprep.subr.bf16.mxu0 %v14583_v16  ;;  %5451 = vmatprep.subr.bf16.mxu1 %v14586_v18  ;;  %v14664_v16 = vld [vmem:[%s15491_s21 + $0x380] ss:$16 sps:$4 sm:$0xff]   ;;  %v14667_v18 = vld [vmem:[%s15491_s21 + $0x388] ss:$16 sps:$4 sm:$0xff]  }
 0x2d1   : > { %5263 = vmatpush1.bf16.msra.mxu0 %v14581_v19  ;;  %5452 = vmatpush1.bf16.msra.mxu1 %v14584_v20  ;;  %v14673_v19 = vld [vmem:[%s15491_s21 + $0x3a4] ss:$16 sps:$4 sm:$0xff]   ;;  %v14676_v20 = vld [vmem:[%s15491_s21 + $0x3ac] ss:$16 sps:$4 sm:$0xff]  }
 0x2d2   : > { %5295 = vmatprep.subr.bf16.mxu0 %v14592_v21  ;;  %5484 = vmatprep.subr.bf16.mxu1 %v14595_v22  ;;  %v14671_v21 = vld [vmem:[%s15491_s21 + $0x3a0] ss:$16 sps:$4 sm:$0xff]   ;;  %v14674_v22 = vld [vmem:[%s15491_s21 + $0x3a8] ss:$16 sps:$4 sm:$0xff]  }
 0x2d4   : > { %5265 = vmatmul.mubr.bf16.vlgmr.msra.gmra.mrb[36].mxu0 %v14587_v24  ;;  %5454 = vmatmul.mubr.bf16.vlgmr.msra.gmra.mrb[36].mxu1 %v14587_v24  ;;  %v14681_v24 = vld [vmem:[%s15491_s21 + $0x3c4] ss:$16 sps:$4 sm:$0xff]  }
 0x2d5   : > { %5296 = vmatpush1.bf16.msra.mxu0 %v14590_v17  ;;  %5485 = vmatpush1.bf16.msra.mxu1 %v14593_v25  ;;  %v14684_v17 = vld [vmem:[%s15491_s21 + $0x3cc] ss:$16 sps:$4 sm:$0xff]   ;;  %v14679_v25 = vld [vmem:[%s15491_s21 + $0x3c0] ss:$16 sps:$4 sm:$0xff]  }
 0x2d6   : > { %5297 = vmatprep.subr.bf16.mxu0 %v14598_v26  ;;  %5486 = vmatprep.subr.bf16.mxu1 %v14601_v27  ;;  %v14682_v26 = vld [vmem:[%s15491_s21 + $0x3c8] ss:$16 sps:$4 sm:$0xff]   ;;  %v14688_v27 = vld [vmem:[%s15491_s21 + $0x3e4] ss:$16 sps:$4 sm:$0xff]  }
 0x2d7   : > { %5274 = vmatprep.mubr.bf16.mxu0 %v14662_v45  ;;  %5463 = vmatprep.mubr.bf16.mxu1 %v14662_v45  ;;  %v14691_v45 = vld [vmem:[%s15491_s21 + $0x3ec] ss:$16 sps:$4 sm:$0xff]  }
 0x2d9   : > { %5298 = vmatpush1.bf16.msra.mxu0 %v14596_v29  ;;  %5487 = vmatpush1.bf16.msra.mxu1 %v14599_v30  ;;  %v14686_v29 = vld [vmem:[%s15491_s21 + $0x3e0] ss:$16 sps:$4 sm:$0xff]   ;;  %v14689_v30 = vld [vmem:[%s15491_s21 + $0x3e8] ss:$16 sps:$4 sm:$0xff]  }
 0x2da   : > { %5299 = vmatprep.subr.bf16.mxu0 %v14604_v31  ;;  %5488 = vmatprep.subr.bf16.mxu1 %v14607_v32  ;;  %v14697_v31 = vld [vmem:[%s15491_s21 + $0x404] ss:$16 sps:$4 sm:$0xff]   ;;  %v14700_v32 = vld [vmem:[%s15491_s21 + $0x40c] ss:$16 sps:$4 sm:$0xff]  }
 0x2dc   : > { %5275 = vmatmul.mubr.bf16.gmra.mrb[40].mxu0 %v14670_v33  ;;  %5464 = vmatmul.mubr.bf16.gmra.mrb[40].mxu1 %v14670_v33  ;;  %v14692_v33 = vld [vmem:[%s18955_s5 + $0x8] ss:$24 sps:$4 sm:$0xff]  }
 0x2dd   : > { %5300 = vmatpush1.bf16.msra.mxu0 %v14602_v34  ;;  %5489 = vmatpush1.bf16.msra.mxu1 %v14605_v35  ;;  %v14695_v34 = vld [vmem:[%s15491_s21 + $0x400] ss:$16 sps:$4 sm:$0xff]   ;;  %v14698_v35 = vld [vmem:[%s15491_s21 + $0x408] ss:$16 sps:$4 sm:$0xff]  }
 0x2de   : > { %5301 = vmatprep.subr.bf16.mxu0 %v14610_v36  ;;  %5490 = vmatprep.subr.bf16.mxu1 %v14613_v37  ;;  %v14703_v36 = vld [vmem:[%s15491_s21 + $0x424] ss:$16 sps:$4 sm:$0xff]   ;;  %v14706_v37 = vld [vmem:[%s15491_s21 + $0x42c] ss:$16 sps:$4 sm:$0xff]  }
 0x2df   : > { %5284 = vmatprep.mubr.bf16.mxu0 %v14677_v23  ;;  %5473 = vmatprep.mubr.bf16.mxu1 %v14677_v23  ;;  %v14767_v23 = vld [vmem:[%s18955_s5 + $0x3c] ss:$24 sps:$4 sm:$0xff]  }
 0x2e1   : > { %5302 = vmatpush1.bf16.msra.mxu0 %v14608_v38  ;;  %5491 = vmatpush1.bf16.msra.mxu1 %v14611_v41  ;;  %v14701_v38 = vld [vmem:[%s15491_s21 + $0x420] ss:$16 sps:$4 sm:$0xff]   ;;  %v14704_v41 = vld [vmem:[%s15491_s21 + $0x428] ss:$16 sps:$4 sm:$0xff]  }
 0x2e2   : > { %5303 = vmatprep.subr.bf16.mxu0 %v14616_v43  ;;  %5492 = vmatprep.subr.bf16.mxu1 %v14619_v44  ;;  %v14709_v43 = vld [vmem:[%s15491_s21 + $0x444] ss:$16 sps:$4 sm:$0xff]   ;;  %v14712_v44 = vld [vmem:[%s15491_s21 + $0x44c] ss:$16 sps:$4 sm:$0xff]  }
 0x2e4   : > { %5285 = vmatmul.mubr.bf16.gmra.mrb[44].mxu0 %v14685_v46  ;;  %5474 = vmatmul.mubr.bf16.gmra.mrb[44].mxu1 %v14685_v46  ;;  %v14769_v46 = vld [vmem:[%s18955_s5 + $0x38] ss:$24 sps:$4 sm:$0xff]  }
 0x2e5   : > { %5304 = vmatpush1.bf16.msra.mxu0 %v14614_v47  ;;  %5493 = vmatpush1.bf16.msra.mxu1 %v14617_v48  ;;  %v14707_v47 = vld [vmem:[%s15491_s21 + $0x440] ss:$16 sps:$4 sm:$0xff]   ;;  %v14710_v48 = vld [vmem:[%s15491_s21 + $0x448] ss:$16 sps:$4 sm:$0xff]  }
 0x2e6   : > { %5305 = vmatprep.subr.bf16.mxu0 %v14622_v50  ;;  %5494 = vmatprep.subr.bf16.mxu1 %v14625_v40  ;;  %v14715_v50 = vld [vmem:[%s15491_s21 + $0x464] ss:$16 sps:$4 sm:$0xff]   ;;  %v14718_v40 = vld [vmem:[%s15491_s21 + $0x46c] ss:$16 sps:$4 sm:$0xff]  }
 0x2e7   : > { %5327 = vmatprep.mubr.bf16.mxu0 %v14694_v58  ;;  %5516 = vmatprep.mubr.bf16.mxu1 %v14694_v58  ;;  %v14782_v58 = vld [vmem:[%s18955_s5 + $0x6c] ss:$24 sps:$4 sm:$0xff]  }
 0x2e9   : > { %5306 = vmatpush1.bf16.msra.mxu0 %v14620_v57  ;;  %5495 = vmatpush1.bf16.msra.mxu1 %v14623_v61  ;;  %v14713_v57 = vld [vmem:[%s15491_s21 + $0x460] ss:$16 sps:$4 sm:$0xff]   ;;  %v14716_v61 = vld [vmem:[%s15491_s21 + $0x468] ss:$16 sps:$4 sm:$0xff]  }
 0x2ea   : > { %5307 = vmatprep.subr.bf16.mxu0 %v14628_v5  ;;  %5496 = vmatprep.subr.bf16.mxu1 %v14631_v59  ;;  %v14721_v5 = vld [vmem:[%s15491_s21 + $0x484] ss:$16 sps:$4 sm:$0xff]   ;;  %v14724_v59 = vld [vmem:[%s15491_s21 + $0x48c] ss:$16 sps:$4 sm:$0xff]  }
 0x2ed   : > { %5308 = vmatpush1.bf16.msra.mxu0 %v14626_v60  ;;  %5497 = vmatpush1.bf16.msra.mxu1 %v14629_v62  ;;  %v14784_v60 = vld [vmem:[%s18955_s5 + $0x68] ss:$24 sps:$4 sm:$0xff]  }
 0x2ee   : > { %5309 = vmatprep.subr.bf16.mxu0 %v14634_v54  ;;  %5498 = vmatprep.subr.bf16.mxu1 %v14637_v55  ;;  %v14719_v62 = vld [vmem:[%s15491_s21 + $0x480] ss:$16 sps:$4 sm:$0xff]   ;;  %v14722_v54 = vld [vmem:[%s15491_s21 + $0x488] ss:$16 sps:$4 sm:$0xff]   ;;  %v14727_v55 = vld [vmem:[%s15491_s21 + $0x4a4] ss:$16 sps:$4 sm:$0xff]  }
 0x2f1   : > { %5310 = vmatpush1.bf16.msra.mxu0 %v14632_v51  ;;  %5499 = vmatpush1.bf16.msra.mxu1 %v14635_v53  ;;  %v14730_v51 = vld [vmem:[%s15491_s21 + $0x4ac] ss:$16 sps:$4 sm:$0xff]  }
 0x2f2   : > { %5311 = vmatprep.subr.bf16.mxu0 %v14640_v56  ;;  %5500 = vmatprep.subr.bf16.mxu1 %v14643_v0  ;;  %v14799_v53 = vld [vmem:[%s18955_s5 + $0x14] ss:$24 sps:$4 sm:$0xff]   ;;  %v14725_v56 = vld [vmem:[%s15491_s21 + $0x4a0] ss:$16 sps:$4 sm:$0xff]   ;;  %v14728_v0 = vld [vmem:[%s15491_s21 + $0x4a8] ss:$16 sps:$4 sm:$0xff]  }
 0x2f5   : > { %5312 = vmatpush1.bf16.msra.mxu0 %v14638_v1  ;;  %5501 = vmatpush1.bf16.msra.mxu1 %v14641_v2  ;;  %v14733_v1 = vld [vmem:[%s15491_s21 + $0x4c4] ss:$16 sps:$4 sm:$0xff]   ;;  %v14736_v2 = vld [vmem:[%s15491_s21 + $0x4cc] ss:$16 sps:$4 sm:$0xff]  }
 0x2f6   : > { %5313 = vmatprep.subr.bf16.mxu0 %v14646_v3  ;;  %5502 = vmatprep.subr.bf16.mxu1 %v14649_v4  ;;  %v14731_v3 = vld [vmem:[%s15491_s21 + $0x4c0] ss:$16 sps:$4 sm:$0xff]   ;;  %v14734_v4 = vld [vmem:[%s15491_s21 + $0x4c8] ss:$16 sps:$4 sm:$0xff]  }
 0x2f9   : > { %5314 = vmatpush1.bf16.msra.mxu0 %v14644_v49  ;;  %5503 = vmatpush1.bf16.msra.mxu1 %v14647_v6  ;;  %v14739_v49 = vld [vmem:[%s15491_s21 + $0x4e4] ss:$16 sps:$4 sm:$0xff]   ;;  %v14742_v6 = vld [vmem:[%s15491_s21 + $0x4ec] ss:$16 sps:$4 sm:$0xff]  }
 0x2fa   : > { %5315 = vmatprep.subr.bf16.mxu0 %v14652_v7  ;;  %5504 = vmatprep.subr.bf16.mxu1 %v14655_v63  ;;  %v14737_v7 = vld [vmem:[%s15491_s21 + $0x4e0] ss:$16 sps:$4 sm:$0xff]   ;;  %v14740_v63 = vld [vmem:[%s15491_s21 + $0x4e8] ss:$16 sps:$4 sm:$0xff]  }
 0x2fd   : > { %5316 = vmatpush1.bf16.msra.mxu0 %v14650_v8  ;;  %5505 = vmatpush1.bf16.msra.mxu1 %v14653_v9  ;;  %v14745_v8 = vld [vmem:[%s15491_s21 + $0x504] ss:$16 sps:$4 sm:$0xff]   ;;  %v14748_v9 = vld [vmem:[%s15491_s21 + $0x50c] ss:$16 sps:$4 sm:$0xff]  }
 0x2fe   : > { %5317 = vmatprep.subr.bf16.mxu0 %v14658_v10  ;;  %5506 = vmatprep.subr.bf16.mxu1 %v14661_v11  ;;  %v14743_v10 = vld [vmem:[%s15491_s21 + $0x500] ss:$16 sps:$4 sm:$0xff]   ;;  %v14746_v11 = vld [vmem:[%s15491_s21 + $0x508] ss:$16 sps:$4 sm:$0xff]  }
 0x301   : > { %5318 = vmatpush1.bf16.msra.mxu0 %v14656_v12  ;;  %5507 = vmatpush1.bf16.msra.mxu1 %v14659_v13  ;;  %v14751_v12 = vld [vmem:[%s15491_s21 + $0x524] ss:$16 sps:$4 sm:$0xff]   ;;  %v14754_v13 = vld [vmem:[%s15491_s21 + $0x52c] ss:$16 sps:$4 sm:$0xff]  }
 0x302   : > { %5319 = vmatprep.subr.bf16.mxu0 %v14666_v14  ;;  %5508 = vmatprep.subr.bf16.mxu1 %v14669_v15  ;;  %v14749_v14 = vld [vmem:[%s15491_s21 + $0x520] ss:$16 sps:$4 sm:$0xff]   ;;  %v14752_v15 = vld [vmem:[%s15491_s21 + $0x528] ss:$16 sps:$4 sm:$0xff]  }
 0x305   : > { %5320 = vmatpush1.bf16.msra.mxu0 %v14664_v16  ;;  %5509 = vmatpush1.bf16.msra.mxu1 %v14667_v18  ;;  %v14757_v16 = vld [vmem:[%s15491_s21 + $0x544] ss:$16 sps:$4 sm:$0xff]   ;;  %v14760_v18 = vld [vmem:[%s15491_s21 + $0x54c] ss:$16 sps:$4 sm:$0xff]  }
 0x306   : > { %5321 = vmatprep.subr.bf16.mxu0 %v14673_v19  ;;  %5510 = vmatprep.subr.bf16.mxu1 %v14676_v20  ;;  %v14755_v19 = vld [vmem:[%s15491_s21 + $0x540] ss:$16 sps:$4 sm:$0xff]   ;;  %v14758_v20 = vld [vmem:[%s15491_s21 + $0x548] ss:$16 sps:$4 sm:$0xff]  }
 0x309   : > { %5322 = vmatpush1.bf16.msra.mxu0 %v14671_v21  ;;  %5511 = vmatpush1.bf16.msra.mxu1 %v14674_v22  ;;  %v14763_v21 = vld [vmem:[%s15491_s21 + $0x564] ss:$16 sps:$4 sm:$0xff]   ;;  %v14766_v22 = vld [vmem:[%s15491_s21 + $0x56c] ss:$16 sps:$4 sm:$0xff]  }
 0x30a   : > { %5323 = vmatprep.subr.bf16.mxu0 %v14681_v24  ;;  %5512 = vmatprep.subr.bf16.mxu1 %v14684_v17  ;;  %v14761_v24 = vld [vmem:[%s15491_s21 + $0x560] ss:$16 sps:$4 sm:$0xff]   ;;  %v14764_v17 = vld [vmem:[%s15491_s21 + $0x568] ss:$16 sps:$4 sm:$0xff]  }
 0x30d   : > { %5324 = vmatpush1.bf16.msra.mxu0 %v14679_v25  ;;  %5513 = vmatpush1.bf16.msra.mxu1 %v14682_v26  ;;  %v14772_v25 = vld [vmem:[%s15491_s21 + $0x584] ss:$16 sps:$4 sm:$0xff]   ;;  %v14775_v26 = vld [vmem:[%s15491_s21 + $0x58c] ss:$16 sps:$4 sm:$0xff]  }
 0x30e   : > { %5325 = vmatprep.subr.bf16.mxu0 %v14688_v27  ;;  %5514 = vmatprep.subr.bf16.mxu1 %v14691_v45  ;;  %v14770_v27 = vld [vmem:[%s15491_s21 + $0x580] ss:$16 sps:$4 sm:$0xff]   ;;  %v14773_v45 = vld [vmem:[%s15491_s21 + $0x588] ss:$16 sps:$4 sm:$0xff]  }
 0x311   : > { %5326 = vmatpush1.bf16.msra.mxu0 %v14686_v29  ;;  %5515 = vmatpush1.bf16.msra.mxu1 %v14689_v30  ;;  %v14778_v29 = vld [vmem:[%s15491_s21 + $0x5a4] ss:$16 sps:$4 sm:$0xff]   ;;  %v14781_v30 = vld [vmem:[%s15491_s21 + $0x5ac] ss:$16 sps:$4 sm:$0xff]  }
 0x312   : > { %5358 = vmatprep.subr.bf16.mxu0 %v14697_v31  ;;  %5547 = vmatprep.subr.bf16.mxu1 %v14700_v32  ;;  %v14776_v31 = vld [vmem:[%s15491_s21 + $0x5a0] ss:$16 sps:$4 sm:$0xff]   ;;  %v14779_v32 = vld [vmem:[%s15491_s21 + $0x5a8] ss:$16 sps:$4 sm:$0xff]  }
 0x314   : > { %5328 = vmatmul.mubr.bf16.vlgmr.msra.gmra.mrb[36].mxu0 %v14692_v33  ;;  %5517 = vmatmul.mubr.bf16.vlgmr.msra.gmra.mrb[36].mxu1 %v14692_v33  ;;  %v14787_v33 = vld [vmem:[%s15491_s21 + $0x5c4] ss:$16 sps:$4 sm:$0xff]  }
 0x315   : > { %5359 = vmatpush1.bf16.msra.mxu0 %v14695_v34  ;;  %5548 = vmatpush1.bf16.msra.mxu1 %v14698_v35  ;;  %v14790_v34 = vld [vmem:[%s15491_s21 + $0x5cc] ss:$16 sps:$4 sm:$0xff]   ;;  %v14785_v35 = vld [vmem:[%s15491_s21 + $0x5c0] ss:$16 sps:$4 sm:$0xff]  }
 0x316   : > { %5360 = vmatprep.subr.bf16.mxu0 %v14703_v36  ;;  %5549 = vmatprep.subr.bf16.mxu1 %v14706_v37  ;;  %v14788_v36 = vld [vmem:[%s15491_s21 + $0x5c8] ss:$16 sps:$4 sm:$0xff]   ;;  %v14793_v37 = vld [vmem:[%s15491_s21 + $0x5e4] ss:$16 sps:$4 sm:$0xff]  }
 0x317   : > { %5337 = vmatprep.mubr.bf16.mxu0 %v14767_v23  ;;  %5526 = vmatprep.mubr.bf16.mxu1 %v14767_v23  ;;  %v14796_v23 = vld [vmem:[%s15491_s21 + $0x5ec] ss:$16 sps:$4 sm:$0xff]  }
 0x319   : > { %5361 = vmatpush1.bf16.msra.mxu0 %v14701_v38  ;;  %5550 = vmatpush1.bf16.msra.mxu1 %v14704_v41  ;;  %v14791_v38 = vld [vmem:[%s15491_s21 + $0x5e0] ss:$16 sps:$4 sm:$0xff]   ;;  %v14794_v41 = vld [vmem:[%s15491_s21 + $0x5e8] ss:$16 sps:$4 sm:$0xff]  }
 0x31a   : > { %5362 = vmatprep.subr.bf16.mxu0 %v14709_v43  ;;  %5551 = vmatprep.subr.bf16.mxu1 %v14712_v44  ;;  %v14800_v43 = vld [vmem:[%s15496_s11 + $0x140] sm:$0xff]  }
 0x31b   : > { %v14801_v44 = vld [vmem:[%s15496_s11 + $0x1c0] sm:$0xff]  }
 0x31c   : > { %5338 = vmatmul.mubr.bf16.gmra.mrb[40].mxu0 %v14769_v46  ;;  %5527 = vmatmul.mubr.bf16.gmra.mrb[40].mxu1 %v14769_v46 }
 0x31d   : > { %5363 = vmatpush1.bf16.msra.mxu0 %v14707_v47  ;;  %5552 = vmatpush1.bf16.msra.mxu1 %v14710_v48 }
 0x31e   : > { %5364 = vmatprep.subr.bf16.mxu0 %v14715_v50  ;;  %5553 = vmatprep.subr.bf16.mxu1 %v14718_v40  ;;  %v14797_v40 = vld [vmem:[%s18955_s5 + $0x10] ss:$24 sps:$4 sm:$0xff]  }
 0x31f   : > { %5347 = vmatprep.mubr.bf16.mxu0 %v14782_v58  ;;  %5536 = vmatprep.mubr.bf16.mxu1 %v14782_v58  ;;  %v14802_v58 = vld [vmem:[%s15496_s11 + $0x100] sm:$0xff]  }
 0x321   : > { %5365 = vmatpush1.bf16.msra.mxu0 %v14713_v57  ;;  %5554 = vmatpush1.bf16.msra.mxu1 %v14716_v61  ;;  %v14803_v57 = vld [vmem:[%s15496_s11 + $0x180] sm:$0xff]   ;;  %v14804_v61 = vld [vmem:[%s15496_s11 + $0x148] sm:$0xff]  }
 0x322   : > { %5366 = vmatprep.subr.bf16.mxu0 %v14721_v5  ;;  %5555 = vmatprep.subr.bf16.mxu1 %v14724_v59  ;;  %v14805_v5 = vld [vmem:[%s15496_s11 + $0x1c8] sm:$0xff]  }
 0x324   : > { %5348 = vmatmul.mubr.bf16.gmra.mrb[44].mxu0 %v14784_v60  ;;  %5537 = vmatmul.mubr.bf16.gmra.mrb[44].mxu1 %v14784_v60 }
 0x325   : > { %5367 = vmatpush1.bf16.msra.mxu0 %v14719_v62  ;;  %5556 = vmatpush1.bf16.msra.mxu1 %v14722_v54  ;;  %v14808_v62 = vld [vmem:[%s18955_s5 + $0x44] ss:$24 sps:$4 sm:$0xff]  }
 0x326   : > { %5368 = vmatprep.subr.bf16.mxu0 %v14727_v55  ;;  %5557 = vmatprep.subr.bf16.mxu1 %v14730_v51  ;;  %v14853_v55 = vld [vmem:[%s15496_s11 + $0x98] sm:$0xff]   ;;  %v14856_v54 = vld [vmem:[%s15496_s11 + $0x20] sm:$0xff]  }
 0x327   : > { %5390 = vmatprep.mubr.bf16.mxu0 %v14799_v53  ;;  %5579 = vmatprep.mubr.bf16.mxu1 %v14799_v53 }
 0x329   : > { %5369 = vmatpush1.bf16.msra.mxu0 %v14725_v56  ;;  %5558 = vmatpush1.bf16.msra.mxu1 %v14728_v0  ;;  %v14859_v0 = vld [vmem:[%s15496_s11 + $0xe8] sm:$0xff]  }
 0x32a   : > { %5370 = vmatprep.subr.bf16.mxu0 %v14733_v1  ;;  %5559 = vmatprep.subr.bf16.mxu1 %v14736_v2  ;;  %v14806_v1 = vld [vmem:[%s15496_s11 + $0x108] sm:$0xff]  }
 0x32b   : > { %v14807_v2 = vld [vmem:[%s15496_s11 + $0x188] sm:$0xff]  }
 0x32d   : > { %5371 = vmatpush1.bf16.msra.mxu0 %v14731_v3  ;;  %5560 = vmatpush1.bf16.msra.mxu1 %v14734_v4  ;;  %v14811_v3 = vld [vmem:[%s15496_s11 + $0x150] sm:$0xff]  }
 0x32e   : > { %5372 = vmatprep.subr.bf16.mxu0 %v14739_v49  ;;  %5561 = vmatprep.subr.bf16.mxu1 %v14742_v6  ;;  %v14812_v4 = vld [vmem:[%s15496_s11 + $0x1d0] sm:$0xff]  }
 0x331   : > { %5373 = vmatpush1.bf16.msra.mxu0 %v14737_v7  ;;  %5562 = vmatpush1.bf16.msra.mxu1 %v14740_v63 }
 0x332   : > { %5374 = vmatprep.subr.bf16.mxu0 %v14745_v8  ;;  %5563 = vmatprep.subr.bf16.mxu1 %v14748_v9  ;;  %v14810_v8 = vld [vmem:[%s18955_s5 + $0x40] ss:$24 sps:$4 sm:$0xff]   ;;  %v14813_v9 = vld [vmem:[%s15496_s11 + $0x110] sm:$0xff]  }
 0x335   : > { %5375 = vmatpush1.bf16.msra.mxu0 %v14743_v10  ;;  %5564 = vmatpush1.bf16.msra.mxu1 %v14746_v11  ;;  %v14814_v10 = vld [vmem:[%s15496_s11 + $0x190] sm:$0xff]   ;;  %v14815_v11 = vld [vmem:[%s15496_s11 + $0x158] sm:$0xff]  }
 0x336   : > { %5376 = vmatprep.subr.bf16.mxu0 %v14751_v12  ;;  %5565 = vmatprep.subr.bf16.mxu1 %v14754_v13  ;;  %v14816_v12 = vld [vmem:[%s15496_s11 + $0x1d8] sm:$0xff]  }
 0x339   : > { %5377 = vmatpush1.bf16.msra.mxu0 %v14749_v14  ;;  %5566 = vmatpush1.bf16.msra.mxu1 %v14752_v15  ;;  %v14819_v15 = vld [vmem:[%s18955_s5 + $0x74] ss:$24 sps:$4 sm:$0xff]  }
 0x33a   : > { %5378 = vmatprep.subr.bf16.mxu0 %v14757_v16  ;;  %5567 = vmatprep.subr.bf16.mxu1 %v14760_v18  ;;  %v14849_v18 = vld [vmem:[%s15496_s11 + $0x90] sm:$0xff]  }
 0x33d   : > { %5379 = vmatpush1.bf16.msra.mxu0 %v14755_v19  ;;  %5568 = vmatpush1.bf16.msra.mxu1 %v14758_v20 }
 0x33e   : > { %5380 = vmatprep.subr.bf16.mxu0 %v14763_v21  ;;  %5569 = vmatprep.subr.bf16.mxu1 %v14766_v22  ;;  %v14852_v21 = vld [vmem:[%s15496_s11 + $0x18] sm:$0xff]  }
 0x341   : > { %5381 = vmatpush1.bf16.msra.mxu0 %v14761_v24  ;;  %5570 = vmatpush1.bf16.msra.mxu1 %v14764_v17  ;;  %v14817_v24 = vld [vmem:[%s15496_s11 + $0x118] sm:$0xff]  }
 0x342   : > { %5382 = vmatprep.subr.bf16.mxu0 %v14772_v25  ;;  %5571 = vmatprep.subr.bf16.mxu1 %v14775_v26  ;;  %v14818_v17 = vld [vmem:[%s15496_s11 + $0x198] sm:$0xff]   ;;  %v14822_v25 = vld [vmem:[%s15496_s11 + $0x160] sm:$0xff]  }
 0x343   : > { %v14823_v26 = vld [vmem:[%s15496_s11 + $0x1e0] sm:$0xff]  }
 0x345   : > { %5383 = vmatpush1.bf16.msra.mxu0 %v14770_v27  ;;  %5572 = vmatpush1.bf16.msra.mxu1 %v14773_v45 }
 0x346   : > { %5384 = vmatprep.subr.bf16.mxu0 %v14778_v29  ;;  %5573 = vmatprep.subr.bf16.mxu1 %v14781_v30 }
 0x349   : > { %5385 = vmatpush1.bf16.msra.mxu0 %v14776_v31  ;;  %5574 = vmatpush1.bf16.msra.mxu1 %v14779_v32  ;;  %v14821_v31 = vld [vmem:[%s18955_s5 + $0x70] ss:$24 sps:$4 sm:$0xff]   ;;  %v14824_v32 = vld [vmem:[%s15496_s11 + $0x120] sm:$0xff]  }
 0x34a   : > { %5386 = vmatprep.subr.bf16.mxu0 %v14787_v33  ;;  %5575 = vmatprep.subr.bf16.mxu1 %v14790_v34  ;;  %v14825_v33 = vld [vmem:[%s15496_s11 + $0x1a0] sm:$0xff]   ;;  %v14826_v34 = vld [vmem:[%s15496_s11 + $0x168] sm:$0xff]  }
 0x34d   : > { %5387 = vmatpush1.bf16.msra.mxu0 %v14785_v35  ;;  %5576 = vmatpush1.bf16.msra.mxu1 %v14788_v36  ;;  %v14827_v35 = vld [vmem:[%s15496_s11 + $0x1e8] sm:$0xff]  }
 0x34e   : > { %5388 = vmatprep.subr.bf16.mxu0 %v14793_v37  ;;  %5577 = vmatprep.subr.bf16.mxu1 %v14796_v23 }
 0x34f   : > { %v16365_v46 = vpop.f32.mrb[12].mxu0  ;;  %v16367_v47 = vpop.f32.mrb[12].mxu1 }
 0x350   : > { %v16369_v48 = vpop.f32.mrb[13].mxu0  ;;  %v16371_v50 = vpop.f32.mrb[13].mxu1 }
 0x351   : > { %5389 = vmatpush1.bf16.msra.mxu0 %v14791_v38  ;;  %5578 = vmatpush1.bf16.msra.mxu1 %v14794_v41  ;;  %v14845_v38 = vld [vmem:[%s15496_s11 + $0x88] sm:$0xff]  }
 0x352   : > { %13373 = vmatprep.subr.bf16.mxu0 %v14800_v43  ;;  %13407 = vmatprep.subr.bf16.mxu1 %v14801_v44 }
 0x353   : > { %v16380_v59 = vpop.f32.mrb[14].mxu0  ;;  %v16382_v60 = vpop.f32.mrb[14].mxu1 }
 0x354   : > { %5391 = vmatmul.mubr.bf16.vlgmr.msra.gmra.mrb[36].mxu0 %v14797_v40  ;;  %5580 = vmatmul.mubr.bf16.vlgmr.msra.gmra.mrb[36].mxu1 %v14797_v40  ;;  %v16391_v51 = vpop.f32.mrb[15].mxu0  ;;  %v16393_v53 = vpop.f32.mrb[15].mxu1 }
 0x355   : > { %v5803_v56 = vpack.c.bf16 %v16391_v51, %v16369_v48  ;;  %13374 = vmatpush3.bf16.msra.mxu0 %v14802_v58  ;;  %13408 = vmatpush3.bf16.msra.mxu1 %v14803_v57  ;;  %v14828_v58 = vld [vmem:[%s15496_s11 + $0x128] sm:$0xff]   ;;  %v14865_v48 = vld [vmem:[%s15496_s11 + $0xb0] sm:$0xff]   ;;  %v14866_v51 = vld [vmem:[%s15496_s11 + $0x78] sm:$0xff]  }
 0x356   : > { %13375 = vmatprep.subr.bf16.mxu0 %v14804_v61  ;;  %13409 = vmatprep.subr.bf16.mxu1 %v14805_v5  ;;  %v14829_v57 = vld [vmem:[%s15496_s11 + $0x1a8] sm:$0xff]   ;;  %v14830_v61 = vld [vmem:[%s15496_s11 + $0x170] sm:$0xff]  }
 0x357   : > { %v16403_v49 = vpop.f32.mrb[16].mxu0  ;;  %v16405_v6 = vpop.f32.mrb[16].mxu1  ;;  %5400 = vmatprep.mubr.bf16.mxu0 %v14808_v62  ;;  %5589 = vmatprep.mubr.bf16.mxu1 %v14808_v62  ;;  %v14831_v5 = vld [vmem:[%s15496_s11 + $0x1f0] sm:$0xff]  }
 0x358   : > { %v16407_v7 = vpop.f32.mrb[17].mxu0  ;;  %v16409_v63 = vpop.f32.mrb[17].mxu1 }
 0x359   : > { %13376 = vmatpush3.bf16.msra.mxu0 %v14806_v1  ;;  %13410 = vmatpush3.bf16.msra.mxu1 %v14807_v2 }
 0x35a   : > { %13377 = vmatprep.subr.bf16.mxu0 %v14811_v3  ;;  %13411 = vmatprep.subr.bf16.mxu1 %v14812_v4  ;;  %v14832_v4 = vld [vmem:[%s15496_s11 + $0x130] sm:$0xff]  }
 0x35b   : > { %v16418_v13 = vpop.f32.mrb[18].mxu0  ;;  %v16420_v14 = vpop.f32.mrb[18].mxu1 }
 0x35c   : > { %5401 = vmatmul.mubr.bf16.gmra.mrb[40].mxu0 %v14810_v8  ;;  %5590 = vmatmul.mubr.bf16.gmra.mrb[40].mxu1 %v14810_v8  ;;  %v16429_v19 = vpop.f32.mrb[19].mxu0  ;;  %v16431_v20 = vpop.f32.mrb[19].mxu1  ;;  %v14833_v8 = vld [vmem:[%s15496_s11 + $0x1b0] sm:$0xff]  }
 0x35d   : > { %13378 = vmatpush3.bf16.msra.mxu0 %v14813_v9  ;;  %13412 = vmatpush3.bf16.msra.mxu1 %v14814_v10  ;;  %v14834_v9 = vld [vmem:[%s15496_s11 + $0x178] sm:$0xff]  }
 0x35e   : > { %13379 = vmatprep.subr.bf16.mxu0 %v14815_v11  ;;  %13413 = vmatprep.subr.bf16.mxu1 %v14816_v12  ;;  %v14835_v10 = vld [vmem:[%s15496_s11 + $0x1f8] sm:$0xff]  }
 0x35f   : > { %v16441_v27 = vpop.f32.mrb[20].mxu0  ;;  %v16443_v45 = vpop.f32.mrb[20].mxu1  ;;  %5410 = vmatprep.mubr.bf16.mxu0 %v14819_v15  ;;  %5599 = vmatprep.mubr.bf16.mxu1 %v14819_v15 }
 0x360   : > { %v16445_v29 = vpop.f32.mrb[21].mxu0  ;;  %v16447_v30 = vpop.f32.mrb[21].mxu1 }
 0x361   : > { %13380 = vmatpush3.bf16.msra.mxu0 %v14817_v24  ;;  %13414 = vmatpush3.bf16.msra.mxu1 %v14818_v17 }
 0x362   : > { %13381 = vmatprep.subr.bf16.mxu0 %v14822_v25  ;;  %13415 = vmatprep.subr.bf16.mxu1 %v14823_v26 }
 0x363   : > { %v16456_v36 = vpop.f32.mrb[22].mxu0  ;;  %v16458_v37 = vpop.f32.mrb[22].mxu1 }
 0x364   : > { %5411 = vmatmul.mubr.bf16.gmra.mrb[44].mxu0 %v14821_v31  ;;  %5600 = vmatmul.mubr.bf16.gmra.mrb[44].mxu1 %v14821_v31  ;;  %v16464_v41 = vpop.f32.mrb[23].mxu0  ;;  %v16466_v43 = vpop.f32.mrb[23].mxu1 }
 0x365   : > { %13382 = vmatpush3.bf16.msra.mxu0 %v14824_v32  ;;  %13416 = vmatpush3.bf16.msra.mxu1 %v14825_v33  ;;  %v14836_v32 = vld [vmem:[%s15496_s11 + $0x138] sm:$0xff]  }
 0x366   : > { %13383 = vmatprep.subr.bf16.mxu0 %v14826_v34  ;;  %13417 = vmatprep.subr.bf16.mxu1 %v14827_v35  ;;  %v14837_v33 = vld [vmem:[%s15496_s11 + $0x1b8] sm:$0xff]   ;;  %v14838_v34 = vld [vmem:[%s15496_s11 + $0x40] sm:$0xff]  }
 0x367   : > { %v16476_v62 = vpop.f32.mrb[24].mxu0  ;;  %v16478_v1 = vpop.f32.mrb[24].mxu1  ;;  %v14839_v35 = vld [vmem:[%s15496_s11 + $0xc0] sm:$0xff]  }
 0x368   : > { %v16480_v2 = vpop.f32.mrb[25].mxu0  ;;  %v16482_v3 = vpop.f32.mrb[25].mxu1 }
 0x369   : > { %13384 = vmatpush3.bf16.msra.mxu0 %v14828_v58  ;;  %13418 = vmatpush3.bf16.msra.mxu1 %v14829_v57 }
 0x36a   : > { %13385 = vmatprep.subr.bf16.mxu0 %v14830_v61  ;;  %13419 = vmatprep.subr.bf16.mxu1 %v14831_v5 }
 0x36b   : > { %v16488_v11 = vpop.f32.mrb[26].mxu0  ;;  %v16490_v12 = vpop.f32.mrb[26].mxu1 }
 0x36c   : > { %v5814_v15 = vpack.c.bf16 %v16488_v11, %v16476_v62  ;;  %v5816_v24 = vpack.c.bf16 %v16490_v12, %v16478_v1  ;;  %v16496_v17 = vpop.f32.mrb[27].mxu0  ;;  %v16498_v25 = vpop.f32.mrb[27].mxu1 }
 0x36d   : > { %v5815_v26 = vpack.c.bf16 %v16496_v17, %v16480_v2  ;;  %v5817_v31 = vpack.c.bf16 %v16498_v25, %v16482_v3  ;;  %13386 = vmatpush3.bf16.msra.mxu0 %v14832_v4  ;;  %13420 = vmatpush3.bf16.msra.mxu1 %v14833_v8  ;;  %v14840_v4 = vld [vmem:[%s15496_s11] sm:$0xff]  }
 0x36e   : > { %13387 = vmatprep.subr.bf16.mxu0 %v14834_v9  ;;  %13421 = vmatprep.subr.bf16.mxu1 %v14835_v10  ;;  %v14841_v8 = vld [vmem:[%s15496_s11 + $0x80] sm:$0xff]   ;;  %v14842_v9 = vld [vmem:[%s15496_s11 + $0x48] sm:$0xff]  }
 0x36f   : > { %v16508_v58 = vpop.f32.mrb[28].mxu0  ;;  %v16510_v57 = vpop.f32.mrb[28].mxu1  ;;  %6050 = vmatprep.mubr.bf16.mxu0 %v5815_v26  ;;  %6107 = vmatprep.mubr.bf16.mxu1 %v5817_v31  ;;  %v14843_v10 = vld [vmem:[%s15496_s11 + $0xc8] sm:$0xff]  }
 0x370   : > { %v16512_v61 = vpop.f32.mrb[29].mxu0  ;;  %v16514_v5 = vpop.f32.mrb[29].mxu1 }
 0x371   : > { %13388 = vmatpush3.bf16.msra.mxu0 %v14836_v32  ;;  %13422 = vmatpush3.bf16.msra.mxu1 %v14837_v33 }
 0x372   : > { %13441 = vmatprep.subr.bf16.mxu0 %v14838_v34  ;;  %13475 = vmatprep.subr.bf16.mxu1 %v14839_v35 }
 0x373   : > { %v16520_v39 = vpop.f32.mrb[30].mxu0  ;;  %v16522_v52 = vpop.f32.mrb[30].mxu1 }
 0x374   : > { %v5818_v26 = vpack.c.bf16 %v16520_v39, %v16508_v58  ;;  %v5820_v31 = vpack.c.bf16 %v16522_v52, %v16510_v57  ;;  %6051 = vmatmul.mubr.bf16.vlgmr.msra.gmra.mrb[48].mxu0 %v5814_v15  ;;  %6108 = vmatmul.mubr.bf16.vlgmr.msra.gmra.mrb[48].mxu1 %v5816_v24  ;;  %v16528_v32 = vpop.f32.mrb[31].mxu0  ;;  %v16530_v33 = vpop.f32.mrb[31].mxu1  ;;  %v14846_v15 = vld [vmem:[%s15496_s11 + $0x50] sm:$0xff]  }
 0x375   : > { %v5819_v34 = vpack.c.bf16 %v16528_v32, %v16512_v61  ;;  %v5821_v35 = vpack.c.bf16 %v16530_v33, %v16514_v5  ;;  %13442 = vmatpush3.bf16.msra.mxu0 %v14840_v4  ;;  %13476 = vmatpush3.bf16.msra.mxu1 %v14841_v8  ;;  %v14847_v24 = vld [vmem:[%s15496_s11 + $0xd0] sm:$0xff]  }
 0x376   : > { %13443 = vmatprep.subr.bf16.mxu0 %v14842_v9  ;;  %13477 = vmatprep.subr.bf16.mxu1 %v14843_v10  ;;  %v14848_v8 = vld [vmem:[%s15496_s11 + $0x10] sm:$0xff]   ;;  %v14850_v9 = vld [vmem:[%s15496_s11 + $0x58] sm:$0xff]  }
 0x377   : > { %v16540_v23 = vpop.f32.mrb[32].mxu0  ;;  %v16542_v40 = vpop.f32.mrb[32].mxu1  ;;  %6058 = vmatprep.mubr.bf16.mxu0 %v5819_v34  ;;  %6115 = vmatprep.mubr.bf16.mxu1 %v5821_v35  ;;  %v14851_v10 = vld [vmem:[%s15496_s11 + $0xd8] sm:$0xff]  }
 0x378   : > { %18993 = vst [vmem:[#allocation7_spill] sm:$0xff] %v16540_v23  ;;  %18994 = vst [vmem:[#allocation8_spill] sm:$0xff] %v16542_v40  ;;  %v16544_v44 = vpop.f32.mrb[33].mxu0  ;;  %v16546_v4 = vpop.f32.mrb[33].mxu1 }
 0x379   : > { %18995 = vst [vmem:[#allocation9_spill] sm:$0xff] %v16546_v4  ;;  %13444 = vmatpush3.bf16.msra.mxu0 %v14844_v28  ;;  %13478 = vmatpush3.bf16.msra.mxu1 %v14845_v38 }
 0x37a   : > { %13445 = vmatprep.subr.bf16.mxu0 %v14846_v15  ;;  %13479 = vmatprep.subr.bf16.mxu1 %v14847_v24 }
 0x37b   : > { %v16552_v16 = vpop.f32.mrb[34].mxu0  ;;  %v16554_v22 = vpop.f32.mrb[34].mxu1 }
 0x37c   : > { %18996 = vst [vmem:[#allocation10_spill] sm:$0xff] %v16552_v16  ;;  %18997 = vst [vmem:[#allocation11_spill] sm:$0xff] %v16554_v22  ;;  %v5822_v34 = vpack.c.bf16 %v16552_v16, %v16540_v23  ;;  %v5824_v28 = vpack.c.bf16 %v16554_v22, %v16542_v40  ;;  %6059 = vmatmul.mubr.bf16.gmra.mrb[52].mxu0 %v5818_v26  ;;  %6116 = vmatmul.mubr.bf16.gmra.mrb[52].mxu1 %v5820_v31  ;;  %v16560_v38 = vpop.f32.mrb[35].mxu0  ;;  %v16562_v35 = vpop.f32.mrb[35].mxu1  ;;  %v14854_v26 = vld [vmem:[%s15496_s11 + $0x60] sm:$0xff]  }
 0x37d   : > { %v5823_v15 = vpack.c.bf16 %v16560_v38, %v16544_v44  ;;  %v5825_v24 = vpack.c.bf16 %v16562_v35, %v16546_v4  ;;  %13446 = vmatpush3.bf16.msra.mxu0 %v14848_v8  ;;  %13480 = vmatpush3.bf16.msra.mxu1 %v14849_v18  ;;  %v14855_v31 = vld [vmem:[%s15496_s11 + $0xe0] sm:$0xff]   ;;  %v14858_v18 = vld [vmem:[%s15496_s11 + $0x68] sm:$0xff]  }
 0x37e   : > { %13447 = vmatprep.subr.bf16.mxu0 %v14850_v9  ;;  %13481 = vmatprep.subr.bf16.mxu1 %v14851_v10  ;;  %v14857_v8 = vld [vmem:[%s15496_s11 + $0xa0] sm:$0xff]   ;;  %v14861_v9 = vld [vmem:[%s15496_s11 + $0xa8] sm:$0xff]   ;;  %v14862_v10 = vld [vmem:[%s15496_s11 + $0x70] sm:$0xff]  }
 0x37f   : > { %6066 = vmatprep.mubr.bf16.mxu0 %v5823_v15  ;;  %6123 = vmatprep.mubr.bf16.mxu1 %v5825_v24  ;;  %v14872_v15 = vld [vmem:[%s15496_s11 + $0x200] sm:$0xff]  }
 0x380   : > { %v14873_v24 = vld [vmem:[%s15496_s11 + $0x280] sm:$0xff]  }
 0x381   : > { %13448 = vmatpush3.bf16.msra.mxu0 %v14852_v21  ;;  %13482 = vmatpush3.bf16.msra.mxu1 %v14853_v55  ;;  %v14860_v21 = vld [vmem:[%s15496_s11 + $0x28] sm:$0xff]   ;;  %v18998_v55 = vpack.c.bf16 %v16393_v53, %v16371_v50  ;;  %v14867_v50 = vld [vmem:[%s15496_s11 + $0xf8] sm:$0xff]  }
 0x382   : > { %13449 = vmatprep.subr.bf16.mxu0 %v14854_v26  ;;  %13483 = vmatprep.subr.bf16.mxu1 %v14855_v31  ;;  %v14868_v53 = vld [vmem:[%s15496_s11 + $0x38] sm:$0xff]   ;;  %v14874_v26 = vld [vmem:[%s15496_s11 + $0x248] sm:$0xff]   ;;  %v18999_v31 = vpack.c.bf16 %v16380_v59, %v16365_v46  ;;  %v14878_v59 = vld [vmem:[%s15496_s11 + $0x250] sm:$0xff]  }
 0x383   : > { %v14877_v46 = vld [vmem:[%s15496_s11 + $0x288] sm:$0xff]  }
 0x384   : > { %6067 = vmatmul.mubr.bf16.gmra.mrb[56].mxu0 %v5822_v34  ;;  %6124 = vmatmul.mubr.bf16.gmra.mrb[56].mxu1 %v5824_v28  ;;  %v14863_v34 = vld [vmem:[%s15496_s11 + $0xf0] sm:$0xff]   ;;  %v14871_v28 = vld [vmem:[%s15496_s11 + $0x2c0] sm:$0xff]  }
 0x385   : > { %13450 = vmatpush3.bf16.msra.mxu0 %v14856_v54  ;;  %6356 = vmatprep.mubr.bf16.mxu0 %v5803_v56  ;;  %v14864_v54 = vld [vmem:[%s15496_s11 + $0x30] sm:$0xff]   ;;  %v14869_v56 = vld [vmem:[%s15496_s11 + $0xb8] sm:$0xff]  }
 0x386   : > { %13484 = vmatpush3.bf16.msra.mxu1 %v14857_v8  ;;  %6413 = vmatprep.mubr.bf16.mxu1 %v18998_v55  ;;  %v14875_v8 = vld [vmem:[%s15496_s11 + $0x2c8] sm:$0xff]   ;;  %v19002_v55 = vpack.c.bf16 %v16431_v20, %v16409_v63  ;;  %v14882_v63 = vld [vmem:[%s15496_s11 + $0x258] sm:$0xff]  }
 0x387   : > { %13451 = vmatprep.subr.bf16.mxu0 %v14858_v18  ;;  %13485 = vmatprep.subr.bf16.mxu1 %v14859_v0  ;;  %v14870_v0 = vld [vmem:[%s15496_s11 + $0x240] sm:$0xff]   ;;  %v19000_v18 = vpack.c.bf16 %v16382_v60, %v16367_v47  ;;  %v14879_v47 = vld [vmem:[%s15496_s11 + $0x2d0] sm:$0xff]   ;;  %v14883_v20 = vld [vmem:[%s15496_s11 + $0x2d8] sm:$0xff]  }
 0x388   : > { %v14880_v60 = vld [vmem:[%s15496_s11 + $0x210] sm:$0xff]  }
 0x389   : > { %13452 = vmatpush3.bf16.msra.mxu0 %v14860_v21  ;;  %v19001_v21 = vpack.c.bf16 %v16429_v19, %v16407_v7  ;;  %v14881_v7 = vld [vmem:[%s15496_s11 + $0x290] sm:$0xff]   ;;  %v19003_v19 = vpack.c.bf16 %v16418_v13, %v16403_v49  ;;  %v14884_v49 = vld [vmem:[%s15496_s11 + $0x218] sm:$0xff]  }
 0x38a   : > { %13486 = vmatpush3.bf16.msra.mxu1 %v14861_v9  ;;  %13453 = vmatprep.subr.bf16.mxu0 %v14862_v10  ;;  %v14876_v9 = vld [vmem:[%s15496_s11 + $0x208] sm:$0xff]   ;;  %v19004_v10 = vpack.c.bf16 %v16420_v14, %v16405_v6  ;;  %v14885_v13 = vld [vmem:[%s15496_s11 + $0x298] sm:$0xff]   ;;  %v14887_v6 = vld [vmem:[%s15496_s11 + $0x2e0] sm:$0xff]  }
 0x38b   : > { %13487 = vmatprep.subr.bf16.mxu1 %v14863_v34  ;;  %v19005_v34 = vpack.c.bf16 %v16464_v41, %v16445_v29  ;;  %v14888_v14 = vld [vmem:[%s15496_s11 + $0x220] sm:$0xff]   ;;  %v19007_v41 = vpack.c.bf16 %v16456_v36, %v16441_v27  ;;  %v14895_v27 = vld [vmem:[%s15496_s11 + $0x2f0] sm:$0xff]  }
 0x38c   : > { %v14889_v29 = vld [vmem:[%s15496_s11 + $0x2a0] sm:$0xff]   ;;  %v14896_v36 = vld [vmem:[%s15496_s11 + $0x230] sm:$0xff]  }
 0x38d   : > { %13454 = vmatpush3.bf16.msra.mxu0 %v14864_v54  ;;  %v19006_v54 = vpack.c.bf16 %v16466_v43, %v16447_v30  ;;  %v14890_v30 = vld [vmem:[%s15496_s11 + $0x268] sm:$0xff]  }
 0x38e   : > { %13488 = vmatpush3.bf16.msra.mxu1 %v14865_v48  ;;  %13455 = vmatprep.subr.bf16.mxu0 %v14866_v51  ;;  %v14886_v48 = vld [vmem:[%s15496_s11 + $0x260] sm:$0xff]   ;;  %v14891_v43 = vld [vmem:[%s15496_s11 + $0x2e8] sm:$0xff]   ;;  %v19008_v51 = vpack.c.bf16 %v16458_v37, %v16443_v45  ;;  %v14899_v45 = vld [vmem:[%s15496_s11 + $0x2f8] sm:$0xff]  }
 0x38f   : > { %13489 = vmatprep.subr.bf16.mxu1 %v14867_v50  ;;  %v14892_v50 = vld [vmem:[%s15496_s11 + $0x228] sm:$0xff]   ;;  %v14900_v37 = vld [vmem:[%s15496_s11 + $0x238] sm:$0xff]  }
 0x391   : > { %13456 = vmatpush3.bf16.msra.mxu0 %v14868_v53  ;;  %v14893_v53 = vld [vmem:[%s15496_s11 + $0x2a8] sm:$0xff]  }
 0x392   : > { %13490 = vmatpush3.bf16.msra.mxu1 %v14869_v56  ;;  %13509 = vmatprep.subr.bf16.mxu0 %v14870_v0  ;;  %v14894_v56 = vld [vmem:[%s15496_s11 + $0x270] sm:$0xff]  }
 0x393   : > { %13543 = vmatprep.subr.bf16.mxu1 %v14871_v28  ;;  %v14897_v0 = vld [vmem:[%s15496_s11 + $0x2b0] sm:$0xff]   ;;  %v14898_v28 = vld [vmem:[%s15496_s11 + $0x278] sm:$0xff]  }
 0x394   : > { %6357 = vmatmul.mubr.bf16.vlgmr.msra.gmra.mrb[60].mxu0 %v18999_v31 }
 0x395   : > { %6414 = vmatmul.mubr.bf16.vlgmr.msra.gmra.mrb[60].mxu1 %v19000_v18  ;;  %6364 = vmatprep.mubr.bf16.mxu0 %v19001_v21 }
 0x396   : > { %6421 = vmatprep.mubr.bf16.mxu1 %v19002_v55  ;;  %13510 = vmatpush3.bf16.msra.mxu0 %v14872_v15  ;;  %v14901_v15 = vld [vmem:[%s15496_s11 + $0x2b8] sm:$0xff]  }
 0x397   : > { %13544 = vmatpush3.bf16.msra.mxu1 %v14873_v24  ;;  %13511 = vmatprep.subr.bf16.mxu0 %v14874_v26 }
 0x398   : > { %13545 = vmatprep.subr.bf16.mxu1 %v14875_v8 }
 0x39a   : > { %13512 = vmatpush3.bf16.msra.mxu0 %v14876_v9 }
 0x39b   : > { %13546 = vmatpush3.bf16.msra.mxu1 %v14877_v46  ;;  %13513 = vmatprep.subr.bf16.mxu0 %v14878_v59 }
 0x39c   : > { %6365 = vmatmul.mubr.bf16.gmra.mrb[64].mxu0 %v19003_v19  ;;  %13547 = vmatprep.subr.bf16.mxu1 %v14879_v47 }
 0x39d   : > { %6422 = vmatmul.mubr.bf16.gmra.mrb[64].mxu1 %v19004_v10  ;;  %6372 = vmatprep.mubr.bf16.mxu0 %v19005_v34 }
 0x39e   : > { %6429 = vmatprep.mubr.bf16.mxu1 %v19006_v54  ;;  %13514 = vmatpush3.bf16.msra.mxu0 %v14880_v60 }
 0x39f   : > { %13548 = vmatpush3.bf16.msra.mxu1 %v14881_v7  ;;  %13515 = vmatprep.subr.bf16.mxu0 %v14882_v63 }
 0x3a0   : > { %13549 = vmatprep.subr.bf16.mxu1 %v14883_v20 }
 0x3a2   : > { %13516 = vmatpush3.bf16.msra.mxu0 %v14884_v49 }
 0x3a3   : > { %13550 = vmatpush3.bf16.msra.mxu1 %v14885_v13  ;;  %13517 = vmatprep.subr.bf16.mxu0 %v14886_v48 }
 0x3a4   : > { %6373 = vmatmul.mubr.bf16.gmra.mrb[68].mxu0 %v19007_v41  ;;  %13551 = vmatprep.subr.bf16.mxu1 %v14887_v6 }
 0x3a5   : > { %6430 = vmatmul.mubr.bf16.gmra.mrb[68].mxu1 %v19008_v51 }
 0x3a6   : > { %13518 = vmatpush3.bf16.msra.mxu0 %v14888_v14 }
 0x3a7   : > { %13552 = vmatpush3.bf16.msra.mxu1 %v14889_v29  ;;  %13519 = vmatprep.subr.bf16.mxu0 %v14890_v30  ;;  %v6782_v29 = vpop.permute.xlu0 %6781 }
 0x3a8   : > { %13553 = vmatprep.subr.bf16.mxu1 %v14891_v43  ;;  %vm16655_vm13 = vcmp.eq.s32.totalorder %v16056_v42, %v6782_v29 }
 0x3aa   : > { %13520 = vmatpush3.bf16.msra.mxu0 %v14892_v50 }
 0x3ab   : > { %13554 = vmatpush3.bf16.msra.mxu1 %v14893_v53  ;;  %13521 = vmatprep.subr.bf16.mxu0 %v14894_v56 }
 0x3ac   : > { %13555 = vmatprep.subr.bf16.mxu1 %v14895_v27 }
 0x3ae   : > { %13522 = vmatpush3.bf16.msra.mxu0 %v14896_v36 }
 0x3af   : > { %13556 = vmatpush3.bf16.msra.mxu1 %v14897_v0  ;;  %13523 = vmatprep.subr.bf16.mxu0 %v14898_v28 }
 0x3b0   : > { %13557 = vmatprep.subr.bf16.mxu1 %v14899_v45 }
 0x3b2   : > { %13524 = vmatpush3.bf16.msra.mxu0 %v14900_v37 }
 0x3b3   : > { %13558 = vmatpush3.bf16.msra.mxu1 %v14901_v15  ;;  %v19011_v15 = vmov 0.0  }
 0x427   : > { %v5392_v24 = vpop.f32.mrb[36].mxu0  ;;  %v5581_v26 = vpop.f32.mrb[36].mxu1 }
 0x428   : > { %v5394_v31 = vpop.f32.mrb[37].mxu0  ;;  %v5583_v8 = vpop.f32.mrb[37].mxu1 }
 0x429   : > { %v5396_v18 = vpop.f32.mrb[38].mxu0  ;;  %v5585_v21 = vpop.f32.mrb[38].mxu1 }
 0x42a   : > { %v6438_v55 = vpack.c.bf16 %v5396_v18, %v5392_v24  ;;  %v6440_v9 = vpack.c.bf16 %v5585_v21, %v5581_v26  ;;  %v5398_v46 = vpop.f32.mrb[39].mxu0  ;;  %v5587_v59 = vpop.f32.mrb[39].mxu1  ;;  %v16662_v24 = vsel %vm16655_vm13, 1.0, %v19011_v15 }
 0x42b   : > { %v6439_v47 = vpack.c.bf16 %v5398_v46, %v5394_v31  ;;  %v6441_v60 = vpack.c.bf16 %v5587_v59, %v5583_v8 }
 0x42d   : > { %6674 = vmatprep.mubr.bf16.mxu0 %v6439_v47  ;;  %6731 = vmatprep.mubr.bf16.mxu1 %v6441_v60 }
 0x42e   : > { %6675 = vmatmul.mubr.bf16.vlgmr.msra.gmra.mrb[72].mxu0 %v6438_v55  ;;  %6732 = vmatmul.mubr.bf16.vlgmr.msra.gmra.mrb[72].mxu1 %v6440_v9 }
 0x42f   : > { %v5402_v7 = vpop.f32.mrb[40].mxu0  ;;  %v5591_v63 = vpop.f32.mrb[40].mxu1 }
 0x430   : > { %v5404_v19 = vpop.f32.mrb[41].mxu0  ;;  %v5593_v20 = vpop.f32.mrb[41].mxu1 }
 0x431   : > { %v5406_v10 = vpop.f32.mrb[42].mxu0  ;;  %v5595_v34 = vpop.f32.mrb[42].mxu1 }
 0x432   : > { %v6442_v54 = vpack.c.bf16 %v5406_v10, %v5402_v7  ;;  %v6444_v49 = vpack.c.bf16 %v5595_v34, %v5591_v63  ;;  %v5408_v13 = vpop.f32.mrb[43].mxu0  ;;  %v5597_v48 = vpop.f32.mrb[43].mxu1 }
 0x433   : > { %v6443_v6 = vpack.c.bf16 %v5408_v13, %v5404_v19  ;;  %v6445_v14 = vpack.c.bf16 %v5597_v48, %v5593_v20 }
 0x435   : > { %6682 = vmatprep.mubr.bf16.mxu0 %v6443_v6  ;;  %6739 = vmatprep.mubr.bf16.mxu1 %v6445_v14 }
 0x436   : > { %6683 = vmatmul.mubr.bf16.gmra.mrb[76].mxu0 %v6442_v54  ;;  %6740 = vmatmul.mubr.bf16.gmra.mrb[76].mxu1 %v6444_v49 }
 0x437   : > { %v5412_v30 = vpop.f32.mrb[44].mxu0  ;;  %v5601_v41 = vpop.f32.mrb[44].mxu1 }
 0x438   : > { %v5414_v43 = vpop.f32.mrb[45].mxu0  ;;  %v5603_v51 = vpop.f32.mrb[45].mxu1 }
 0x439   : > { %v5416_v50 = vpop.f32.mrb[46].mxu0  ;;  %v5605_v53 = vpop.f32.mrb[46].mxu1 }
 0x43a   : > { %v6446_v56 = vpack.c.bf16 %v5416_v50, %v5412_v30  ;;  %v6448_v27 = vpack.c.bf16 %v5605_v53, %v5601_v41  ;;  %v5418_v36 = vpop.f32.mrb[47].mxu0  ;;  %v5607_v0 = vpop.f32.mrb[47].mxu1 }
 0x43b   : > { %v6447_v45 = vpack.c.bf16 %v5418_v36, %v5414_v43  ;;  %v6449_v37 = vpack.c.bf16 %v5607_v0, %v5603_v51 }
 0x43d   : > { %6690 = vmatprep.mubr.bf16.mxu0 %v6447_v45  ;;  %6747 = vmatprep.mubr.bf16.mxu1 %v6449_v37 }
 0x43e   : > { %6691 = vmatmul.mubr.bf16.gmra.mrb[80].mxu0 %v6446_v56  ;;  %6748 = vmatmul.mubr.bf16.gmra.mrb[80].mxu1 %v6448_v27 }
 0x43f   : > { %13612 = vmatprep.mubr.msk.f32.mxu1 %vm6865_vm14, %v16662_v24 }
 0x447   : > { %v13389_v26 = vpop.f32.mrb[48].mxu0  ;;  %v13423_v31 = vpop.f32.mrb[48].mxu1 }
 0x448   : > { %v13390_v8 = vpop.f32.mrb[49].mxu0  ;;  %v13424_v18 = vpop.f32.mrb[49].mxu1 }
 0x449   : > { %v13391_v21 = vadd.f32 %v13390_v8, %v13389_v26  ;;  %v13425_v55 = vadd.f32 %v13424_v18, %v13423_v31  ;;  %v13392_v9 = vpop.f32.mrb[50].mxu0  ;;  %v13426_v46 = vpop.f32.mrb[50].mxu1 }
 0x44a   : > { %v13393_v59 = vpop.f32.mrb[51].mxu0  ;;  %v13427_v47 = vpop.f32.mrb[51].mxu1 }
 0x44b   : > { %v6110_v60 = vadd.f32 %v13425_v55, %v13391_v21  ;;  %v13394_v7 = vadd.f32 %v13393_v59, %v13392_v9  ;;  %v13428_v63 = vadd.f32 %v13427_v47, %v13426_v46 }
 0x44d   : > { %v6113_v19 = vadd.f32 %v13428_v63, %v13394_v7 }
 0x44f   : > { %v13395_v20 = vpop.f32.mrb[52].mxu0  ;;  %v13429_v10 = vpop.f32.mrb[52].mxu1 }
 0x450   : > { %v13396_v34 = vpop.f32.mrb[53].mxu0  ;;  %v13430_v54 = vpop.f32.mrb[53].mxu1 }
 0x451   : > { %v13397_v49 = vadd.f32 %v13396_v34, %v13395_v20  ;;  %v13431_v13 = vadd.f32 %v13430_v54, %v13429_v10  ;;  %v13398_v48 = vpop.f32.mrb[54].mxu0  ;;  %v13432_v6 = vpop.f32.mrb[54].mxu1 }
 0x452   : > { %v13399_v14 = vpop.f32.mrb[55].mxu0  ;;  %v13433_v29 = vpop.f32.mrb[55].mxu1 }
 0x453   : > { %v6118_v30 = vadd.f32 %v13431_v13, %v13397_v49  ;;  %v13400_v41 = vadd.f32 %v13399_v14, %v13398_v48  ;;  %v13434_v43 = vadd.f32 %v13433_v29, %v13432_v6 }
 0x455   : > { %v6121_v51 = vadd.f32 %v13434_v43, %v13400_v41 }
 0x457   : > { %v13401_v50 = vpop.f32.mrb[56].mxu0  ;;  %v13435_v53 = vpop.f32.mrb[56].mxu1 }
 0x458   : > { %v13402_v56 = vpop.f32.mrb[57].mxu0  ;;  %v13436_v27 = vpop.f32.mrb[57].mxu1 }
 0x459   : > { %v13403_v36 = vadd.f32 %v13402_v56, %v13401_v50  ;;  %v13437_v0 = vadd.f32 %v13436_v27, %v13435_v53  ;;  %v13404_v45 = vpop.f32.mrb[58].mxu0  ;;  %v13438_v37 = vpop.f32.mrb[58].mxu1 }
 0x45a   : > { %v13405_v26 = vpop.f32.mrb[59].mxu0  ;;  %v13439_v31 = vpop.f32.mrb[59].mxu1 }
 0x45b   : > { %v6126_v8 = vadd.f32 %v13437_v0, %v13403_v36  ;;  %v13406_v18 = vadd.f32 %v13405_v26, %v13404_v45  ;;  %v13440_v21 = vadd.f32 %v13439_v31, %v13438_v37 }
 0x45d   : > { %v6129_v55 = vadd.f32 %v13440_v21, %v13406_v18 }
 0x467   : > { %v13457_v9 = vpop.f32.mrb[60].mxu0 }
 0x468   : > { %v13491_v46 = vpop.f32.mrb[60].mxu1  ;;  %v13458_v59 = vpop.f32.mrb[61].mxu0 }
 0x469   : > { %v13459_v47 = vadd.f32 %v13458_v59, %v13457_v9  ;;  %v13492_v7 = vpop.f32.mrb[61].mxu1  ;;  %v13460_v63 = vpop.f32.mrb[62].mxu0 }
 0x46a   : > { %v13493_v20 = vadd.f32 %v13492_v7, %v13491_v46  ;;  %v13494_v10 = vpop.f32.mrb[62].mxu1  ;;  %v13461_v34 = vpop.f32.mrb[63].mxu0 }
 0x46b   : > { %v6359_v54 = vadd.f32 %v13459_v47, %v6110_v60  ;;  %v13462_v49 = vadd.f32 %v13461_v34, %v13460_v63  ;;  %v13495_v13 = vpop.f32.mrb[63].mxu1 }
 0x46c   : > { %v13496_v48 = vadd.f32 %v13495_v13, %v13494_v10 }
 0x46d   : > { %v6416_v6 = vadd.f32 %v13493_v20, %v6359_v54  ;;  %v6362_v14 = vadd.f32 %v13462_v49, %v6113_v19 }
 0x46f   : > { %v6419_v29 = vadd.f32 %v13496_v48, %v6362_v14  ;;  %v13463_v41 = vpop.f32.mrb[64].mxu0 }
 0x470   : > { %v13497_v43 = vpop.f32.mrb[64].mxu1  ;;  %v13464_v50 = vpop.f32.mrb[65].mxu0 }
 0x471   : > { %v13465_v53 = vadd.f32 %v13464_v50, %v13463_v41  ;;  %v13498_v56 = vpop.f32.mrb[65].mxu1  ;;  %v13466_v27 = vpop.f32.mrb[66].mxu0 }
 0x472   : > { %v13499_v36 = vadd.f32 %v13498_v56, %v13497_v43  ;;  %v13500_v0 = vpop.f32.mrb[66].mxu1  ;;  %v13467_v45 = vpop.f32.mrb[67].mxu0 }
 0x473   : > { %v6367_v37 = vadd.f32 %v13465_v53, %v6118_v30  ;;  %v13468_v26 = vadd.f32 %v13467_v45, %v13466_v27  ;;  %v13501_v31 = vpop.f32.mrb[67].mxu1 }
 0x474   : > { %v13502_v18 = vadd.f32 %v13501_v31, %v13500_v0 }
 0x475   : > { %v6424_v60 = vadd.f32 %v13499_v36, %v6367_v37  ;;  %v6370_v21 = vadd.f32 %v13468_v26, %v6121_v51  ;;  %v18980_v51 = vmov 2  }
 0x476   : > { %13873 = vset.pattern.permute.xlu1 %v18980_v51 }
 0x477   : > { %v6427_v9 = vadd.f32 %v13502_v18, %v6370_v21  ;;  %v13469_v46 = vpop.f32.mrb[68].mxu0 }
 0x478   : > { %v13503_v59 = vpop.f32.mrb[68].mxu1  ;;  %v13470_v19 = vpop.f32.mrb[69].mxu0 }
 0x479   : > { %v13471_v47 = vadd.f32 %v13470_v19, %v13469_v46  ;;  %v13504_v7 = vpop.f32.mrb[69].mxu1  ;;  %v13472_v63 = vpop.f32.mrb[70].mxu0 }
 0x47a   : > { %v13505_v20 = vadd.f32 %v13504_v7, %v13503_v59  ;;  %v13506_v10 = vpop.f32.mrb[70].mxu1  ;;  %v13473_v34 = vpop.f32.mrb[71].mxu0 }
 0x47b   : > { %v6375_v54 = vadd.f32 %v13471_v47, %v6126_v8  ;;  %v13474_v49 = vadd.f32 %v13473_v34, %v13472_v63  ;;  %v13507_v13 = vpop.f32.mrb[71].mxu1 }
 0x47c   : > { %v13508_v48 = vadd.f32 %v13507_v13, %v13506_v10 }
 0x47d   : > { %v16666_v30 = vadd.f32 %v13505_v20, %v6375_v54  ;;  %v6378_v14 = vadd.f32 %v13474_v49, %v6129_v55 }
 0x47f   : > { %v16668_v41 = vadd.f32 %v13508_v48, %v6378_v14 }
 0x501   : > { %v13525_v43 = vpop.f32.mrb[72].mxu0  ;;  %v13559_v50 = vpop.f32.mrb[72].mxu1 }
 0x502   : > { %v13526_v53 = vpop.f32.mrb[73].mxu0  ;;  %v13560_v56 = vpop.f32.mrb[73].mxu1 }
 0x503   : > { %v13527_v27 = vadd.f32 %v13526_v53, %v13525_v43  ;;  %v13561_v36 = vadd.f32 %v13560_v56, %v13559_v50  ;;  %v13528_v0 = vpop.f32.mrb[74].mxu0  ;;  %v13562_v45 = vpop.f32.mrb[74].mxu1  ;;  %v19012_v56 = vmov 0  }
 0x504   : > { %v13529_v8 = vpop.f32.mrb[75].mxu0  ;;  %v13563_v37 = vpop.f32.mrb[75].mxu1 }
 0x505   : > { %v6734_v26 = vadd.f32 %v13561_v36, %v13527_v27  ;;  %v13530_v31 = vadd.f32 %v13529_v8, %v13528_v0  ;;  %v13564_v18 = vadd.f32 %v13563_v37, %v13562_v45  ;;  %v18976_v27 = vmov 1  }
 0x507   : > { %v6756_v21 = vadd.f32 %v6734_v26, %v6416_v6  ;;  %v6737_v55 = vadd.f32 %v13564_v18, %v13530_v31 }
 0x509   : > { %v6768_v46 = vmul.f32 0.2, %v6756_v21  ;;  %v6757_v59 = vadd.f32 %v6737_v55, %v6419_v29  ;;  %v13531_v19 = vpop.f32.mrb[76].mxu0  ;;  %v13565_v47 = vpop.f32.mrb[76].mxu1  ;;  %vm6762_vm15 = vcmp.ge.f32.partialorder %v6756_v21, 0.0 }
 0x50a   : > { %v13532_v7 = vpop.f32.mrb[77].mxu0  ;;  %v13566_v63 = vpop.f32.mrb[77].mxu1 }
 0x50b   : > { %v13533_v20 = vadd.f32 %v13532_v7, %v13531_v19  ;;  %v13567_v10 = vadd.f32 %v13566_v63, %v13565_v47  ;;  %v13534_v34 = vpop.f32.mrb[78].mxu0  ;;  %v13568_v54 = vpop.f32.mrb[78].mxu1  ;;  %v16671_v49 = vsel %vm6762_vm15, %v6756_v21, %v6768_v46  ;;  %v6769_v13 = vmul.f32 0.2, %v6757_v59 }
 0x50c   : > { %v13535_v48 = vpop.f32.mrb[79].mxu0  ;;  %v13569_v14 = vpop.f32.mrb[79].mxu1  ;;  %6979 = vperm.xlu1 %13873, %v16671_v49   ;;  %6831 = vperm.xlu0 %13870, %v16671_v49   ;;  %vm6763_vm0 = vcmp.ge.f32.partialorder %v6757_v59, 0.0  ;;  %vm7134_vm15 = vcmask 23552  }
 0x50d   : > { %v6742_v6 = vadd.f32 %v13567_v10, %v13533_v20  ;;  %v13536_v29 = vadd.f32 %v13535_v48, %v13534_v34  ;;  %v13570_v43 = vadd.f32 %v13569_v14, %v13568_v54  ;;  %v16677_v36 = vsel %vm6763_vm0, %v6757_v59, %v6769_v13 }
 0x50f   : > { %v6758_v50 = vadd.f32 %v6742_v6, %v6424_v60  ;;  %v6745_v53 = vadd.f32 %v13570_v43, %v13536_v29  ;;  %v6785_v6 = vpop.permute.xlu1 %6784  ;;  %v6794_v43 = vpop.permute.xlu0 %6793 }
 0x510   : > { %13875 = vset.pattern.permute.xlu1 %v19012_v56  ;;  %13872 = vset.pattern.permute.xlu0 %v18976_v27  ;;  %vm16747_vm7 = vcmp.eq.s32.totalorder %v16056_v42, %v6785_v6  ;;  %vm16763_vm9 = vcmp.eq.s32.totalorder %v16056_v42, %v6794_v43 }
 0x511   : > { %v6759_v0 = vadd.f32 %v6745_v53, %v6427_v9  ;;  %v13537_v45 = vpop.f32.mrb[80].mxu0  ;;  %v13571_v8 = vpop.f32.mrb[80].mxu1  ;;  %6836 = vperm.xlu1 %13875, %v16677_v36   ;;  %6908 = vperm.xlu0 %13872, %v16671_v49   ;;  %v18978_v9 = vmov 3   ;;  %vm6764_vm4 = vcmp.ge.f32.partialorder %v6758_v50, 0.0 }
 0x512   : > { %v13538_v37 = vpop.f32.mrb[81].mxu0  ;;  %v13572_v26 = vpop.f32.mrb[81].mxu1 }
 0x513   : > { %v13539_v31 = vadd.f32 %v13538_v37, %v13537_v45  ;;  %v13573_v18 = vadd.f32 %v13572_v26, %v13571_v8  ;;  %v13540_v60 = vpop.f32.mrb[82].mxu0  ;;  %v13574_v21 = vpop.f32.mrb[82].mxu1  ;;  %v6771_v59 = vmul.f32 0.2, %v6759_v0  ;;  %vm6765_vm2 = vcmp.ge.f32.partialorder %v6759_v0, 0.0 }
 0x514   : > { %v13541_v55 = vpop.f32.mrb[83].mxu0  ;;  %v13575_v46 = vpop.f32.mrb[83].mxu1 }
 0x515   : > { %v6750_v19 = vadd.f32 %v13573_v18, %v13539_v31  ;;  %v13542_v47 = vadd.f32 %v13541_v55, %v13540_v60  ;;  %v13576_v7 = vadd.f32 %v13575_v46, %v13574_v21  ;;  %13876 = vset.pattern.permute.xlu1 %v18976_v27  ;;  %13874 = vset.pattern.permute.xlu0 %v18978_v9  ;;  %v6797_v29 = vpop.permute.xlu1 %6796  ;;  %v6791_v53 = vpop.permute.xlu0 %6790 }
 0x516   : > { %6912 = vperm.xlu1 %13876, %v16677_v36   ;;  %7050 = vperm.xlu0 %13874, %v16671_v49   ;;  %v16689_v54 = vsel %vm6765_vm2, %v6759_v0, %v6771_v59  ;;  %vm16740_vm6 = vcmp.eq.s32.totalorder %v16056_v42, %v6797_v29  ;;  %vm16752_vm8 = vcmp.eq.s32.totalorder %v16056_v42, %v6791_v53 }
 0x517   : > { %v6760_v63 = vadd.f32 %v6750_v19, %v16666_v30  ;;  %v6753_v20 = vadd.f32 %v13576_v7, %v13542_v47  ;;  %v6770_v30 = vmul.f32 0.2, %v6758_v50 }
 0x519   : > { %v6761_v10 = vadd.f32 %v6753_v20, %v16668_v41  ;;  %v6772_v34 = vmul.f32 0.2, %v6760_v63  ;;  %vm6766_vm3 = vcmp.ge.f32.partialorder %v6760_v63, 0.0  ;;  %v16701_v48 = vsel %vm6764_vm4, %v6758_v50, %v6770_v30  ;;  %v6788_v50 = vpop.permute.xlu1 %6787 }
 0x51a   : > { %13877 = vset.pattern.permute.xlu1 %v18980_v51  ;;  %13882 = vset.pattern.permute.xlu0 %v19012_v56  ;;  %vm16768_vm10 = vcmp.eq.s32.totalorder %v16056_v42, %v6788_v50 }
 0x51b   : > { %6983 = vperm.xlu1 %13877, %v16677_v36   ;;  %6846 = vperm.xlu0 %13882, %v16689_v54   ;;  %v16693_v13 = vsel %vm6766_vm3, %v6760_v63, %v6772_v34  ;;  %v6773_v41 = vmul.f32 0.2, %v6761_v10  ;;  %vm6767_vm5 = vcmp.ge.f32.partialorder %v6761_v10, 0.0 }
 0x51d   : > { %v16705_v14 = vsel %vm6767_vm5, %v6761_v10, %v6773_v41 }
 0x51f   : > { %13878 = vset.pattern.permute.xlu1 %v18978_v9  ;;  %6851 = vperm.xlu0 %13882, %v16693_v13  }
 0x520   : > { %7054 = vperm.xlu1 %13878, %v16677_v36  }
 0x523   : > { %13884 = vset.pattern.permute.xlu0 %v18980_v51 }
 0x524   : > { %13879 = vset.pattern.permute.xlu1 %v19012_v56  ;;  %6995 = vperm.xlu0 %13884, %v16693_v13  }
 0x525   : > { %6841 = vperm.xlu1 %13879, %v16701_v48  }
 0x528   : > { %13887 = vset.pattern.permute.xlu0 %v18976_v27 }
 0x529   : > { %13880 = vset.pattern.permute.xlu1 %v18976_v27  ;;  %6928 = vperm.xlu0 %13887, %v16705_v14  }
 0x52a   : > { %6916 = vperm.xlu1 %13880, %v16701_v48  }
 0x52d   : > { %13889 = vset.pattern.permute.xlu0 %v18978_v9 }
 0x52e   : > { %13881 = vset.pattern.permute.xlu1 %v18980_v51  ;;  %7070 = vperm.xlu0 %13889, %v16705_v14  }
 0x52f   : > { %6987 = vperm.xlu1 %13881, %v16701_v48  }
 0x532   : > { %13890 = vset.pattern.permute.xlu0 %v18980_v51 }
 0x533   : > { %13883 = vset.pattern.permute.xlu1 %v18976_v27  ;;  %6991 = vperm.xlu0 %13890, %v16689_v54  }
 0x534   : > { %6920 = vperm.xlu1 %13883, %v16689_v54  }
 0x537   : > { %13892 = vset.pattern.permute.xlu0 %v18976_v27 }
 0x538   : > { %6924 = vperm.xlu1 %13883, %v16693_v13  }
 0x53c   : > { %13885 = vset.pattern.permute.xlu1 %v18978_v9 }
 0x53d   : > { %7066 = vperm.xlu1 %13885, %v16693_v13  }
 0x541   : > { %13886 = vset.pattern.permute.xlu1 %v19012_v56 }
 0x542   : > { %6856 = vperm.xlu1 %13886, %v16705_v14  }
 0x546   : > { %13888 = vset.pattern.permute.xlu1 %v18980_v51 }
 0x547   : > { %6999 = vperm.xlu1 %13888, %v16705_v14  }
 0x54b   : > { %13891 = vset.pattern.permute.xlu1 %v18978_v9 }
 0x54c   : > { %7058 = vperm.xlu1 %13891, %v16701_v48  }
 0x550   : > { %7062 = vperm.xlu1 %13891, %v16689_v54  }
 0x58b   : > { %v16729_v0 = vpop.permute.xlu1 %6979  ;;  %v6832_v45 = vpop.permute.xlu0 %6831 }
 0x590   : > { %v6837_v8 = vpop.permute.xlu1 %6836  ;;  %v6909_v37 = vpop.permute.xlu0 %6908 }
 0x591   : > { %v6931_v41 = vsel %vm16655_vm13, %v6909_v37, -1e+30 }
 0x595   : > { %v6913_v26 = vpop.permute.xlu1 %6912  ;;  %v16731_v31 = vpop.permute.xlu0 %7050 }
 0x596   : > { %v6932_v29 = vsel %vm16747_vm7, %v6913_v26, -1e+30 }
 0x597   : > { %v6938_v43 = vsel %vm6865_vm14, %v6932_v29, -inf }
 0x59a   : > { %v16733_v18 = vpop.permute.xlu1 %6983  ;;  %v6847_v60 = vpop.permute.xlu0 %6846 }
 0x59e   : > { %v6852_v46 = vpop.permute.xlu0 %6851 }
 0x59f   : > { %v16735_v21 = vpop.permute.xlu1 %7054 }
 0x5a3   : > { %v6996_v47 = vpop.permute.xlu0 %6995 }
 0x5a4   : > { %v6842_v55 = vpop.permute.xlu1 %6841 }
 0x5a5   : > { %v6861_v29 = vsel %vm16768_vm10, %v6842_v55, -1e+30  ;;  %v7003_v55 = vsel %vm16747_vm7, %v16733_v18, -1e+30 }
 0x5a8   : > { %v6929_v59 = vpop.permute.xlu0 %6928 }
 0x5a9   : > { %v6917_v19 = vpop.permute.xlu1 %6916  ;;  %v6936_v10 = vsel %vm16740_vm6, %v6929_v59, -1e+30 }
 0x5aa   : > { %v6943_v59 = vsel %vm6865_vm14, %v6936_v10, -inf  ;;  %v6933_v37 = vsel %vm16768_vm10, %v6917_v19, -1e+30  ;;  %v6863_v19 = vsel %vm16763_vm9, %v6852_v46, -1e+30  ;;  %v6868_v46 = vsel %vm6865_vm14, %v6861_v29, -inf }
 0x5ab   : > { %v6944_v50 = vmax.f32 %v6938_v43, %v6943_v59  ;;  %v6939_v40 = vsel %vm6865_vm14, %v6933_v37, -inf }
 0x5ad   : > { %v7071_v10 = vpop.permute.xlu0 %7070 }
 0x5ae   : > { %v16737_v7 = vpop.permute.xlu1 %6987 }
 0x5af   : > { %v7004_v29 = vsel %vm16768_vm10, %v16737_v7, -1e+30  ;;  %v7078_v7 = vsel %vm16740_vm6, %v7071_v10, -1e+30 }
 0x5b3   : > { %v6921_v20 = vpop.permute.xlu1 %6920 }
 0x5b4   : > { %v6934_v27 = vsel %vm16752_vm8, %v6921_v20, -1e+30  ;;  %v6937_v20 = vsel %vm6865_vm14, %v6931_v41, -inf  ;;  %v6859_v41 = vsel %vm16655_vm13, %v6832_v45, -1e+30 }
 0x5b5   : > { %v6940_v51 = vsel %vm6865_vm14, %v6934_v27, -inf  ;;  %v6860_v27 = vsel %vm16747_vm7, %v6837_v8, -1e+30  ;;  %v6862_v45 = vsel %vm16752_vm8, %v6847_v60, -1e+30 }
 0x5b6   : > { %v6946_v23 = vmax.f32 %v6939_v40, %v6940_v51  ;;  %v7002_v40 = vsel %vm16655_vm13, %v16729_v0, -1e+30  ;;  %v6992_v51 = vpop.permute.xlu0 %6991  ;;  %v7006_v0 = vsel %vm16763_vm9, %v6996_v47, -1e+30  ;;  %v7009_v47 = vsel %vm6865_vm14, %v7003_v55, -inf }
 0x5b7   : > { %v6925_v9 = vpop.permute.xlu1 %6924  ;;  %v7005_v43 = vsel %vm16752_vm8, %v6992_v51, -1e+30  ;;  %v7010_v55 = vsel %vm6865_vm14, %v7004_v29, -inf }
 0x5b8   : > { %v6935_v26 = vsel %vm16763_vm9, %v6925_v9, -1e+30 }
 0x5b9   : > { %v6941_v42 = vsel %vm6865_vm14, %v6935_v26, -inf }
 0x5ba   : > { %v6942_v22 = vmax.f32 %v6937_v20, %v6941_v42 }
 0x5bc   : > { %v6945_v16 = vmax.f32 %v6942_v22, %v6944_v50  ;;  %v7067_v4 = vpop.permute.xlu1 %7066  ;;  %v6870_v22 = vsel %vm6865_vm14, %v6863_v19, -inf  ;;  %v6869_v50 = vsel %vm6865_vm14, %v6862_v45, -inf  ;;  %v7008_v19 = vsel %vm6865_vm14, %v7002_v40, -inf }
 0x5bd   : > { %v6875_v18 = vmax.f32 %v6868_v46, %v6869_v50  ;;  %v7077_v40 = vsel %vm16763_vm9, %v7067_v4, -1e+30 }
 0x5be   : > { %v6947_v9 = vmax.f32 %v6945_v16, %v6946_v23  ;;  %v6866_v16 = vsel %vm6865_vm14, %v6859_v41, -inf  ;;  %v6867_v23 = vsel %vm6865_vm14, %v6860_v27, -inf  ;;  %v7012_v41 = vsel %vm6865_vm14, %v7006_v0, -inf }
 0x5bf   : > { %v6871_v20 = vmax.f32 %v6866_v16, %v6870_v22  ;;  %v7011_v22 = vsel %vm6865_vm14, %v7005_v43, -inf  ;;  %v7074_v43 = vsel %vm16747_vm7, %v16735_v21, -1e+30 }
 0x5c0   : > { %v6948_v59 = vrot.slane %v6947_v9, 4  ;;  %v7017_v46 = vmax.f32 %v7010_v55, %v7011_v22 }
 0x5c1   : > { %v6857_v37 = vpop.permute.xlu1 %6856 }
 0x5c2   : > { %v6864_v8 = vsel %vm16740_vm6, %v6857_v37, -1e+30  ;;  %v6949_v42 = vmax.f32 %v6947_v9, %v6948_v59 }
 0x5c3   : > { %v6872_v26 = vsel %vm6865_vm14, %v6864_v8, -inf  ;;  %v7073_v8 = vsel %vm16655_vm13, %v16731_v31, -1e+30  ;;  %v7085_v31 = vsel %vm6865_vm14, %v7078_v7, -inf  ;;  %vm7127_vm13 = vcmask 15360  }
 0x5c4   : > { %v6873_v60 = vmax.f32 %v6867_v23, %v6872_v26  ;;  %v6950_v59 = vrot.slane %v6949_v42, 2  ;;  %v7013_v23 = vmax.f32 %v7008_v19, %v7012_v41  ;;  %v7083_v26 = vsel %vm6865_vm14, %v7077_v40, -inf }
 0x5c5   : > { %v7079_v28 = vsel %vm6865_vm14, %v7073_v8, -inf }
 0x5c6   : > { %v6874_v27 = vmax.f32 %v6871_v20, %v6873_v60  ;;  %v7000_v37 = vpop.permute.xlu1 %6999  ;;  %v6951_v60 = vmax.f32 %v6949_v42, %v6950_v59  ;;  %v7084_v10 = vmax.f32 %v7079_v28, %v7083_v26 }
 0x5c7   : > { %v7007_v9 = vsel %vm16740_vm6, %v7000_v37, -1e+30 }
 0x5c8   : > { %v6876_v51 = vmax.f32 %v6874_v27, %v6875_v18  ;;  %v7014_v16 = vsel %vm6865_vm14, %v7007_v9, -inf  ;;  %v7080_v27 = vsel %vm6865_vm14, %v7074_v43, -inf  ;;  %v6952_v22 = vrot.slane %v6951_v60, 1 }
 0x5c9   : > { %v7015_v45 = vmax.f32 %v7009_v47, %v7014_v16  ;;  %v7086_v29 = vmax.f32 %v7080_v27, %v7085_v31 }
 0x5ca   : > { %v6877_v0 = vrot.slane %v6876_v51, 4  ;;  %v16841_v8 = vmax.f32 %v6951_v60, %v6952_v22 }
 0x5cb   : > { %v7016_v20 = vmax.f32 %v7013_v23, %v7015_v45  ;;  %v7059_v4 = vpop.permute.xlu1 %7058 }
 0x5cc   : > { %v6878_v50 = vmax.f32 %v6876_v51, %v6877_v0  ;;  %v7075_v18 = vsel %vm16768_vm10, %v7059_v4, -1e+30  ;;  %v7087_v51 = vmax.f32 %v7084_v10, %v7086_v29  ;;  %v16848_v0 = vsel %vm16747_vm7, 1.0, %v19011_v15 }
 0x5cd   : > { %v7018_v19 = vmax.f32 %v7016_v20, %v7017_v46  ;;  %v7081_v59 = vsel %vm6865_vm14, %v7075_v18, -inf  ;;  %v6954_v31 = vmul.f32 %v16662_v24, %v16841_v8  ;;  %v6955_v27 = vmul.f32 %v16848_v0, %v16841_v8 }
 0x5ce   : > { %v6879_v41 = vrot.slane %v6878_v50, 2 }
 0x5cf   : > { %v7019_v37 = vrot.slane %v7018_v19, 4  ;;  %v7063_v47 = vpop.permute.xlu1 %7062  ;;  %v6960_v18 = vsel %vm6865_vm14, %v6954_v31, 0.0  ;;  %v6963_v22 = vsel %vm6865_vm14, %v6955_v27, 0.0 }
 0x5d0   : > { %v6880_v9 = vmax.f32 %v6878_v50, %v6879_v41  ;;  %v7076_v21 = vsel %vm16752_vm8, %v7063_v47, -1e+30 }
 0x5d1   : > { %v7020_v42 = vmax.f32 %v7018_v19, %v7019_v37  ;;  %v7082_v40 = vsel %vm6865_vm14, %v7076_v21, -inf }
 0x5d2   : > { %v6881_v16 = vrot.slane %v6880_v9, 1  ;;  %v7088_v23 = vmax.f32 %v7081_v59, %v7082_v40 }
 0x5d3   : > { %v7021_v45 = vrot.slane %v7020_v42, 2 }
 0x5d4   : > { %v16843_v7 = vmax.f32 %v6880_v9, %v6881_v16  ;;  %v7089_v55 = vmax.f32 %v7087_v51, %v7088_v23 }
 0x5d5   : > { %v7022_v46 = vmax.f32 %v7020_v42, %v7021_v45  ;;  %v16873_v42 = vsel %vm16768_vm10, 1.0, %v19011_v15 }
 0x5d6   : > { %v7090_v26 = vrot.slane %v7089_v55, 4  ;;  %v6884_v20 = vmul.f32 %v16848_v0, %v16843_v7  ;;  %v6883_v4 = vmul.f32 %v16662_v24, %v16843_v7  ;;  %v6885_v16 = vmul.f32 %v16873_v42, %v16843_v7 }
 0x5d7   : > { %v7023_v43 = vrot.slane %v7022_v46, 1 }
 0x5d8   : > { %v7091_v50 = vmax.f32 %v7089_v55, %v7090_v26  ;;  %v6892_v60 = vsel %vm6865_vm14, %v6884_v20, 0.0  ;;  %v6889_v28 = vsel %vm6865_vm14, %v6883_v4, 0.0  ;;  %v6895_v23 = vsel %vm6865_vm14, %v6885_v16, 0.0 }
 0x5d9   : > { %v16858_v34 = vmax.f32 %v7022_v46, %v7023_v43  ;;  %6893 = vadd.xlane.f32.xlu1 %v6892_v60  ;;  %6890 = vadd.xlane.f32.xlu0 %v6889_v28  ;;  %v6956_v55 = vmul.f32 %v16873_v42, %v16841_v8  ;;  %v16905_v28 = vsel %vm16763_vm9, 1.0, %v19011_v15 }
 0x5da   : > { %v7092_v19 = vrot.slane %v7091_v50, 2 }
 0x5db   : > { %v7025_v10 = vmul.f32 %v16662_v24, %v16858_v34  ;;  %v7026_v9 = vmul.f32 %v16848_v0, %v16858_v34  ;;  %v6966_v26 = vsel %vm6865_vm14, %v6956_v55, 0.0  ;;  %v7027_v20 = vmul.f32 %v16873_v42, %v16858_v34 }
 0x5dc   : > { %v7093_v41 = vmax.f32 %v7091_v50, %v7092_v19 }
 0x5dd   : > { %6961 = vadd.xlane.f32.xlu0 %v6960_v18  ;;  %v7031_v37 = vsel %vm6865_vm14, %v7025_v10, 0.0  ;;  %v7034_v59 = vsel %vm6865_vm14, %v7026_v9, 0.0  ;;  %v7037_v43 = vsel %vm6865_vm14, %v7027_v20, 0.0  ;;  %v16915_v18 = vsel %vm16740_vm6, 1.0, %v19011_v15 }
 0x5de   : > { %v7094_v47 = vrot.slane %v7093_v41, 1  ;;  %7032 = vadd.xlane.f32.xlu1 %v7031_v37  ;;  %v6888_v37 = vmul.f32 %v16915_v18, %v16843_v7  ;;  %v6959_v63 = vmul.f32 %v16915_v18, %v16841_v8 }
 0x5e0   : > { %v7095_v29 = vmax.f32 %v7093_v41, %v7094_v47  ;;  %v6887_v41 = vmul.f32 %v16905_v28, %v16843_v7  ;;  %v6958_v47 = vmul.f32 %v16905_v28, %v16841_v8 }
 0x5e1   : > { %6964 = vadd.xlane.f32.xlu0 %v6963_v22  ;;  %v6904_v22 = vsel %vm6865_vm14, %v6888_v37, 0.0 }
 0x5e2   : > { %v7096_v21 = vmul.f32 %v16662_v24, %v7095_v29  ;;  %v7097_v51 = vmul.f32 %v16848_v0, %v7095_v29  ;;  %v16883_v24 = vsel %vm16752_vm8, 1.0, %v19011_v15  ;;  %v7098_v60 = vmul.f32 %v16873_v42, %v7095_v29 }
 0x5e3   : > { %v6886_v45 = vmul.f32 %v16883_v24, %v16843_v7  ;;  %v6957_v30 = vmul.f32 %v16883_v24, %v16841_v8  ;;  %v7028_v50 = vmul.f32 %v16883_v24, %v16858_v34  ;;  %v7099_v10 = vmul.f32 %v16883_v24, %v7095_v29 }
 0x5e4   : > { %v7102_v40 = vsel %vm6865_vm14, %v7096_v21, 0.0  ;;  %v7105_v53 = vsel %vm6865_vm14, %v7097_v51, 0.0  ;;  %v7108_v19 = vsel %vm6865_vm14, %v7098_v60, 0.0  ;;  %v6901_v27 = vsel %vm6865_vm14, %v6887_v41, 0.0 }
 0x5e5   : > { %7035 = vadd.xlane.f32.xlu0 %v7034_v59  ;;  %7103 = vadd.xlane.f32.xlu1 %v7102_v40  ;;  %v6898_v46 = vsel %vm6865_vm14, %v6886_v45, 0.0  ;;  %v6969_v4 = vsel %vm6865_vm14, %v6957_v30, 0.0  ;;  %v7040_v31 = vsel %vm6865_vm14, %v7028_v50, 0.0  ;;  %v7111_v6 = vsel %vm6865_vm14, %v7099_v10, 0.0  ;;  %v16941_v45 = vld [vmem:[%s18953_s3] ss:$0 sm:$0xff] }
 0x5e6   : > { %v6972_v9 = vsel %vm6865_vm14, %v6958_v47, 0.0  ;;  %v7029_v21 = vmul.f32 %v16905_v28, %v16858_v34  ;;  %v6975_v59 = vsel %vm6865_vm14, %v6959_v63, 0.0  ;;  %v7030_v40 = vmul.f32 %v16915_v18, %v16858_v34 }
 0x5e7   : > { %v7100_v51 = vmul.f32 %v16905_v28, %v7095_v29  ;;  %v19023_v34 = vlaneseq }
 0x5e8   : > { %v7043_v7 = vsel %vm6865_vm14, %v7029_v21, 0.0  ;;  %v7046_v16 = vsel %vm6865_vm14, %v7030_v40, 0.0 }
 0x5e9   : > { %7106 = vadd.xlane.f32.xlu0 %v7105_v53  ;;  %6896 = vadd.xlane.f32.xlu1 %v6895_v23  ;;  %v7114_v8 = vsel %vm6865_vm14, %v7100_v51, 0.0  ;;  %v7101_v53 = vmul.f32 %v16915_v18, %v7095_v29  ;;  %v16944_v55 = vshrl.u32 %v19023_v34, 7 }
 0x5eb   : > { %v7117_v23 = vsel %vm6865_vm14, %v7101_v53, 0.0  ;;  %vm6823_vm11 = vcmp.eq.s32.totalorder %v16944_v55, %v16941_v45 }
 0x5ed   : > { %6899 = vadd.xlane.f32.xlu0 %v6898_v46  ;;  %6967 = vadd.xlane.f32.xlu1 %v6966_v26  ;;  %v16949_v46 = vsel %vm6823_vm11, 1.0, %v19011_v15 }
 0x5ee   : > { %13605 = vmatprep.mubr.msk.f32.mxu0 %vm3531_vm1, %v16949_v46 }
 0x5f1   : > { %6970 = vadd.xlane.f32.xlu0 %v6969_v4  ;;  %7038 = vadd.xlane.f32.xlu1 %v7037_v43 }
 0x5f5   : > { %7041 = vadd.xlane.f32.xlu0 %v7040_v31  ;;  %7109 = vadd.xlane.f32.xlu1 %v7108_v19 }
 0x5f9   : > { %7112 = vadd.xlane.f32.xlu0 %v7111_v6  ;;  %6902 = vadd.xlane.f32.xlu1 %v6901_v27 }
 0x5fd   : > { %6905 = vadd.xlane.f32.xlu0 %v6904_v22  ;;  %6973 = vadd.xlane.f32.xlu1 %v6972_v9 }
 0x601   : > { %6976 = vadd.xlane.f32.xlu0 %v6975_v59  ;;  %7044 = vadd.xlane.f32.xlu1 %v7043_v7 }
 0x605   : > { %7047 = vadd.xlane.f32.xlu0 %v7046_v16  ;;  %7115 = vadd.xlane.f32.xlu1 %v7114_v8 }
 0x609   : > { %7118 = vadd.xlane.f32.xlu0 %v7117_v23 }
 0x666   : > { %v6891_v29 = vpop.xlane.xlu0 %6890  ;;  %v6894_v26 = vpop.xlane.xlu1 %6893 }
 0x66a   : > { %v6962_v30 = vpop.xlane.xlu0 %6961 }
 0x66b   : > { %v7033_v20 = vpop.xlane.xlu1 %7032  ;;  %v7121_v43 = vsel %vm7120_vm12, %v6891_v29, %v6962_v30 }
 0x66c   : > { %v7128_v50 = vsel %vm7127_vm13, %v7121_v43, %v7033_v20 }
 0x66e   : > { %v6965_v4 = vpop.xlane.xlu0 %6964 }
 0x66f   : > { %v7122_v41 = vsel %vm7120_vm12, %v6894_v26, %v6965_v4 }
 0x672   : > { %v7104_v60 = vpop.xlane.xlu1 %7103  ;;  %v7036_v31 = vpop.xlane.xlu0 %7035 }
 0x673   : > { %v7135_v19 = vsel %vm7134_vm15, %v7128_v50, %v7104_v60  ;;  %v7129_v6 = vsel %vm7127_vm13, %v7122_v41, %v7036_v31 }
 0x674   : > { %v7141_v10 = vsub.f32 %v16671_v49, %v7135_v19 }
 0x676   : > { %v6897_v27 = vpop.xlane.xlu1 %6896  ;;  %v7107_v37 = vpop.xlane.xlu0 %7106  ;;  %v7147_v47 = vmul.f32 1.442695, %v7141_v10 }
 0x677   : > { %v7136_v22 = vsel %vm7134_vm15, %v7129_v6, %v7107_v37 }
 0x678   : > { %v7142_v9 = vsub.f32 %v16677_v36, %v7136_v22  ;;  %14902 = vpow2.f32 %v7147_v47 }
 0x67a   : > { %v7149_v63 = vmul.f32 1.442695, %v7142_v9  ;;  %v6968_v21 = vpop.xlane.xlu1 %6967  ;;  %v6900_v59 = vpop.xlane.xlu0 %6899 }
 0x67b   : > { %v7123_v49 = vsel %vm7120_vm12, %v6897_v27, %v6968_v21 }
 0x67c   : > { %14904 = vpow2.f32 %v7149_v63 }
 0x67e   : > { %v7039_v7 = vpop.xlane.xlu1 %7038  ;;  %v6971_v40 = vpop.xlane.xlu0 %6970 }
 0x67f   : > { %v7130_v51 = vsel %vm7127_vm13, %v7123_v49, %v7039_v7  ;;  %v7124_v36 = vsel %vm7120_vm12, %v6900_v59, %v6971_v40 }
 0x682   : > { %v7110_v16 = vpop.xlane.xlu1 %7109  ;;  %v7042_v8 = vpop.xlane.xlu0 %7041 }
 0x683   : > { %v7137_v53 = vsel %vm7134_vm15, %v7130_v51, %v7110_v16  ;;  %v16965_v34 = vpop.eup %14902  ;;  %v7131_v26 = vsel %vm7127_vm13, %v7124_v36, %v7042_v8 }
 0x684   : > { %v7143_v23 = vsub.f32 %v16701_v48, %v7137_v53 }
 0x686   : > { %v16968_v29 = vpop.eup %14904  ;;  %v6903_v30 = vpop.xlane.xlu1 %6902  ;;  %v7151_v4 = vmul.f32 1.442695, %v7143_v23 }
 0x687   : > { %v7113_v20 = vpop.xlane.xlu0 %7112  ;;  %v13669_v50 = vpack.c.bf16 %v16968_v29, %v16965_v34 }
 0x688   : > { %v7138_v43 = vsel %vm7134_vm15, %v7131_v26, %v7113_v20  ;;  %14906 = vpow2.f32 %v7151_v4 }
 0x689   : > { %v7144_v60 = vsub.f32 %v16689_v54, %v7138_v43  ;;  %13670 = vmatprep.subr.bf16.mxu0 %v13669_v50 }
 0x68a   : > { %v6974_v31 = vpop.xlane.xlu1 %6973  ;;  %13672 = vmatpush3.bf16.msra.mxu0 %v13669_v50 }
 0x68b   : > { %v7153_v48 = vmul.f32 1.442695, %v7144_v60  ;;  %v6906_v19 = vpop.xlane.xlu0 %6905  ;;  %v7125_v6 = vsel %vm7120_vm12, %v6903_v30, %v6974_v31 }
 0x68d   : > { %14908 = vpow2.f32 %v7153_v48 }
 0x68e   : > { %v7045_v10 = vpop.xlane.xlu1 %7044 }
 0x68f   : > { %v6977_v41 = vpop.xlane.xlu0 %6976  ;;  %v7132_v27 = vsel %vm7127_vm13, %v7125_v6, %v7045_v10  ;;  %v19024_v10 = vmov 2  }
 0x690   : > { %v7126_v63 = vsel %vm7120_vm12, %v6906_v19, %v6977_v41  ;;  %v19025_v41 = vmov 3  }
 0x692   : > { %v7116_v37 = vpop.xlane.xlu1 %7115  ;;  %v14907_v54 = vpop.eup %14906 }
 0x693   : > { %v7048_v47 = vpop.xlane.xlu0 %7047  ;;  %v7139_v22 = vsel %vm7134_vm15, %v7132_v27, %v7116_v37 }
 0x694   : > { %v7145_v9 = vsub.f32 %v16693_v13, %v7139_v22  ;;  %v7133_v59 = vsel %vm7127_vm13, %v7126_v63, %v7048_v47  ;;  %v6818_v13 = vadd.s32 8, %v16944_v55  ;;  %v19026_v47 = vmov 1  }
 0x696   : > { %v7155_v40 = vmul.f32 1.442695, %v7145_v9  ;;  %vm6824_vm0 = vcmp.eq.s32.totalorder %v6818_v13, %v16941_v45 }
 0x697   : > { %v14909_v21 = vpop.eup %14908  ;;  %v7119_v7 = vpop.xlane.xlu0 %7118  ;;  %v16986_v26 = vsel %vm6824_vm0, 1.0, %v19011_v15 }
 0x698   : > { %v7140_v49 = vsel %vm7134_vm15, %v7133_v59, %v7119_v7  ;;  %v13673_v51 = vpack.c.bf16 %v14909_v21, %v14907_v54  ;;  %14910 = vpow2.f32 %v7155_v40 }
 0x699   : > { %v7146_v16 = vsub.f32 %v16705_v14, %v7140_v49 }
 0x69a   : > { %13674 = vmatprep.subr.bf16.mxu0 %v13673_v51 }
 0x69b   : > { %v7157_v8 = vmul.f32 1.442695, %v7146_v16  ;;  %13676 = vmatpush3.bf16.msra.mxu0 %v13673_v51 }
 0x69d   : > { %14912 = vpow2.f32 %v7157_v8 }
 0x6a2   : > { %v14911_v53 = vpop.eup %14910 }
 0x6a7   : > { %v14913_v23 = vpop.eup %14912 }
 0x6a8   : > { %v13677_v36 = vpack.c.bf16 %v14913_v23, %v14911_v53 }
 0x6aa   : > { %13678 = vmatprep.subr.bf16.mxu0 %v13677_v36 }
 0x6ab   : > { %13680 = vmatpush3.bf16.msra.mxu0 %v13677_v36 }
 0x6ae   : > { %13606 = vmatmul.mubr.msk.f32.vlgmr.msra.gmra.mrb[84].mxu0 %vm3531_vm1, %v16986_v26 }
 0x6af   : > { %7577 = vmatprep.mubr.f32.mxu0 %v19011_v15 }
 0x781   : > { %v13607_v14 = vpop.f32.mrb[84].mxu0 }
 0x782   : > { %v7231_v30 = vpop.f32.mrb[85].mxu0 }
 0x783   : > { %v13681_v20 = vpack.c.bf16 %v13607_v14, %v7231_v30 }
 0x785   : > { %13682 = vmatprep.subr.bf16.mxu1 %v13681_v20 }
 0x786   : > { %13684 = vmatpush3.bf16.msra.mxu1 %v13681_v20 }
 0x789   : > { %13613 = vmatmul.mubr.msk.f32.vlgmr.msra.gmra.mrb[84].mxu1 %vm6865_vm14, %v16848_v0 }
 0x78a   : > { %13615 = vmatprep.mubr.msk.f32.mxu1 %vm6865_vm14, %v16873_v42 }
 0x78d   : > { %13616 = vmatmul.mubr.msk.f32.gmra.mrb[86].mxu1 %vm6865_vm14, %v16883_v24 }
 0x78e   : > { %13618 = vmatprep.mubr.msk.f32.mxu1 %vm6865_vm14, %v16905_v28 }
 0x791   : > { %13619 = vmatmul.mubr.msk.f32.gmra.mrb[88].mxu1 %vm6865_vm14, %v16915_v18 }
 0x792   : > { %7654 = vmatprep.mubr.f32.mxu1 %v19011_v15 }
 0x85c   : > { %v13614_v45 = vpop.f32.mrb[84].mxu1 }
 0x85d   : > { %14914 = vrcp.f32 %v13614_v45  ;;  %v7324_v4 = vpop.f32.mrb[85].mxu1 }
 0x860   : > { %v13617_v43 = vpop.f32.mrb[86].mxu1 }
 0x861   : > { %14916 = vrcp.f32 %v13617_v43  ;;  %v7334_v0 = vpop.f32.mrb[87].mxu1 }
 0x862   : > { %14918 = vrcp.f32 %v7334_v0 }
 0x864   : > { %v13620_v50 = vpop.f32.mrb[88].mxu1 }
 0x865   : > { %v7344_v42 = vpop.f32.mrb[89].mxu1  ;;  %14920 = vrcp.f32 %v13620_v50 }
 0x866   : > { %14922 = vrcp.f32 %v7324_v4 }
 0x867   : > { %v14915_v60 = vpop.eup %14914  ;;  %14924 = vrcp.f32 %v7344_v42 }
 0x868   : > { %v7360_v24 = vmul.f32 %v14915_v60, %v16968_v29 }
 0x86a   : > { %7466 = vperm.xlu1 %13891, %v7360_v24   ;;  %7406 = vperm.xlu0 %13892, %v7360_v24  }
 0x86b   : > { %v14917_v28 = vpop.eup %14916 }
 0x86c   : > { %v7362_v18 = vmul.f32 %v14917_v28, %v14909_v21  ;;  %v14919_v48 = vpop.eup %14918 }
 0x86d   : > { %v7361_v31 = vmul.f32 %v14919_v48, %v14907_v54 }
 0x86e   : > { %13893 = vset.pattern.permute.xlu1 %v19012_v56  ;;  %13901 = vset.pattern.permute.xlu0 %v19012_v56 }
 0x86f   : > { %7372 = vperm.xlu1 %13893, %v7360_v24   ;;  %7382 = vperm.xlu0 %13901, %v7362_v18   ;;  %v14921_v19 = vpop.eup %14920 }
 0x870   : > { %v14923_v29 = vpop.eup %14922  ;;  %v7364_v6 = vmul.f32 %v14921_v19, %v14913_v23 }
 0x871   : > { %v7359_v27 = vmul.f32 %v14923_v29, %v16965_v34  ;;  %v14925_v37 = vpop.eup %14924  ;;  %v19027_v29 = vld [vmem:[#allocation9_spill] sm:$0xff] }
 0x872   : > { %v7363_v22 = vmul.f32 %v14925_v37, %v14911_v53 }
 0x873   : > { %13894 = vset.pattern.permute.xlu1 %v19024_v10  ;;  %13904 = vset.pattern.permute.xlu0 %v19025_v41 }
 0x874   : > { %7436 = vperm.xlu1 %13894, %v7360_v24   ;;  %7470 = vperm.xlu0 %13904, %v7361_v31  }
 0x878   : > { %13895 = vset.pattern.permute.xlu1 %v19026_v47  ;;  %7482 = vperm.xlu0 %13904, %v7364_v6  }
 0x879   : > { %7402 = vperm.xlu1 %13895, %v7359_v27  }
 0x87c   : > { %13909 = vset.pattern.permute.xlu0 %v19026_v47 }
 0x87d   : > { %13896 = vset.pattern.permute.xlu1 %v19025_v41  ;;  %7418 = vperm.xlu0 %13909, %v7363_v22  }
 0x87e   : > { %7462 = vperm.xlu1 %13896, %v7359_v27  }
 0x881   : > { %13912 = vset.pattern.permute.xlu0 %v19024_v10 }
 0x882   : > { %13897 = vset.pattern.permute.xlu1 %v19012_v56  ;;  %7448 = vperm.xlu0 %13912, %v7363_v22  }
 0x883   : > { %7367 = vperm.xlu1 %13897, %v7359_v27  }
 0x886   : > { %13914 = vset.pattern.permute.xlu0 %v19025_v41 }
 0x887   : > { %13898 = vset.pattern.permute.xlu1 %v19024_v10 }
 0x888   : > { %7432 = vperm.xlu1 %13898, %v7359_v27  }
 0x88c   : > { %13899 = vset.pattern.permute.xlu1 %v19026_v47 }
 0x88d   : > { %7414 = vperm.xlu1 %13899, %v7362_v18  }
 0x891   : > { %13900 = vset.pattern.permute.xlu1 %v19025_v41 }
 0x892   : > { %7474 = vperm.xlu1 %13900, %v7362_v18  }
 0x896   : > { %13902 = vset.pattern.permute.xlu1 %v19024_v10 }
 0x897   : > { %7444 = vperm.xlu1 %13902, %v7362_v18  }
 0x89b   : > { %13903 = vset.pattern.permute.xlu1 %v19026_v47 }
 0x89c   : > { %7410 = vperm.xlu1 %13903, %v7361_v31  }
 0x8a0   : > { %13905 = vset.pattern.permute.xlu1 %v19012_v56 }
 0x8a1   : > { %7377 = vperm.xlu1 %13905, %v7361_v31  }
 0x8a5   : > { %13906 = vset.pattern.permute.xlu1 %v19024_v10 }
 0x8a6   : > { %7440 = vperm.xlu1 %13906, %v7361_v31  }
 0x8aa   : > { %13907 = vset.pattern.permute.xlu1 %v19026_v47  ;;  %v19029_v47 = vld [vmem:[#allocation7_spill] sm:$0xff] }
 0x8ab   : > { %7422 = vperm.xlu1 %13907, %v7364_v6  }
 0x8af   : > { %13908 = vset.pattern.permute.xlu1 %v19012_v56 }
 0x8b0   : > { %7392 = vperm.xlu1 %13908, %v7364_v6  }
 0x8b4   : > { %13910 = vset.pattern.permute.xlu1 %v19025_v41 }
 0x8b5   : > { %7478 = vperm.xlu1 %13910, %v7363_v22  }
 0x8b9   : > { %13911 = vset.pattern.permute.xlu1 %v19012_v56 }
 0x8ba   : > { %7387 = vperm.xlu1 %13911, %v7363_v22  }
 0x8be   : > { %13913 = vset.pattern.permute.xlu1 %v19024_v10 }
 0x8bf   : > { %7452 = vperm.xlu1 %13913, %v7364_v6  }
 0x8e9   : > { %v7467_v34 = vpop.permute.xlu1 %7466  ;;  %v7407_v63 = vpop.permute.xlu0 %7406 }
 0x8ea   : > { %v7426_v59 = vmul.f32 %v7407_v63, %v16496_v17  ;;  %v7486_v51 = vmul.f32 %v7467_v34, %v16498_v25  ;;  %v19031_v63 = vld [vmem:[#allocation11_spill] sm:$0xff] }
 0x8ee   : > { %v7373_v9 = vpop.permute.xlu1 %7372  ;;  %v7383_v14 = vpop.permute.xlu0 %7382 }
 0x8ef   : > { %v7396_v13 = vmul.f32 %v7373_v9, %v16488_v11  ;;  %v7398_v42 = vmul.f32 %v7383_v14, %v16520_v39 }
 0x8f3   : > { %v7437_v54 = vpop.permute.xlu1 %7436  ;;  %v7471_v20 = vpop.permute.xlu0 %7470 }
 0x8f4   : > { %v7456_v17 = vmul.f32 %v7437_v54, %v16490_v12  ;;  %v7487_v45 = vmul.f32 %v7471_v20, %v16514_v5 }
 0x8f7   : > { %v7483_v24 = vpop.permute.xlu0 %7482 }
 0x8f8   : > { %v7403_v21 = vpop.permute.xlu1 %7402  ;;  %v7490_v41 = vmul.f32 %v7483_v24, %v16562_v35  ;;  %v17061_v35 = vsub.s32 0, %v16944_v55 }
 0x8f9   : > { %v7425_v7 = vmul.f32 %v7403_v21, %v16480_v2 }
 0x8fb   : > { %v13685_v40 = vpack.c.bf16 %v7426_v59, %v7425_v7  ;;  %v7491_v7 = vld [vmem:[%s15481_s29] sm:$0xf] }
 0x8fc   : > { %v7419_v48 = vpop.permute.xlu0 %7418 }
 0x8fd   : > { %13686 = vmatprep.subr.bf16.mxu0 %v13685_v40  ;;  %v7463_v49 = vpop.permute.xlu1 %7462  ;;  %v17065_v40 = vsub.s32 1, %v16944_v55 }
 0x8fe   : > { %v7485_v56 = vmul.f32 %v7463_v49, %v16482_v3  ;;  %v7496_v49 = vrot.slane %v7491_v7, %v17061_v35 }
 0x900   : > { %v13697_v16 = vpack.c.bf16 %v7486_v51, %v7485_v56  ;;  %v17069_v51 = vsub.s32 2, %v16944_v55  ;;  %v7500_v56 = vrot.slane %v7491_v7, %v17065_v40 }
 0x901   : > { %v7449_v34 = vpop.permute.xlu0 %7448 }
 0x902   : > { %13698 = vmatprep.subr.bf16.mxu1 %v13697_v16  ;;  %v7368_v8 = vpop.permute.xlu1 %7367 }
 0x903   : > { %v7395_v53 = vmul.f32 %v7368_v8, %v16476_v62  ;;  %v7504_v8 = vrot.slane %v7491_v7, %v17069_v51 }
 0x905   : > { %v13687_v23 = vpack.c.bf16 %v7396_v13, %v7395_v53  ;;  %v14927_v53 = vld [vmem:[#allocation2] sm:$0xff] }
 0x907   : > { %13688 = vmatpush1.bf16.msra.mxu0 %v13687_v23  ;;  %v7433_v36 = vpop.permute.xlu1 %7432 }
 0x908   : > { %v7455_v2 = vmul.f32 %v7433_v36, %v16478_v1 }
 0x90a   : > { %v13699_v30 = vpack.c.bf16 %v7456_v17, %v7455_v2  ;;  %v14928_v17 = vld [vmem:[#allocation2 + $0x8] sm:$0xff] }
 0x90c   : > { %13700 = vmatpush1.bf16.msra.mxu1 %v13699_v30  ;;  %v7415_v25 = vpop.permute.xlu1 %7414 }
 0x90d   : > { %v7428_v0 = vmul.f32 %v7415_v25, %v16528_v32 }
 0x911   : > { %v7475_v3 = vpop.permute.xlu1 %7474 }
 0x912   : > { %v7488_v4 = vmul.f32 %v7475_v3, %v16530_v33 }
 0x914   : > { %v13701_v11 = vpack.c.bf16 %v7488_v4, %v7487_v45 }
 0x916   : > { %v7445_v43 = vpop.permute.xlu1 %7444  ;;  %13702 = vmatprep.subr.bf16.mxu1 %v13701_v11 }
 0x917   : > { %v7458_v33 = vmul.f32 %v7445_v43, %v16522_v52  ;;  %v14929_v43 = vld [vmem:[#allocation2 + $0x20] sm:$0xff] }
 0x91b   : > { %v7411_v62 = vpop.permute.xlu1 %7410 }
 0x91c   : > { %v7427_v12 = vmul.f32 %v7411_v62, %v16512_v61  ;;  %v7429_v61 = vmul.f32 %v7419_v48, %v16544_v44 }
 0x91e   : > { %v13689_v50 = vpack.c.bf16 %v7428_v0, %v7427_v12  ;;  %v14930_v0 = vld [vmem:[#allocation2 + $0x10] sm:$0xff] }
 0x920   : > { %13690 = vmatprep.subr.bf16.mxu0 %v13689_v50  ;;  %v7378_v1 = vpop.permute.xlu1 %7377  ;;  %v14931_v50 = vld [vmem:[#allocation2 + $0x28] sm:$0xff] }
 0x921   : > { %v7397_v60 = vmul.f32 %v7378_v1, %v16508_v58 }
 0x923   : > { %v13691_v28 = vpack.c.bf16 %v7398_v42, %v7397_v60  ;;  %v14932_v42 = vld [vmem:[#allocation2 + $0x18] sm:$0xff] }
 0x925   : > { %13692 = vmatpush1.bf16.msra.mxu0 %v13691_v28  ;;  %v7441_v5 = vpop.permute.xlu1 %7440 }
 0x926   : > { %v7457_v18 = vmul.f32 %v7441_v5, %v16510_v57  ;;  %v19028_v57 = vld [vmem:[#allocation10_spill] sm:$0xff] }
 0x928   : > { %v13703_v31 = vpack.c.bf16 %v7458_v33, %v7457_v18  ;;  %v14933_v18 = vld [vmem:[#allocation2 + $0x30] sm:$0xff] }
 0x92a   : > { %13704 = vmatpush1.bf16.msra.mxu1 %v13703_v31  ;;  %v7423_v32 = vpop.permute.xlu1 %7422  ;;  %v14934_v31 = vld [vmem:[#allocation2 + $0x38] sm:$0xff] }
 0x92b   : > { %v7430_v19 = vmul.f32 %v7423_v32, %v16560_v38  ;;  %v19030_v38 = vld [vmem:[#allocation8_spill] sm:$0xff] }
 0x92c   : > { %v7459_v54 = vmul.f32 %v7449_v34, %v19030_v38 }
 0x92d   : > { %v13693_v10 = vpack.c.bf16 %v7430_v19, %v7429_v61  ;;  %v7689_v61 = vld [vmem:[%s19032_s19] sm:$0xff] (!%p12856_p5)  ;;  %v7690_v19 = vld [vmem:[%s19032_s19 + $0x8] sm:$0xff] (!%p12856_p5) }
 0x92f   : > { %v7393_v39 = vpop.permute.xlu1 %7392  ;;  %13694 = vmatprep.subr.bf16.mxu0 %v13693_v10  ;;  %v7691_v10 = vld [vmem:[%s19032_s19 + $0x10] sm:$0xff] (!%p12856_p5) }
 0x930   : > { %v7400_v37 = vmul.f32 %v7393_v39, %v19028_v57  ;;  %v7692_v39 = vld [vmem:[%s19032_s19 + $0x18] sm:$0xff] (!%p12856_p5) }
 0x931   : > { %v7696_v57 = vld [vmem:[%s19032_s19 + $0x38] sm:$0xff] (!%p12856_p5) }
 0x934   : > { %v7479_v58 = vpop.permute.xlu1 %7478 }
 0x935   : > { %v7489_v6 = vmul.f32 %v7479_v58, %v19027_v29 }
 0x937   : > { %v13705_v27 = vpack.c.bf16 %v7490_v41, %v7489_v6  ;;  %v7693_v6 = vld [vmem:[%s19032_s19 + $0x20] sm:$0xff] (!%p12856_p5) }
 0x939   : > { %13706 = vmatprep.subr.bf16.mxu1 %v13705_v27  ;;  %v7388_v52 = vpop.permute.xlu1 %7387  ;;  %v7694_v27 = vld [vmem:[%s19032_s19 + $0x28] sm:$0xff] (!%p12856_p5) }
 0x93a   : > { %v7399_v22 = vmul.f32 %v7388_v52, %v19029_v47  ;;  %v7695_v52 = vld [vmem:[%s19032_s19 + $0x30] sm:$0xff] (!%p12856_p5) }
 0x93c   : > { %v13695_v44 = vpack.c.bf16 %v7400_v37, %v7399_v22 }
 0x93e   : > { %v7453_v9 = vpop.permute.xlu1 %7452  ;;  %13696 = vmatpush1.bf16.msra.mxu0 %v13695_v44 }
 0x93f   : > { %v7460_v21 = vmul.f32 %v7453_v9, %v19031_v63 }
 0x941   : > { %v13707_v59 = vpack.c.bf16 %v7460_v21, %v7459_v54  ;;  %12852 = vmatmul.mubr.msk.f32.vlgmr.msra.gmra.mrb[86].mxu0 %vm3531_vm1, %v16949_v46 }
 0x942   : > { %7583 = vmatprep.mubr.f32.mxu0 %v19011_v15 }
 0x943   : > { %13708 = vmatpush1.bf16.msra.mxu1 %v13707_v59 }
 0x945   : > { %12853 = vmatmul.mubr.msk.f32.gmra.mrb[88].mxu0 %vm3531_vm1, %v16986_v26 }
 0x946   : > { %12854 = vmatmul.mubr.msk.f32.vlgmr.msra.gmra.mrb[90].mxu1 %vm3531_vm1, %v16949_v46  ;;  %v17073_v46 = vsub.s32 3, %v16944_v55 }
 0x947   : > { %7660 = vmatprep.mubr.f32.mxu1 %v19011_v15 }
 0x948   : > { %v7508_v36 = vrot.slane %v7491_v7, %v17073_v46  ;;  %v7820_v7 = vld [vmem:[%s18960_s10] sm:$0xff] (!%p12856_p5) }
 0x94a   : > { %12855 = vmatmul.mubr.msk.f32.gmra.mrb[92].mxu1 %vm3531_vm1, %v16986_v26 }
 0xa14   : > { %v7579_v15 = vpop.f32.mrb[86].mxu0 }
 0xa15   : > { %v7580_v16 = vadd.f32 %v7579_v15, %v7496_v49  ;;  %v7581_v26 = vpop.f32.mrb[87].mxu0 }
 0xa16   : > { %v7582_v13 = vadd.f32 %v7581_v26, %v7500_v56 }
 0xa17   : > { %v7667_v23 = vadd.f32 %v14927_v53, %v7580_v16  ;;  %v7825_v16 = vld [vmem:[%s18960_s10 + $0x28] sm:$0xff] (!%p12856_p5) }
 0xa18   : > { %v7668_v2 = vadd.f32 %v14928_v17, %v7582_v13  ;;  %v7585_v14 = vpop.f32.mrb[88].mxu0  ;;  %v7832_v13 = vld [vmem:[%s18960_s10 + $0x60] sm:$0xff] (!%p12856_p5)  ;;  %v7829_v17 = vld [vmem:[%s18960_s10 + $0x48] sm:$0xff] (!%p12856_p5) }
 0xa19   : > { %7675 = vst [vmem:[#allocation2] sm:$0xff] %v7667_v23  ;;  %v7656_v30 = vpop.f32.mrb[90].mxu1  ;;  %v7586_v25 = vadd.f32 %v7585_v14, %v7496_v49  ;;  %v7587_v20 = vpop.f32.mrb[89].mxu0  ;;  %v17090_v58 = vadd.f32 (!%p12856_p5), %v7689_v61, %v7667_v23  ;;  %v7824_v49 = vld [vmem:[%s18960_s10 + $0x20] sm:$0xff] (!%p12856_p5) }
 0xa1a   : > { %v7657_v3 = vadd.f32 %v7656_v30, %v7504_v8  ;;  %7676 = vst [vmem:[#allocation2 + $0x8] sm:$0xff] %v7668_v2  ;;  %v7658_v45 = vpop.f32.mrb[91].mxu1  ;;  %v7588_v4 = vadd.f32 %v7587_v20, %v7500_v56  ;;  %v17092_v41 = vadd.f32 (!%p12856_p5), %v7690_v19, %v7668_v2  ;;  %v7821_v56 = vld [vmem:[%s18960_s10 + $0x8] sm:$0xff] (!%p12856_p5)  ;;  %v12858_v15 = vcombine.high (!%p12856_p5), %v7820_v7, %v7824_v49  ;;  %v7836_v14 = vld [vmem:[%s18960_s10 + $0x80] sm:$0xff] (!%p12856_p5) }
 0xa1b   : > { %v7659_v11 = vadd.f32 %v7658_v45, %v7508_v36  ;;  %v7671_v62 = vadd.f32 %v14929_v43, %v7586_v25  ;;  %v12857_v26 = vcombine.low (!%p12856_p5), %v7820_v7, %v7824_v49  ;;  %v12860_v53 = vcombine.high (!%p12856_p5), %v7821_v56, %v7825_v16  ;;  %v7833_v2 = vld [vmem:[%s18960_s10 + $0x68] sm:$0xff] (!%p12856_p5)  ;;  %v7840_v25 = vld [vmem:[%s18960_s10 + $0xa0] sm:$0xff] (!%p12856_p5) }
 0xa1c   : > { %v7669_v12 = vadd.f32 %v14930_v0, %v7657_v3  ;;  %v7672_v1 = vadd.f32 %v14931_v50, %v7588_v4  ;;  %v7705_v34 = vadd.f32 (!%p12856_p5), %v17092_v41, %v17090_v58  ;;  %v12859_v23 = vcombine.low (!%p12856_p5), %v7821_v56, %v7825_v16  ;;  %9398 = vmatprep.subr.bf16.mxu0 (!%p12856_p5), %v12858_v15  ;;  %v7837_v20 = vld [vmem:[%s18960_s10 + $0x88] sm:$0xff] (!%p12856_p5)  ;;  %v7848_v0 = vld [vmem:[%s18960_s10 + $0xe0] sm:$0xff] (!%p12856_p5) }
 0xa1d   : > { %v7670_v60 = vadd.f32 %v14932_v42, %v7659_v11  ;;  %7679 = vst [vmem:[#allocation2 + $0x20] sm:$0xff] %v7671_v62  ;;  %v7662_v24 = vpop.f32.mrb[92].mxu1  ;;  %7686 = sbr.rel (%p12856_p5) target bundleno = 3945 (0xf69), region = 92  ;;  %v17108_v37 = vadd.f32 (!%p12856_p5), %v7693_v6, %v7671_v62  ;;  %v12868_v30 = vcombine.high (!%p12856_p5), %v7829_v17, %v7833_v2  ;;  %v7841_v3 = vld [vmem:[%s18960_s10 + $0xa8] sm:$0xff] (!%p12856_p5)  ;;  %9484 = vmatprep.subr.bf16.mxu1 (!%p12856_p5), %v12860_v53  ;;  %v7844_v62 = vld [vmem:[%s18960_s10 + $0xc0] sm:$0xff] (!%p12856_p5) }
 0xa1e   : > { %7677 = vst [vmem:[#allocation2 + $0x10] sm:$0xff] %v7669_v12  ;;  %v7663_v28 = vadd.f32 %v7662_v24, %v7504_v8  ;;  %7680 = vst [vmem:[#allocation2 + $0x28] sm:$0xff] %v7672_v1  ;;  %v7664_v5 = vpop.f32.mrb[93].mxu1  ;;  %v17094_v29 = vadd.f32 (!%p12856_p5), %v7691_v10, %v7669_v12  ;;  %v17110_v47 = vadd.f32 (!%p12856_p5), %v7694_v27, %v7672_v1  ;;  %v7828_v8 = vld [vmem:[%s18960_s10 + $0x40] sm:$0xff] (!%p12856_p5)  ;;  %9399 = vmatpush1.bf16.msra.mxu0 (!%p12856_p5), %v12857_v26  ;;  %v7845_v12 = vld [vmem:[%s18960_s10 + $0xc8] sm:$0xff] (!%p12856_p5) }
 0xa1f   : > { %7678 = vst [vmem:[#allocation2 + $0x18] sm:$0xff] %v7670_v60  ;;  %v7665_v33 = vadd.f32 %v7664_v5, %v7508_v36  ;;  %v17112_v22 = vadd.f32 (!%p12856_p5), %v7692_v39, %v7670_v60  ;;  %v12866_v36 = vcombine.high (!%p12856_p5), %v7828_v8, %v7832_v13  ;;  %v12865_v45 = vcombine.low (!%p12856_p5), %v7828_v8, %v7832_v13  ;;  %v7849_v50 = vld [vmem:[%s18960_s10 + $0xe8] sm:$0xff] (!%p12856_p5)  ;;  %v7856_v5 = vld [vmem:[%s18960_s10 + $0x120] sm:$0xff] (!%p12856_p5) }
 0xa20   : > { %v7673_v48 = vadd.f32 %v14933_v18, %v7663_v28  ;;  %v7710_v9 = vadd.f32 (!%p12856_p5), %v17110_v47, %v17108_v37  ;;  %v7706_v38 = vadd.f32 (!%p12856_p5), %v7705_v34, %v17094_v29  ;;  %9485 = vmatpush1.bf16.msra.mxu1 (!%p12856_p5), %v12859_v23  ;;  %v12867_v4 = vcombine.low (!%p12856_p5), %v7829_v17, %v7833_v2  ;;  %v7852_v28 = vld [vmem:[%s18960_s10 + $0x100] sm:$0xff] (!%p12856_p5)  ;;  %v7857_v18 = vld [vmem:[%s18960_s10 + $0x128] sm:$0xff] (!%p12856_p5) }
 0xa21   : > { %v7674_v32 = vadd.f32 %v14934_v31, %v7665_v33  ;;  %9400 = vmatprep.subr.bf16.mxu0 (!%p12856_p5), %v12866_v36  ;;  %v12874_v11 = vcombine.high (!%p12856_p5), %v7836_v14, %v7840_v25  ;;  %9486 = vmatprep.subr.bf16.mxu1 (!%p12856_p5), %v12868_v30  ;;  %v12876_v43 = vcombine.high (!%p12856_p5), %v7837_v20, %v7841_v3  ;;  %v7853_v33 = vld [vmem:[%s18960_s10 + $0x108] sm:$0xff] (!%p12856_p5)  ;;  %v7860_v31 = vld [vmem:[%s18960_s10 + $0x140] sm:$0xff] (!%p12856_p5) }
 0xa22   : > { %7681 = vst [vmem:[#allocation2 + $0x30] sm:$0xff] %v7673_v48  ;;  %v17116_v44 = vadd.f32 (!%p12856_p5), %v7695_v52, %v7673_v48  ;;  %v7707_v21 = vadd.f32 (!%p12856_p5), %v7706_v38, %v17112_v22  ;;  %9401 = vmatpush1.bf16.msra.mxu0 (!%p12856_p5), %v12865_v45  ;;  %v12873_v1 = vcombine.low (!%p12856_p5), %v7836_v14, %v7840_v25  ;;  %v7861_v10 = vld [vmem:[%s18960_s10 + $0x148] sm:$0xff] (!%p12856_p5)  ;;  %v7868_v52 = vld [vmem:[%s18960_s10 + $0x180] sm:$0xff] (!%p12856_p5) }
 0xa23   : > { %7682 = vst [vmem:[#allocation2 + $0x38] sm:$0xff] %v7674_v32  ;;  %v17121_v54 = vadd.f32 (!%p12856_p5), %v7696_v57, %v7674_v32  ;;  %9402 = vmatprep.subr.bf16.mxu0 (!%p12856_p5), %v12874_v11  ;;  %v12875_v42 = vcombine.low (!%p12856_p5), %v7837_v20, %v7841_v3  ;;  %v12882_v60 = vcombine.high (!%p12856_p5), %v7844_v62, %v7848_v0  ;;  %v7864_v32 = vld [vmem:[%s18960_s10 + $0x160] sm:$0xff] (!%p12856_p5)  ;;  %v7865_v39 = vld [vmem:[%s18960_s10 + $0x168] sm:$0xff] (!%p12856_p5) }
 0xa24   : > { %v7711_v63 = vadd.f32 %v7710_v9, %v17116_v44  ;;  %7708 = vadd.xlane.f32.xlu0 %v7707_v21  ;;  %9487 = vmatpush1.bf16.msra.mxu1 %v12867_v4  ;;  %v12884_v24 = vcombine.high %v7845_v12, %v7849_v50  ;;  %v12881_v48 = vcombine.low %v7844_v62, %v7848_v0  ;;  %v7872_v57 = vld [vmem:[%s18960_s10 + $0x1a0] sm:$0xff]  ;;  %v7869_v38 = vld [vmem:[%s18960_s10 + $0x188] sm:$0xff] }
 0xa25   : > { %9488 = vmatprep.subr.bf16.mxu1 %v12876_v43  ;;  %v12883_v61 = vcombine.low %v7845_v12, %v7849_v50  ;;  %v12890_v19 = vcombine.high %v7852_v28, %v7856_v5  ;;  %v12892_v6 = vcombine.high %v7853_v33, %v7857_v18  ;;  %v12889_v27 = vcombine.low %v7852_v28, %v7856_v5  ;;  %v7876_v7 = vld [vmem:[%s18960_s10 + $0x1c0] sm:$0xff]  ;;  %v7877_v16 = vld [vmem:[%s18960_s10 + $0x1c8] sm:$0xff] }
 0xa26   : > { %v7712_v59 = vadd.f32 %v7711_v63, %v17121_v54  ;;  %9403 = vmatpush1.bf16.msra.mxu0 %v12873_v1  ;;  %v12891_v34 = vcombine.low %v7853_v33, %v7857_v18  ;;  %v12898_v9 = vcombine.high %v7860_v31, %v7864_v32  ;;  %v7873_v63 = vld [vmem:[%s18960_s10 + $0x1a8] sm:$0xff]  ;;  %v12900_v21 = vcombine.high %v7861_v10, %v7865_v39  ;;  %v7880_v49 = vld [vmem:[%s18960_s10 + $0x1e0] sm:$0xff] }
 0xa27   : > { %9404 = vmatprep.subr.bf16.mxu0 %v12882_v60  ;;  %v12899_v56 = vcombine.low %v7861_v10, %v7865_v39  ;;  %v12906_v15 = vcombine.high %v7868_v52, %v7872_v57  ;;  %v7881_v26 = vld [vmem:[%s18960_s10 + $0x1e8] sm:$0xff]  ;;  %v12908_v8 = vcombine.high %v7869_v38, %v7873_v63  ;;  %v12905_v13 = vcombine.low %v7868_v52, %v7872_v57  ;;  %v7884_v53 = vld [vmem:[%s18960_s10 + $0x200] sm:$0xff] }
 0xa28   : > { %7713 = vadd.xlane.f32.xlu0 %v7712_v59  ;;  %9489 = vmatpush1.bf16.msra.mxu1 %v12875_v42  ;;  %v12897_v59 = vcombine.low %v7860_v31, %v7864_v32  ;;  %v7888_v23 = vld [vmem:[%s18960_s10 + $0x220] sm:$0xff]  ;;  %v12907_v36 = vcombine.low %v7869_v38, %v7873_v63  ;;  %v12914_v17 = vcombine.high %v7876_v7, %v7880_v49  ;;  %v7885_v2 = vld [vmem:[%s18960_s10 + $0x208] sm:$0xff] }
 0xa29   : > { %9490 = vmatprep.subr.bf16.mxu1 %v12884_v24  ;;  %v7889_v14 = vld [vmem:[%s18960_s10 + $0x228] sm:$0xff]  ;;  %v12916_v30 = vcombine.high %v7877_v16, %v7881_v26  ;;  %v12913_v25 = vcombine.low %v7876_v7, %v7880_v49  ;;  %v7892_v20 = vld [vmem:[%s18960_s10 + $0x240] sm:$0xff]  ;;  %v12915_v45 = vcombine.low %v7877_v16, %v7881_v26  ;;  %v12922_v4 = vcombine.high %v7884_v53, %v7888_v23 }
 0xa2a   : > { %9405 = vmatpush1.bf16.msra.mxu0 %v12881_v48  ;;  %v7896_v3 = vld [vmem:[%s18960_s10 + $0x260] sm:$0xff]  ;;  %v7893_v11 = vld [vmem:[%s18960_s10 + $0x248] sm:$0xff]  ;;  %v12924_v62 = vcombine.high %v7885_v2, %v7889_v14  ;;  %v12921_v0 = vcombine.low %v7884_v53, %v7888_v23  ;;  %v12923_v12 = vcombine.low %v7885_v2, %v7889_v14 }
 0xa2b   : > { %9406 = vmatprep.subr.bf16.mxu0 %v12890_v19  ;;  %v7897_v43 = vld [vmem:[%s18960_s10 + $0x268] sm:$0xff]  ;;  %v12930_v50 = vcombine.high %v7892_v20, %v7896_v3  ;;  %v7900_v38 = vld [vmem:[%s18960_s10 + $0x280] sm:$0xff] }
 0xa2c   : > { %9491 = vmatpush1.bf16.msra.mxu1 %v12883_v61  ;;  %v12932_v1 = vcombine.high %v7893_v11, %v7897_v43  ;;  %v7904_v63 = vld [vmem:[%s18960_s10 + $0x2a0] sm:$0xff]  ;;  %v7905_v7 = vld [vmem:[%s18960_s10 + $0x2a8] sm:$0xff] }
 0xa2d   : > { %9492 = vmatprep.subr.bf16.mxu1 %v12892_v6  ;;  %v7908_v16 = vld [vmem:[%s18960_s10 + $0x2c0] sm:$0xff]  ;;  %v7913_v53 = vld [vmem:[%s18960_s10 + $0x2e8] sm:$0xff] }
 0xa2e   : > { %9407 = vmatpush1.bf16.msra.mxu0 %v12889_v27  ;;  %v7912_v26 = vld [vmem:[%s18960_s10 + $0x2e0] sm:$0xff] }
 0xa2f   : > { %9408 = vmatprep.subr.bf16.mxu0 %v12898_v9  ;;  %v12931_v9 = vcombine.low %v7893_v11, %v7897_v43  ;;  %v7916_v2 = vld [vmem:[%s18960_s10 + $0x300] sm:$0xff] }
 0xa30   : > { %9493 = vmatpush1.bf16.msra.mxu1 %v12891_v34  ;;  %v7920_v14 = vld [vmem:[%s18960_s10 + $0x320] sm:$0xff] }
 0xa31   : > { %9494 = vmatprep.subr.bf16.mxu1 %v12900_v21  ;;  %v7901_v21 = vld [vmem:[%s18960_s10 + $0x288] sm:$0xff] }
 0xa32   : > { %9409 = vmatpush1.bf16.msra.mxu0 %v12897_v59  ;;  %v12938_v59 = vcombine.high %v7900_v38, %v7904_v63  ;;  %v12940_v49 = vcombine.high %v7901_v21, %v7905_v7 }
 0xa33   : > { %9410 = vmatprep.subr.bf16.mxu0 %v12906_v15  ;;  %v12939_v15 = vcombine.low %v7901_v21, %v7905_v7 }
 0xa34   : > { %9495 = vmatpush1.bf16.msra.mxu1 %v12899_v56  ;;  %v12937_v56 = vcombine.low %v7900_v38, %v7904_v63  ;;  %v7953_v63 = vld [vmem:[%s18960_s10 + $0x428] sm:$0xff] }
 0xa35   : > { %9496 = vmatprep.subr.bf16.mxu1 %v12908_v8  ;;  %v7909_v8 = vld [vmem:[%s18960_s10 + $0x2c8] sm:$0xff] }
 0xa36   : > { %9411 = vmatpush1.bf16.msra.mxu0 %v12905_v13  ;;  %v12946_v13 = vcombine.high %v7908_v16, %v7912_v26  ;;  %v12948_v23 = vcombine.high %v7909_v8, %v7913_v53 }
 0xa37   : > { %9412 = vmatprep.subr.bf16.mxu0 %v12914_v17  ;;  %v12947_v17 = vcombine.low %v7909_v8, %v7913_v53 }
 0xa38   : > { %9497 = vmatpush1.bf16.msra.mxu1 %v12907_v36  ;;  %v12945_v36 = vcombine.low %v7908_v16, %v7912_v26 }
 0xa39   : > { %9498 = vmatprep.subr.bf16.mxu1 %v12916_v30  ;;  %v7917_v30 = vld [vmem:[%s18960_s10 + $0x308] sm:$0xff] }
 0xa3a   : > { %9413 = vmatpush1.bf16.msra.mxu0 %v12913_v25  ;;  %v12954_v25 = vcombine.high %v7916_v2, %v7920_v14 }
 0xa3b   : > { %9414 = vmatprep.subr.bf16.mxu0 %v12922_v4  ;;  %v7928_v4 = vld [vmem:[%s18960_s10 + $0x360] sm:$0xff] }
 0xa3c   : > { %9499 = vmatpush1.bf16.msra.mxu1 %v12915_v45  ;;  %v7924_v45 = vld [vmem:[%s18960_s10 + $0x340] sm:$0xff] }
 0xa3d   : > { %9500 = vmatprep.subr.bf16.mxu1 %v12924_v62  ;;  %v12962_v62 = vcombine.high %v7924_v45, %v7928_v4 }
 0xa3e   : > { %9415 = vmatpush1.bf16.msra.mxu0 %v12921_v0  ;;  %v7925_v0 = vld [vmem:[%s18960_s10 + $0x348] sm:$0xff] }
 0xa3f   : > { %9416 = vmatprep.subr.bf16.mxu0 %v12930_v50 }
 0xa40   : > { %9501 = vmatpush1.bf16.msra.mxu1 %v12923_v12  ;;  %v7929_v12 = vld [vmem:[%s18960_s10 + $0x368] sm:$0xff] }
 0xa41   : > { %9502 = vmatprep.subr.bf16.mxu1 %v12932_v1  ;;  %v12964_v50 = vcombine.high %v7925_v0, %v7929_v12  ;;  %v7932_v1 = vld [vmem:[%s18960_s10 + $0x380] sm:$0xff] }
 0xa44   : > { %9503 = vmatpush1.bf16.msra.mxu1 %v12931_v9  ;;  %v17371_v9 = vld [vmem:[%s18960_s10 + $0x408] sm:$0xff] }
 0xa45   : > { %9504 = vmatprep.subr.bf16.mxu1 %v12940_v49  ;;  %v12988_v7 = vcombine.high %v17371_v9, %v7953_v63 }
 0xa48   : > { %9505 = vmatpush1.bf16.msra.mxu1 %v12939_v15 }
 0xa49   : > { %9506 = vmatprep.subr.bf16.mxu1 %v12948_v23  ;;  %v17392_v23 = vld [vmem:[%s18965_s15] sm:$0xf] }
 0xa4c   : > { %9507 = vmatpush1.bf16.msra.mxu1 %v12947_v17 }
 0xab1   : > { %v7709_v42 = vpop.xlane.xlu0 %7708 }
 0xab2   : > { %v7716_v60 = vmul.f32 0.001953125, %v7709_v42  ;;  %v7936_v42 = vld [vmem:[%s18960_s10 + $0x3a0] sm:$0xff] }
 0xab4   : > { %v17247_v24 = vsub.f32 %v17090_v58, %v7716_v60  ;;  %v17250_v28 = vsub.f32 %v17092_v41, %v7716_v60  ;;  %v17253_v5 = vsub.f32 %v17094_v29, %v7716_v60  ;;  %v17256_v18 = vsub.f32 %v17112_v22, %v7716_v60  ;;  %v7933_v60 = vld [vmem:[%s18960_s10 + $0x388] sm:$0xff] }
 0xab5   : > { %v7714_v33 = vpop.xlane.xlu0 %7713 }
 0xab6   : > { %v7717_v48 = vmul.f32 0.001953125, %v7714_v33  ;;  %v7726_v31 = vmul.f32 %v17247_v24, %v17247_v24  ;;  %v7727_v32 = vmul.f32 %v17250_v28, %v17250_v28  ;;  %v7728_v58 = vmul.f32 %v17253_v5, %v17253_v5  ;;  %v7937_v33 = vld [vmem:[%s18960_s10 + $0x3a8] sm:$0xff] }
 0xab7   : > { %v7729_v19 = vmul.f32 %v17256_v18, %v17256_v18 }
 0xab8   : > { %v17265_v41 = vsub.f32 %v17108_v37, %v7717_v48  ;;  %v17268_v29 = vsub.f32 %v17110_v47, %v7717_v48  ;;  %v7734_v61 = vadd.f32 %v7727_v32, %v7726_v31  ;;  %v17271_v22 = vsub.f32 %v17116_v44, %v7717_v48 }
 0xab9   : > { %v17276_v39 = vsub.f32 %v17121_v54, %v7717_v48  ;;  %v12929_v54 = vcombine.low %v7892_v20, %v7896_v3  ;;  %v7921_v20 = vld [vmem:[%s18960_s10 + $0x328] sm:$0xff]  ;;  %v12953_v3 = vcombine.low %v7916_v2, %v7920_v14  ;;  %v12961_v48 = vcombine.low %v7924_v45, %v7928_v4 }
 0xaba   : > { %v7735_v10 = vadd.f32 %v7734_v61, %v7728_v58  ;;  %v7730_v6 = vmul.f32 %v17265_v41, %v17265_v41  ;;  %v7731_v37 = vmul.f32 %v17268_v29, %v17268_v29  ;;  %v7732_v47 = vmul.f32 %v17271_v22, %v17271_v22  ;;  %v7940_v61 = vld [vmem:[%s18960_s10 + $0x3c0] sm:$0xff] }
 0xabb   : > { %v7733_v44 = vmul.f32 %v17276_v39, %v17276_v39  ;;  %9417 = vmatpush1.bf16.msra.mxu0 %v12929_v54  ;;  %v12956_v11 = vcombine.high %v7917_v30, %v7921_v20  ;;  %v12955_v43 = vcombine.low %v7917_v30, %v7921_v20  ;;  %v12963_v31 = vcombine.low %v7925_v0, %v7929_v12  ;;  %v17366_v54 = vld [vmem:[%s18960_s10 + $0x420] sm:$0xff] }
 0xabc   : > { %v7736_v27 = vadd.f32 %v7735_v10, %v7729_v19  ;;  %v7739_v52 = vadd.f32 %v7731_v37, %v7730_v6  ;;  %9418 = vmatprep.subr.bf16.mxu0 %v12938_v59  ;;  %v12970_v32 = vcombine.high %v7932_v1, %v7936_v42  ;;  %v12972_v58 = vcombine.high %v7933_v60, %v7937_v33  ;;  %v7944_v19 = vld [vmem:[%s18960_s10 + $0x3e0] sm:$0xff]  ;;  %v7941_v10 = vld [vmem:[%s18960_s10 + $0x3c8] sm:$0xff] }
 0xabd   : > { %9508 = vmatprep.subr.bf16.mxu1 %v12956_v11  ;;  %v7945_v6 = vld [vmem:[%s18960_s10 + $0x3e8] sm:$0xff]  ;;  %v12969_v37 = vcombine.low %v7932_v1, %v7936_v42  ;;  %v12987_v59 = vcombine.low %v17371_v9, %v7953_v63  ;;  %v7956_v42 = vld [vmem:[%s18960_s10 + $0x440] sm:$0xff] }
 0xabe   : > { %7737 = vadd.xlane.f32.xlu1 %v7736_v27  ;;  %v7740_v57 = vadd.f32 %v7739_v52, %v7732_v47  ;;  %9509 = vmatpush1.bf16.msra.mxu1 %v12955_v43  ;;  %v12971_v27 = vcombine.low %v7933_v60, %v7937_v33  ;;  %v12978_v47 = vcombine.high %v7940_v61, %v7944_v19  ;;  %v7960_v33 = vld [vmem:[%s18960_s10 + $0x460] sm:$0xff]  ;;  %v7973_v63 = vld [vmem:[%s18960_s10 + $0x4c8] sm:$0xff] }
 0xabf   : > { %9419 = vmatpush1.bf16.msra.mxu0 %v12937_v56  ;;  %9510 = vmatprep.subr.bf16.mxu1 %v12964_v50  ;;  %v12980_v52 = vcombine.high %v7941_v10, %v7945_v6  ;;  %v7972_v9 = vld [vmem:[%s18960_s10 + $0x4c0] sm:$0xff] }
 0xac0   : > { %v7741_v34 = vadd.f32 %v7740_v57, %v7733_v44  ;;  %9420 = vmatprep.subr.bf16.mxu0 %v12946_v13  ;;  %v12977_v44 = vcombine.low %v7940_v61, %v7944_v19  ;;  %v12979_v57 = vcombine.low %v7941_v10, %v7945_v6  ;;  %v17385_v13 = vld [vmem:[%s18964_s14] sm:$0xf]  ;;  %v12994_v10 = vcombine.high %v7956_v42, %v7960_v33 }
 0xac1   : > { %v17398_v17 = vrot.slane %v17385_v13, %v17065_v40  ;;  %v17404_v14 = vrot.slane %v17385_v13, %v17061_v35  ;;  %v7964_v19 = vld [vmem:[%s18960_s10 + $0x480] sm:$0xff] }
 0xac2   : > { %7742 = vadd.xlane.f32.xlu1 %v7741_v34  ;;  %9511 = vmatpush1.bf16.msra.mxu1 %v12963_v31  ;;  %v17361_v34 = vld [vmem:[%s18960_s10 + $0x400] sm:$0xff]  ;;  %v7961_v31 = vld [vmem:[%s18960_s10 + $0x468] sm:$0xff] }
 0xac3   : > { %9421 = vmatpush1.bf16.msra.mxu0 %v12945_v36  ;;  %9512 = vmatprep.subr.bf16.mxu1 %v12972_v58  ;;  %v12986_v38 = vcombine.high %v17361_v34, %v17366_v54  ;;  %v12985_v21 = vcombine.low %v17361_v34, %v17366_v54 }
 0xac4   : > { %9422 = vmatprep.subr.bf16.mxu0 %v12954_v25  ;;  %v17410_v25 = vrot.slane %v17392_v23, %v17065_v40 }
 0xac6   : > { %9513 = vmatpush1.bf16.msra.mxu1 %v12971_v27  ;;  %v7965_v27 = vld [vmem:[%s18960_s10 + $0x488] sm:$0xff] }
 0xac7   : > { %9423 = vmatpush1.bf16.msra.mxu0 %v12953_v3  ;;  %9514 = vmatprep.subr.bf16.mxu1 %v12980_v52 }
 0xac8   : > { %9424 = vmatprep.subr.bf16.mxu0 %v12962_v62 }
 0xaca   : > { %9515 = vmatpush1.bf16.msra.mxu1 %v12979_v57 }
 0xacb   : > { %9425 = vmatpush1.bf16.msra.mxu0 %v12961_v48  ;;  %9527 = vmatprep.subr.bf16.mxu1 %v12988_v7  ;;  %v7957_v48 = vld [vmem:[%s18960_s10 + $0x448] sm:$0xff] }
 0xacc   : > { %9426 = vmatprep.subr.bf16.mxu0 %v12970_v32  ;;  %v12996_v6 = vcombine.high %v7957_v48, %v7961_v31  ;;  %v12995_v57 = vcombine.low %v7957_v48, %v7961_v31  ;;  %v7997_v48 = vld [vmem:[%s18960_s10 + $0x588] sm:$0xff] }
 0xacd   : > { %v8001_v31 = vld [vmem:[%s18960_s10 + $0x5a8] sm:$0xff] }
 0xacf   : > { %9427 = vmatpush1.bf16.msra.mxu0 %v12969_v37  ;;  %v7968_v37 = vld [vmem:[%s18960_s10 + $0x4a0] sm:$0xff] }
 0xad0   : > { %9428 = vmatprep.subr.bf16.mxu0 %v12978_v47  ;;  %v7969_v47 = vld [vmem:[%s18960_s10 + $0x4a8] sm:$0xff]  ;;  %v13002_v34 = vcombine.high %v7964_v19, %v7968_v37 }
 0xad1   : > { %v13004_v54 = vcombine.high %v7965_v27, %v7969_v47  ;;  %v13003_v7 = vcombine.low %v7965_v27, %v7969_v47  ;;  %v8004_v27 = vld [vmem:[%s18960_s10 + $0x5c0] sm:$0xff] }
 0xad2   : > { %v8008_v47 = vld [vmem:[%s18960_s10 + $0x5e0] sm:$0xff] }
 0xad3   : > { %9429 = vmatpush1.bf16.msra.mxu0 %v12977_v44  ;;  %v12993_v44 = vcombine.low %v7956_v42, %v7960_v33  ;;  %v7996_v42 = vld [vmem:[%s18960_s10 + $0x580] sm:$0xff] }
 0xad4   : > { %9441 = vmatprep.subr.bf16.mxu0 %v12986_v38  ;;  %v7976_v38 = vld [vmem:[%s18960_s10 + $0x4e0] sm:$0xff] }
 0xad5   : > { %v8000_v33 = vld [vmem:[%s18960_s10 + $0x5a0] sm:$0xff] }
 0xb4b   : > { %v7738_v49 = vpop.xlane.xlu1 %7737 }
 0xb4c   : > { %v7744_v56 = vmul.f32 0.001953125, %v7738_v49  ;;  %v13010_v49 = vcombine.high %v7972_v9, %v7976_v38 }
 0xb4e   : > { %v7746_v15 = vadd.f32 1e-05, %v7744_v56 }
 0xb4f   : > { %v7743_v16 = vpop.xlane.xlu1 %7742 }
 0xb50   : > { %15319 = vrsqrt.f32 %v7746_v15  ;;  %v7745_v26 = vmul.f32 0.001953125, %v7743_v16  ;;  %v7980_v15 = vld [vmem:[%s18960_s10 + $0x500] sm:$0xff] }
 0xb51   : > { %v7984_v16 = vld [vmem:[%s18960_s10 + $0x520] sm:$0xff] }
 0xb52   : > { %v7747_v8 = vadd.f32 1e-05, %v7745_v26  ;;  %v7981_v26 = vld [vmem:[%s18960_s10 + $0x508] sm:$0xff] }
 0xb54   : > { %15321 = vrsqrt.f32 %v7747_v8  ;;  %v7985_v8 = vld [vmem:[%s18960_s10 + $0x528] sm:$0xff] }
 0xb5a   : > { %v17387_v53 = vpop.eup %15319 }
 0xb5b   : > { %v7751_v36 = vmul.f32 %v17387_v53, %v17250_v28  ;;  %v7750_v2 = vmul.f32 %v17387_v53, %v17247_v24  ;;  %v17414_v28 = vrot.slane %v17392_v23, %v17061_v35  ;;  %v7753_v20 = vmul.f32 %v17387_v53, %v17256_v18 }
 0xb5c   : > { %v17420_v24 = vrot.slane %v17385_v13, %v17073_v46 }
 0xb5d   : > { %v7780_v45 = vmul.f32 %v17398_v17, %v7751_v36  ;;  %v7779_v11 = vmul.f32 %v17404_v14, %v7750_v2  ;;  %v13009_v36 = vcombine.low %v7972_v9, %v7976_v38  ;;  %v13042_v9 = vcombine.high %v8004_v27, %v8008_v47 }
 0xb5e   : > { %v17406_v30 = vpop.eup %15321  ;;  %v7782_v0 = vmul.f32 %v17420_v24, %v7753_v20  ;;  %v13018_v20 = vcombine.high %v7980_v15, %v7984_v16 }
 0xb5f   : > { %v7755_v3 = vmul.f32 %v17406_v30, %v17268_v29  ;;  %v7754_v4 = vmul.f32 %v17406_v30, %v17265_v41  ;;  %v7757_v43 = vmul.f32 %v17406_v30, %v17276_v39  ;;  %v17436_v29 = vrot.slane %v17392_v23, %v17073_v46 }
 0xb60   : > { %v17439_v50 = vadd.f32 %v17410_v25, %v7780_v45  ;;  %v17445_v39 = vadd.f32 %v17414_v28, %v7779_v11  ;;  %v7988_v45 = vld [vmem:[%s18960_s10 + $0x540] sm:$0xff]  ;;  %v7989_v11 = vld [vmem:[%s18960_s10 + $0x548] sm:$0xff] }
 0xb61   : > { %v7784_v62 = vmul.f32 %v17398_v17, %v7755_v3  ;;  %v7783_v18 = vmul.f32 %v17404_v14, %v7754_v4  ;;  %v7786_v12 = vmul.f32 %v17420_v24, %v7757_v43  ;;  %v17474_v61 = vadd.f32 %v17436_v29, %v7782_v0  ;;  %v7992_v4 = vld [vmem:[%s18960_s10 + $0x560] sm:$0xff]  ;;  %v7993_v43 = vld [vmem:[%s18960_s10 + $0x568] sm:$0xff] }
 0xb62   : > { %v13020_v3 = vcombine.high %v7981_v26, %v7985_v8  ;;  %v13026_v0 = vcombine.high %v7988_v45, %v7992_v4 }
 0xb63   : > { %v17442_v41 = vadd.f32 %v17410_v25, %v7784_v62  ;;  %v17448_v1 = vadd.f32 %v17414_v28, %v7783_v18  ;;  %v17454_v60 = vadd.f32 %v17436_v29, %v7786_v12  ;;  %v13017_v62 = vcombine.low %v7980_v15, %v7984_v16 }
 0xb64   : > { %v13019_v18 = vcombine.low %v7981_v26, %v7985_v8  ;;  %v13028_v12 = vcombine.high %v7989_v11, %v7993_v43  ;;  %v8020_v26 = vld [vmem:[%s18960_s10 + $0x640] sm:$0xff] }
 0xb65   : > { %v17467_v32 = vpack.c.bf16 %v17442_v41, %v17439_v50  ;;  %v17471_v58 = vpack.c.bf16 %v17448_v1, %v17445_v39  ;;  %v17494_v52 = vpack.c.bf16 %v17454_v60, %v17474_v61  ;;  %v8024_v8 = vld [vmem:[%s18960_s10 + $0x660] sm:$0xff] }
 0xb67   : > { %9430 = vmatprep.mubr.bf16.mxu0 %v17467_v32  ;;  %9516 = vmatprep.mubr.bf16.mxu1 %v17467_v32 }
 0xb68   : > { %9431 = vmatmul.mubr.bf16.vlgmr.msra.gmra.mrb[0].mxu0 %v17471_v58  ;;  %9517 = vmatmul.mubr.bf16.vlgmr.msra.gmra.mrb[0].mxu1 %v17471_v58 }
 0xb69   : > { %9442 = vmatpush1.bf16.msra.mxu0 %v12985_v21  ;;  %9528 = vmatpush1.bf16.msra.mxu1 %v12987_v59  ;;  %v7977_v21 = vld [vmem:[%s18960_s10 + $0x4e8] sm:$0xff]  ;;  %v13001_v59 = vcombine.low %v7964_v19, %v7968_v37  ;;  %v13025_v19 = vcombine.low %v7988_v45, %v7992_v4  ;;  %v13036_v37 = vcombine.high %v7997_v48, %v8001_v31 }
 0xb6a   : > { %9473 = vmatprep.mubr.bf16.mxu0 %v17494_v52  ;;  %9559 = vmatprep.mubr.bf16.mxu1 %v17494_v52  ;;  %v13012_v56 = vcombine.high %v7973_v63, %v7977_v21  ;;  %v13011_v2 = vcombine.low %v7973_v63, %v7977_v21  ;;  %v8012_v63 = vld [vmem:[%s18960_s10 + $0x600] sm:$0xff]  ;;  %v13058_v45 = vcombine.high %v8020_v26, %v8024_v8 }
 0xb6b   : > { %9443 = vmatprep.subr.bf16.mxu0 %v12994_v10  ;;  %9529 = vmatprep.subr.bf16.mxu1 %v12996_v6  ;;  %v13027_v10 = vcombine.low %v7989_v11, %v7993_v43  ;;  %v13034_v6 = vcombine.high %v7996_v42, %v8000_v33  ;;  %v8016_v21 = vld [vmem:[%s18960_s10 + $0x620] sm:$0xff] }
 0xb6c   : > { %v13050_v15 = vcombine.high %v8012_v63, %v8016_v21  ;;  %v8028_v11 = vld [vmem:[%s18960_s10 + $0x680] sm:$0xff] }
 0xb6d   : > { %9444 = vmatpush1.bf16.msra.mxu0 %v12993_v44  ;;  %9530 = vmatpush1.bf16.msra.mxu1 %v12995_v57  ;;  %v8005_v44 = vld [vmem:[%s18960_s10 + $0x5c8] sm:$0xff]  ;;  %v8032_v43 = vld [vmem:[%s18960_s10 + $0x6a0] sm:$0xff] }
 0xb6e   : > { %9445 = vmatprep.subr.bf16.mxu0 %v13002_v34  ;;  %9531 = vmatprep.subr.bf16.mxu1 %v13004_v54  ;;  %v8009_v57 = vld [vmem:[%s18960_s10 + $0x5e8] sm:$0xff]  ;;  %v13033_v34 = vcombine.low %v7996_v42, %v8000_v33  ;;  %v13035_v54 = vcombine.low %v7997_v48, %v8001_v31  ;;  %v13066_v42 = vcombine.high %v8028_v11, %v8032_v43  ;;  %v8036_v48 = vld [vmem:[%s18960_s10 + $0x6c0] sm:$0xff] }
 0xb6f   : > { %v13044_v38 = vcombine.high %v8005_v44, %v8009_v57  ;;  %v8040_v31 = vld [vmem:[%s18960_s10 + $0x6e0] sm:$0xff] }
 0xb71   : > { %9446 = vmatpush1.bf16.msra.mxu0 %v13001_v59  ;;  %9532 = vmatpush1.bf16.msra.mxu1 %v13003_v7  ;;  %v8013_v59 = vld [vmem:[%s18960_s10 + $0x608] sm:$0xff] }
 0xb72   : > { %9447 = vmatprep.subr.bf16.mxu0 %v13010_v49  ;;  %9533 = vmatprep.subr.bf16.mxu1 %v13012_v56  ;;  %v8017_v7 = vld [vmem:[%s18960_s10 + $0x628] sm:$0xff]  ;;  %v13041_v49 = vcombine.low %v8004_v27, %v8008_v47  ;;  %v13043_v56 = vcombine.low %v8005_v44, %v8009_v57  ;;  %v13074_v27 = vcombine.high %v8036_v48, %v8040_v31  ;;  %v8044_v44 = vld [vmem:[%s18960_s10 + $0x700] sm:$0xff] }
 0xb73   : > { %v13052_v16 = vcombine.high %v8013_v59, %v8017_v7  ;;  %v8048_v57 = vld [vmem:[%s18960_s10 + $0x720] sm:$0xff] }
 0xb75   : > { %9448 = vmatpush1.bf16.msra.mxu0 %v13009_v36  ;;  %9534 = vmatpush1.bf16.msra.mxu1 %v13011_v2  ;;  %v8021_v36 = vld [vmem:[%s18960_s10 + $0x648] sm:$0xff] }
 0xb76   : > { %9449 = vmatprep.subr.bf16.mxu0 %v13018_v20  ;;  %9535 = vmatprep.subr.bf16.mxu1 %v13020_v3  ;;  %v8025_v2 = vld [vmem:[%s18960_s10 + $0x668] sm:$0xff]  ;;  %v13049_v20 = vcombine.low %v8012_v63, %v8016_v21  ;;  %v13051_v3 = vcombine.low %v8013_v59, %v8017_v7  ;;  %v13082_v63 = vcombine.high %v8044_v44, %v8048_v57  ;;  %v8052_v59 = vld [vmem:[%s18960_s10 + $0x740] sm:$0xff] }
 0xb77   : > { %v13060_v4 = vcombine.high %v8021_v36, %v8025_v2  ;;  %v8056_v7 = vld [vmem:[%s18960_s10 + $0x760] sm:$0xff] }
 0xb79   : > { %9450 = vmatpush1.bf16.msra.mxu0 %v13017_v62  ;;  %9536 = vmatpush1.bf16.msra.mxu1 %v13019_v18  ;;  %v8029_v62 = vld [vmem:[%s18960_s10 + $0x688] sm:$0xff] }
 0xb7a   : > { %9451 = vmatprep.subr.bf16.mxu0 %v13026_v0  ;;  %9537 = vmatprep.subr.bf16.mxu1 %v13028_v12  ;;  %v8033_v18 = vld [vmem:[%s18960_s10 + $0x6a8] sm:$0xff]  ;;  %v13057_v0 = vcombine.low %v8020_v26, %v8024_v8  ;;  %v13059_v12 = vcombine.low %v8021_v36, %v8025_v2  ;;  %v13090_v26 = vcombine.high %v8052_v59, %v8056_v7  ;;  %v8060_v36 = vld [vmem:[%s18960_s10 + $0x780] sm:$0xff] }
 0xb7b   : > { %v13068_v33 = vcombine.high %v8029_v62, %v8033_v18  ;;  %v8064_v2 = vld [vmem:[%s18960_s10 + $0x7a0] sm:$0xff] }
 0xb7d   : > { %9452 = vmatpush1.bf16.msra.mxu0 %v13025_v19  ;;  %9538 = vmatpush1.bf16.msra.mxu1 %v13027_v10  ;;  %v8037_v19 = vld [vmem:[%s18960_s10 + $0x6c8] sm:$0xff] }
 0xb7e   : > { %9453 = vmatprep.subr.bf16.mxu0 %v13034_v6  ;;  %9539 = vmatprep.subr.bf16.mxu1 %v13036_v37  ;;  %v8041_v10 = vld [vmem:[%s18960_s10 + $0x6e8] sm:$0xff]  ;;  %v13065_v6 = vcombine.low %v8028_v11, %v8032_v43  ;;  %v13067_v37 = vcombine.low %v8029_v62, %v8033_v18  ;;  %v13098_v11 = vcombine.high %v8060_v36, %v8064_v2  ;;  %v8068_v62 = vld [vmem:[%s18960_s10 + $0x7c0] sm:$0xff] }
 0xb7f   : > { %v13076_v47 = vcombine.high %v8037_v19, %v8041_v10  ;;  %v7756_v18 = vmul.f32 %v17406_v30, %v17271_v22  ;;  %v13097_v22 = vcombine.low %v8060_v36, %v8064_v2  ;;  %v7843_v36 = vld [vmem:[%s18960_s10 + $0xb8] sm:$0xff] }
 0xb81   : > { %9454 = vmatpush1.bf16.msra.mxu0 %v13033_v34  ;;  %9540 = vmatpush1.bf16.msra.mxu1 %v13035_v54  ;;  %v8045_v34 = vld [vmem:[%s18960_s10 + $0x708] sm:$0xff] }
 0xb82   : > { %9455 = vmatprep.subr.bf16.mxu0 %v13042_v9  ;;  %9541 = vmatprep.subr.bf16.mxu1 %v13044_v38  ;;  %v8049_v54 = vld [vmem:[%s18960_s10 + $0x728] sm:$0xff]  ;;  %v13073_v9 = vcombine.low %v8036_v48, %v8040_v31  ;;  %v13075_v38 = vcombine.low %v8037_v19, %v8041_v10  ;;  %v17660_v48 = vrot.slane %v17385_v13, %v17069_v51  ;;  %v7823_v13 = vld [vmem:[%s18960_s10 + $0x18] sm:$0xff] }
 0xb83   : > { %v13084_v21 = vcombine.high %v8045_v34, %v8049_v54 }
 0xb84   : > { %v7785_v10 = vmul.f32 %v17660_v48, %v7756_v18 }
 0xb85   : > { %9456 = vmatpush1.bf16.msra.mxu0 %v13041_v49  ;;  %9542 = vmatpush1.bf16.msra.mxu1 %v13043_v56  ;;  %v8053_v49 = vld [vmem:[%s18960_s10 + $0x748] sm:$0xff] }
 0xb86   : > { %9457 = vmatprep.subr.bf16.mxu0 %v13050_v15  ;;  %9543 = vmatprep.subr.bf16.mxu1 %v13052_v16  ;;  %v8057_v56 = vld [vmem:[%s18960_s10 + $0x768] sm:$0xff]  ;;  %v13081_v15 = vcombine.low %v8044_v44, %v8048_v57  ;;  %v13083_v16 = vcombine.low %v8045_v34, %v8049_v54 }
 0xb87   : > { %v13092_v8 = vcombine.high %v8053_v49, %v8057_v56 }
 0xb89   : > { %9458 = vmatpush1.bf16.msra.mxu0 %v13049_v20  ;;  %9544 = vmatpush1.bf16.msra.mxu1 %v13051_v3  ;;  %v8061_v20 = vld [vmem:[%s18960_s10 + $0x788] sm:$0xff] }
 0xb8a   : > { %9459 = vmatprep.subr.bf16.mxu0 %v13058_v45  ;;  %9545 = vmatprep.subr.bf16.mxu1 %v13060_v4  ;;  %v8065_v3 = vld [vmem:[%s18960_s10 + $0x7a8] sm:$0xff]  ;;  %v13089_v45 = vcombine.low %v8052_v59, %v8056_v7  ;;  %v13091_v4 = vcombine.low %v8053_v49, %v8057_v56 }
 0xb8b   : > { %v13100_v43 = vcombine.high %v8061_v20, %v8065_v3  ;;  %v13099_v30 = vcombine.low %v8061_v20, %v8065_v3 }
 0xb8d   : > { %9460 = vmatpush1.bf16.msra.mxu0 %v13057_v0  ;;  %9546 = vmatpush1.bf16.msra.mxu1 %v13059_v12  ;;  %v8072_v0 = vld [vmem:[%s18960_s10 + $0x7e0] sm:$0xff]  ;;  %v8069_v12 = vld [vmem:[%s18960_s10 + $0x7c8] sm:$0xff] }
 0xb8e   : > { %9461 = vmatprep.subr.bf16.mxu0 %v13066_v42  ;;  %9547 = vmatprep.subr.bf16.mxu1 %v13068_v33  ;;  %v8073_v42 = vld [vmem:[%s18960_s10 + $0x7e8] sm:$0xff]  ;;  %v7752_v33 = vmul.f32 %v17387_v53, %v17253_v5  ;;  %v13106_v31 = vcombine.high %v8068_v62, %v8072_v0  ;;  %v7826_v5 = vld [vmem:[%s18960_s10 + $0x30] sm:$0xff]  ;;  %v7827_v53 = vld [vmem:[%s18960_s10 + $0x38] sm:$0xff] }
 0xb8f   : > { %v13108_v19 = vcombine.high %v8069_v12, %v8073_v42  ;;  %v13107_v44 = vcombine.low %v8069_v12, %v8073_v42  ;;  %v12864_v54 = vcombine.high %v7823_v13, %v7827_v53  ;;  %v12863_v49 = vcombine.low %v7823_v13, %v7827_v53  ;;  %v7854_v42 = vld [vmem:[%s18960_s10 + $0x110] sm:$0xff]  ;;  %v7863_v53 = vld [vmem:[%s18960_s10 + $0x158] sm:$0xff] }
 0xb90   : > { %v7866_v13 = vld [vmem:[%s18960_s10 + $0x170] sm:$0xff] }
 0xb91   : > { %9462 = vmatpush1.bf16.msra.mxu0 %v13065_v6  ;;  %9548 = vmatpush1.bf16.msra.mxu1 %v13067_v37  ;;  %v7822_v6 = vld [vmem:[%s18960_s10 + $0x10] sm:$0xff]  ;;  %v7781_v37 = vmul.f32 %v17660_v48, %v7752_v33 }
 0xb92   : > { %9463 = vmatprep.subr.bf16.mxu0 %v13074_v27  ;;  %9549 = vmatprep.subr.bf16.mxu1 %v13076_v47  ;;  %v17678_v27 = vrot.slane %v17392_v23, %v17069_v51  ;;  %v13105_v47 = vcombine.low %v8068_v62, %v8072_v0  ;;  %v12862_v34 = vcombine.high %v7822_v6, %v7826_v5  ;;  %v7834_v23 = vld [vmem:[%s18960_s10 + $0x70] sm:$0xff] }
 0xb93   : > { %v12861_v59 = vcombine.low %v7822_v6, %v7826_v5  ;;  %v7858_v33 = vld [vmem:[%s18960_s10 + $0x130] sm:$0xff] }
 0xb94   : > { %v17681_v57 = vadd.f32 %v17678_v27, %v7785_v10  ;;  %v12894_v10 = vcombine.high %v7854_v42, %v7858_v33  ;;  %v7862_v5 = vld [vmem:[%s18960_s10 + $0x150] sm:$0xff] }
 0xb95   : > { %9464 = vmatpush1.bf16.msra.mxu0 %v13073_v9  ;;  %9550 = vmatpush1.bf16.msra.mxu1 %v13075_v38  ;;  %v7830_v9 = vld [vmem:[%s18960_s10 + $0x50] sm:$0xff]  ;;  %v17687_v38 = vadd.f32 %v17678_v27, %v7781_v37  ;;  %v7867_v37 = vld [vmem:[%s18960_s10 + $0x178] sm:$0xff] }
 0xb96   : > { %9465 = vmatprep.subr.bf16.mxu0 %v13082_v63  ;;  %9551 = vmatprep.subr.bf16.mxu1 %v13084_v21  ;;  %v7831_v63 = vld [vmem:[%s18960_s10 + $0x58] sm:$0xff]  ;;  %v12870_v56 = vcombine.high %v7830_v9, %v7834_v23  ;;  %v12869_v2 = vcombine.low %v7830_v9, %v7834_v23  ;;  %v7870_v9 = vld [vmem:[%s18960_s10 + $0x190] sm:$0xff] }
 0xb97   : > { %v7835_v21 = vld [vmem:[%s18960_s10 + $0x78] sm:$0xff]  ;;  %v17700_v7 = vpack.c.bf16 %v17681_v57, %v17687_v38  ;;  %v7874_v23 = vld [vmem:[%s18960_s10 + $0x1b0] sm:$0xff] }
 0xb98   : > { %v12871_v20 = vcombine.low %v7831_v63, %v7835_v21 }
 0xb99   : > { %9466 = vmatpush1.bf16.msra.mxu0 %v13081_v15  ;;  %9552 = vmatpush1.bf16.msra.mxu1 %v13083_v16  ;;  %v12872_v15 = vcombine.high %v7831_v63, %v7835_v21  ;;  %v7838_v16 = vld [vmem:[%s18960_s10 + $0x90] sm:$0xff]  ;;  %v7871_v63 = vld [vmem:[%s18960_s10 + $0x198] sm:$0xff] }
 0xb9a   : > { %9467 = vmatprep.subr.bf16.mxu0 %v13090_v26  ;;  %9553 = vmatprep.subr.bf16.mxu1 %v13092_v8  ;;  %v7842_v26 = vld [vmem:[%s18960_s10 + $0xb0] sm:$0xff]  ;;  %v7839_v8 = vld [vmem:[%s18960_s10 + $0x98] sm:$0xff] }
 0xb9b   : > { %v12878_v3 = vcombine.high %v7838_v16, %v7842_v26  ;;  %v12877_v62 = vcombine.low %v7838_v16, %v7842_v26  ;;  %v12879_v18 = vcombine.low %v7839_v8, %v7843_v36  ;;  %v7875_v21 = vld [vmem:[%s18960_s10 + $0x1b8] sm:$0xff]  ;;  %v7878_v16 = vld [vmem:[%s18960_s10 + $0x1d0] sm:$0xff] }
 0xb9c   : > { %v7882_v26 = vld [vmem:[%s18960_s10 + $0x1f0] sm:$0xff] }
 0xb9d   : > { %9468 = vmatpush1.bf16.msra.mxu0 %v13089_v45  ;;  %9554 = vmatpush1.bf16.msra.mxu1 %v13091_v4  ;;  %v12880_v45 = vcombine.high %v7839_v8, %v7843_v36  ;;  %v7846_v4 = vld [vmem:[%s18960_s10 + $0xd0] sm:$0xff]  ;;  %v7879_v8 = vld [vmem:[%s18960_s10 + $0x1d8] sm:$0xff] }
 0xb9e   : > { %9469 = vmatprep.subr.bf16.mxu0 %v13098_v11  ;;  %9555 = vmatprep.subr.bf16.mxu1 %v13100_v43  ;;  %v7850_v11 = vld [vmem:[%s18960_s10 + $0xf0] sm:$0xff]  ;;  %v7847_v43 = vld [vmem:[%s18960_s10 + $0xd8] sm:$0xff] }
 0xb9f   : > { %v12886_v0 = vcombine.high %v7846_v4, %v7850_v11  ;;  %v7883_v36 = vld [vmem:[%s18960_s10 + $0x1f8] sm:$0xff] }
 0xba1   : > { %9470 = vmatpush1.bf16.msra.mxu0 %v13097_v22  ;;  %9556 = vmatpush1.bf16.msra.mxu1 %v13099_v30  ;;  %v7855_v22 = vld [vmem:[%s18960_s10 + $0x118] sm:$0xff] }
 0xba2   : > { %9471 = vmatprep.subr.bf16.mxu0 %v13106_v31  ;;  %9557 = vmatprep.subr.bf16.mxu1 %v13108_v19  ;;  %v7859_v30 = vld [vmem:[%s18960_s10 + $0x138] sm:$0xff]  ;;  %v12885_v31 = vcombine.low %v7846_v4, %v7850_v11  ;;  %v7886_v4 = vld [vmem:[%s18960_s10 + $0x210] sm:$0xff] }
 0xba3   : > { %v12896_v6 = vcombine.high %v7855_v22, %v7859_v30  ;;  %v7890_v11 = vld [vmem:[%s18960_s10 + $0x230] sm:$0xff] }
 0xba5   : > { %9472 = vmatpush1.bf16.msra.mxu0 %v13105_v47  ;;  %9558 = vmatpush1.bf16.msra.mxu1 %v13107_v44  ;;  %v12893_v47 = vcombine.low %v7854_v42, %v7858_v33  ;;  %v12895_v44 = vcombine.low %v7855_v22, %v7859_v30  ;;  %v7894_v42 = vld [vmem:[%s18960_s10 + $0x250] sm:$0xff]  ;;  %v7895_v22 = vld [vmem:[%s18960_s10 + $0x258] sm:$0xff] }
 0xba6   : > { %9570 = vmatprep.subr.bf16.mxu0 %v12862_v34  ;;  %9656 = vmatprep.subr.bf16.mxu1 %v12864_v54  ;;  %v12902_v34 = vcombine.high %v7862_v5, %v7866_v13  ;;  %v12904_v54 = vcombine.high %v7863_v53, %v7867_v37  ;;  %v7898_v33 = vld [vmem:[%s18960_s10 + $0x270] sm:$0xff]  ;;  %v7899_v30 = vld [vmem:[%s18960_s10 + $0x278] sm:$0xff] }
 0xba8   : > { %9474 = vmatmul.mubr.bf16.vlgmr.msra.gmra.mrb[0].mxu0 %v17700_v7  ;;  %9560 = vmatmul.mubr.bf16.vlgmr.msra.gmra.mrb[0].mxu1 %v17700_v7 }
 0xba9   : > { %9571 = vmatpush1.bf16.msra.mxu0 %v12861_v59  ;;  %9602 = vmatprep.mubr.bf16.mxu0 %v17467_v32  ;;  %v12901_v59 = vcombine.low %v7862_v5, %v7866_v13  ;;  %v7902_v5 = vld [vmem:[%s18960_s10 + $0x290] sm:$0xff] }
 0xbaa   : > { %9657 = vmatpush1.bf16.msra.mxu1 %v12863_v49  ;;  %9688 = vmatprep.mubr.bf16.mxu1 %v17467_v32  ;;  %v7851_v32 = vld [vmem:[%s18960_s10 + $0xf8] sm:$0xff]  ;;  %v12903_v49 = vcombine.low %v7863_v53, %v7867_v37  ;;  %v7906_v13 = vld [vmem:[%s18960_s10 + $0x2b0] sm:$0xff] }
 0xbab   : > { %9572 = vmatprep.subr.bf16.mxu0 %v12870_v56  ;;  %9658 = vmatprep.subr.bf16.mxu1 %v12872_v15  ;;  %v12888_v12 = vcombine.high %v7847_v43, %v7851_v32  ;;  %v12887_v19 = vcombine.low %v7847_v43, %v7851_v32  ;;  %v12910_v56 = vcombine.high %v7870_v9, %v7874_v23  ;;  %v7887_v43 = vld [vmem:[%s18960_s10 + $0x218] sm:$0xff] }
 0xbac   : > { %v12912_v15 = vcombine.high %v7871_v63, %v7875_v21  ;;  %v7891_v32 = vld [vmem:[%s18960_s10 + $0x238] sm:$0xff] }
 0xbad   : > { %9573 = vmatpush1.bf16.msra.mxu0 %v12869_v2  ;;  %v12909_v2 = vcombine.low %v7870_v9, %v7874_v23  ;;  %v7903_v53 = vld [vmem:[%s18960_s10 + $0x298] sm:$0xff]  ;;  %v7910_v9 = vld [vmem:[%s18960_s10 + $0x2d0] sm:$0xff] }
 0xbae   : > { %9659 = vmatpush1.bf16.msra.mxu1 %v12871_v20  ;;  %9574 = vmatprep.subr.bf16.mxu0 %v12878_v3  ;;  %v12911_v20 = vcombine.low %v7871_v63, %v7875_v21  ;;  %v12918_v3 = vcombine.high %v7878_v16, %v7882_v26  ;;  %v7907_v37 = vld [vmem:[%s18960_s10 + $0x2b8] sm:$0xff]  ;;  %v7914_v23 = vld [vmem:[%s18960_s10 + $0x2f0] sm:$0xff] }
 0xbaf   : > { %9660 = vmatprep.subr.bf16.mxu1 %v12880_v45  ;;  %v12920_v45 = vcombine.high %v7879_v8, %v7883_v36  ;;  %v7911_v63 = vld [vmem:[%s18960_s10 + $0x2d8] sm:$0xff] }
 0xbb0   : > { %v7915_v21 = vld [vmem:[%s18960_s10 + $0x2f8] sm:$0xff] }
 0xbb1   : > { %9575 = vmatpush1.bf16.msra.mxu0 %v12877_v62  ;;  %v12917_v62 = vcombine.low %v7878_v16, %v7882_v26  ;;  %v7918_v16 = vld [vmem:[%s18960_s10 + $0x310] sm:$0xff] }
 0xbb2   : > { %9661 = vmatpush1.bf16.msra.mxu1 %v12879_v18  ;;  %9576 = vmatprep.subr.bf16.mxu0 %v12886_v0  ;;  %v12919_v18 = vcombine.low %v7879_v8, %v7883_v36  ;;  %v12926_v0 = vcombine.high %v7886_v4, %v7890_v11  ;;  %v7922_v26 = vld [vmem:[%s18960_s10 + $0x330] sm:$0xff]  ;;  %v7919_v8 = vld [vmem:[%s18960_s10 + $0x318] sm:$0xff] }
 0xbb3   : > { %9662 = vmatprep.subr.bf16.mxu1 %v12888_v12  ;;  %v12928_v12 = vcombine.high %v7887_v43, %v7891_v32  ;;  %v7923_v36 = vld [vmem:[%s18960_s10 + $0x338] sm:$0xff] }
 0xbb5   : > { %9577 = vmatpush1.bf16.msra.mxu0 %v12885_v31  ;;  %v12925_v31 = vcombine.low %v7886_v4, %v7890_v11  ;;  %v7926_v4 = vld [vmem:[%s18960_s10 + $0x350] sm:$0xff] }
 0xbb6   : > { %9663 = vmatpush1.bf16.msra.mxu1 %v12887_v19  ;;  %9578 = vmatprep.subr.bf16.mxu0 %v12894_v10  ;;  %v12927_v19 = vcombine.low %v7887_v43, %v7891_v32  ;;  %v12934_v10 = vcombine.high %v7894_v42, %v7898_v33  ;;  %v7930_v11 = vld [vmem:[%s18960_s10 + $0x370] sm:$0xff]  ;;  %v7927_v43 = vld [vmem:[%s18960_s10 + $0x358] sm:$0xff] }
 0xbb7   : > { %9664 = vmatprep.subr.bf16.mxu1 %v12896_v6  ;;  %v12936_v6 = vcombine.high %v7895_v22, %v7899_v30  ;;  %v7931_v32 = vld [vmem:[%s18960_s10 + $0x378] sm:$0xff] }
 0xbb9   : > { %9579 = vmatpush1.bf16.msra.mxu0 %v12893_v47  ;;  %v12933_v47 = vcombine.low %v7894_v42, %v7898_v33  ;;  %v7934_v42 = vld [vmem:[%s18960_s10 + $0x390] sm:$0xff] }
 0xbba   : > { %9665 = vmatpush1.bf16.msra.mxu1 %v12895_v44  ;;  %9580 = vmatprep.subr.bf16.mxu0 %v12902_v34  ;;  %v12935_v44 = vcombine.low %v7895_v22, %v7899_v30  ;;  %v12942_v34 = vcombine.high %v7902_v5, %v7906_v13  ;;  %v7938_v33 = vld [vmem:[%s18960_s10 + $0x3b0] sm:$0xff]  ;;  %v7935_v22 = vld [vmem:[%s18960_s10 + $0x398] sm:$0xff] }
 0xbbb   : > { %9666 = vmatprep.subr.bf16.mxu1 %v12904_v54  ;;  %v12944_v54 = vcombine.high %v7903_v53, %v7907_v37  ;;  %v7939_v30 = vld [vmem:[%s18960_s10 + $0x3b8] sm:$0xff] }
 0xbbd   : > { %9581 = vmatpush1.bf16.msra.mxu0 %v12901_v59  ;;  %v12941_v59 = vcombine.low %v7902_v5, %v7906_v13  ;;  %v7942_v5 = vld [vmem:[%s18960_s10 + $0x3d0] sm:$0xff] }
 0xbbe   : > { %9667 = vmatpush1.bf16.msra.mxu1 %v12903_v49  ;;  %9582 = vmatprep.subr.bf16.mxu0 %v12910_v56  ;;  %v12943_v49 = vcombine.low %v7903_v53, %v7907_v37  ;;  %v12950_v56 = vcombine.high %v7910_v9, %v7914_v23  ;;  %v7946_v13 = vld [vmem:[%s18960_s10 + $0x3f0] sm:$0xff]  ;;  %v7943_v53 = vld [vmem:[%s18960_s10 + $0x3d8] sm:$0xff] }
 0xbbf   : > { %9668 = vmatprep.subr.bf16.mxu1 %v12912_v15  ;;  %v12952_v15 = vcombine.high %v7911_v63, %v7915_v21  ;;  %v7947_v37 = vld [vmem:[%s18960_s10 + $0x3f8] sm:$0xff] }
 0xbc1   : > { %9583 = vmatpush1.bf16.msra.mxu0 %v12909_v2  ;;  %v12949_v2 = vcombine.low %v7910_v9, %v7914_v23  ;;  %v7950_v9 = vld [vmem:[%s18960_s10 + $0x410] sm:$0xff] }
 0xbc2   : > { %9669 = vmatpush1.bf16.msra.mxu1 %v12911_v20  ;;  %9584 = vmatprep.subr.bf16.mxu0 %v12918_v3  ;;  %v12951_v20 = vcombine.low %v7911_v63, %v7915_v21  ;;  %v12958_v3 = vcombine.high %v7918_v16, %v7922_v26  ;;  %v7954_v23 = vld [vmem:[%s18960_s10 + $0x430] sm:$0xff]  ;;  %v7951_v63 = vld [vmem:[%s18960_s10 + $0x418] sm:$0xff] }
 0xbc3   : > { %9670 = vmatprep.subr.bf16.mxu1 %v12920_v45  ;;  %v12960_v45 = vcombine.high %v7919_v8, %v7923_v36  ;;  %v7955_v21 = vld [vmem:[%s18960_s10 + $0x438] sm:$0xff] }
 0xbc5   : > { %9585 = vmatpush1.bf16.msra.mxu0 %v12917_v62  ;;  %v12957_v62 = vcombine.low %v7918_v16, %v7922_v26  ;;  %v7958_v16 = vld [vmem:[%s18960_s10 + $0x450] sm:$0xff] }
 0xbc6   : > { %9671 = vmatpush1.bf16.msra.mxu1 %v12919_v18  ;;  %9586 = vmatprep.subr.bf16.mxu0 %v12926_v0  ;;  %v12959_v18 = vcombine.low %v7919_v8, %v7923_v36  ;;  %v12966_v0 = vcombine.high %v7926_v4, %v7930_v11  ;;  %v7962_v26 = vld [vmem:[%s18960_s10 + $0x470] sm:$0xff]  ;;  %v12989_v8 = vcombine.low %v7950_v9, %v7954_v23  ;;  %v7959_v36 = vld [vmem:[%s18960_s10 + $0x458] sm:$0xff] }
 0xbc7   : > { %9672 = vmatprep.subr.bf16.mxu1 %v12928_v12  ;;  %v12968_v12 = vcombine.high %v7927_v43, %v7931_v32 }
 0xbc9   : > { %9587 = vmatpush1.bf16.msra.mxu0 %v12925_v31  ;;  %v12965_v31 = vcombine.low %v7926_v4, %v7930_v11  ;;  %v7970_v4 = vld [vmem:[%s18960_s10 + $0x4b0] sm:$0xff] }
 0xbca   : > { %9673 = vmatpush1.bf16.msra.mxu1 %v12927_v19  ;;  %9588 = vmatprep.subr.bf16.mxu0 %v12934_v10  ;;  %v12967_v19 = vcombine.low %v7927_v43, %v7931_v32  ;;  %v12974_v10 = vcombine.high %v7934_v42, %v7938_v33  ;;  %v7967_v43 = vld [vmem:[%s18960_s10 + $0x498] sm:$0xff] }
 0xbcb   : > { %9674 = vmatprep.subr.bf16.mxu1 %v12936_v6  ;;  %v12976_v6 = vcombine.high %v7935_v22, %v7939_v30  ;;  %v7971_v32 = vld [vmem:[%s18960_s10 + $0x4b8] sm:$0xff] }
 0xbcd   : > { %9589 = vmatpush1.bf16.msra.mxu0 %v12933_v47  ;;  %v12973_v47 = vcombine.low %v7934_v42, %v7938_v33  ;;  %v7974_v42 = vld [vmem:[%s18960_s10 + $0x4d0] sm:$0xff] }
 0xbce   : > { %9675 = vmatpush1.bf16.msra.mxu1 %v12935_v44  ;;  %9590 = vmatprep.subr.bf16.mxu0 %v12942_v34  ;;  %v12975_v44 = vcombine.low %v7935_v22, %v7939_v30  ;;  %v12982_v34 = vcombine.high %v7942_v5, %v7946_v13  ;;  %v7978_v33 = vld [vmem:[%s18960_s10 + $0x4f0] sm:$0xff]  ;;  %v7979_v22 = vld [vmem:[%s18960_s10 + $0x4f8] sm:$0xff]  ;;  %v13007_v30 = vcombine.low %v7967_v43, %v7971_v32 }
 0xbcf   : > { %9676 = vmatprep.subr.bf16.mxu1 %v12944_v54  ;;  %v12984_v54 = vcombine.high %v7943_v53, %v7947_v37 }
 0xbd1   : > { %9591 = vmatpush1.bf16.msra.mxu0 %v12941_v59  ;;  %v12981_v59 = vcombine.low %v7942_v5, %v7946_v13  ;;  %v7983_v5 = vld [vmem:[%s18960_s10 + $0x518] sm:$0xff] }
 0xbd2   : > { %9677 = vmatpush1.bf16.msra.mxu1 %v12943_v49  ;;  %9592 = vmatprep.subr.bf16.mxu0 %v12950_v56  ;;  %v12983_v49 = vcombine.low %v7943_v53, %v7947_v37  ;;  %v12990_v56 = vcombine.high %v7950_v9, %v7954_v23  ;;  %v7987_v13 = vld [vmem:[%s18960_s10 + $0x538] sm:$0xff]  ;;  %v13013_v53 = vcombine.low %v7974_v42, %v7978_v33 }
 0xbd3   : > { %9678 = vmatprep.subr.bf16.mxu1 %v12952_v15  ;;  %v12992_v15 = vcombine.high %v7951_v63, %v7955_v21  ;;  %v7991_v9 = vld [vmem:[%s18960_s10 + $0x558] sm:$0xff] }
 0xbd4   : > { %v7995_v23 = vld [vmem:[%s18960_s10 + $0x578] sm:$0xff] }
 0xbd5   : > { %9593 = vmatpush1.bf16.msra.mxu0 %v12949_v2  ;;  %v7963_v2 = vld [vmem:[%s18960_s10 + $0x478] sm:$0xff] }
 0xbd6   : > { %9679 = vmatpush1.bf16.msra.mxu1 %v12951_v20  ;;  %9594 = vmatprep.subr.bf16.mxu0 %v12958_v3  ;;  %v12991_v20 = vcombine.low %v7951_v63, %v7955_v21  ;;  %v12998_v3 = vcombine.high %v7958_v16, %v7962_v26  ;;  %v13000_v11 = vcombine.high %v7959_v36, %v7963_v2 }
 0xbd7   : > { %9680 = vmatprep.subr.bf16.mxu1 %v12960_v45  ;;  %v7966_v45 = vld [vmem:[%s18960_s10 + $0x490] sm:$0xff]  ;;  %v13023_v21 = vcombine.low %v7983_v5, %v7987_v13 }
 0xbd9   : > { %9595 = vmatpush1.bf16.msra.mxu0 %v12957_v62  ;;  %v12997_v62 = vcombine.low %v7958_v16, %v7962_v26  ;;  %v7999_v16 = vld [vmem:[%s18960_s10 + $0x598] sm:$0xff] }
 0xbda   : > { %9681 = vmatpush1.bf16.msra.mxu1 %v12959_v18  ;;  %9596 = vmatprep.subr.bf16.mxu0 %v12966_v0  ;;  %v12999_v18 = vcombine.low %v7959_v36, %v7963_v2  ;;  %v13006_v0 = vcombine.high %v7966_v45, %v7970_v4  ;;  %v8003_v26 = vld [vmem:[%s18960_s10 + $0x5b8] sm:$0xff]  ;;  %v13031_v36 = vcombine.low %v7991_v9, %v7995_v23 }
 0xbdb   : > { %9682 = vmatprep.subr.bf16.mxu1 %v12968_v12  ;;  %v13008_v12 = vcombine.high %v7967_v43, %v7971_v32  ;;  %v13039_v32 = vcombine.low %v7999_v16, %v8003_v26 }
 0xbdd   : > { %9597 = vmatpush1.bf16.msra.mxu0 %v12965_v31  ;;  %v13014_v31 = vcombine.high %v7974_v42, %v7978_v33  ;;  %v8015_v42 = vld [vmem:[%s18960_s10 + $0x618] sm:$0xff] }
 0xbde   : > { %9683 = vmatpush1.bf16.msra.mxu1 %v12967_v19  ;;  %9598 = vmatprep.subr.bf16.mxu0 %v12974_v10  ;;  %v7982_v10 = vld [vmem:[%s18960_s10 + $0x510] sm:$0xff]  ;;  %v8019_v33 = vld [vmem:[%s18960_s10 + $0x638] sm:$0xff] }
 0xbdf   : > { %9684 = vmatprep.subr.bf16.mxu1 %v12976_v6  ;;  %v7986_v6 = vld [vmem:[%s18960_s10 + $0x530] sm:$0xff] }
 0xbe0   : > { %v13021_v63 = vcombine.low %v7982_v10, %v7986_v6 }
 0xbe1   : > { %9599 = vmatpush1.bf16.msra.mxu0 %v12973_v47  ;;  %v13022_v47 = vcombine.high %v7982_v10, %v7986_v6  ;;  %v8023_v10 = vld [vmem:[%s18960_s10 + $0x658] sm:$0xff] }
 0xbe2   : > { %9685 = vmatpush1.bf16.msra.mxu1 %v12975_v44  ;;  %9600 = vmatprep.subr.bf16.mxu0 %v12982_v34  ;;  %v13024_v44 = vcombine.high %v7983_v5, %v7987_v13  ;;  %v7990_v34 = vld [vmem:[%s18960_s10 + $0x550] sm:$0xff]  ;;  %v8027_v6 = vld [vmem:[%s18960_s10 + $0x678] sm:$0xff]  ;;  %v13055_v13 = vcombine.low %v8015_v42, %v8019_v33 }
 0xbe3   : > { %9686 = vmatprep.subr.bf16.mxu1 %v12984_v54  ;;  %v7994_v54 = vld [vmem:[%s18960_s10 + $0x570] sm:$0xff] }
 0xbe5   : > { %9601 = vmatpush1.bf16.msra.mxu0 %v12981_v59  ;;  %v13030_v59 = vcombine.high %v7990_v34, %v7994_v54 }
 0xbe6   : > { %9687 = vmatpush1.bf16.msra.mxu1 %v12983_v49  ;;  %9613 = vmatprep.subr.bf16.mxu0 %v12990_v56  ;;  %v13032_v49 = vcombine.high %v7991_v9, %v7995_v23  ;;  %v7998_v56 = vld [vmem:[%s18960_s10 + $0x590] sm:$0xff]  ;;  %v13063_v23 = vcombine.low %v8023_v10, %v8027_v6 }
 0xbe7   : > { %9699 = vmatprep.subr.bf16.mxu1 %v12992_v15  ;;  %v8002_v15 = vld [vmem:[%s18960_s10 + $0x5b0] sm:$0xff] }
 0xbe8   : > { %9603 = vmatmul.mubr.bf16.vlgmr.msra.gmra.mrb[4].mxu0 %v17471_v58  ;;  %v13038_v2 = vcombine.high %v7998_v56, %v8002_v15  ;;  %v13037_v43 = vcombine.low %v7998_v56, %v8002_v15  ;;  %v8039_v56 = vld [vmem:[%s18960_s10 + $0x6d8] sm:$0xff] }
 0xbe9   : > { %9689 = vmatmul.mubr.bf16.vlgmr.msra.gmra.mrb[4].mxu1 %v17471_v58  ;;  %9614 = vmatpush1.bf16.msra.mxu0 %v12989_v8  ;;  %v7975_v58 = vld [vmem:[%s18960_s10 + $0x4d8] sm:$0xff]  ;;  %v13029_v8 = vcombine.low %v7990_v34, %v7994_v54 }
 0xbea   : > { %9645 = vmatprep.mubr.bf16.mxu0 %v17494_v52  ;;  %9700 = vmatpush1.bf16.msra.mxu1 %v12991_v20  ;;  %v13016_v19 = vcombine.high %v7975_v58, %v7979_v22  ;;  %v13015_v37 = vcombine.low %v7975_v58, %v7979_v22  ;;  %v13040_v20 = vcombine.high %v7999_v16, %v8003_v26  ;;  %v8031_v34 = vld [vmem:[%s18960_s10 + $0x698] sm:$0xff] }
 0xbeb   : > { %9731 = vmatprep.mubr.bf16.mxu1 %v17494_v52  ;;  %9615 = vmatprep.subr.bf16.mxu0 %v12998_v3  ;;  %v13005_v52 = vcombine.low %v7966_v45, %v7970_v4  ;;  %v8006_v3 = vld [vmem:[%s18960_s10 + $0x5d0] sm:$0xff]  ;;  %v8007_v4 = vld [vmem:[%s18960_s10 + $0x5d8] sm:$0xff] }
 0xbec   : > { %9701 = vmatprep.subr.bf16.mxu1 %v13000_v11  ;;  %v8010_v45 = vld [vmem:[%s18960_s10 + $0x5f0] sm:$0xff]  ;;  %v8011_v11 = vld [vmem:[%s18960_s10 + $0x5f8] sm:$0xff] }
 0xbed   : > { %9616 = vmatpush1.bf16.msra.mxu0 %v12997_v62  ;;  %v13046_v62 = vcombine.high %v8006_v3, %v8010_v45  ;;  %v13045_v58 = vcombine.low %v8006_v3, %v8010_v45  ;;  %v13047_v22 = vcombine.low %v8007_v4, %v8011_v11  ;;  %v8035_v54 = vld [vmem:[%s18960_s10 + $0x6b8] sm:$0xff] }
 0xbee   : > { %9702 = vmatpush1.bf16.msra.mxu1 %v12999_v18  ;;  %9617 = vmatprep.subr.bf16.mxu0 %v13006_v0  ;;  %v13048_v18 = vcombine.high %v8007_v4, %v8011_v11  ;;  %v8014_v0 = vld [vmem:[%s18960_s10 + $0x610] sm:$0xff]  ;;  %v8043_v15 = vld [vmem:[%s18960_s10 + $0x6f8] sm:$0xff]  ;;  %v13071_v26 = vcombine.low %v8031_v34, %v8035_v54 }
 0xbef   : > { %9703 = vmatprep.subr.bf16.mxu1 %v13008_v12  ;;  %v8018_v12 = vld [vmem:[%s18960_s10 + $0x630] sm:$0xff]  ;;  %v8047_v3 = vld [vmem:[%s18960_s10 + $0x718] sm:$0xff]  ;;  %v13079_v11 = vcombine.low %v8039_v56, %v8043_v15 }
 0xbf0   : > { %v13053_v5 = vcombine.low %v8014_v0, %v8018_v12  ;;  %v8051_v45 = vld [vmem:[%s18960_s10 + $0x738] sm:$0xff] }
 0xbf1   : > { %9618 = vmatpush1.bf16.msra.mxu0 %v13005_v52  ;;  %v13054_v52 = vcombine.high %v8014_v0, %v8018_v12  ;;  %v8055_v0 = vld [vmem:[%s18960_s10 + $0x758] sm:$0xff] }
 0xbf2   : > { %9704 = vmatpush1.bf16.msra.mxu1 %v13007_v30  ;;  %9619 = vmatprep.subr.bf16.mxu0 %v13014_v31  ;;  %v13056_v30 = vcombine.high %v8015_v42, %v8019_v33  ;;  %v8022_v31 = vld [vmem:[%s18960_s10 + $0x650] sm:$0xff]  ;;  %v8059_v12 = vld [vmem:[%s18960_s10 + $0x778] sm:$0xff]  ;;  %v13087_v33 = vcombine.low %v8047_v3, %v8051_v45 }
 0xbf3   : > { %9705 = vmatprep.subr.bf16.mxu1 %v13016_v19  ;;  %v8026_v19 = vld [vmem:[%s18960_s10 + $0x670] sm:$0xff] }
 0xbf4   : > { %v13061_v9 = vcombine.low %v8022_v31, %v8026_v19 }
 0xbf5   : > { %9620 = vmatpush1.bf16.msra.mxu0 %v13013_v53  ;;  %v13062_v53 = vcombine.high %v8022_v31, %v8026_v19  ;;  %v8063_v31 = vld [vmem:[%s18960_s10 + $0x798] sm:$0xff] }
 0xbf6   : > { %9706 = vmatpush1.bf16.msra.mxu1 %v13015_v37  ;;  %9621 = vmatprep.subr.bf16.mxu0 %v13022_v47  ;;  %v13064_v37 = vcombine.high %v8023_v10, %v8027_v6  ;;  %v8030_v47 = vld [vmem:[%s18960_s10 + $0x690] sm:$0xff]  ;;  %v8067_v19 = vld [vmem:[%s18960_s10 + $0x7b8] sm:$0xff]  ;;  %v13095_v6 = vcombine.low %v8055_v0, %v8059_v12 }
 0xbf7   : > { %9707 = vmatprep.subr.bf16.mxu1 %v13024_v44  ;;  %v8034_v44 = vld [vmem:[%s18960_s10 + $0x6b0] sm:$0xff] }
 0xbf8   : > { %v13069_v16 = vcombine.low %v8030_v47, %v8034_v44 }
 0xbf9   : > { %9622 = vmatpush1.bf16.msra.mxu0 %v13021_v63  ;;  %v13070_v63 = vcombine.high %v8030_v47, %v8034_v44  ;;  %v8071_v47 = vld [vmem:[%s18960_s10 + $0x7d8] sm:$0xff] }
 0xbfa   : > { %9708 = vmatpush1.bf16.msra.mxu1 %v13023_v21  ;;  %9623 = vmatprep.subr.bf16.mxu0 %v13030_v59  ;;  %v13072_v21 = vcombine.high %v8031_v34, %v8035_v54  ;;  %v8038_v59 = vld [vmem:[%s18960_s10 + $0x6d0] sm:$0xff]  ;;  %v8075_v44 = vld [vmem:[%s18960_s10 + $0x7f8] sm:$0xff]  ;;  %v13103_v54 = vcombine.low %v8063_v31, %v8067_v19 }
 0xbfb   : > { %9709 = vmatprep.subr.bf16.mxu1 %v13032_v49  ;;  %v8042_v49 = vld [vmem:[%s18960_s10 + $0x6f0] sm:$0xff] }
 0xbfc   : > { %v13077_v4 = vcombine.low %v8038_v59, %v8042_v49 }
 0xbfd   : > { %9624 = vmatpush1.bf16.msra.mxu0 %v13029_v8  ;;  %v13078_v8 = vcombine.high %v8038_v59, %v8042_v49  ;;  %v14937_v59 = vld [vmem:[%s18962_s12 + $0x4] ss:$16 sps:$4 sm:$0xff]   ;;  %v14940_v49 = vld [vmem:[%s18962_s12 + $0xc] ss:$16 sps:$4 sm:$0xff]  }
 0xbfe   : > { %9710 = vmatpush1.bf16.msra.mxu1 %v13031_v36  ;;  %9625 = vmatprep.subr.bf16.mxu0 %v13038_v2  ;;  %v13080_v36 = vcombine.high %v8039_v56, %v8043_v15  ;;  %v8046_v2 = vld [vmem:[%s18960_s10 + $0x710] sm:$0xff]  ;;  %v14938_v15 = vld [vmem:[%s18962_s12 + $0x8] ss:$16 sps:$4 sm:$0xff]  }
 0xbff   : > { %9711 = vmatprep.subr.bf16.mxu1 %v13040_v20  ;;  %v8050_v20 = vld [vmem:[%s18960_s10 + $0x730] sm:$0xff] }
 0xc00   : > { %v13085_v42 = vcombine.low %v8046_v2, %v8050_v20  ;;  %v14935_v56 = vld [vmem:[%s18962_s12] ss:$16 sps:$4 sm:$0xff]  }
 0xc01   : > { %9626 = vmatpush1.bf16.msra.mxu0 %v13037_v43  ;;  %v13086_v43 = vcombine.high %v8046_v2, %v8050_v20  ;;  %v14949_v2 = vld [vmem:[%s18962_s12 + $0x44] ss:$16 sps:$4 sm:$0xff]   ;;  %v14947_v20 = vld [vmem:[%s18962_s12 + $0x40] ss:$16 sps:$4 sm:$0xff]  }
 0xc02   : > { %9712 = vmatpush1.bf16.msra.mxu1 %v13039_v32  ;;  %9627 = vmatprep.subr.bf16.mxu0 %v13046_v62  ;;  %v13088_v32 = vcombine.high %v8047_v3, %v8051_v45  ;;  %v8054_v62 = vld [vmem:[%s18960_s10 + $0x750] sm:$0xff]  ;;  %v14950_v3 = vld [vmem:[%s18962_s12 + $0x48] ss:$16 sps:$4 sm:$0xff]  }
 0xc03   : > { %9713 = vmatprep.subr.bf16.mxu1 %v13048_v18  ;;  %v8058_v18 = vld [vmem:[%s18960_s10 + $0x770] sm:$0xff] }
 0xc04   : > { %v13093_v10 = vcombine.low %v8054_v62, %v8058_v18  ;;  %v14955_v45 = vld [vmem:[%s18962_s12 + $0x64] ss:$16 sps:$4 sm:$0xff]  }
 0xc05   : > { %9628 = vmatpush1.bf16.msra.mxu0 %v13045_v58  ;;  %v13094_v58 = vcombine.high %v8054_v62, %v8058_v18  ;;  %v14964_v62 = vld [vmem:[%s18962_s12 + $0x8c] ss:$16 sps:$4 sm:$0xff]   ;;  %v14959_v18 = vld [vmem:[%s18962_s12 + $0x80] ss:$16 sps:$4 sm:$0xff]  }
 0xc06   : > { %9714 = vmatpush1.bf16.msra.mxu1 %v13047_v22  ;;  %9629 = vmatprep.subr.bf16.mxu0 %v13054_v52  ;;  %v13096_v22 = vcombine.high %v8055_v0, %v8059_v12  ;;  %v8062_v52 = vld [vmem:[%s18960_s10 + $0x790] sm:$0xff]  ;;  %v14962_v0 = vld [vmem:[%s18962_s12 + $0x88] ss:$16 sps:$4 sm:$0xff]  }
 0xc07   : > { %9715 = vmatprep.subr.bf16.mxu1 %v13056_v30  ;;  %v8066_v30 = vld [vmem:[%s18960_s10 + $0x7b0] sm:$0xff] }
 0xc08   : > { %v13101_v34 = vcombine.low %v8062_v52, %v8066_v30  ;;  %v14967_v12 = vld [vmem:[%s18962_s12 + $0xa4] ss:$16 sps:$4 sm:$0xff]  }
 0xc09   : > { %9630 = vmatpush1.bf16.msra.mxu0 %v13053_v5  ;;  %v13102_v5 = vcombine.high %v8062_v52, %v8066_v30  ;;  %v14976_v52 = vld [vmem:[%s18962_s12 + $0xcc] ss:$16 sps:$4 sm:$0xff]   ;;  %v14971_v30 = vld [vmem:[%s18962_s12 + $0xc0] ss:$16 sps:$4 sm:$0xff]  }
 0xc0a   : > { %9716 = vmatpush1.bf16.msra.mxu1 %v13055_v13  ;;  %9631 = vmatprep.subr.bf16.mxu0 %v13062_v53  ;;  %v13104_v13 = vcombine.high %v8063_v31, %v8067_v19  ;;  %v8070_v53 = vld [vmem:[%s18960_s10 + $0x7d0] sm:$0xff]  ;;  %v14974_v31 = vld [vmem:[%s18962_s12 + $0xc8] ss:$16 sps:$4 sm:$0xff]  }
 0xc0b   : > { %9717 = vmatprep.subr.bf16.mxu1 %v13064_v37  ;;  %v8074_v37 = vld [vmem:[%s18960_s10 + $0x7f0] sm:$0xff] }
 0xc0c   : > { %v14979_v19 = vld [vmem:[%s18962_s12 + $0xe4] ss:$16 sps:$4 sm:$0xff]  }
 0xc0d   : > { %9632 = vmatpush1.bf16.msra.mxu0 %v13061_v9  ;;  %v13110_v9 = vcombine.high %v8070_v53, %v8074_v37 }
 0xc0e   : > { %9718 = vmatpush1.bf16.msra.mxu1 %v13063_v23  ;;  %9633 = vmatprep.subr.bf16.mxu0 %v13070_v63  ;;  %v13112_v23 = vcombine.high %v8071_v47, %v8075_v44  ;;  %v13109_v63 = vcombine.low %v8070_v53, %v8074_v37  ;;  %v14988_v53 = vld [vmem:[%s18962_s12 + $0x10c] ss:$16 sps:$4 sm:$0xff]   ;;  %v14983_v37 = vld [vmem:[%s18962_s12 + $0x100] ss:$16 sps:$4 sm:$0xff]  }
 0xc0f   : > { %9719 = vmatprep.subr.bf16.mxu1 %v13072_v21  ;;  %v13111_v21 = vcombine.low %v8071_v47, %v8075_v44  ;;  %v14986_v47 = vld [vmem:[%s18962_s12 + $0x108] ss:$16 sps:$4 sm:$0xff]   ;;  %v14991_v44 = vld [vmem:[%s18962_s12 + $0x124] ss:$16 sps:$4 sm:$0xff]  }
 0xc11   : > { %9634 = vmatpush1.bf16.msra.mxu0 %v13069_v16  ;;  %v14943_v16 = vld [vmem:[%s18962_s12 + $0x24] ss:$16 sps:$4 sm:$0xff]  }
 0xc12   : > { %9720 = vmatpush1.bf16.msra.mxu1 %v13071_v26  ;;  %9635 = vmatprep.subr.bf16.mxu0 %v13078_v8  ;;  %v14946_v26 = vld [vmem:[%s18962_s12 + $0x2c] ss:$16 sps:$4 sm:$0xff]   ;;  %v14941_v8 = vld [vmem:[%s18962_s12 + $0x20] ss:$16 sps:$4 sm:$0xff]  }
 0xc13   : > { %9721 = vmatprep.subr.bf16.mxu1 %v13080_v36  ;;  %v14944_v36 = vld [vmem:[%s18962_s12 + $0x28] ss:$16 sps:$4 sm:$0xff]  }
 0xc15   : > { %9636 = vmatpush1.bf16.msra.mxu0 %v13077_v4  ;;  %v14958_v4 = vld [vmem:[%s18962_s12 + $0x6c] ss:$16 sps:$4 sm:$0xff]  }
 0xc16   : > { %9722 = vmatpush1.bf16.msra.mxu1 %v13079_v11  ;;  %9637 = vmatprep.subr.bf16.mxu0 %v13086_v43  ;;  %v14953_v11 = vld [vmem:[%s18962_s12 + $0x60] ss:$16 sps:$4 sm:$0xff]   ;;  %v14956_v43 = vld [vmem:[%s18962_s12 + $0x68] ss:$16 sps:$4 sm:$0xff]  }
 0xc17   : > { %9723 = vmatprep.subr.bf16.mxu1 %v13088_v32  ;;  %v14961_v32 = vld [vmem:[%s18962_s12 + $0x84] ss:$16 sps:$4 sm:$0xff]  }
 0xc19   : > { %9638 = vmatpush1.bf16.msra.mxu0 %v13085_v42  ;;  %v14970_v42 = vld [vmem:[%s18962_s12 + $0xac] ss:$16 sps:$4 sm:$0xff]  }
 0xc1a   : > { %9724 = vmatpush1.bf16.msra.mxu1 %v13087_v33  ;;  %9639 = vmatprep.subr.bf16.mxu0 %v13094_v58  ;;  %v14965_v33 = vld [vmem:[%s18962_s12 + $0xa0] ss:$16 sps:$4 sm:$0xff]   ;;  %v14968_v58 = vld [vmem:[%s18962_s12 + $0xa8] ss:$16 sps:$4 sm:$0xff]  }
 0xc1b   : > { %9725 = vmatprep.subr.bf16.mxu1 %v13096_v22  ;;  %v14973_v22 = vld [vmem:[%s18962_s12 + $0xc4] ss:$16 sps:$4 sm:$0xff]  }
 0xc1d   : > { %9640 = vmatpush1.bf16.msra.mxu0 %v13093_v10  ;;  %v14982_v10 = vld [vmem:[%s18962_s12 + $0xec] ss:$16 sps:$4 sm:$0xff]  }
 0xc1e   : > { %9726 = vmatpush1.bf16.msra.mxu1 %v13095_v6  ;;  %9641 = vmatprep.subr.bf16.mxu0 %v13102_v5  ;;  %v14977_v6 = vld [vmem:[%s18962_s12 + $0xe0] ss:$16 sps:$4 sm:$0xff]   ;;  %v14980_v5 = vld [vmem:[%s18962_s12 + $0xe8] ss:$16 sps:$4 sm:$0xff]  }
 0xc1f   : > { %9727 = vmatprep.subr.bf16.mxu1 %v13104_v13  ;;  %v14985_v13 = vld [vmem:[%s18962_s12 + $0x104] ss:$16 sps:$4 sm:$0xff]  }
 0xc21   : > { %9642 = vmatpush1.bf16.msra.mxu0 %v13101_v34  ;;  %v14994_v34 = vld [vmem:[%s18962_s12 + $0x12c] ss:$16 sps:$4 sm:$0xff]  }
 0xc22   : > { %9728 = vmatpush1.bf16.msra.mxu1 %v13103_v54  ;;  %9643 = vmatprep.subr.bf16.mxu0 %v13110_v9  ;;  %v14989_v54 = vld [vmem:[%s18962_s12 + $0x120] ss:$16 sps:$4 sm:$0xff]   ;;  %v14992_v9 = vld [vmem:[%s18962_s12 + $0x128] ss:$16 sps:$4 sm:$0xff]  }
 0xc23   : > { %9729 = vmatprep.subr.bf16.mxu1 %v13112_v23  ;;  %v14997_v23 = vld [vmem:[%s18962_s12 + $0x144] ss:$16 sps:$4 sm:$0xff]  }
 0xc25   : > { %9644 = vmatpush1.bf16.msra.mxu0 %v13109_v63  ;;  %v15000_v63 = vld [vmem:[%s18962_s12 + $0x14c] ss:$16 sps:$4 sm:$0xff]  }
 0xc26   : > { %9730 = vmatpush1.bf16.msra.mxu1 %v13111_v21  ;;  %11324 = vmatprep.subr.bf16.mxu0 %v14937_v59  ;;  %v14995_v21 = vld [vmem:[%s18962_s12 + $0x140] ss:$16 sps:$4 sm:$0xff]   ;;  %v14998_v59 = vld [vmem:[%s18962_s12 + $0x148] ss:$16 sps:$4 sm:$0xff]  }
 0xc27   : > { %11496 = vmatprep.subr.bf16.mxu1 %v14940_v49  ;;  %v15003_v49 = vld [vmem:[%s18962_s12 + $0x164] ss:$16 sps:$4 sm:$0xff]  }
 0xc28   : > { %9646 = vmatmul.mubr.bf16.vlgmr.msra.gmra.mrb[4].mxu0 %v17700_v7 }
 0xc29   : > { %9732 = vmatmul.mubr.bf16.vlgmr.msra.gmra.mrb[4].mxu1 %v17700_v7  ;;  %11325 = vmatpush1.bf16.msra.mxu0 %v14935_v56  ;;  %v14952_v7 = vld [vmem:[%s18962_s12 + $0x4c] ss:$16 sps:$4 sm:$0xff]  }
 0xc2a   : > { %11497 = vmatpush1.bf16.msra.mxu1 %v14938_v15  ;;  %11326 = vmatprep.subr.bf16.mxu0 %v14943_v16  ;;  %v15006_v56 = vld [vmem:[%s18962_s12 + $0x16c] ss:$16 sps:$4 sm:$0xff]   ;;  %v15001_v15 = vld [vmem:[%s18962_s12 + $0x160] ss:$16 sps:$4 sm:$0xff]   ;;  %v15004_v16 = vld [vmem:[%s18962_s12 + $0x168] ss:$16 sps:$4 sm:$0xff]  }
 0xc2b   : > { %11498 = vmatprep.subr.bf16.mxu1 %v14946_v26  ;;  %v15009_v26 = vld [vmem:[%s18962_s12 + $0x184] ss:$16 sps:$4 sm:$0xff]  }
 0xc2d   : > { %11327 = vmatpush1.bf16.msra.mxu0 %v14941_v8  ;;  %v15012_v8 = vld [vmem:[%s18962_s12 + $0x18c] ss:$16 sps:$4 sm:$0xff]  }
 0xc2e   : > { %11499 = vmatpush1.bf16.msra.mxu1 %v14944_v36  ;;  %11328 = vmatprep.subr.bf16.mxu0 %v14949_v2  ;;  %v15007_v36 = vld [vmem:[%s18962_s12 + $0x180] ss:$16 sps:$4 sm:$0xff]   ;;  %v15010_v2 = vld [vmem:[%s18962_s12 + $0x188] ss:$16 sps:$4 sm:$0xff]  }
 0xc2f   : > { %11500 = vmatprep.subr.bf16.mxu1 %v14952_v7  ;;  %v15015_v7 = vld [vmem:[%s18962_s12 + $0x1a4] ss:$16 sps:$4 sm:$0xff]  }
 0xc31   : > { %11329 = vmatpush1.bf16.msra.mxu0 %v14947_v20  ;;  %v15018_v20 = vld [vmem:[%s18962_s12 + $0x1ac] ss:$16 sps:$4 sm:$0xff]  }
 0xc32   : > { %11501 = vmatpush1.bf16.msra.mxu1 %v14950_v3  ;;  %11330 = vmatprep.subr.bf16.mxu0 %v14955_v45  ;;  %v15013_v3 = vld [vmem:[%s18962_s12 + $0x1a0] ss:$16 sps:$4 sm:$0xff]   ;;  %v15016_v45 = vld [vmem:[%s18962_s12 + $0x1a8] ss:$16 sps:$4 sm:$0xff]  }
 0xc33   : > { %11502 = vmatprep.subr.bf16.mxu1 %v14958_v4  ;;  %v15021_v4 = vld [vmem:[%s18962_s12 + $0x1c4] ss:$16 sps:$4 sm:$0xff]  }
 0xc35   : > { %11331 = vmatpush1.bf16.msra.mxu0 %v14953_v11  ;;  %v15024_v11 = vld [vmem:[%s18962_s12 + $0x1cc] ss:$16 sps:$4 sm:$0xff]  }
 0xc36   : > { %11503 = vmatpush1.bf16.msra.mxu1 %v14956_v43  ;;  %11332 = vmatprep.subr.bf16.mxu0 %v14961_v32  ;;  %v15019_v43 = vld [vmem:[%s18962_s12 + $0x1c0] ss:$16 sps:$4 sm:$0xff]   ;;  %v15022_v32 = vld [vmem:[%s18962_s12 + $0x1c8] ss:$16 sps:$4 sm:$0xff]  }
 0xc37   : > { %11504 = vmatprep.subr.bf16.mxu1 %v14964_v62  ;;  %v15027_v62 = vld [vmem:[%s18962_s12 + $0x1e4] ss:$16 sps:$4 sm:$0xff]  }
 0xc39   : > { %11333 = vmatpush1.bf16.msra.mxu0 %v14959_v18  ;;  %v15030_v18 = vld [vmem:[%s18962_s12 + $0x1ec] ss:$16 sps:$4 sm:$0xff]  }
 0xc3a   : > { %11505 = vmatpush1.bf16.msra.mxu1 %v14962_v0  ;;  %11334 = vmatprep.subr.bf16.mxu0 %v14967_v12  ;;  %v15025_v0 = vld [vmem:[%s18962_s12 + $0x1e0] ss:$16 sps:$4 sm:$0xff]   ;;  %v15028_v12 = vld [vmem:[%s18962_s12 + $0x1e8] ss:$16 sps:$4 sm:$0xff]  }
 0xc3b   : > { %11506 = vmatprep.subr.bf16.mxu1 %v14970_v42  ;;  %v15033_v42 = vld [vmem:[%s18962_s12 + $0x204] ss:$16 sps:$4 sm:$0xff]  }
 0xc3d   : > { %11335 = vmatpush1.bf16.msra.mxu0 %v14965_v33  ;;  %v15036_v33 = vld [vmem:[%s18962_s12 + $0x20c] ss:$16 sps:$4 sm:$0xff]  }
 0xc3e   : > { %11507 = vmatpush1.bf16.msra.mxu1 %v14968_v58  ;;  %11336 = vmatprep.subr.bf16.mxu0 %v14973_v22  ;;  %v18273_v58 = vld [vmem:[%s19033_s23] sm:$0xff] }
 0xc3f   : > { %11508 = vmatprep.subr.bf16.mxu1 %v14976_v52  ;;  %v8081_v22 = vrot.slane %v18273_v58, %v17061_v35  ;;  %v8089_v52 = vrot.slane %v18273_v58, %v17069_v51 }
 0xc41   : > { %11337 = vmatpush1.bf16.msra.mxu0 %v14971_v30  ;;  %v8085_v30 = vrot.slane %v18273_v58, %v17065_v40 }
 0xc42   : > { %11509 = vmatpush1.bf16.msra.mxu1 %v14974_v31  ;;  %11338 = vmatprep.subr.bf16.mxu0 %v14979_v19  ;;  %v8093_v31 = vrot.slane %v18273_v58, %v17073_v46 }
 0xc43   : > { %11510 = vmatprep.subr.bf16.mxu1 %v14982_v10 }
 0xc45   : > { %11339 = vmatpush1.bf16.msra.mxu0 %v14977_v6 }
 0xc46   : > { %11511 = vmatpush1.bf16.msra.mxu1 %v14980_v5  ;;  %11340 = vmatprep.subr.bf16.mxu0 %v14985_v13 }
 0xc47   : > { %11512 = vmatprep.subr.bf16.mxu1 %v14988_v53 }
 0xc49   : > { %11341 = vmatpush1.bf16.msra.mxu0 %v14983_v37 }
 0xc4a   : > { %11513 = vmatpush1.bf16.msra.mxu1 %v14986_v47  ;;  %11342 = vmatprep.subr.bf16.mxu0 %v14991_v44 }
 0xc4b   : > { %11514 = vmatprep.subr.bf16.mxu1 %v14994_v34 }
 0xc4d   : > { %11343 = vmatpush1.bf16.msra.mxu0 %v14989_v54 }
 0xc4e   : > { %11515 = vmatpush1.bf16.msra.mxu1 %v14992_v9  ;;  %11344 = vmatprep.subr.bf16.mxu0 %v14997_v23 }
 0xc4f   : > { %11516 = vmatprep.subr.bf16.mxu1 %v15000_v63 }
 0xc51   : > { %11345 = vmatpush1.bf16.msra.mxu0 %v14995_v21 }
 0xc52   : > { %11517 = vmatpush1.bf16.msra.mxu1 %v14998_v59  ;;  %11346 = vmatprep.subr.bf16.mxu0 %v15003_v49 }
 0xc53   : > { %11518 = vmatprep.subr.bf16.mxu1 %v15006_v56 }
 0xc55   : > { %11347 = vmatpush1.bf16.msra.mxu0 %v15001_v15 }
 0xc56   : > { %11519 = vmatpush1.bf16.msra.mxu1 %v15004_v16  ;;  %11348 = vmatprep.subr.bf16.mxu0 %v15009_v26 }
 0xc57   : > { %11520 = vmatprep.subr.bf16.mxu1 %v15012_v8 }
 0xc59   : > { %11349 = vmatpush1.bf16.msra.mxu0 %v15007_v36 }
 0xc5a   : > { %11521 = vmatpush1.bf16.msra.mxu1 %v15010_v2  ;;  %11350 = vmatprep.subr.bf16.mxu0 %v15015_v7 }
 0xc5b   : > { %11522 = vmatprep.subr.bf16.mxu1 %v15018_v20 }
 0xc5d   : > { %11351 = vmatpush1.bf16.msra.mxu0 %v15013_v3 }
 0xc5e   : > { %11523 = vmatpush1.bf16.msra.mxu1 %v15016_v45  ;;  %11352 = vmatprep.subr.bf16.mxu0 %v15021_v4  ;;  %v15031_v4 = vld [vmem:[%s18962_s12 + $0x200] ss:$16 sps:$4 sm:$0xff]  }
 0xc5f   : > { %11524 = vmatprep.subr.bf16.mxu1 %v15024_v11  ;;  %v15034_v11 = vld [vmem:[%s18962_s12 + $0x208] ss:$16 sps:$4 sm:$0xff]  }
 0xc61   : > { %11353 = vmatpush1.bf16.msra.mxu0 %v15019_v43  ;;  %v15039_v43 = vld [vmem:[%s18962_s12 + $0x224] ss:$16 sps:$4 sm:$0xff]  }
 0xc62   : > { %11525 = vmatpush1.bf16.msra.mxu1 %v15022_v32  ;;  %11354 = vmatprep.subr.bf16.mxu0 %v15027_v62  ;;  %v15042_v32 = vld [vmem:[%s18962_s12 + $0x22c] ss:$16 sps:$4 sm:$0xff]   ;;  %v15037_v62 = vld [vmem:[%s18962_s12 + $0x220] ss:$16 sps:$4 sm:$0xff]  }
 0xc63   : > { %11526 = vmatprep.subr.bf16.mxu1 %v15030_v18  ;;  %v15040_v18 = vld [vmem:[%s18962_s12 + $0x228] ss:$16 sps:$4 sm:$0xff]  }
 0xc65   : > { %11355 = vmatpush1.bf16.msra.mxu0 %v15025_v0  ;;  %v15045_v0 = vld [vmem:[%s18962_s12 + $0x244] ss:$16 sps:$4 sm:$0xff]  }
 0xc66   : > { %11527 = vmatpush1.bf16.msra.mxu1 %v15028_v12  ;;  %11367 = vmatprep.subr.bf16.mxu0 %v15033_v42  ;;  %v15048_v12 = vld [vmem:[%s18962_s12 + $0x24c] ss:$16 sps:$4 sm:$0xff]   ;;  %v15043_v42 = vld [vmem:[%s18962_s12 + $0x240] ss:$16 sps:$4 sm:$0xff]  }
 0xc67   : > { %11539 = vmatprep.subr.bf16.mxu1 %v15036_v33  ;;  %v15046_v33 = vld [vmem:[%s18962_s12 + $0x248] ss:$16 sps:$4 sm:$0xff]  }
 0xc7b   : > { %v9475_v19 = vpop.f32.mrb[0].mxu0  ;;  %v9561_v10 = vpop.f32.mrb[0].mxu1 }
 0xc7c   : > { %v13781_v6 = vadd.f32 %v9475_v19, %v8081_v22  ;;  %v13785_v5 = vadd.f32 %v9561_v10, %v8089_v52  ;;  %v9477_v13 = vpop.f32.mrb[1].mxu0  ;;  %v9563_v53 = vpop.f32.mrb[1].mxu1  ;;  %v15057_v19 = vld [vmem:[%s18962_s12 + $0x284] ss:$16 sps:$4 sm:$0xff]   ;;  %v15060_v10 = vld [vmem:[%s18962_s12 + $0x28c] ss:$16 sps:$4 sm:$0xff]  }
 0xc7d   : > { %v13782_v37 = vadd.f32 %v9477_v13, %v8085_v30  ;;  %v13786_v47 = vadd.f32 %v9563_v53, %v8093_v31  ;;  %v9479_v44 = vpop.f32.mrb[2].mxu0  ;;  %v9565_v34 = vpop.f32.mrb[2].mxu1  ;;  %v15063_v13 = vld [vmem:[%s18962_s12 + $0x2a4] ss:$16 sps:$4 sm:$0xff]   ;;  %v15066_v53 = vld [vmem:[%s18962_s12 + $0x2ac] ss:$16 sps:$4 sm:$0xff]  }
 0xc7e   : > { %v13783_v54 = vadd.f32 %v9479_v44, %v8081_v22  ;;  %v13787_v9 = vadd.f32 %v9565_v34, %v8089_v52  ;;  %v9481_v23 = vpop.f32.mrb[3].mxu0  ;;  %v9567_v63 = vpop.f32.mrb[3].mxu1  ;;  %v9742_v49 = vmax.f32 %v13781_v6, 0.0  ;;  %v9744_v56 = vmax.f32 %v13785_v5, 0.0  ;;  %v15051_v22 = vld [vmem:[%s18962_s12 + $0x264] ss:$16 sps:$4 sm:$0xff]  }
 0xc7f   : > { %v13784_v21 = vadd.f32 %v9481_v23, %v8085_v30  ;;  %v13788_v59 = vadd.f32 %v9567_v63, %v8093_v31  ;;  %v9743_v26 = vmax.f32 %v13782_v37, 0.0  ;;  %v9745_v8 = vmax.f32 %v13786_v47, 0.0  ;;  %v15054_v52 = vld [vmem:[%s18962_s12 + $0x26c] ss:$16 sps:$4 sm:$0xff]   ;;  %v15049_v30 = vld [vmem:[%s18962_s12 + $0x260] ss:$16 sps:$4 sm:$0xff]  }
 0xc80   : > { %v9750_v15 = vmax.f32 %v13783_v54, 0.0  ;;  %v9752_v16 = vmax.f32 %v13787_v9, 0.0  ;;  %v15052_v31 = vld [vmem:[%s18962_s12 + $0x268] ss:$16 sps:$4 sm:$0xff]   ;;  %v15055_v6 = vld [vmem:[%s18962_s12 + $0x280] ss:$16 sps:$4 sm:$0xff]  }
 0xc81   : > { %v9751_v36 = vmax.f32 %v13784_v21, 0.0  ;;  %v9753_v2 = vmax.f32 %v13788_v59, 0.0  ;;  %v15058_v5 = vld [vmem:[%s18962_s12 + $0x288] ss:$16 sps:$4 sm:$0xff]   ;;  %v15061_v37 = vld [vmem:[%s18962_s12 + $0x2a0] ss:$16 sps:$4 sm:$0xff]  }
 0xc82   : > { %v9758_v7 = vpack.c.bf16 %v9750_v15, %v9742_v49  ;;  %v18283_v20 = vpack.c.bf16 %v9752_v16, %v9744_v56  ;;  %v15064_v47 = vld [vmem:[%s18962_s12 + $0x2a8] ss:$16 sps:$4 sm:$0xff]   ;;  %v15069_v44 = vld [vmem:[%s18962_s12 + $0x2c4] ss:$16 sps:$4 sm:$0xff]   ;;  %v15072_v34 = vld [vmem:[%s18962_s12 + $0x2cc] ss:$16 sps:$4 sm:$0xff]  }
 0xc83   : > { %v9759_v3 = vpack.c.bf16 %v9751_v36, %v9743_v26  ;;  %v9761_v45 = vpack.c.bf16 %v9753_v2, %v9745_v8  ;;  %v15067_v54 = vld [vmem:[%s18962_s12 + $0x2c0] ss:$16 sps:$4 sm:$0xff]   ;;  %v15070_v9 = vld [vmem:[%s18962_s12 + $0x2c8] ss:$16 sps:$4 sm:$0xff]   ;;  %v15075_v23 = vld [vmem:[%s18962_s12 + $0x2e4] ss:$16 sps:$4 sm:$0xff]  }
 0xc84   : > { %v15078_v63 = vld [vmem:[%s18962_s12 + $0x2ec] ss:$16 sps:$4 sm:$0xff]   ;;  %v15073_v21 = vld [vmem:[%s18962_s12 + $0x2e0] ss:$16 sps:$4 sm:$0xff]   ;;  %v15076_v59 = vld [vmem:[%s18962_s12 + $0x2e8] ss:$16 sps:$4 sm:$0xff]  }
 0xc85   : > { %11356 = vmatprep.mubr.bf16.mxu0 %v9759_v3  ;;  %11528 = vmatprep.mubr.bf16.mxu1 %v9759_v3  ;;  %v15081_v49 = vld [vmem:[%s18962_s12 + $0x304] ss:$16 sps:$4 sm:$0xff]   ;;  %v15084_v56 = vld [vmem:[%s18962_s12 + $0x30c] ss:$16 sps:$4 sm:$0xff]   ;;  %v15079_v15 = vld [vmem:[%s18962_s12 + $0x300] ss:$16 sps:$4 sm:$0xff]  }
 0xc86   : > { %11357 = vmatmul.mubr.bf16.vlgmr.msra.gmra.mrb[8].mxu0 %v9758_v7  ;;  %11529 = vmatmul.mubr.bf16.vlgmr.msra.gmra.mrb[8].mxu1 %v9758_v7  ;;  %v15082_v16 = vld [vmem:[%s18962_s12 + $0x308] ss:$16 sps:$4 sm:$0xff]   ;;  %v15087_v26 = vld [vmem:[%s18962_s12 + $0x324] ss:$16 sps:$4 sm:$0xff]   ;;  %v15090_v8 = vld [vmem:[%s18962_s12 + $0x32c] ss:$16 sps:$4 sm:$0xff]  }
 0xc87   : > { %11368 = vmatpush1.bf16.msra.mxu0 %v15031_v4  ;;  %11540 = vmatpush1.bf16.msra.mxu1 %v15034_v11  ;;  %v15085_v36 = vld [vmem:[%s18962_s12 + $0x320] ss:$16 sps:$4 sm:$0xff]   ;;  %v15088_v2 = vld [vmem:[%s18962_s12 + $0x328] ss:$16 sps:$4 sm:$0xff]   ;;  %v15093_v7 = vld [vmem:[%s18962_s12 + $0x344] ss:$16 sps:$4 sm:$0xff]  }
 0xc88   : > { %11399 = vmatprep.mubr.bf16.mxu0 %v9761_v45  ;;  %11571 = vmatprep.mubr.bf16.mxu1 %v9761_v45  ;;  %v15096_v3 = vld [vmem:[%s18962_s12 + $0x34c] ss:$16 sps:$4 sm:$0xff]   ;;  %v15091_v45 = vld [vmem:[%s18962_s12 + $0x340] ss:$16 sps:$4 sm:$0xff]   ;;  %v15094_v4 = vld [vmem:[%s18962_s12 + $0x348] ss:$16 sps:$4 sm:$0xff]  }
 0xc89   : > { %11369 = vmatprep.subr.bf16.mxu0 %v15039_v43  ;;  %11541 = vmatprep.subr.bf16.mxu1 %v15042_v32  ;;  %v15099_v11 = vld [vmem:[%s18962_s12 + $0x364] ss:$16 sps:$4 sm:$0xff]   ;;  %v15102_v43 = vld [vmem:[%s18962_s12 + $0x36c] ss:$16 sps:$4 sm:$0xff]   ;;  %v15097_v32 = vld [vmem:[%s18962_s12 + $0x360] ss:$16 sps:$4 sm:$0xff]  }
 0xc8b   : > { %11370 = vmatpush1.bf16.msra.mxu0 %v15037_v62  ;;  %11542 = vmatpush1.bf16.msra.mxu1 %v15040_v18  ;;  %v15100_v62 = vld [vmem:[%s18962_s12 + $0x368] ss:$16 sps:$4 sm:$0xff]   ;;  %v15105_v18 = vld [vmem:[%s18962_s12 + $0x384] ss:$16 sps:$4 sm:$0xff]  }
 0xc8c   : > { %11371 = vmatprep.subr.bf16.mxu0 %v15045_v0  ;;  %11543 = vmatprep.subr.bf16.mxu1 %v15048_v12  ;;  %v15108_v0 = vld [vmem:[%s18962_s12 + $0x38c] ss:$16 sps:$4 sm:$0xff]   ;;  %v15103_v12 = vld [vmem:[%s18962_s12 + $0x380] ss:$16 sps:$4 sm:$0xff]  }
 0xc8f   : > { %11372 = vmatpush1.bf16.msra.mxu0 %v15043_v42  ;;  %11544 = vmatpush1.bf16.msra.mxu1 %v15046_v33  ;;  %v15106_v42 = vld [vmem:[%s18962_s12 + $0x388] ss:$16 sps:$4 sm:$0xff]   ;;  %v15111_v33 = vld [vmem:[%s18962_s12 + $0x3a4] ss:$16 sps:$4 sm:$0xff]  }
 0xc90   : > { %11373 = vmatprep.subr.bf16.mxu0 %v15051_v22  ;;  %11545 = vmatprep.subr.bf16.mxu1 %v15054_v52  ;;  %v15114_v22 = vld [vmem:[%s18962_s12 + $0x3ac] ss:$16 sps:$4 sm:$0xff]   ;;  %v15109_v52 = vld [vmem:[%s18962_s12 + $0x3a0] ss:$16 sps:$4 sm:$0xff]  }
 0xc93   : > { %11374 = vmatpush1.bf16.msra.mxu0 %v15049_v30  ;;  %11546 = vmatpush1.bf16.msra.mxu1 %v15052_v31  ;;  %v15112_v30 = vld [vmem:[%s18962_s12 + $0x3a8] ss:$16 sps:$4 sm:$0xff]   ;;  %v15117_v31 = vld [vmem:[%s18962_s12 + $0x3c4] ss:$16 sps:$4 sm:$0xff]  }
 0xc94   : > { %11375 = vmatprep.subr.bf16.mxu0 %v15057_v19  ;;  %11547 = vmatprep.subr.bf16.mxu1 %v15060_v10  ;;  %v15120_v19 = vld [vmem:[%s18962_s12 + $0x3cc] ss:$16 sps:$4 sm:$0xff]   ;;  %v15115_v10 = vld [vmem:[%s18962_s12 + $0x3c0] ss:$16 sps:$4 sm:$0xff]  }
 0xc97   : > { %11376 = vmatpush1.bf16.msra.mxu0 %v15055_v6  ;;  %11548 = vmatpush1.bf16.msra.mxu1 %v15058_v5  ;;  %v15118_v6 = vld [vmem:[%s18962_s12 + $0x3c8] ss:$16 sps:$4 sm:$0xff]   ;;  %v15123_v5 = vld [vmem:[%s18962_s12 + $0x3e4] ss:$16 sps:$4 sm:$0xff]  }
 0xc98   : > { %11377 = vmatprep.subr.bf16.mxu0 %v15063_v13  ;;  %11549 = vmatprep.subr.bf16.mxu1 %v15066_v53  ;;  %v15126_v13 = vld [vmem:[%s18962_s12 + $0x3ec] ss:$16 sps:$4 sm:$0xff]   ;;  %v15121_v53 = vld [vmem:[%s18962_s12 + $0x3e0] ss:$16 sps:$4 sm:$0xff]  }
 0xc9b   : > { %11378 = vmatpush1.bf16.msra.mxu0 %v15061_v37  ;;  %11550 = vmatpush1.bf16.msra.mxu1 %v15064_v47  ;;  %v15124_v37 = vld [vmem:[%s18962_s12 + $0x3e8] ss:$16 sps:$4 sm:$0xff]   ;;  %v15129_v47 = vld [vmem:[%s18962_s12 + $0x404] ss:$16 sps:$4 sm:$0xff]  }
 0xc9c   : > { %11379 = vmatprep.subr.bf16.mxu0 %v15069_v44  ;;  %11551 = vmatprep.subr.bf16.mxu1 %v15072_v34  ;;  %v15132_v44 = vld [vmem:[%s18962_s12 + $0x40c] ss:$16 sps:$4 sm:$0xff]   ;;  %v15127_v34 = vld [vmem:[%s18962_s12 + $0x400] ss:$16 sps:$4 sm:$0xff]  }
 0xc9f   : > { %11380 = vmatpush1.bf16.msra.mxu0 %v15067_v54  ;;  %11552 = vmatpush1.bf16.msra.mxu1 %v15070_v9  ;;  %v15130_v54 = vld [vmem:[%s18962_s12 + $0x408] ss:$16 sps:$4 sm:$0xff]   ;;  %v15135_v9 = vld [vmem:[%s18962_s12 + $0x424] ss:$16 sps:$4 sm:$0xff]  }
 0xca0   : > { %11381 = vmatprep.subr.bf16.mxu0 %v15075_v23  ;;  %11553 = vmatprep.subr.bf16.mxu1 %v15078_v63  ;;  %v15138_v23 = vld [vmem:[%s18962_s12 + $0x42c] ss:$16 sps:$4 sm:$0xff]   ;;  %v15133_v63 = vld [vmem:[%s18962_s12 + $0x420] ss:$16 sps:$4 sm:$0xff]  }
 0xca3   : > { %11382 = vmatpush1.bf16.msra.mxu0 %v15073_v21  ;;  %11554 = vmatpush1.bf16.msra.mxu1 %v15076_v59  ;;  %v15136_v21 = vld [vmem:[%s18962_s12 + $0x428] ss:$16 sps:$4 sm:$0xff]   ;;  %v15141_v59 = vld [vmem:[%s18962_s12 + $0x444] ss:$16 sps:$4 sm:$0xff]  }
 0xca4   : > { %11383 = vmatprep.subr.bf16.mxu0 %v15081_v49  ;;  %11555 = vmatprep.subr.bf16.mxu1 %v15084_v56  ;;  %v15139_v49 = vld [vmem:[%s18962_s12 + $0x440] ss:$16 sps:$4 sm:$0xff]   ;;  %v15142_v56 = vld [vmem:[%s18962_s12 + $0x448] ss:$16 sps:$4 sm:$0xff]  }
 0xca7   : > { %11384 = vmatpush1.bf16.msra.mxu0 %v15079_v15  ;;  %11556 = vmatpush1.bf16.msra.mxu1 %v15082_v16  ;;  %v15147_v15 = vld [vmem:[%s18962_s12 + $0x464] ss:$16 sps:$4 sm:$0xff]   ;;  %v15150_v16 = vld [vmem:[%s18962_s12 + $0x46c] ss:$16 sps:$4 sm:$0xff]  }
 0xca8   : > { %11385 = vmatprep.subr.bf16.mxu0 %v15087_v26  ;;  %11557 = vmatprep.subr.bf16.mxu1 %v15090_v8  ;;  %v15145_v26 = vld [vmem:[%s18962_s12 + $0x460] ss:$16 sps:$4 sm:$0xff]   ;;  %v15148_v8 = vld [vmem:[%s18962_s12 + $0x468] ss:$16 sps:$4 sm:$0xff]  }
 0xcab   : > { %11386 = vmatpush1.bf16.msra.mxu0 %v15085_v36  ;;  %11558 = vmatpush1.bf16.msra.mxu1 %v15088_v2  ;;  %v15153_v36 = vld [vmem:[%s18962_s12 + $0x484] ss:$16 sps:$4 sm:$0xff]   ;;  %v15156_v2 = vld [vmem:[%s18962_s12 + $0x48c] ss:$16 sps:$4 sm:$0xff]  }
 0xcac   : > { %11387 = vmatprep.subr.bf16.mxu0 %v15093_v7  ;;  %11559 = vmatprep.subr.bf16.mxu1 %v15096_v3  ;;  %v15151_v7 = vld [vmem:[%s18962_s12 + $0x480] ss:$16 sps:$4 sm:$0xff]   ;;  %v15154_v3 = vld [vmem:[%s18962_s12 + $0x488] ss:$16 sps:$4 sm:$0xff]  }
 0xcaf   : > { %11388 = vmatpush1.bf16.msra.mxu0 %v15091_v45  ;;  %11560 = vmatpush1.bf16.msra.mxu1 %v15094_v4  ;;  %v15159_v45 = vld [vmem:[%s18962_s12 + $0x4a4] ss:$16 sps:$4 sm:$0xff]   ;;  %v15162_v4 = vld [vmem:[%s18962_s12 + $0x4ac] ss:$16 sps:$4 sm:$0xff]  }
 0xcb0   : > { %11389 = vmatprep.subr.bf16.mxu0 %v15099_v11  ;;  %11561 = vmatprep.subr.bf16.mxu1 %v15102_v43  ;;  %v15157_v11 = vld [vmem:[%s18962_s12 + $0x4a0] ss:$16 sps:$4 sm:$0xff]   ;;  %v15160_v43 = vld [vmem:[%s18962_s12 + $0x4a8] ss:$16 sps:$4 sm:$0xff]  }
 0xcb3   : > { %11390 = vmatpush1.bf16.msra.mxu0 %v15097_v32  ;;  %11562 = vmatpush1.bf16.msra.mxu1 %v15100_v62  ;;  %v15165_v32 = vld [vmem:[%s18962_s12 + $0x4c4] ss:$16 sps:$4 sm:$0xff]   ;;  %v15168_v62 = vld [vmem:[%s18962_s12 + $0x4cc] ss:$16 sps:$4 sm:$0xff]  }
 0xcb4   : > { %11391 = vmatprep.subr.bf16.mxu0 %v15105_v18  ;;  %11563 = vmatprep.subr.bf16.mxu1 %v15108_v0  ;;  %v15163_v18 = vld [vmem:[%s18962_s12 + $0x4c0] ss:$16 sps:$4 sm:$0xff]   ;;  %v15166_v0 = vld [vmem:[%s18962_s12 + $0x4c8] ss:$16 sps:$4 sm:$0xff]  }
 0xcb7   : > { %11392 = vmatpush1.bf16.msra.mxu0 %v15103_v12  ;;  %11564 = vmatpush1.bf16.msra.mxu1 %v15106_v42  ;;  %v15171_v12 = vld [vmem:[%s18962_s12 + $0x4e4] ss:$16 sps:$4 sm:$0xff]   ;;  %v15174_v42 = vld [vmem:[%s18962_s12 + $0x4ec] ss:$16 sps:$4 sm:$0xff]  }
 0xcb8   : > { %11393 = vmatprep.subr.bf16.mxu0 %v15111_v33  ;;  %11565 = vmatprep.subr.bf16.mxu1 %v15114_v22  ;;  %v15169_v33 = vld [vmem:[%s18962_s12 + $0x4e0] ss:$16 sps:$4 sm:$0xff]   ;;  %v15172_v22 = vld [vmem:[%s18962_s12 + $0x4e8] ss:$16 sps:$4 sm:$0xff]  }
 0xcbb   : > { %11394 = vmatpush1.bf16.msra.mxu0 %v15109_v52  ;;  %11566 = vmatpush1.bf16.msra.mxu1 %v15112_v30  ;;  %v15177_v52 = vld [vmem:[%s18962_s12 + $0x504] ss:$16 sps:$4 sm:$0xff]   ;;  %v15180_v30 = vld [vmem:[%s18962_s12 + $0x50c] ss:$16 sps:$4 sm:$0xff]  }
 0xcbc   : > { %11395 = vmatprep.subr.bf16.mxu0 %v15117_v31  ;;  %11567 = vmatprep.subr.bf16.mxu1 %v15120_v19  ;;  %v15175_v31 = vld [vmem:[%s18962_s12 + $0x500] ss:$16 sps:$4 sm:$0xff]   ;;  %v15178_v19 = vld [vmem:[%s18962_s12 + $0x508] ss:$16 sps:$4 sm:$0xff]  }
 0xcbf   : > { %11396 = vmatpush1.bf16.msra.mxu0 %v15115_v10  ;;  %11568 = vmatpush1.bf16.msra.mxu1 %v15118_v6  ;;  %v15183_v10 = vld [vmem:[%s18962_s12 + $0x524] ss:$16 sps:$4 sm:$0xff]   ;;  %v15186_v6 = vld [vmem:[%s18962_s12 + $0x52c] ss:$16 sps:$4 sm:$0xff]  }
 0xcc0   : > { %11397 = vmatprep.subr.bf16.mxu0 %v15123_v5  ;;  %11569 = vmatprep.subr.bf16.mxu1 %v15126_v13  ;;  %v15181_v5 = vld [vmem:[%s18962_s12 + $0x520] ss:$16 sps:$4 sm:$0xff]   ;;  %v15184_v13 = vld [vmem:[%s18962_s12 + $0x528] ss:$16 sps:$4 sm:$0xff]  }
 0xcc3   : > { %11398 = vmatpush1.bf16.msra.mxu0 %v15121_v53  ;;  %11570 = vmatpush1.bf16.msra.mxu1 %v15124_v37  ;;  %v15189_v53 = vld [vmem:[%s18962_s12 + $0x544] ss:$16 sps:$4 sm:$0xff]   ;;  %v15192_v37 = vld [vmem:[%s18962_s12 + $0x54c] ss:$16 sps:$4 sm:$0xff]  }
 0xcc4   : > { %11410 = vmatprep.subr.bf16.mxu0 %v15129_v47  ;;  %11582 = vmatprep.subr.bf16.mxu1 %v15132_v44  ;;  %v15187_v47 = vld [vmem:[%s18962_s12 + $0x540] ss:$16 sps:$4 sm:$0xff]   ;;  %v15190_v44 = vld [vmem:[%s18962_s12 + $0x548] ss:$16 sps:$4 sm:$0xff]  }
 0xcc6   : > { %11400 = vmatmul.mubr.bf16.vlgmr.msra.gmra.mrb[8].mxu0 %v18283_v20  ;;  %11572 = vmatmul.mubr.bf16.vlgmr.msra.gmra.mrb[8].mxu1 %v18283_v20  ;;  %v15144_v20 = vld [vmem:[%s18962_s12 + $0x44c] ss:$16 sps:$4 sm:$0xff]  }
 0xcc7   : > { %11411 = vmatpush1.bf16.msra.mxu0 %v15127_v34  ;;  %11583 = vmatpush1.bf16.msra.mxu1 %v15130_v54  ;;  %v15195_v34 = vld [vmem:[%s18962_s12 + $0x564] ss:$16 sps:$4 sm:$0xff]   ;;  %v15198_v54 = vld [vmem:[%s18962_s12 + $0x56c] ss:$16 sps:$4 sm:$0xff]  }
 0xcc8   : > { %11412 = vmatprep.subr.bf16.mxu0 %v15135_v9  ;;  %11584 = vmatprep.subr.bf16.mxu1 %v15138_v23  ;;  %v15193_v9 = vld [vmem:[%s18962_s12 + $0x560] ss:$16 sps:$4 sm:$0xff]   ;;  %v15196_v23 = vld [vmem:[%s18962_s12 + $0x568] ss:$16 sps:$4 sm:$0xff]  }
 0xccb   : > { %11413 = vmatpush1.bf16.msra.mxu0 %v15133_v63  ;;  %11585 = vmatpush1.bf16.msra.mxu1 %v15136_v21  ;;  %v15201_v63 = vld [vmem:[%s18962_s12 + $0x584] ss:$16 sps:$4 sm:$0xff]   ;;  %v15204_v21 = vld [vmem:[%s18962_s12 + $0x58c] ss:$16 sps:$4 sm:$0xff]  }
 0xccc   : > { %11414 = vmatprep.subr.bf16.mxu0 %v15141_v59  ;;  %11586 = vmatprep.subr.bf16.mxu1 %v15144_v20  ;;  %v15199_v59 = vld [vmem:[%s18962_s12 + $0x580] ss:$16 sps:$4 sm:$0xff]   ;;  %v15202_v20 = vld [vmem:[%s18962_s12 + $0x588] ss:$16 sps:$4 sm:$0xff]  }
 0xccf   : > { %11415 = vmatpush1.bf16.msra.mxu0 %v15139_v49  ;;  %11587 = vmatpush1.bf16.msra.mxu1 %v15142_v56  ;;  %v15207_v49 = vld [vmem:[%s18962_s12 + $0x5a4] ss:$16 sps:$4 sm:$0xff]   ;;  %v15210_v56 = vld [vmem:[%s18962_s12 + $0x5ac] ss:$16 sps:$4 sm:$0xff]  }
 0xcd0   : > { %11416 = vmatprep.subr.bf16.mxu0 %v15147_v15  ;;  %11588 = vmatprep.subr.bf16.mxu1 %v15150_v16  ;;  %v8096_v15 = vsub.s32 4, %v16944_v55  ;;  %v8104_v16 = vsub.s32 6, %v16944_v55 }
 0xcd3   : > { %11417 = vmatpush1.bf16.msra.mxu0 %v15145_v26  ;;  %11589 = vmatpush1.bf16.msra.mxu1 %v15148_v8  ;;  %v8100_v26 = vsub.s32 5, %v16944_v55  ;;  %v8108_v8 = vsub.s32 7, %v16944_v55  ;;  %v15216_v55 = vld [vmem:[%s18962_s12 + $0x5cc] ss:$16 sps:$4 sm:$0xff]  }
 0xcd4   : > { %11418 = vmatprep.subr.bf16.mxu0 %v15153_v36  ;;  %11590 = vmatprep.subr.bf16.mxu1 %v15156_v2  ;;  %v15205_v36 = vld [vmem:[%s18962_s12 + $0x5a0] ss:$16 sps:$4 sm:$0xff]   ;;  %v15208_v2 = vld [vmem:[%s18962_s12 + $0x5a8] ss:$16 sps:$4 sm:$0xff]  }
 0xcd7   : > { %11419 = vmatpush1.bf16.msra.mxu0 %v15151_v7  ;;  %11591 = vmatpush1.bf16.msra.mxu1 %v15154_v3  ;;  %v8097_v7 = vrot.slane %v18273_v58, %v8096_v15  ;;  %v15213_v3 = vld [vmem:[%s18962_s12 + $0x5c4] ss:$16 sps:$4 sm:$0xff]  }
 0xcd8   : > { %11420 = vmatprep.subr.bf16.mxu0 %v15159_v45  ;;  %11592 = vmatprep.subr.bf16.mxu1 %v15162_v4  ;;  %v8105_v45 = vrot.slane %v18273_v58, %v8104_v16  ;;  %v8101_v4 = vrot.slane %v18273_v58, %v8100_v26 }
 0xcdb   : > { %11421 = vmatpush1.bf16.msra.mxu0 %v15157_v11  ;;  %11593 = vmatpush1.bf16.msra.mxu1 %v15160_v43  ;;  %v8109_v11 = vrot.slane %v18273_v58, %v8108_v8  ;;  %v15219_v58 = vld [vmem:[%s18962_s12 + $0x5e4] ss:$16 sps:$4 sm:$0xff]   ;;  %v15223_v8 = vld [vmem:[%s18962_s12 + $0x600] ss:$16 sps:$4 sm:$0xff]  }
 0xcdc   : > { %11422 = vmatprep.subr.bf16.mxu0 %v15165_v32  ;;  %11594 = vmatprep.subr.bf16.mxu1 %v15168_v62  ;;  %v15211_v32 = vld [vmem:[%s18962_s12 + $0x5c0] ss:$16 sps:$4 sm:$0xff]   ;;  %v15214_v62 = vld [vmem:[%s18962_s12 + $0x5c8] ss:$16 sps:$4 sm:$0xff]  }
 0xcdf   : > { %11423 = vmatpush1.bf16.msra.mxu0 %v15163_v18  ;;  %11595 = vmatpush1.bf16.msra.mxu1 %v15166_v0 }
 0xce0   : > { %11424 = vmatprep.subr.bf16.mxu0 %v15171_v12  ;;  %11596 = vmatprep.subr.bf16.mxu1 %v15174_v42  ;;  %v15222_v42 = vld [vmem:[%s18962_s12 + $0x5ec] ss:$16 sps:$4 sm:$0xff]  }
 0xce3   : > { %11425 = vmatpush1.bf16.msra.mxu0 %v15169_v33  ;;  %11597 = vmatpush1.bf16.msra.mxu1 %v15172_v22 }
 0xce4   : > { %11426 = vmatprep.subr.bf16.mxu0 %v15177_v52  ;;  %11598 = vmatprep.subr.bf16.mxu1 %v15180_v30 }
 0xce7   : > { %11427 = vmatpush1.bf16.msra.mxu0 %v15175_v31  ;;  %11599 = vmatpush1.bf16.msra.mxu1 %v15178_v19 }
 0xce8   : > { %11428 = vmatprep.subr.bf16.mxu0 %v15183_v10  ;;  %11600 = vmatprep.subr.bf16.mxu1 %v15186_v6 }
 0xceb   : > { %11429 = vmatpush1.bf16.msra.mxu0 %v15181_v5  ;;  %11601 = vmatpush1.bf16.msra.mxu1 %v15184_v13 }
 0xcec   : > { %11430 = vmatprep.subr.bf16.mxu0 %v15189_v53  ;;  %11602 = vmatprep.subr.bf16.mxu1 %v15192_v37  ;;  %v15217_v37 = vld [vmem:[%s18962_s12 + $0x5e0] ss:$16 sps:$4 sm:$0xff]  }
 0xcef   : > { %11431 = vmatpush1.bf16.msra.mxu0 %v15187_v47  ;;  %11603 = vmatpush1.bf16.msra.mxu1 %v15190_v44  ;;  %v15220_v47 = vld [vmem:[%s18962_s12 + $0x5e8] ss:$16 sps:$4 sm:$0xff]  }
 0xcf0   : > { %11432 = vmatprep.subr.bf16.mxu0 %v15195_v34  ;;  %11604 = vmatprep.subr.bf16.mxu1 %v15198_v54 }
 0xcf3   : > { %11433 = vmatpush1.bf16.msra.mxu0 %v15193_v9  ;;  %11605 = vmatpush1.bf16.msra.mxu1 %v15196_v23  ;;  %v15225_v9 = vld [vmem:[%s18962_s12 + $0x604] ss:$16 sps:$4 sm:$0xff]   ;;  %v15228_v23 = vld [vmem:[%s18962_s12 + $0x60c] ss:$16 sps:$4 sm:$0xff]  }
 0xcf4   : > { %11434 = vmatprep.subr.bf16.mxu0 %v15201_v63  ;;  %11606 = vmatprep.subr.bf16.mxu1 %v15204_v21 }
 0xcf7   : > { %11435 = vmatpush1.bf16.msra.mxu0 %v15199_v59  ;;  %11607 = vmatpush1.bf16.msra.mxu1 %v15202_v20 }
 0xcf8   : > { %11436 = vmatprep.subr.bf16.mxu0 %v15207_v49  ;;  %11608 = vmatprep.subr.bf16.mxu1 %v15210_v56 }
 0xcfb   : > { %11437 = vmatpush1.bf16.msra.mxu0 %v15205_v36  ;;  %11609 = vmatpush1.bf16.msra.mxu1 %v15208_v2  ;;  %v9647_v43 = vpop.f32.mrb[4].mxu0  ;;  %v15226_v36 = vld [vmem:[%s18962_s12 + $0x608] ss:$16 sps:$4 sm:$0xff]  }
 0xcfc   : > { %v13789_v18 = vadd.f32 %v9647_v43, %v8097_v7  ;;  %v9733_v0 = vpop.f32.mrb[4].mxu1  ;;  %v9649_v12 = vpop.f32.mrb[5].mxu0  ;;  %11438 = vmatprep.subr.bf16.mxu0 %v15213_v3  ;;  %11610 = vmatprep.subr.bf16.mxu1 %v15216_v55  ;;  %v15234_v3 = vld [vmem:[%s18962_s12 + $0x62c] ss:$16 sps:$4 sm:$0xff]   ;;  %v15229_v55 = vld [vmem:[%s18962_s12 + $0x620] ss:$16 sps:$4 sm:$0xff]  }
 0xcfd   : > { %v13793_v33 = vadd.f32 %v9733_v0, %v8105_v45  ;;  %v13790_v22 = vadd.f32 %v9649_v12, %v8101_v4  ;;  %v9735_v52 = vpop.f32.mrb[5].mxu1  ;;  %v9651_v30 = vpop.f32.mrb[6].mxu0  ;;  %v15235_v43 = vld [vmem:[%s18962_s12 + $0x640] ss:$16 sps:$4 sm:$0xff]   ;;  %v15244_v12 = vld [vmem:[%s18962_s12 + $0x668] ss:$16 sps:$4 sm:$0xff]  }
 0xcfe   : > { %v13794_v31 = vadd.f32 %v9735_v52, %v8109_v11  ;;  %v13791_v19 = vadd.f32 %v9651_v30, %v8097_v7  ;;  %v9737_v10 = vpop.f32.mrb[6].mxu1  ;;  %v9653_v6 = vpop.f32.mrb[7].mxu0  ;;  %v9746_v44 = vmax.f32 %v13789_v18, 0.0  ;;  %v15231_v7 = vld [vmem:[%s18962_s12 + $0x624] ss:$16 sps:$4 sm:$0xff]  }
 0xcff   : > { %v13795_v5 = vadd.f32 %v9737_v10, %v8105_v45  ;;  %v13792_v13 = vadd.f32 %v9653_v6, %v8101_v4  ;;  %v9739_v53 = vpop.f32.mrb[7].mxu1  ;;  %11439 = vmatpush1.bf16.msra.mxu0 %v15211_v32  ;;  %11611 = vmatpush1.bf16.msra.mxu1 %v15214_v62  ;;  %v9748_v63 = vmax.f32 %v13793_v33, 0.0  ;;  %v9747_v21 = vmax.f32 %v13790_v22, 0.0  ;;  %v15232_v45 = vld [vmem:[%s18962_s12 + $0x628] ss:$16 sps:$4 sm:$0xff]  }
 0xd00   : > { %v9754_v34 = vmax.f32 %v13791_v19, 0.0  ;;  %v13796_v54 = vadd.f32 %v9739_v53, %v8109_v11  ;;  %11440 = vmatprep.subr.bf16.mxu0 %v15219_v58  ;;  %11612 = vmatprep.subr.bf16.mxu1 %v15222_v42  ;;  %v9749_v49 = vmax.f32 %v13794_v31, 0.0  ;;  %v15237_v4 = vld [vmem:[%s18962_s12 + $0x644] ss:$16 sps:$4 sm:$0xff]   ;;  %v15240_v11 = vld [vmem:[%s18962_s12 + $0x64c] ss:$16 sps:$4 sm:$0xff]  }
 0xd01   : > { %v9756_v59 = vmax.f32 %v13795_v5, 0.0  ;;  %v9755_v20 = vmax.f32 %v13792_v13, 0.0  ;;  %v15238_v32 = vld [vmem:[%s18962_s12 + $0x648] ss:$16 sps:$4 sm:$0xff]   ;;  %v15243_v62 = vld [vmem:[%s18962_s12 + $0x664] ss:$16 sps:$4 sm:$0xff]  }
 0xd02   : > { %v9762_v56 = vpack.c.bf16 %v9754_v34, %v9746_v44  ;;  %v9757_v15 = vmax.f32 %v13796_v54, 0.0  ;;  %v15246_v18 = vld [vmem:[%s18962_s12 + $0x66c] ss:$16 sps:$4 sm:$0xff]   ;;  %v15241_v0 = vld [vmem:[%s18962_s12 + $0x660] ss:$16 sps:$4 sm:$0xff]  }
 0xd03   : > { %v18679_v16 = vpack.c.bf16 %v9756_v59, %v9748_v63  ;;  %v9763_v26 = vpack.c.bf16 %v9755_v20, %v9747_v21  ;;  %11441 = vmatpush1.bf16.msra.mxu0 %v15217_v37  ;;  %11613 = vmatpush1.bf16.msra.mxu1 %v15220_v47  ;;  %v15249_v58 = vld [vmem:[%s18962_s12 + $0x684] ss:$16 sps:$4 sm:$0xff]   ;;  %v15252_v42 = vld [vmem:[%s18962_s12 + $0x68c] ss:$16 sps:$4 sm:$0xff]   ;;  %v15247_v33 = vld [vmem:[%s18962_s12 + $0x680] ss:$16 sps:$4 sm:$0xff]  }
 0xd04   : > { %v9765_v2 = vpack.c.bf16 %v9757_v15, %v9749_v49  ;;  %11453 = vmatprep.subr.bf16.mxu0 %v15225_v9  ;;  %11625 = vmatprep.subr.bf16.mxu1 %v15228_v23  ;;  %v15250_v22 = vld [vmem:[%s18962_s12 + $0x688] ss:$16 sps:$4 sm:$0xff]   ;;  %v15255_v52 = vld [vmem:[%s18962_s12 + $0x6a4] ss:$16 sps:$4 sm:$0xff]   ;;  %v15258_v30 = vld [vmem:[%s18962_s12 + $0x6ac] ss:$16 sps:$4 sm:$0xff]  }
 0xd05   : > { %11442 = vmatprep.mubr.bf16.mxu0 %v9763_v26  ;;  %11614 = vmatprep.mubr.bf16.mxu1 %v9763_v26  ;;  %v15253_v31 = vld [vmem:[%s18962_s12 + $0x6a0] ss:$16 sps:$4 sm:$0xff]   ;;  %v15256_v19 = vld [vmem:[%s18962_s12 + $0x6a8] ss:$16 sps:$4 sm:$0xff]   ;;  %v15261_v10 = vld [vmem:[%s18962_s12 + $0x6c4] ss:$16 sps:$4 sm:$0xff]  }
 0xd06   : > { %11443 = vmatmul.mubr.bf16.vlgmr.msra.gmra.mrb[8].mxu0 %v9762_v56  ;;  %11615 = vmatmul.mubr.bf16.vlgmr.msra.gmra.mrb[8].mxu1 %v9762_v56  ;;  %v15264_v6 = vld [vmem:[%s18962_s12 + $0x6cc] ss:$16 sps:$4 sm:$0xff]   ;;  %v15259_v5 = vld [vmem:[%s18962_s12 + $0x6c0] ss:$16 sps:$4 sm:$0xff]   ;;  %v15262_v13 = vld [vmem:[%s18962_s12 + $0x6c8] ss:$16 sps:$4 sm:$0xff]  }
 0xd07   : > { %11454 = vmatpush1.bf16.msra.mxu0 %v15223_v8  ;;  %11626 = vmatpush1.bf16.msra.mxu1 %v15226_v36  ;;  %v15267_v53 = vld [vmem:[%s18962_s12 + $0x6e4] ss:$16 sps:$4 sm:$0xff]   ;;  %v15270_v37 = vld [vmem:[%s18962_s12 + $0x6ec] ss:$16 sps:$4 sm:$0xff]   ;;  %v15265_v47 = vld [vmem:[%s18962_s12 + $0x6e0] ss:$16 sps:$4 sm:$0xff]  }
 0xd08   : > { %11485 = vmatprep.mubr.bf16.mxu0 %v9765_v2  ;;  %11657 = vmatprep.mubr.bf16.mxu1 %v9765_v2  ;;  %v15268_v44 = vld [vmem:[%s18962_s12 + $0x6e8] ss:$16 sps:$4 sm:$0xff]   ;;  %v15273_v34 = vld [vmem:[%s18962_s12 + $0x704] ss:$16 sps:$4 sm:$0xff]   ;;  %v15276_v54 = vld [vmem:[%s18962_s12 + $0x70c] ss:$16 sps:$4 sm:$0xff]  }
 0xd09   : > { %11455 = vmatprep.subr.bf16.mxu0 %v15231_v7  ;;  %11627 = vmatprep.subr.bf16.mxu1 %v15234_v3  ;;  %v15271_v9 = vld [vmem:[%s18962_s12 + $0x700] ss:$16 sps:$4 sm:$0xff]   ;;  %v15274_v23 = vld [vmem:[%s18962_s12 + $0x708] ss:$16 sps:$4 sm:$0xff]   ;;  %v15279_v63 = vld [vmem:[%s18962_s12 + $0x724] ss:$16 sps:$4 sm:$0xff]  }
 0xd0a   : > { %v15282_v21 = vld [vmem:[%s18962_s12 + $0x72c] ss:$16 sps:$4 sm:$0xff]   ;;  %v15277_v59 = vld [vmem:[%s18962_s12 + $0x720] ss:$16 sps:$4 sm:$0xff]   ;;  %v15280_v20 = vld [vmem:[%s18962_s12 + $0x728] ss:$16 sps:$4 sm:$0xff]  }
 0xd0b   : > { %11456 = vmatpush1.bf16.msra.mxu0 %v15229_v55  ;;  %11628 = vmatpush1.bf16.msra.mxu1 %v15232_v45  ;;  %v15285_v49 = vld [vmem:[%s18962_s12 + $0x744] ss:$16 sps:$4 sm:$0xff]   ;;  %v15288_v56 = vld [vmem:[%s18962_s12 + $0x74c] ss:$16 sps:$4 sm:$0xff]   ;;  %v15283_v15 = vld [vmem:[%s18962_s12 + $0x740] ss:$16 sps:$4 sm:$0xff]  }
 0xd0c   : > { %11457 = vmatprep.subr.bf16.mxu0 %v15237_v4  ;;  %11629 = vmatprep.subr.bf16.mxu1 %v15240_v11  ;;  %v15286_v26 = vld [vmem:[%s18962_s12 + $0x748] ss:$16 sps:$4 sm:$0xff]   ;;  %v15291_v8 = vld [vmem:[%s18962_s12 + $0x764] ss:$16 sps:$4 sm:$0xff]   ;;  %v15294_v36 = vld [vmem:[%s18962_s12 + $0x76c] ss:$16 sps:$4 sm:$0xff]  }
 0xd0d   : > { %v15289_v2 = vld [vmem:[%s18962_s12 + $0x760] ss:$16 sps:$4 sm:$0xff]   ;;  %v15292_v7 = vld [vmem:[%s18962_s12 + $0x768] ss:$16 sps:$4 sm:$0xff]   ;;  %v15297_v3 = vld [vmem:[%s18962_s12 + $0x784] ss:$16 sps:$4 sm:$0xff]  }
 0xd0e   : > { %v15300_v55 = vld [vmem:[%s18962_s12 + $0x78c] ss:$16 sps:$4 sm:$0xff]   ;;  %v15295_v45 = vld [vmem:[%s18962_s12 + $0x780] ss:$16 sps:$4 sm:$0xff]   ;;  %v15298_v4 = vld [vmem:[%s18962_s12 + $0x788] ss:$16 sps:$4 sm:$0xff]  }
 0xd0f   : > { %11458 = vmatpush1.bf16.msra.mxu0 %v15235_v43  ;;  %11630 = vmatpush1.bf16.msra.mxu1 %v15238_v32  ;;  %v15303_v11 = vld [vmem:[%s18962_s12 + $0x7a4] ss:$16 sps:$4 sm:$0xff]   ;;  %v15306_v43 = vld [vmem:[%s18962_s12 + $0x7ac] ss:$16 sps:$4 sm:$0xff]   ;;  %v15301_v32 = vld [vmem:[%s18962_s12 + $0x7a0] ss:$16 sps:$4 sm:$0xff]  }
 0xd10   : > { %11459 = vmatprep.subr.bf16.mxu0 %v15243_v62  ;;  %11631 = vmatprep.subr.bf16.mxu1 %v15246_v18  ;;  %v15304_v62 = vld [vmem:[%s18962_s12 + $0x7a8] ss:$16 sps:$4 sm:$0xff]   ;;  %v15309_v18 = vld [vmem:[%s18962_s12 + $0x7c4] ss:$16 sps:$4 sm:$0xff]  }
 0xd13   : > { %11460 = vmatpush1.bf16.msra.mxu0 %v15241_v0  ;;  %11632 = vmatpush1.bf16.msra.mxu1 %v15244_v12  ;;  %v15312_v0 = vld [vmem:[%s18962_s12 + $0x7cc] ss:$16 sps:$4 sm:$0xff]   ;;  %v15307_v12 = vld [vmem:[%s18962_s12 + $0x7c0] ss:$16 sps:$4 sm:$0xff]  }
 0xd14   : > { %11461 = vmatprep.subr.bf16.mxu0 %v15249_v58  ;;  %11633 = vmatprep.subr.bf16.mxu1 %v15252_v42  ;;  %v15310_v58 = vld [vmem:[%s18962_s12 + $0x7c8] ss:$16 sps:$4 sm:$0xff]   ;;  %v15315_v42 = vld [vmem:[%s18962_s12 + $0x7e4] ss:$16 sps:$4 sm:$0xff]  }
 0xd17   : > { %11462 = vmatpush1.bf16.msra.mxu0 %v15247_v33  ;;  %11634 = vmatpush1.bf16.msra.mxu1 %v15250_v22  ;;  %v15318_v33 = vld [vmem:[%s18962_s12 + $0x7ec] ss:$16 sps:$4 sm:$0xff]   ;;  %v15313_v22 = vld [vmem:[%s18962_s12 + $0x7e0] ss:$16 sps:$4 sm:$0xff]  }
 0xd18   : > { %11463 = vmatprep.subr.bf16.mxu0 %v15255_v52  ;;  %11635 = vmatprep.subr.bf16.mxu1 %v15258_v30  ;;  %v15316_v52 = vld [vmem:[%s18962_s12 + $0x7e8] ss:$16 sps:$4 sm:$0xff]   ;;  %v10022_v30 = vld [vmem:[%s19034_s28] sm:$0xf] }
 0xd1b   : > { %11464 = vmatpush1.bf16.msra.mxu0 %v15253_v31  ;;  %11636 = vmatpush1.bf16.msra.mxu1 %v15256_v19  ;;  %v10027_v31 = vrot.slane %v10022_v30, %v17061_v35  ;;  %v10035_v19 = vrot.slane %v10022_v30, %v17069_v51 }
 0xd1c   : > { %11465 = vmatprep.subr.bf16.mxu0 %v15261_v10  ;;  %11637 = vmatprep.subr.bf16.mxu1 %v15264_v6  ;;  %v10031_v10 = vrot.slane %v10022_v30, %v17065_v40 }
 0xd1f   : > { %11466 = vmatpush1.bf16.msra.mxu0 %v15259_v5  ;;  %11638 = vmatpush1.bf16.msra.mxu1 %v15262_v13  ;;  %v10039_v13 = vrot.slane %v10022_v30, %v17073_v46 }
 0xd20   : > { %11467 = vmatprep.subr.bf16.mxu0 %v15267_v53  ;;  %11639 = vmatprep.subr.bf16.mxu1 %v15270_v37 }
 0xd23   : > { %11468 = vmatpush1.bf16.msra.mxu0 %v15265_v47  ;;  %11640 = vmatpush1.bf16.msra.mxu1 %v15268_v44 }
 0xd24   : > { %11469 = vmatprep.subr.bf16.mxu0 %v15273_v34  ;;  %11641 = vmatprep.subr.bf16.mxu1 %v15276_v54 }
 0xd27   : > { %11470 = vmatpush1.bf16.msra.mxu0 %v15271_v9  ;;  %11642 = vmatpush1.bf16.msra.mxu1 %v15274_v23 }
 0xd28   : > { %11471 = vmatprep.subr.bf16.mxu0 %v15279_v63  ;;  %11643 = vmatprep.subr.bf16.mxu1 %v15282_v21 }
 0xd2b   : > { %11472 = vmatpush1.bf16.msra.mxu0 %v15277_v59  ;;  %11644 = vmatpush1.bf16.msra.mxu1 %v15280_v20 }
 0xd2c   : > { %11473 = vmatprep.subr.bf16.mxu0 %v15285_v49  ;;  %11645 = vmatprep.subr.bf16.mxu1 %v15288_v56 }
 0xd2f   : > { %11474 = vmatpush1.bf16.msra.mxu0 %v15283_v15  ;;  %11646 = vmatpush1.bf16.msra.mxu1 %v15286_v26 }
 0xd30   : > { %11475 = vmatprep.subr.bf16.mxu0 %v15291_v8  ;;  %11647 = vmatprep.subr.bf16.mxu1 %v15294_v36 }
 0xd33   : > { %11476 = vmatpush1.bf16.msra.mxu0 %v15289_v2  ;;  %11648 = vmatpush1.bf16.msra.mxu1 %v15292_v7 }
 0xd34   : > { %11477 = vmatprep.subr.bf16.mxu0 %v15297_v3  ;;  %11649 = vmatprep.subr.bf16.mxu1 %v15300_v55 }
 0xd37   : > { %11478 = vmatpush1.bf16.msra.mxu0 %v15295_v45  ;;  %11650 = vmatpush1.bf16.msra.mxu1 %v15298_v4 }
 0xd38   : > { %11479 = vmatprep.subr.bf16.mxu0 %v15303_v11  ;;  %11651 = vmatprep.subr.bf16.mxu1 %v15306_v43 }
 0xd3b   : > { %11480 = vmatpush1.bf16.msra.mxu0 %v15301_v32  ;;  %11652 = vmatpush1.bf16.msra.mxu1 %v15304_v62 }
 0xd3c   : > { %11481 = vmatprep.subr.bf16.mxu0 %v15309_v18  ;;  %11653 = vmatprep.subr.bf16.mxu1 %v15312_v0 }
 0xd3f   : > { %11482 = vmatpush1.bf16.msra.mxu0 %v15307_v12  ;;  %11654 = vmatpush1.bf16.msra.mxu1 %v15310_v58 }
 0xd40   : > { %11483 = vmatprep.subr.bf16.mxu0 %v15315_v42  ;;  %11655 = vmatprep.subr.bf16.mxu1 %v15318_v33 }
 0xd43   : > { %11484 = vmatpush1.bf16.msra.mxu0 %v15313_v22  ;;  %11656 = vmatpush1.bf16.msra.mxu1 %v15316_v52 }
 0xd46   : > { %11486 = vmatmul.mubr.bf16.vlgmr.msra.gmra.mrb[8].mxu0 %v18679_v16  ;;  %11658 = vmatmul.mubr.bf16.vlgmr.msra.gmra.mrb[8].mxu1 %v18679_v16 }
 0xe19   : > { %v11487_v6 = vpop.f32.mrb[8].mxu0  ;;  %v11659_v5 = vpop.f32.mrb[8].mxu1 }
 0xe1a   : > { %v13797_v53 = vadd.f32 %v11487_v6, %v10027_v31  ;;  %v11489_v37 = vpop.f32.mrb[9].mxu0  ;;  %v11661_v47 = vpop.f32.mrb[9].mxu1  ;;  %v13801_v44 = vadd.f32 %v11659_v5, %v10035_v19 }
 0xe1b   : > { %v13798_v34 = vadd.f32 %v11489_v37, %v10031_v10  ;;  %v11491_v16 = vpop.f32.mrb[10].mxu0  ;;  %v11663_v54 = vpop.f32.mrb[10].mxu1  ;;  %v13802_v21 = vadd.f32 %v11661_v47, %v10039_v13 }
 0xe1c   : > { %v11668_v9 = vadd.f32 %v13797_v53, %v17445_v39  ;;  %v13799_v23 = vadd.f32 %v11491_v16, %v10027_v31  ;;  %v11493_v63 = vpop.f32.mrb[11].mxu0  ;;  %v11665_v35 = vpop.f32.mrb[11].mxu1  ;;  %v13803_v40 = vadd.f32 %v11663_v54, %v10035_v19  ;;  %v11670_v46 = vadd.f32 %v13801_v44, %v17687_v38 }
 0xe1d   : > { %v11669_v51 = vadd.f32 %v13798_v34, %v17439_v50  ;;  %v13800_v59 = vadd.f32 %v11493_v63, %v10031_v10  ;;  %v13804_v15 = vadd.f32 %v11665_v35, %v10039_v13  ;;  %v11671_v26 = vadd.f32 %v13802_v21, %v17474_v61 }
 0xe1e   : > { %v11672_v20 = vadd.f32 %v13799_v23, %v17448_v1  ;;  %v11674_v39 = vadd.f32 %v13803_v40, %v17681_v57 }
 0xe1f   : > { %v11676_v49 = vadd.f32 %v11669_v51, %v11668_v9  ;;  %v11673_v56 = vadd.f32 %v13800_v59, %v17442_v41  ;;  %v11675_v2 = vadd.f32 %v13804_v15, %v17454_v60 }
 0xe21   : > { %v11681_v8 = vadd.f32 %v11673_v56, %v11672_v20  ;;  %v11677_v36 = vadd.f32 %v11676_v49, %v11670_v46 }
 0xe23   : > { %v11678_v50 = vadd.f32 %v11677_v36, %v11671_v26  ;;  %v11682_v7 = vadd.f32 %v11681_v8, %v11674_v39 }
 0xe25   : > { %11679 = vadd.xlane.f32.xlu0 %v11678_v50  ;;  %v11683_v3 = vadd.f32 %v11682_v7, %v11675_v2  ;;  %v15327_v7 = vld [vmem:[%s19032_s19] sm:$0xff] }
 0xe27   : > { %11684 = vadd.xlane.f32.xlu1 %v11683_v3 }
 0xeb2   : > { %v11680_v1 = vpop.xlane.xlu0 %11679 }
 0xeb3   : > { %v11686_v55 = vmul.f32 0.001953125, %v11680_v1  ;;  %v15328_v1 = vld [vmem:[%s19032_s19 + $0x8] sm:$0xff] }
 0xeb4   : > { %v11685_v38 = vpop.xlane.xlu1 %11684 }
 0xeb5   : > { %v11688_v45 = vsub.f32 %v11668_v9, %v11686_v55  ;;  %v11689_v4 = vsub.f32 %v11669_v51, %v11686_v55  ;;  %v11687_v41 = vmul.f32 0.001953125, %v11685_v38  ;;  %v11690_v11 = vsub.f32 %v11670_v46, %v11686_v55 }
 0xeb6   : > { %v11691_v43 = vsub.f32 %v11671_v26, %v11686_v55 }
 0xeb7   : > { %v11692_v61 = vsub.f32 %v11672_v20, %v11687_v41  ;;  %v11693_v32 = vsub.f32 %v11673_v56, %v11687_v41  ;;  %v11696_v57 = vmul.f32 %v11688_v45, %v11688_v45  ;;  %v11697_v62 = vmul.f32 %v11689_v4, %v11689_v4 }
 0xeb8   : > { %v11698_v18 = vmul.f32 %v11690_v11, %v11690_v11  ;;  %v11694_v0 = vsub.f32 %v11674_v39, %v11687_v41  ;;  %v11695_v12 = vsub.f32 %v11675_v2, %v11687_v41  ;;  %v11699_v33 = vmul.f32 %v11691_v43, %v11691_v43 }
 0xeb9   : > { %v11704_v60 = vadd.f32 %v11697_v62, %v11696_v57  ;;  %v11700_v58 = vmul.f32 %v11692_v61, %v11692_v61  ;;  %v11701_v42 = vmul.f32 %v11693_v32, %v11693_v32 }
 0xeba   : > { %v11702_v52 = vmul.f32 %v11694_v0, %v11694_v0  ;;  %v11703_v19 = vmul.f32 %v11695_v12, %v11695_v12 }
 0xebb   : > { %v11705_v22 = vadd.f32 %v11704_v60, %v11698_v18  ;;  %v11709_v30 = vadd.f32 %v11701_v42, %v11700_v58 }
 0xebd   : > { %v11706_v31 = vadd.f32 %v11705_v22, %v11699_v33  ;;  %v11710_v10 = vadd.f32 %v11709_v30, %v11702_v52 }
 0xebf   : > { %11707 = vadd.xlane.f32.xlu0 %v11706_v31  ;;  %v11711_v6 = vadd.f32 %v11710_v10, %v11703_v19 }
 0xec1   : > { %11712 = vadd.xlane.f32.xlu1 %v11711_v6 }
 0xf4c   : > { %v11708_v5 = vpop.xlane.xlu0 %11707 }
 0xf4d   : > { %v11714_v13 = vmul.f32 0.001953125, %v11708_v5 }
 0xf4e   : > { %v11713_v53 = vpop.xlane.xlu1 %11712 }
 0xf4f   : > { %v11716_v37 = vadd.f32 1e-05, %v11714_v13  ;;  %v11715_v47 = vmul.f32 0.001953125, %v11713_v53 }
 0xf51   : > { %15323 = vrsqrt.f32 %v11716_v37  ;;  %v11717_v44 = vadd.f32 1e-05, %v11715_v47 }
 0xf53   : > { %15325 = vrsqrt.f32 %v11717_v44 }
 0xf5b   : > { %v15324_v34 = vpop.eup %15323 }
 0xf5c   : > { %v11720_v16 = vmul.f32 %v15324_v34, %v11688_v45  ;;  %v11721_v54 = vmul.f32 %v15324_v34, %v11689_v4  ;;  %v11722_v9 = vmul.f32 %v15324_v34, %v11690_v11  ;;  %v11723_v23 = vmul.f32 %v15324_v34, %v11691_v43  ;;  %v15331_v11 = vld [vmem:[%s19032_s19 + $0x20] sm:$0xff] }
 0xf5d   : > { %v15326_v63 = vpop.eup %15325 }
 0xf5e   : > { %v11728_v35 = vmul.f32 %v11720_v16, %v17404_v14  ;;  %v11729_v51 = vmul.f32 %v11721_v54, %v17398_v17  ;;  %v11730_v21 = vmul.f32 %v11722_v9, %v17660_v48  ;;  %v11731_v40 = vmul.f32 %v11723_v23, %v17420_v24 }
 0xf5f   : > { %v11724_v59 = vmul.f32 %v15326_v63, %v11692_v61  ;;  %v11725_v20 = vmul.f32 %v15326_v63, %v11693_v32  ;;  %v11726_v46 = vmul.f32 %v15326_v63, %v11694_v0  ;;  %v11727_v49 = vmul.f32 %v15326_v63, %v11695_v12  ;;  %v15332_v61 = vld [vmem:[%s19032_s19 + $0x28] sm:$0xff] }
 0xf60   : > { %v11736_v56 = vadd.f32 %v11728_v35, %v17414_v28  ;;  %v11737_v15 = vadd.f32 %v11729_v51, %v17410_v25  ;;  %v11738_v26 = vadd.f32 %v11730_v21, %v17678_v27  ;;  %v11739_v39 = vadd.f32 %v11731_v40, %v17436_v29 }
 0xf61   : > { %v11732_v8 = vmul.f32 %v11724_v59, %v17404_v14  ;;  %v11733_v36 = vmul.f32 %v11725_v20, %v17398_v17  ;;  %v11734_v2 = vmul.f32 %v11726_v46, %v17660_v48  ;;  %v11735_v50 = vmul.f32 %v11727_v49, %v17420_v24  ;;  %v15329_v14 = vld [vmem:[%s19032_s19 + $0x10] sm:$0xff]  ;;  %v15330_v17 = vld [vmem:[%s19032_s19 + $0x18] sm:$0xff] }
 0xf62   : > { %v11744_v3 = vadd.f32 %v15327_v7, %v11736_v56  ;;  %v11745_v55 = vadd.f32 %v15328_v1, %v11737_v15  ;;  %v11746_v38 = vadd.f32 %v15329_v14, %v11738_v26  ;;  %v11747_v24 = vadd.f32 %v15330_v17, %v11739_v39 }
 0xf63   : > { %v11740_v48 = vadd.f32 %v11732_v8, %v17414_v28  ;;  %v11741_v45 = vadd.f32 %v11733_v36, %v17410_v25  ;;  %v11742_v4 = vadd.f32 %v11734_v2, %v17678_v27  ;;  %v11743_v41 = vadd.f32 %v11735_v50, %v17436_v29  ;;  %v15333_v25 = vld [vmem:[%s19032_s19 + $0x30] sm:$0xff]  ;;  %v15334_v29 = vld [vmem:[%s19032_s19 + $0x38] sm:$0xff] }
 0xf64   : > { %11752 = vst [vmem:[#allocation3] sm:$0xff] %v11744_v3  ;;  %11753 = vst [vmem:[#allocation3 + $0x8] sm:$0xff] %v11745_v55 }
 0xf65   : > { %11754 = vst [vmem:[#allocation3 + $0x10] sm:$0xff] %v11746_v38  ;;  %11755 = vst [vmem:[#allocation3 + $0x18] sm:$0xff] %v11747_v24  ;;  %v11748_v43 = vadd.f32 %v15331_v11, %v11740_v48  ;;  %v11749_v28 = vadd.f32 %v15332_v61, %v11741_v45  ;;  %v11750_v27 = vadd.f32 %v15333_v25, %v11742_v4 }
 0xf66   : > { %v11751_v32 = vadd.f32 %v15334_v29, %v11743_v41 }
 0xf67   : > { %11756 = vst [vmem:[#allocation3 + $0x20] sm:$0xff] %v11748_v43  ;;  %11757 = vst [vmem:[#allocation3 + $0x28] sm:$0xff] %v11749_v28 }
 0xf68   : > { %11758 = vst [vmem:[#allocation3 + $0x30] sm:$0xff] %v11750_v27  ;;  %11759 = vst [vmem:[#allocation3 + $0x38] sm:$0xff] %v11751_v32 }
 0xf69 PF: > { %p13852_p6 = scmp.eq.s32.totalorder %s15472_s22, 1  ;;  %s15378_s23 = smov [#allocation3]  }
 0xf6a   : > { %s11766_s0 = sshll.u32 %s15378_s23, 4  ;;  %s11767_s0 = int_to_ptr.vmem [resolvable:$true] %s11766_s0 }
 0xf6b   : > { %s15335_s13 = scalar_lea.vmem %s11767_s0, 1024  ;;  %p15342_p10 = scmp.lt.s32.totalorder %s11767_s0, %s11767_s0 }
 0xf6c   : > { %p15336_p7 = scmp.ne.s32.totalorder %s11767_s0, %s15335_s13  ;;  %p15343_p11 = scmp.lt.s32.totalorder %s15335_s13, %s15335_s13 }
 0xf6e   : > { %p15337_p8 = pnand %p15336_p7, %p13852_p6  ;;  %p15344_p12 = por %p15343_p11, %p15342_p10 }
 0xf70   : > { %p15338_p9 = pneg %p15337_p8 }
 0xf72   : > { %p15345_p13 = pnand %p15344_p12, %p15338_p9 }
 0xf74   : > { %15348 = shalt.err (!%p15345_p13)
}
 0xf75   : > { %s19035_s11 = sld [smem:[#allocation15_spill]] }
 0xf7b   : > { %s15349_s26 = scalar_lea.hbm %s19035_s11, 1024 }
 0xf7c   : > { %p15350_p0 = scmp.ne.s32.totalorder %s19035_s11, %s15349_s26  ;;  %p15355_p3 = scmp.lt.u32.totalorder %s15349_s26, %s19035_s11 }
 0xf7e   : > { %p15351_p1 = pnand %p15350_p0, %p13852_p6 }
 0xf80   : > { %p15352_p2 = pneg %p15351_p1 }
 0xf82   : > { %p15357_p4 = pnand %p15355_p3, %p15352_p2 }
 0xf84   : > { %15360 = shalt.err (!%p15357_p4)
}
 0xf85   : > { %s15379_s27 = smov 512   ;;  %s15380_s24 = smov 32  }
 0xf86   : > { %13849 = dma.vmem_to_hbm [thread:$0]  (%p13852_p6), %s11767_s0, 1024, %s19035_s11, [#allocation4], %s15379_s27, %s15379_s27, %s15380_s24  }
 0xf87   : > { %15366 = dma.done.wait (%p13852_p6), [#allocation4], 1024  }
 0xf88   : > { %15368 = vsyncadd (%p13852_p6), [#allocation4], 4294966272 }
 0xf89 PF: > { %s19036_s30 = sld [smem:[#allocation6_spill]] }
 0xf8f   : > { %s27_s21 = sadd.s32 1, %s19036_s30  }
 0xf90   : > { %p24_p5 = scmp.ge.s32.totalorder %s27_s21, 4  }
 0xf92   :  { %26 = sbr.rel (!%p24_p5) target bundleno = 6 (0x6), region = 130 }
 0xf99   :  { %11782 = vsyncpa [#allocation4], 1 }
 0xf9a   :  { %11784 = vsyncpa [#allocation4 + $0x1], 1 }

</bundles_post_ra>
